<compile_context>
chip_gen: v7x
topology: tpu7x:2x2x1
jax: 0.10.0
libtpu: 0.0.40
codegen_flags: <defaults>
</compile_context>

<pallas_src>
import functools

import jax
import jax.numpy as jnp
from jax.experimental import pallas as pl
from jax.experimental.pallas import tpu as pltpu


def _flow_regression_kernel(num_layers, num_blocks, dim_z,
                            z_ref, mask_ref,
                            w_in_ref, b_in_ref,
                            bnb_s_ref, bnb_b_ref,
                            w_blk_ref, b_blk_ref,
                            w_head_ref, b_head_ref,
                            bn_s_ref, bn_b_ref,
                            o_ref):
    # Transposed layout: features on sublanes, batch on lanes.
    D = dim_z
    x = z_ref[...].astype(jnp.float32)                      # [D, TB]
    for l in range(num_layers):
        m_tr = mask_ref[l]                                  # [D, 1], 1.0 on transformed feats
        # --- conditioner: ResidualNet on the identity features (mask folded into w_in) ---
        h = jnp.dot(w_in_ref[l], x.astype(jnp.bfloat16),
                    preferred_element_type=jnp.float32) + b_in_ref[l]          # [H, TB]
        for b in range(num_blocks):
            bi = l * num_blocks + b
            t = h * bnb_s_ref[bi] + bnb_b_ref[bi]           # block-input BN (eval, folded)
            t = jnp.maximum(t, 0.0)                         # ReLU
            t = jnp.dot(w_blk_ref[2 * bi], t.astype(jnp.bfloat16),
                        preferred_element_type=jnp.float32) + b_blk_ref[2 * bi]
            t = jnp.maximum(t, 0.0)                         # mid-block BN folded into Linear
            t = jnp.dot(w_blk_ref[2 * bi + 1], t.astype(jnp.bfloat16),
                        preferred_element_type=jnp.float32) + b_blk_ref[2 * bi + 1]
            h = h + t                                       # residual connection
        # --- fused affine-coupling head: one matmul gives [shift ; unconstrained scale] ---
        head = jnp.dot(w_head_ref[l], h.astype(jnp.bfloat16),
                       preferred_element_type=jnp.float32) + b_head_ref[l]     # [2D, TB]
        shift = head[:D, :]                                 # aligned sublane slices (free)
        raw = head[D:, :]
        # sigmoid(raw + 2) + 1e-3, with exp on EUP and the divide as approx reciprocal (EUP)
        scale = pl.reciprocal(1.0 + jnp.exp(-(raw + 2.0)), approx=True) + 1e-3
        # --- coupling select fused with the inter-layer BatchNorm flow transform (eval) ---
        #   where m: (x*scale + shift)*bn_s + bn_b ; else: x*bn_s + bn_b
        s_eff = jnp.where(m_tr > 0.5, scale, 1.0) * bn_s_ref[l]
        b_eff = jnp.where(m_tr > 0.5, shift, 0.0) * bn_s_ref[l] + bn_b_ref[l]
        x = x * s_eff + b_eff
    # --- PresetActivation(cat_softmax_activation=False): Hardtanh(min=0, max=1) ---
    # Lane-dense [D, TB] output slab -> unmasked stores on all generations.
    o_ref[...] = jnp.clip(x, 0.0, 1.0).astype(o_ref.dtype)


def make_flow_regression_params(key, dim_z, hidden, num_layers, num_blocks):
    """Deterministic synthetic parameters (eval-mode BN folded + build-time perf folds)."""
    D, H, L, NB = dim_z, hidden, num_layers, num_blocks
    n_lin = L * NB * 2
    keys = jax.random.split(key, 16)

    # Alternating binary masks (nflows create_alternating_binary_mask).
    feat = jnp.arange(D)
    masks = jnp.stack([jnp.where((feat % 2) == (l % 2), 1.0, 0.0) for l in range(L)])
    masks = masks.reshape(L, 1, D).astype(jnp.float32)

    w_in = 0.1 * jax.random.normal(keys[0], (L, D, H), jnp.float32)
    b_in = 0.01 * jax.random.normal(keys[1], (L, 1, H), jnp.float32)
    w_blk = 0.1 * jax.random.normal(keys[2], (n_lin, H, H), jnp.float32)
    b_blk = 0.01 * jax.random.normal(keys[3], (n_lin, 1, H), jnp.float32)
    w_shift = 0.1 * jax.random.normal(keys[4], (L, H, D), jnp.float32)
    b_shift = 0.01 * jax.random.normal(keys[5], (L, 1, D), jnp.float32)
    w_scale = 0.1 * jax.random.normal(keys[6], (L, H, D), jnp.float32)
    b_scale = 0.01 * jax.random.normal(keys[7], (L, 1, D), jnp.float32)

    eps = 1e-5
    # BatchNorm1d inside the ResidualNet blocks (eval) -> fold to scale/bias.
    gamma = 1.0 + 0.05 * jax.random.normal(keys[8], (n_lin, 1, H), jnp.float32)
    beta = 0.05 * jax.random.normal(keys[9], (n_lin, 1, H), jnp.float32)
    r_mean = 0.05 * jax.random.normal(keys[10], (n_lin, 1, H), jnp.float32)
    r_var = 1.0 + 0.1 * jax.nn.sigmoid(jax.random.normal(keys[11], (n_lin, 1, H), jnp.float32))
    inv = jax.lax.rsqrt(r_var + eps)
    bnb_s_all = gamma * inv
    bnb_b_all = beta - gamma * inv * r_mean

    # nflows BatchNorm flow transform between layers (eval) -> fold to scale/bias.
    uw = 0.1 * jax.random.normal(keys[12], (L, 1, D), jnp.float32)
    fb = 0.05 * jax.random.normal(keys[13], (L, 1, D), jnp.float32)
    fr_mean = 0.05 * jax.random.normal(keys[14], (L, 1, D), jnp.float32)
    fr_var = 1.0 + 0.1 * jax.nn.sigmoid(jax.random.normal(keys[15], (L, 1, D), jnp.float32))
    weight = jax.nn.softplus(uw) + eps
    finv = jax.lax.rsqrt(fr_var + eps)
    bn_s = weight * finv
    bn_b = fb - weight * finv * fr_mean

    # ---------------- build-time performance folds ----------------
    # NOTE: when porting real trained nflows weights, first scatter the D/2-feature
    # conditioner weights into the identity-feature rows of w_in / transformed-feature
    # columns of w_shift & w_scale, THEN apply the folds below.
    # (1) identity mask into w_in:  (x * m_id) @ W == x @ (W with transformed rows zeroed).
    w_in_fold = w_in * (1.0 - masks).reshape(L, D, 1)
    # (2) fold the k=1 (post first Linear) BN affine into that Linear:
    #     (t @ W0 + b0) * s1 + beta1 == t @ (W0 * s1) + (b0 * s1 + beta1).
    s = bnb_s_all.reshape(L * NB, 2, 1, H)
    bbn = bnb_b_all.reshape(L * NB, 2, 1, H)
    w2 = w_blk.reshape(L * NB, 2, H, H)
    b2 = b_blk.reshape(L * NB, 2, 1, H)
    w0 = w2[:, 0] * s[:, 1]                            # scale output columns
    b0 = b2[:, 0] * s[:, 1] + bbn[:, 1]
    w_blk_fold = jnp.stack([w0, w2[:, 1]], axis=1).reshape(n_lin, H, H)
    b_blk_fold = jnp.stack([b0, b2[:, 1]], axis=1).reshape(n_lin, 1, H)
    bnb_s_blk = s[:, 0]                                # [L*NB, 1, H] block-input BN only
    bnb_b_blk = bbn[:, 0]
    # (3) fused coupling head: single [H, 2D] weight -> [shift | unconstrained scale].
    w_head = jnp.concatenate([w_shift, w_scale], axis=-1)   # [L, H, 2D]
    b_head = jnp.concatenate([b_shift, b_scale], axis=-1)   # [L, 1, 2D]

    # (4) transpose everything for the batch-on-lanes kernel layout:
    #     weights -> [out_feat, in_feat], per-feature vectors -> [F, 1].
    def t2(a):  # swap last two axes
        return jnp.swapaxes(a, -1, -2)

    params = dict(
        mask=t2(masks),                                     # [L, D, 1]
        w_in=t2(w_in_fold).astype(jnp.bfloat16),            # [L, H, D]
        b_in=t2(b_in),                                      # [L, H, 1]
        bnb_s=t2(bnb_s_blk), bnb_b=t2(bnb_b_blk),           # [L*NB, H, 1]
        w_blk=t2(w_blk_fold).astype(jnp.bfloat16),          # [n_lin, H, H]
        b_blk=t2(b_blk_fold),                               # [n_lin, H, 1]
        w_head=t2(w_head).astype(jnp.bfloat16),             # [L, 2D, H]
        b_head=t2(b_head),                                  # [L, 2D, 1]
        bn_s=t2(bn_s), bn_b=t2(bn_b),                       # [L, D, 1]
    )
    # Raw (unfused, f32, original orientation) parameters kept only for the reference check.
    params["_raw"] = dict(mask=masks, w_in=w_in, b_in=b_in, w_blk=w_blk, b_blk=b_blk,
                          bnb_s=bnb_s_all, bnb_b=bnb_b_all, w_shift=w_shift, b_shift=b_shift,
                          w_scale=w_scale, b_scale=b_scale, bn_s=bn_s, bn_b=bn_b)
    return params


def flow_regression_reference(z_K, raw, num_layers, num_blocks):
    """Pure-JAX f32 reference using the original (unfused) formulation."""
    x = z_K.astype(jnp.float32)
    for l in range(num_layers):
        m_tr = raw["mask"][l]
        m_id = 1.0 - m_tr
        h = (x * m_id) @ raw["w_in"][l] + raw["b_in"][l]
        for b in range(num_blocks):
            t = h
            for k in range(2):
                idx = (l * num_blocks + b) * 2 + k
                t = t * raw["bnb_s"][idx] + raw["bnb_b"][idx]
                t = jnp.maximum(t, 0.0)
                t = t @ raw["w_blk"][idx] + raw["b_blk"][idx]
            h = h + t
        shift = h @ raw["w_shift"][l] + raw["b_shift"][l]
        uscale = h @ raw["w_scale"][l] + raw["b_scale"][l]
        scale = jax.nn.sigmoid(uscale + 2.0) + 1e-3
        x = m_id * x + m_tr * (x * scale + shift)
        x = x * raw["bn_s"][l] + raw["bn_b"][l]
    return jnp.clip(x, 0.0, 1.0)


def flow_regression_forward(z_K, params, num_layers, num_blocks, block_batch=1024):
    B, D = z_K.shape
    H = params["w_in"].shape[-2]
    NB = num_blocks

    # ---- batch-tile selection (batch lives on the 128-lane axis) ----
    LANE = 128
    B_lane = -(-B // LANE) * LANE                 # pad batch to a lane multiple
    TB = min(block_batch, B_lane)
    # Guarantee >=2 grid steps whenever the batch allows it, so the "parallel" axis
    # spans both v7x TensorCores (and TB becomes a 256-multiple at large batch for
    # the v6e/v7x 2x256^2 MXU).
    if B_lane >= 2 * LANE and B_lane // TB < 2:
        TB = max(LANE, (B_lane // 2) // LANE * LANE)
    B_pad = -(-B_lane // TB) * TB
    grid = (B_pad // TB,)

    # Transpose once in the wrapper: kernel works on a [D, B_pad] lane-dense slab.
    z_t = z_K.T.astype(jnp.float32)
    z_in = z_t if B_pad == B else jnp.zeros((D, B_pad), jnp.float32).at[:, :B].set(z_t)

    kernel = functools.partial(_flow_regression_kernel, num_layers, num_blocks, D)
    param_order = ("mask", "w_in", "b_in", "bnb_s", "bnb_b", "w_blk", "b_blk",
                   "w_head", "b_head", "bn_s", "bn_b")
    p_args = tuple(params[k] for k in param_order)

    param_bytes = sum(int(p.size) * p.dtype.itemsize for p in p_args)
    cost = pl.CostEstimate(
        flops=int(2 * B_pad * num_layers * (D * H + 2 * NB * H * H + H * 2 * D)),
        transcendentals=int(2 * B_pad * D * num_layers),
        bytes_accessed=int(param_bytes + 2 * B_pad * D * 4),
    )

    def build(single_buffer_params):
        if single_buffer_params:
            def const_spec(p):
                return pl.BlockSpec(p.shape, lambda i, _nd=p.ndim: (0,) * _nd,
                                    pipeline_mode=pl.Buffered(1))
        else:
            def const_spec(p):
                return pl.BlockSpec(p.shape, lambda i, _nd=p.ndim: (0,) * _nd)
        in_specs = [pl.BlockSpec((D, TB), lambda i: (0, i))] + [const_spec(p) for p in p_args]
        out_spec = pl.BlockSpec((D, TB), lambda i: (0, i))
        return pl.pallas_call(
            kernel,
            out_shape=jax.ShapeDtypeStruct((D, B_pad), jnp.float32),
            grid=grid,
            in_specs=in_specs,
            out_specs=out_spec,
            compiler_params=pltpu.CompilerParams(dimension_semantics=("parallel",)),
            cost_estimate=cost,
        )

    try:
        # Constant-index_map params fetched once into a single resident buffer.
        out_t = jax.block_until_ready(build(True)(z_in, *p_args))
    except Exception:
        # Fallback if this jax version rejects pl.Buffered(1) on TPU.
        out_t = build(False)(z_in, *p_args)

    return out_t[:, :B].T


if __name__ == "__main__":
    # architecture 'realnvp_4l32': 4 RealNVP layers, 32 hidden features, 2 blocks/layer.
    B, DIM_Z, HIDDEN, N_LAYERS, N_BLOCKS = 8, 16, 32, 4, 2

    key = jax.random.PRNGKey(0)
    k_z, k_p = jax.random.split(key)
    z_K = jax.random.normal(k_z, (B, DIM_Z), jnp.float32)
    params = make_flow_regression_params(k_p, DIM_Z, HIDDEN, N_LAYERS, N_BLOCKS)

    out = flow_regression_forward(z_K, params, N_LAYERS, N_BLOCKS)
    out = jax.block_until_ready(out)

    assert out.shape == (B, DIM_Z)
    assert bool(jnp.all(out >= 0.0)) and bool(jnp.all(out <= 1.0))

    # Validate the build-time folds / fused head / fused BN-coupling against the original
    # unfused f32 math (loose tolerance: bf16 weights + approx reciprocal in the kernel).
    ref = flow_regression_reference(z_K, params["_raw"], N_LAYERS, N_BLOCKS)
    max_err = float(jnp.max(jnp.abs(out - ref)))
    assert max_err < 1e-1, f"mismatch vs reference: {max_err}"

    # TODO(synk): PresetActivation's cat_softmax_activation=True branch (per-group softmax
    # over categorical index sets from PresetIndexesHelper) is not implemented; the default
    # Hardtanh(0,1) branch is.
    print("KERNEL_OK")
</pallas_src>

<mosaic_0001>
module attributes {stable_mosaic.version = 11 : i64} {
  func.func @_flow_regression_kernel(%arg0: i32, %arg1: memref<16x128xf32, #tpu.memory_space<vmem>>, %arg2: memref<4x16x1xf32, #tpu.memory_space<vmem>>, %arg3: memref<4x32x16xbf16, #tpu.memory_space<vmem>>, %arg4: memref<4x32x1xf32, #tpu.memory_space<vmem>>, %arg5: memref<8x32x1xf32, #tpu.memory_space<vmem>>, %arg6: memref<8x32x1xf32, #tpu.memory_space<vmem>>, %arg7: memref<16x32x32xbf16, #tpu.memory_space<vmem>>, %arg8: memref<16x32x1xf32, #tpu.memory_space<vmem>>, %arg9: memref<4x32x32xbf16, #tpu.memory_space<vmem>>, %arg10: memref<4x32x1xf32, #tpu.memory_space<vmem>>, %arg11: memref<4x16x1xf32, #tpu.memory_space<vmem>>, %arg12: memref<4x16x1xf32, #tpu.memory_space<vmem>>, %arg13: memref<16x128xf32, #tpu.memory_space<vmem>>) attributes {dimension_semantics = [#tpu.dimension_semantics<parallel>], iteration_bounds = array<i64: 1>, scalar_prefetch = 0 : i64, scratch_operands = 0 : i64, tpu.core_type = #tpu.core_type<tc>, window_params = [{transform_indices = @transform_0, window_bounds = array<i64: 16, 128>}, {pipeline_mode = #tpu.pipeline_mode<synchronous>, transform_indices = @transform_1, window_bounds = array<i64: 4, 16, 1>}, {pipeline_mode = #tpu.pipeline_mode<synchronous>, transform_indices = @transform_2, window_bounds = array<i64: 4, 32, 16>}, {pipeline_mode = #tpu.pipeline_mode<synchronous>, transform_indices = @transform_3, window_bounds = array<i64: 4, 32, 1>}, {pipeline_mode = #tpu.pipeline_mode<synchronous>, transform_indices = @transform_4, window_bounds = array<i64: 8, 32, 1>}, {pipeline_mode = #tpu.pipeline_mode<synchronous>, transform_indices = @transform_5, window_bounds = array<i64: 8, 32, 1>}, {pipeline_mode = #tpu.pipeline_mode<synchronous>, transform_indices = @transform_6, window_bounds = array<i64: 16, 32, 32>}, {pipeline_mode = #tpu.pipeline_mode<synchronous>, transform_indices = @transform_7, window_bounds = array<i64: 16, 32, 1>}, {pipeline_mode = #tpu.pipeline_mode<synchronous>, transform_indices = @transform_8, window_bounds = array<i64: 4, 32, 32>}, {pipeline_mode = #tpu.pipeline_mode<synchronous>, transform_indices = @transform_9, window_bounds = array<i64: 4, 32, 1>}, {pipeline_mode = #tpu.pipeline_mode<synchronous>, transform_indices = @transform_10, window_bounds = array<i64: 4, 16, 1>}, {pipeline_mode = #tpu.pipeline_mode<synchronous>, transform_indices = @transform_11, window_bounds = array<i64: 4, 16, 1>}, {transform_indices = @transform_12, window_bounds = array<i64: 16, 128>}]} {
    %c0 = arith.constant 0 : index
    %c0_0 = arith.constant 0 : index
    %0 = vector.load %arg1[%c0, %c0_0] : memref<16x128xf32, #tpu.memory_space<vmem>>, vector<16x128xf32>
    %c0_1 = arith.constant 0 : index
    %c0_2 = arith.constant 0 : index
    %c0_3 = arith.constant 0 : index
    %1 = vector.load %arg2[%c0_1, %c0_2, %c0_3] : memref<4x16x1xf32, #tpu.memory_space<vmem>>, vector<1x16x1xf32>
    %2 = vector.shape_cast %1 : vector<1x16x1xf32> to vector<16x1xf32>
    %c0_4 = arith.constant 0 : index
    %c0_5 = arith.constant 0 : index
    %c0_6 = arith.constant 0 : index
    %3 = vector.load %arg3[%c0_4, %c0_5, %c0_6] : memref<4x32x16xbf16, #tpu.memory_space<vmem>>, vector<1x32x16xbf16>
    %4 = vector.shape_cast %3 : vector<1x32x16xbf16> to vector<32x16xbf16>
    %5 = arith.truncf %0 : vector<16x128xf32> to vector<16x128xbf16>
    %cst = arith.constant dense<0.000000e+00> : vector<32x128xf32>
    %6 = tpu.matmul %4, %5, %cst {dimension_numbers = #tpu.dot_dimension_numbers<[1], [0], [0], [1], [0, 0, 1, 1], [], []>} : vector<32x16xbf16>, vector<16x128xbf16>, vector<32x128xf32> -> vector<32x128xf32>
    %c0_7 = arith.constant 0 : index
    %c0_8 = arith.constant 0 : index
    %c0_9 = arith.constant 0 : index
    %7 = vector.load %arg4[%c0_7, %c0_8, %c0_9] : memref<4x32x1xf32, #tpu.memory_space<vmem>>, vector<1x32x1xf32>
    %8 = vector.shape_cast %7 : vector<1x32x1xf32> to vector<32x1xf32>
    %9 = vector.broadcast %8 : vector<32x1xf32> to vector<32x128xf32>
    %10 = arith.addf %6, %9 : vector<32x128xf32>
    %c0_10 = arith.constant 0 : index
    %c0_11 = arith.constant 0 : index
    %c0_12 = arith.constant 0 : index
    %11 = vector.load %arg5[%c0_10, %c0_11, %c0_12] : memref<8x32x1xf32, #tpu.memory_space<vmem>>, vector<1x32x1xf32>
    %12 = vector.shape_cast %11 : vector<1x32x1xf32> to vector<32x1xf32>
    %13 = vector.broadcast %12 : vector<32x1xf32> to vector<32x128xf32>
    %14 = arith.mulf %10, %13 : vector<32x128xf32>
    %c0_13 = arith.constant 0 : index
    %c0_14 = arith.constant 0 : index
    %c0_15 = arith.constant 0 : index
    %15 = vector.load %arg6[%c0_13, %c0_14, %c0_15] : memref<8x32x1xf32, #tpu.memory_space<vmem>>, vector<1x32x1xf32>
    %16 = vector.shape_cast %15 : vector<1x32x1xf32> to vector<32x1xf32>
    %17 = vector.broadcast %16 : vector<32x1xf32> to vector<32x128xf32>
    %18 = arith.addf %14, %17 : vector<32x128xf32>
    %cst_16 = arith.constant 0.000000e+00 : f32
    %19 = vector.broadcast %cst_16 : f32 to vector<32x128xf32>
    %20 = arith.maximumf %18, %19 : vector<32x128xf32>
    %c0_17 = arith.constant 0 : index
    %c0_18 = arith.constant 0 : index
    %c0_19 = arith.constant 0 : index
    %21 = vector.load %arg7[%c0_17, %c0_18, %c0_19] : memref<16x32x32xbf16, #tpu.memory_space<vmem>>, vector<1x32x32xbf16>
    %22 = vector.shape_cast %21 : vector<1x32x32xbf16> to vector<32x32xbf16>
    %23 = arith.truncf %20 : vector<32x128xf32> to vector<32x128xbf16>
    %cst_20 = arith.constant dense<0.000000e+00> : vector<32x128xf32>
    %24 = tpu.matmul %22, %23, %cst_20 {dimension_numbers = #tpu.dot_dimension_numbers<[1], [0], [0], [1], [0, 0, 1, 1], [], []>} : vector<32x32xbf16>, vector<32x128xbf16>, vector<32x128xf32> -> vector<32x128xf32>
    %c0_21 = arith.constant 0 : index
    %c0_22 = arith.constant 0 : index
    %c0_23 = arith.constant 0 : index
    %25 = vector.load %arg8[%c0_21, %c0_22, %c0_23] : memref<16x32x1xf32, #tpu.memory_space<vmem>>, vector<1x32x1xf32>
    %26 = vector.shape_cast %25 : vector<1x32x1xf32> to vector<32x1xf32>
    %27 = vector.broadcast %26 : vector<32x1xf32> to vector<32x128xf32>
    %28 = arith.addf %24, %27 : vector<32x128xf32>
    %cst_24 = arith.constant 0.000000e+00 : f32
    %29 = vector.broadcast %cst_24 : f32 to vector<32x128xf32>
    %30 = arith.maximumf %28, %29 : vector<32x128xf32>
    %c1 = arith.constant 1 : index
    %c0_25 = arith.constant 0 : index
    %c0_26 = arith.constant 0 : index
    %31 = vector.load %arg7[%c1, %c0_25, %c0_26] : memref<16x32x32xbf16, #tpu.memory_space<vmem>>, vector<1x32x32xbf16>
    %32 = vector.shape_cast %31 : vector<1x32x32xbf16> to vector<32x32xbf16>
    %33 = arith.truncf %30 : vector<32x128xf32> to vector<32x128xbf16>
    %cst_27 = arith.constant dense<0.000000e+00> : vector<32x128xf32>
    %34 = tpu.matmul %32, %33, %cst_27 {dimension_numbers = #tpu.dot_dimension_numbers<[1], [0], [0], [1], [0, 0, 1, 1], [], []>} : vector<32x32xbf16>, vector<32x128xbf16>, vector<32x128xf32> -> vector<32x128xf32>
    %c1_28 = arith.constant 1 : index
    %c0_29 = arith.constant 0 : index
    %c0_30 = arith.constant 0 : index
    %35 = vector.load %arg8[%c1_28, %c0_29, %c0_30] : memref<16x32x1xf32, #tpu.memory_space<vmem>>, vector<1x32x1xf32>
    %36 = vector.shape_cast %35 : vector<1x32x1xf32> to vector<32x1xf32>
    %37 = vector.broadcast %36 : vector<32x1xf32> to vector<32x128xf32>
    %38 = arith.addf %34, %37 : vector<32x128xf32>
    %39 = arith.addf %10, %38 : vector<32x128xf32>
    %c1_31 = arith.constant 1 : index
    %c0_32 = arith.constant 0 : index
    %c0_33 = arith.constant 0 : index
    %40 = vector.load %arg5[%c1_31, %c0_32, %c0_33] : memref<8x32x1xf32, #tpu.memory_space<vmem>>, vector<1x32x1xf32>
    %41 = vector.shape_cast %40 : vector<1x32x1xf32> to vector<32x1xf32>
    %42 = vector.broadcast %41 : vector<32x1xf32> to vector<32x128xf32>
    %43 = arith.mulf %39, %42 : vector<32x128xf32>
    %c1_34 = arith.constant 1 : index
    %c0_35 = arith.constant 0 : index
    %c0_36 = arith.constant 0 : index
    %44 = vector.load %arg6[%c1_34, %c0_35, %c0_36] : memref<8x32x1xf32, #tpu.memory_space<vmem>>, vector<1x32x1xf32>
    %45 = vector.shape_cast %44 : vector<1x32x1xf32> to vector<32x1xf32>
    %46 = vector.broadcast %45 : vector<32x1xf32> to vector<32x128xf32>
    %47 = arith.addf %43, %46 : vector<32x128xf32>
    %cst_37 = arith.constant 0.000000e+00 : f32
    %48 = vector.broadcast %cst_37 : f32 to vector<32x128xf32>
    %49 = arith.maximumf %47, %48 : vector<32x128xf32>
    %c2 = arith.constant 2 : index
    %c0_38 = arith.constant 0 : index
    %c0_39 = arith.constant 0 : index
    %50 = vector.load %arg7[%c2, %c0_38, %c0_39] : memref<16x32x32xbf16, #tpu.memory_space<vmem>>, vector<1x32x32xbf16>
    %51 = vector.shape_cast %50 : vector<1x32x32xbf16> to vector<32x32xbf16>
    %52 = arith.truncf %49 : vector<32x128xf32> to vector<32x128xbf16>
    %cst_40 = arith.constant dense<0.000000e+00> : vector<32x128xf32>
    %53 = tpu.matmul %51, %52, %cst_40 {dimension_numbers = #tpu.dot_dimension_numbers<[1], [0], [0], [1], [0, 0, 1, 1], [], []>} : vector<32x32xbf16>, vector<32x128xbf16>, vector<32x128xf32> -> vector<32x128xf32>
    %c2_41 = arith.constant 2 : index
    %c0_42 = arith.constant 0 : index
    %c0_43 = arith.constant 0 : index
    %54 = vector.load %arg8[%c2_41, %c0_42, %c0_43] : memref<16x32x1xf32, #tpu.memory_space<vmem>>, vector<1x32x1xf32>
    %55 = vector.shape_cast %54 : vector<1x32x1xf32> to vector<32x1xf32>
    %56 = vector.broadcast %55 : vector<32x1xf32> to vector<32x128xf32>
    %57 = arith.addf %53, %56 : vector<32x128xf32>
    %cst_44 = arith.constant 0.000000e+00 : f32
    %58 = vector.broadcast %cst_44 : f32 to vector<32x128xf32>
    %59 = arith.maximumf %57, %58 : vector<32x128xf32>
    %c3 = arith.constant 3 : index
    %c0_45 = arith.constant 0 : index
    %c0_46 = arith.constant 0 : index
    %60 = vector.load %arg7[%c3, %c0_45, %c0_46] : memref<16x32x32xbf16, #tpu.memory_space<vmem>>, vector<1x32x32xbf16>
    %61 = vector.shape_cast %60 : vector<1x32x32xbf16> to vector<32x32xbf16>
    %62 = arith.truncf %59 : vector<32x128xf32> to vector<32x128xbf16>
    %cst_47 = arith.constant dense<0.000000e+00> : vector<32x128xf32>
    %63 = tpu.matmul %61, %62, %cst_47 {dimension_numbers = #tpu.dot_dimension_numbers<[1], [0], [0], [1], [0, 0, 1, 1], [], []>} : vector<32x32xbf16>, vector<32x128xbf16>, vector<32x128xf32> -> vector<32x128xf32>
    %c3_48 = arith.constant 3 : index
    %c0_49 = arith.constant 0 : index
    %c0_50 = arith.constant 0 : index
    %64 = vector.load %arg8[%c3_48, %c0_49, %c0_50] : memref<16x32x1xf32, #tpu.memory_space<vmem>>, vector<1x32x1xf32>
    %65 = vector.shape_cast %64 : vector<1x32x1xf32> to vector<32x1xf32>
    %66 = vector.broadcast %65 : vector<32x1xf32> to vector<32x128xf32>
    %67 = arith.addf %63, %66 : vector<32x128xf32>
    %68 = arith.addf %39, %67 : vector<32x128xf32>
    %c0_51 = arith.constant 0 : index
    %c0_52 = arith.constant 0 : index
    %c0_53 = arith.constant 0 : index
    %69 = vector.load %arg9[%c0_51, %c0_52, %c0_53] : memref<4x32x32xbf16, #tpu.memory_space<vmem>>, vector<1x32x32xbf16>
    %70 = vector.shape_cast %69 : vector<1x32x32xbf16> to vector<32x32xbf16>
    %71 = arith.truncf %68 : vector<32x128xf32> to vector<32x128xbf16>
    %cst_54 = arith.constant dense<0.000000e+00> : vector<32x128xf32>
    %72 = tpu.matmul %70, %71, %cst_54 {dimension_numbers = #tpu.dot_dimension_numbers<[1], [0], [0], [1], [0, 0, 1, 1], [], []>} : vector<32x32xbf16>, vector<32x128xbf16>, vector<32x128xf32> -> vector<32x128xf32>
    %c0_55 = arith.constant 0 : index
    %c0_56 = arith.constant 0 : index
    %c0_57 = arith.constant 0 : index
    %73 = vector.load %arg10[%c0_55, %c0_56, %c0_57] : memref<4x32x1xf32, #tpu.memory_space<vmem>>, vector<1x32x1xf32>
    %74 = vector.shape_cast %73 : vector<1x32x1xf32> to vector<32x1xf32>
    %75 = vector.broadcast %74 : vector<32x1xf32> to vector<32x128xf32>
    %76 = arith.addf %72, %75 : vector<32x128xf32>
    %77 = vector.extract_strided_slice %76 {offsets = [0, 0], sizes = [16, 128], strides = [1, 1]} : vector<32x128xf32> to vector<16x128xf32>
    %78 = vector.extract_strided_slice %76 {offsets = [16, 0], sizes = [16, 128], strides = [1, 1]} : vector<32x128xf32> to vector<16x128xf32>
    %cst_58 = arith.constant 2.000000e+00 : f32
    %79 = vector.broadcast %cst_58 : f32 to vector<16x128xf32>
    %80 = arith.addf %78, %79 : vector<16x128xf32>
    %cst_59 = arith.constant 0.000000e+00 : f32
    %81 = vector.broadcast %cst_59 : f32 to vector<16x128xf32>
    %82 = arith.subf %81, %80 : vector<16x128xf32>
    %83 = math.exp %82 : vector<16x128xf32>
    %cst_60 = arith.constant 1.000000e+00 : f32
    %84 = vector.broadcast %cst_60 : f32 to vector<16x128xf32>
    %85 = arith.addf %84, %83 : vector<16x128xf32>
    %86 = tpu.reciprocal %85 {approx = true} : vector<16x128xf32> -> vector<16x128xf32>
    %cst_61 = arith.constant 1.000000e-03 : f32
    %87 = vector.broadcast %cst_61 : f32 to vector<16x128xf32>
    %88 = arith.addf %86, %87 : vector<16x128xf32>
    %cst_62 = arith.constant 5.000000e-01 : f32
    %89 = vector.broadcast %cst_62 : f32 to vector<16x1xf32>
    %90 = arith.cmpf ogt, %2, %89 : vector<16x1xf32>
    %cst_63 = arith.constant 1.000000e+00 : f32
    %91 = vector.shape_cast %90 : vector<16x1xi1> to vector<16x1xi1>
    %92 = vector.broadcast %91 : vector<16x1xi1> to vector<16x128xi1>
    %93 = vector.broadcast %cst_63 : f32 to vector<16x128xf32>
    %94 = arith.select %92, %88, %93 : vector<16x128xi1>, vector<16x128xf32>
    %c0_64 = arith.constant 0 : index
    %c0_65 = arith.constant 0 : index
    %c0_66 = arith.constant 0 : index
    %95 = vector.load %arg11[%c0_64, %c0_65, %c0_66] : memref<4x16x1xf32, #tpu.memory_space<vmem>>, vector<1x16x1xf32>
    %96 = vector.shape_cast %95 : vector<1x16x1xf32> to vector<16x1xf32>
    %97 = vector.broadcast %96 : vector<16x1xf32> to vector<16x128xf32>
    %98 = arith.mulf %94, %97 : vector<16x128xf32>
    %cst_67 = arith.constant 5.000000e-01 : f32
    %99 = vector.broadcast %cst_67 : f32 to vector<16x1xf32>
    %100 = arith.cmpf ogt, %2, %99 : vector<16x1xf32>
    %cst_68 = arith.constant 0.000000e+00 : f32
    %101 = vector.shape_cast %100 : vector<16x1xi1> to vector<16x1xi1>
    %102 = vector.broadcast %101 : vector<16x1xi1> to vector<16x128xi1>
    %103 = vector.broadcast %cst_68 : f32 to vector<16x128xf32>
    %104 = arith.select %102, %77, %103 : vector<16x128xi1>, vector<16x128xf32>
    %c0_69 = arith.constant 0 : index
    %c0_70 = arith.constant 0 : index
    %c0_71 = arith.constant 0 : index
    %105 = vector.load %arg11[%c0_69, %c0_70, %c0_71] : memref<4x16x1xf32, #tpu.memory_space<vmem>>, vector<1x16x1xf32>
    %106 = vector.shape_cast %105 : vector<1x16x1xf32> to vector<16x1xf32>
    %107 = vector.broadcast %106 : vector<16x1xf32> to vector<16x128xf32>
    %108 = arith.mulf %104, %107 : vector<16x128xf32>
    %c0_72 = arith.constant 0 : index
    %c0_73 = arith.constant 0 : index
    %c0_74 = arith.constant 0 : index
    %109 = vector.load %arg12[%c0_72, %c0_73, %c0_74] : memref<4x16x1xf32, #tpu.memory_space<vmem>>, vector<1x16x1xf32>
    %110 = vector.shape_cast %109 : vector<1x16x1xf32> to vector<16x1xf32>
    %111 = vector.broadcast %110 : vector<16x1xf32> to vector<16x128xf32>
    %112 = arith.addf %108, %111 : vector<16x128xf32>
    %113 = arith.mulf %0, %98 : vector<16x128xf32>
    %114 = arith.addf %113, %112 : vector<16x128xf32>
    %c1_75 = arith.constant 1 : index
    %c0_76 = arith.constant 0 : index
    %c0_77 = arith.constant 0 : index
    %115 = vector.load %arg2[%c1_75, %c0_76, %c0_77] : memref<4x16x1xf32, #tpu.memory_space<vmem>>, vector<1x16x1xf32>
    %116 = vector.shape_cast %115 : vector<1x16x1xf32> to vector<16x1xf32>
    %c1_78 = arith.constant 1 : index
    %c0_79 = arith.constant 0 : index
    %c0_80 = arith.constant 0 : index
    %117 = vector.load %arg3[%c1_78, %c0_79, %c0_80] : memref<4x32x16xbf16, #tpu.memory_space<vmem>>, vector<1x32x16xbf16>
    %118 = vector.shape_cast %117 : vector<1x32x16xbf16> to vector<32x16xbf16>
    %119 = arith.truncf %114 : vector<16x128xf32> to vector<16x128xbf16>
    %cst_81 = arith.constant dense<0.000000e+00> : vector<32x128xf32>
    %120 = tpu.matmul %118, %119, %cst_81 {dimension_numbers = #tpu.dot_dimension_numbers<[1], [0], [0], [1], [0, 0, 1, 1], [], []>} : vector<32x16xbf16>, vector<16x128xbf16>, vector<32x128xf32> -> vector<32x128xf32>
    %c1_82 = arith.constant 1 : index
    %c0_83 = arith.constant 0 : index
    %c0_84 = arith.constant 0 : index
    %121 = vector.load %arg4[%c1_82, %c0_83, %c0_84] : memref<4x32x1xf32, #tpu.memory_space<vmem>>, vector<1x32x1xf32>
    %122 = vector.shape_cast %121 : vector<1x32x1xf32> to vector<32x1xf32>
    %123 = vector.broadcast %122 : vector<32x1xf32> to vector<32x128xf32>
    %124 = arith.addf %120, %123 : vector<32x128xf32>
    %c2_85 = arith.constant 2 : index
    %c0_86 = arith.constant 0 : index
    %c0_87 = arith.constant 0 : index
    %125 = vector.load %arg5[%c2_85, %c0_86, %c0_87] : memref<8x32x1xf32, #tpu.memory_space<vmem>>, vector<1x32x1xf32>
    %126 = vector.shape_cast %125 : vector<1x32x1xf32> to vector<32x1xf32>
    %127 = vector.broadcast %126 : vector<32x1xf32> to vector<32x128xf32>
    %128 = arith.mulf %124, %127 : vector<32x128xf32>
    %c2_88 = arith.constant 2 : index
    %c0_89 = arith.constant 0 : index
    %c0_90 = arith.constant 0 : index
    %129 = vector.load %arg6[%c2_88, %c0_89, %c0_90] : memref<8x32x1xf32, #tpu.memory_space<vmem>>, vector<1x32x1xf32>
    %130 = vector.shape_cast %129 : vector<1x32x1xf32> to vector<32x1xf32>
    %131 = vector.broadcast %130 : vector<32x1xf32> to vector<32x128xf32>
    %132 = arith.addf %128, %131 : vector<32x128xf32>
    %cst_91 = arith.constant 0.000000e+00 : f32
    %133 = vector.broadcast %cst_91 : f32 to vector<32x128xf32>
    %134 = arith.maximumf %132, %133 : vector<32x128xf32>
    %c4 = arith.constant 4 : index
    %c0_92 = arith.constant 0 : index
    %c0_93 = arith.constant 0 : index
    %135 = vector.load %arg7[%c4, %c0_92, %c0_93] : memref<16x32x32xbf16, #tpu.memory_space<vmem>>, vector<1x32x32xbf16>
    %136 = vector.shape_cast %135 : vector<1x32x32xbf16> to vector<32x32xbf16>
    %137 = arith.truncf %134 : vector<32x128xf32> to vector<32x128xbf16>
    %cst_94 = arith.constant dense<0.000000e+00> : vector<32x128xf32>
    %138 = tpu.matmul %136, %137, %cst_94 {dimension_numbers = #tpu.dot_dimension_numbers<[1], [0], [0], [1], [0, 0, 1, 1], [], []>} : vector<32x32xbf16>, vector<32x128xbf16>, vector<32x128xf32> -> vector<32x128xf32>
    %c4_95 = arith.constant 4 : index
    %c0_96 = arith.constant 0 : index
    %c0_97 = arith.constant 0 : index
    %139 = vector.load %arg8[%c4_95, %c0_96, %c0_97] : memref<16x32x1xf32, #tpu.memory_space<vmem>>, vector<1x32x1xf32>
    %140 = vector.shape_cast %139 : vector<1x32x1xf32> to vector<32x1xf32>
    %141 = vector.broadcast %140 : vector<32x1xf32> to vector<32x128xf32>
    %142 = arith.addf %138, %141 : vector<32x128xf32>
    %cst_98 = arith.constant 0.000000e+00 : f32
    %143 = vector.broadcast %cst_98 : f32 to vector<32x128xf32>
    %144 = arith.maximumf %142, %143 : vector<32x128xf32>
    %c5 = arith.constant 5 : index
    %c0_99 = arith.constant 0 : index
    %c0_100 = arith.constant 0 : index
    %145 = vector.load %arg7[%c5, %c0_99, %c0_100] : memref<16x32x32xbf16, #tpu.memory_space<vmem>>, vector<1x32x32xbf16>
    %146 = vector.shape_cast %145 : vector<1x32x32xbf16> to vector<32x32xbf16>
    %147 = arith.truncf %144 : vector<32x128xf32> to vector<32x128xbf16>
    %cst_101 = arith.constant dense<0.000000e+00> : vector<32x128xf32>
    %148 = tpu.matmul %146, %147, %cst_101 {dimension_numbers = #tpu.dot_dimension_numbers<[1], [0], [0], [1], [0, 0, 1, 1], [], []>} : vector<32x32xbf16>, vector<32x128xbf16>, vector<32x128xf32> -> vector<32x128xf32>
    %c5_102 = arith.constant 5 : index
    %c0_103 = arith.constant 0 : index
    %c0_104 = arith.constant 0 : index
    %149 = vector.load %arg8[%c5_102, %c0_103, %c0_104] : memref<16x32x1xf32, #tpu.memory_space<vmem>>, vector<1x32x1xf32>
    %150 = vector.shape_cast %149 : vector<1x32x1xf32> to vector<32x1xf32>
    %151 = vector.broadcast %150 : vector<32x1xf32> to vector<32x128xf32>
    %152 = arith.addf %148, %151 : vector<32x128xf32>
    %153 = arith.addf %124, %152 : vector<32x128xf32>
    %c3_105 = arith.constant 3 : index
    %c0_106 = arith.constant 0 : index
    %c0_107 = arith.constant 0 : index
    %154 = vector.load %arg5[%c3_105, %c0_106, %c0_107] : memref<8x32x1xf32, #tpu.memory_space<vmem>>, vector<1x32x1xf32>
    %155 = vector.shape_cast %154 : vector<1x32x1xf32> to vector<32x1xf32>
    %156 = vector.broadcast %155 : vector<32x1xf32> to vector<32x128xf32>
    %157 = arith.mulf %153, %156 : vector<32x128xf32>
    %c3_108 = arith.constant 3 : index
    %c0_109 = arith.constant 0 : index
    %c0_110 = arith.constant 0 : index
    %158 = vector.load %arg6[%c3_108, %c0_109, %c0_110] : memref<8x32x1xf32, #tpu.memory_space<vmem>>, vector<1x32x1xf32>
    %159 = vector.shape_cast %158 : vector<1x32x1xf32> to vector<32x1xf32>
    %160 = vector.broadcast %159 : vector<32x1xf32> to vector<32x128xf32>
    %161 = arith.addf %157, %160 : vector<32x128xf32>
    %cst_111 = arith.constant 0.000000e+00 : f32
    %162 = vector.broadcast %cst_111 : f32 to vector<32x128xf32>
    %163 = arith.maximumf %161, %162 : vector<32x128xf32>
    %c6 = arith.constant 6 : index
    %c0_112 = arith.constant 0 : index
    %c0_113 = arith.constant 0 : index
    %164 = vector.load %arg7[%c6, %c0_112, %c0_113] : memref<16x32x32xbf16, #tpu.memory_space<vmem>>, vector<1x32x32xbf16>
    %165 = vector.shape_cast %164 : vector<1x32x32xbf16> to vector<32x32xbf16>
    %166 = arith.truncf %163 : vector<32x128xf32> to vector<32x128xbf16>
    %cst_114 = arith.constant dense<0.000000e+00> : vector<32x128xf32>
    %167 = tpu.matmul %165, %166, %cst_114 {dimension_numbers = #tpu.dot_dimension_numbers<[1], [0], [0], [1], [0, 0, 1, 1], [], []>} : vector<32x32xbf16>, vector<32x128xbf16>, vector<32x128xf32> -> vector<32x128xf32>
    %c6_115 = arith.constant 6 : index
    %c0_116 = arith.constant 0 : index
    %c0_117 = arith.constant 0 : index
    %168 = vector.load %arg8[%c6_115, %c0_116, %c0_117] : memref<16x32x1xf32, #tpu.memory_space<vmem>>, vector<1x32x1xf32>
    %169 = vector.shape_cast %168 : vector<1x32x1xf32> to vector<32x1xf32>
    %170 = vector.broadcast %169 : vector<32x1xf32> to vector<32x128xf32>
    %171 = arith.addf %167, %170 : vector<32x128xf32>
    %cst_118 = arith.constant 0.000000e+00 : f32
    %172 = vector.broadcast %cst_118 : f32 to vector<32x128xf32>
    %173 = arith.maximumf %171, %172 : vector<32x128xf32>
    %c7 = arith.constant 7 : index
    %c0_119 = arith.constant 0 : index
    %c0_120 = arith.constant 0 : index
    %174 = vector.load %arg7[%c7, %c0_119, %c0_120] : memref<16x32x32xbf16, #tpu.memory_space<vmem>>, vector<1x32x32xbf16>
    %175 = vector.shape_cast %174 : vector<1x32x32xbf16> to vector<32x32xbf16>
    %176 = arith.truncf %173 : vector<32x128xf32> to vector<32x128xbf16>
    %cst_121 = arith.constant dense<0.000000e+00> : vector<32x128xf32>
    %177 = tpu.matmul %175, %176, %cst_121 {dimension_numbers = #tpu.dot_dimension_numbers<[1], [0], [0], [1], [0, 0, 1, 1], [], []>} : vector<32x32xbf16>, vector<32x128xbf16>, vector<32x128xf32> -> vector<32x128xf32>
    %c7_122 = arith.constant 7 : index
    %c0_123 = arith.constant 0 : index
    %c0_124 = arith.constant 0 : index
    %178 = vector.load %arg8[%c7_122, %c0_123, %c0_124] : memref<16x32x1xf32, #tpu.memory_space<vmem>>, vector<1x32x1xf32>
    %179 = vector.shape_cast %178 : vector<1x32x1xf32> to vector<32x1xf32>
    %180 = vector.broadcast %179 : vector<32x1xf32> to vector<32x128xf32>
    %181 = arith.addf %177, %180 : vector<32x128xf32>
    %182 = arith.addf %153, %181 : vector<32x128xf32>
    %c1_125 = arith.constant 1 : index
    %c0_126 = arith.constant 0 : index
    %c0_127 = arith.constant 0 : index
    %183 = vector.load %arg9[%c1_125, %c0_126, %c0_127] : memref<4x32x32xbf16, #tpu.memory_space<vmem>>, vector<1x32x32xbf16>
    %184 = vector.shape_cast %183 : vector<1x32x32xbf16> to vector<32x32xbf16>
    %185 = arith.truncf %182 : vector<32x128xf32> to vector<32x128xbf16>
    %cst_128 = arith.constant dense<0.000000e+00> : vector<32x128xf32>
    %186 = tpu.matmul %184, %185, %cst_128 {dimension_numbers = #tpu.dot_dimension_numbers<[1], [0], [0], [1], [0, 0, 1, 1], [], []>} : vector<32x32xbf16>, vector<32x128xbf16>, vector<32x128xf32> -> vector<32x128xf32>
    %c1_129 = arith.constant 1 : index
    %c0_130 = arith.constant 0 : index
    %c0_131 = arith.constant 0 : index
    %187 = vector.load %arg10[%c1_129, %c0_130, %c0_131] : memref<4x32x1xf32, #tpu.memory_space<vmem>>, vector<1x32x1xf32>
    %188 = vector.shape_cast %187 : vector<1x32x1xf32> to vector<32x1xf32>
    %189 = vector.broadcast %188 : vector<32x1xf32> to vector<32x128xf32>
    %190 = arith.addf %186, %189 : vector<32x128xf32>
    %191 = vector.extract_strided_slice %190 {offsets = [0, 0], sizes = [16, 128], strides = [1, 1]} : vector<32x128xf32> to vector<16x128xf32>
    %192 = vector.extract_strided_slice %190 {offsets = [16, 0], sizes = [16, 128], strides = [1, 1]} : vector<32x128xf32> to vector<16x128xf32>
    %cst_132 = arith.constant 2.000000e+00 : f32
    %193 = vector.broadcast %cst_132 : f32 to vector<16x128xf32>
    %194 = arith.addf %192, %193 : vector<16x128xf32>
    %cst_133 = arith.constant 0.000000e+00 : f32
    %195 = vector.broadcast %cst_133 : f32 to vector<16x128xf32>
    %196 = arith.subf %195, %194 : vector<16x128xf32>
    %197 = math.exp %196 : vector<16x128xf32>
    %cst_134 = arith.constant 1.000000e+00 : f32
    %198 = vector.broadcast %cst_134 : f32 to vector<16x128xf32>
    %199 = arith.addf %198, %197 : vector<16x128xf32>
    %200 = tpu.reciprocal %199 {approx = true} : vector<16x128xf32> -> vector<16x128xf32>
    %cst_135 = arith.constant 1.000000e-03 : f32
    %201 = vector.broadcast %cst_135 : f32 to vector<16x128xf32>
    %202 = arith.addf %200, %201 : vector<16x128xf32>
    %cst_136 = arith.constant 5.000000e-01 : f32
    %203 = vector.broadcast %cst_136 : f32 to vector<16x1xf32>
    %204 = arith.cmpf ogt, %116, %203 : vector<16x1xf32>
    %cst_137 = arith.constant 1.000000e+00 : f32
    %205 = vector.shape_cast %204 : vector<16x1xi1> to vector<16x1xi1>
    %206 = vector.broadcast %205 : vector<16x1xi1> to vector<16x128xi1>
    %207 = vector.broadcast %cst_137 : f32 to vector<16x128xf32>
    %208 = arith.select %206, %202, %207 : vector<16x128xi1>, vector<16x128xf32>
    %c1_138 = arith.constant 1 : index
    %c0_139 = arith.constant 0 : index
    %c0_140 = arith.constant 0 : index
    %209 = vector.load %arg11[%c1_138, %c0_139, %c0_140] : memref<4x16x1xf32, #tpu.memory_space<vmem>>, vector<1x16x1xf32>
    %210 = vector.shape_cast %209 : vector<1x16x1xf32> to vector<16x1xf32>
    %211 = vector.broadcast %210 : vector<16x1xf32> to vector<16x128xf32>
    %212 = arith.mulf %208, %211 : vector<16x128xf32>
    %cst_141 = arith.constant 5.000000e-01 : f32
    %213 = vector.broadcast %cst_141 : f32 to vector<16x1xf32>
    %214 = arith.cmpf ogt, %116, %213 : vector<16x1xf32>
    %cst_142 = arith.constant 0.000000e+00 : f32
    %215 = vector.shape_cast %214 : vector<16x1xi1> to vector<16x1xi1>
    %216 = vector.broadcast %215 : vector<16x1xi1> to vector<16x128xi1>
    %217 = vector.broadcast %cst_142 : f32 to vector<16x128xf32>
    %218 = arith.select %216, %191, %217 : vector<16x128xi1>, vector<16x128xf32>
    %c1_143 = arith.constant 1 : index
    %c0_144 = arith.constant 0 : index
    %c0_145 = arith.constant 0 : index
    %219 = vector.load %arg11[%c1_143, %c0_144, %c0_145] : memref<4x16x1xf32, #tpu.memory_space<vmem>>, vector<1x16x1xf32>
    %220 = vector.shape_cast %219 : vector<1x16x1xf32> to vector<16x1xf32>
    %221 = vector.broadcast %220 : vector<16x1xf32> to vector<16x128xf32>
    %222 = arith.mulf %218, %221 : vector<16x128xf32>
    %c1_146 = arith.constant 1 : index
    %c0_147 = arith.constant 0 : index
    %c0_148 = arith.constant 0 : index
    %223 = vector.load %arg12[%c1_146, %c0_147, %c0_148] : memref<4x16x1xf32, #tpu.memory_space<vmem>>, vector<1x16x1xf32>
    %224 = vector.shape_cast %223 : vector<1x16x1xf32> to vector<16x1xf32>
    %225 = vector.broadcast %224 : vector<16x1xf32> to vector<16x128xf32>
    %226 = arith.addf %222, %225 : vector<16x128xf32>
    %227 = arith.mulf %114, %212 : vector<16x128xf32>
    %228 = arith.addf %227, %226 : vector<16x128xf32>
    %c2_149 = arith.constant 2 : index
    %c0_150 = arith.constant 0 : index
    %c0_151 = arith.constant 0 : index
    %229 = vector.load %arg2[%c2_149, %c0_150, %c0_151] : memref<4x16x1xf32, #tpu.memory_space<vmem>>, vector<1x16x1xf32>
    %230 = vector.shape_cast %229 : vector<1x16x1xf32> to vector<16x1xf32>
    %c2_152 = arith.constant 2 : index
    %c0_153 = arith.constant 0 : index
    %c0_154 = arith.constant 0 : index
    %231 = vector.load %arg3[%c2_152, %c0_153, %c0_154] : memref<4x32x16xbf16, #tpu.memory_space<vmem>>, vector<1x32x16xbf16>
    %232 = vector.shape_cast %231 : vector<1x32x16xbf16> to vector<32x16xbf16>
    %233 = arith.truncf %228 : vector<16x128xf32> to vector<16x128xbf16>
    %cst_155 = arith.constant dense<0.000000e+00> : vector<32x128xf32>
    %234 = tpu.matmul %232, %233, %cst_155 {dimension_numbers = #tpu.dot_dimension_numbers<[1], [0], [0], [1], [0, 0, 1, 1], [], []>} : vector<32x16xbf16>, vector<16x128xbf16>, vector<32x128xf32> -> vector<32x128xf32>
    %c2_156 = arith.constant 2 : index
    %c0_157 = arith.constant 0 : index
    %c0_158 = arith.constant 0 : index
    %235 = vector.load %arg4[%c2_156, %c0_157, %c0_158] : memref<4x32x1xf32, #tpu.memory_space<vmem>>, vector<1x32x1xf32>
    %236 = vector.shape_cast %235 : vector<1x32x1xf32> to vector<32x1xf32>
    %237 = vector.broadcast %236 : vector<32x1xf32> to vector<32x128xf32>
    %238 = arith.addf %234, %237 : vector<32x128xf32>
    %c4_159 = arith.constant 4 : index
    %c0_160 = arith.constant 0 : index
    %c0_161 = arith.constant 0 : index
    %239 = vector.load %arg5[%c4_159, %c0_160, %c0_161] : memref<8x32x1xf32, #tpu.memory_space<vmem>>, vector<1x32x1xf32>
    %240 = vector.shape_cast %239 : vector<1x32x1xf32> to vector<32x1xf32>
    %241 = vector.broadcast %240 : vector<32x1xf32> to vector<32x128xf32>
    %242 = arith.mulf %238, %241 : vector<32x128xf32>
    %c4_162 = arith.constant 4 : index
    %c0_163 = arith.constant 0 : index
    %c0_164 = arith.constant 0 : index
    %243 = vector.load %arg6[%c4_162, %c0_163, %c0_164] : memref<8x32x1xf32, #tpu.memory_space<vmem>>, vector<1x32x1xf32>
    %244 = vector.shape_cast %243 : vector<1x32x1xf32> to vector<32x1xf32>
    %245 = vector.broadcast %244 : vector<32x1xf32> to vector<32x128xf32>
    %246 = arith.addf %242, %245 : vector<32x128xf32>
    %cst_165 = arith.constant 0.000000e+00 : f32
    %247 = vector.broadcast %cst_165 : f32 to vector<32x128xf32>
    %248 = arith.maximumf %246, %247 : vector<32x128xf32>
    %c8 = arith.constant 8 : index
    %c0_166 = arith.constant 0 : index
    %c0_167 = arith.constant 0 : index
    %249 = vector.load %arg7[%c8, %c0_166, %c0_167] : memref<16x32x32xbf16, #tpu.memory_space<vmem>>, vector<1x32x32xbf16>
    %250 = vector.shape_cast %249 : vector<1x32x32xbf16> to vector<32x32xbf16>
    %251 = arith.truncf %248 : vector<32x128xf32> to vector<32x128xbf16>
    %cst_168 = arith.constant dense<0.000000e+00> : vector<32x128xf32>
    %252 = tpu.matmul %250, %251, %cst_168 {dimension_numbers = #tpu.dot_dimension_numbers<[1], [0], [0], [1], [0, 0, 1, 1], [], []>} : vector<32x32xbf16>, vector<32x128xbf16>, vector<32x128xf32> -> vector<32x128xf32>
    %c8_169 = arith.constant 8 : index
    %c0_170 = arith.constant 0 : index
    %c0_171 = arith.constant 0 : index
    %253 = vector.load %arg8[%c8_169, %c0_170, %c0_171] : memref<16x32x1xf32, #tpu.memory_space<vmem>>, vector<1x32x1xf32>
    %254 = vector.shape_cast %253 : vector<1x32x1xf32> to vector<32x1xf32>
    %255 = vector.broadcast %254 : vector<32x1xf32> to vector<32x128xf32>
    %256 = arith.addf %252, %255 : vector<32x128xf32>
    %cst_172 = arith.constant 0.000000e+00 : f32
    %257 = vector.broadcast %cst_172 : f32 to vector<32x128xf32>
    %258 = arith.maximumf %256, %257 : vector<32x128xf32>
    %c9 = arith.constant 9 : index
    %c0_173 = arith.constant 0 : index
    %c0_174 = arith.constant 0 : index
    %259 = vector.load %arg7[%c9, %c0_173, %c0_174] : memref<16x32x32xbf16, #tpu.memory_space<vmem>>, vector<1x32x32xbf16>
    %260 = vector.shape_cast %259 : vector<1x32x32xbf16> to vector<32x32xbf16>
    %261 = arith.truncf %258 : vector<32x128xf32> to vector<32x128xbf16>
    %cst_175 = arith.constant dense<0.000000e+00> : vector<32x128xf32>
    %262 = tpu.matmul %260, %261, %cst_175 {dimension_numbers = #tpu.dot_dimension_numbers<[1], [0], [0], [1], [0, 0, 1, 1], [], []>} : vector<32x32xbf16>, vector<32x128xbf16>, vector<32x128xf32> -> vector<32x128xf32>
    %c9_176 = arith.constant 9 : index
    %c0_177 = arith.constant 0 : index
    %c0_178 = arith.constant 0 : index
    %263 = vector.load %arg8[%c9_176, %c0_177, %c0_178] : memref<16x32x1xf32, #tpu.memory_space<vmem>>, vector<1x32x1xf32>
    %264 = vector.shape_cast %263 : vector<1x32x1xf32> to vector<32x1xf32>
    %265 = vector.broadcast %264 : vector<32x1xf32> to vector<32x128xf32>
    %266 = arith.addf %262, %265 : vector<32x128xf32>
    %267 = arith.addf %238, %266 : vector<32x128xf32>
    %c5_179 = arith.constant 5 : index
    %c0_180 = arith.constant 0 : index
    %c0_181 = arith.constant 0 : index
    %268 = vector.load %arg5[%c5_179, %c0_180, %c0_181] : memref<8x32x1xf32, #tpu.memory_space<vmem>>, vector<1x32x1xf32>
    %269 = vector.shape_cast %268 : vector<1x32x1xf32> to vector<32x1xf32>
    %270 = vector.broadcast %269 : vector<32x1xf32> to vector<32x128xf32>
    %271 = arith.mulf %267, %270 : vector<32x128xf32>
    %c5_182 = arith.constant 5 : index
    %c0_183 = arith.constant 0 : index
    %c0_184 = arith.constant 0 : index
    %272 = vector.load %arg6[%c5_182, %c0_183, %c0_184] : memref<8x32x1xf32, #tpu.memory_space<vmem>>, vector<1x32x1xf32>
    %273 = vector.shape_cast %272 : vector<1x32x1xf32> to vector<32x1xf32>
    %274 = vector.broadcast %273 : vector<32x1xf32> to vector<32x128xf32>
    %275 = arith.addf %271, %274 : vector<32x128xf32>
    %cst_185 = arith.constant 0.000000e+00 : f32
    %276 = vector.broadcast %cst_185 : f32 to vector<32x128xf32>
    %277 = arith.maximumf %275, %276 : vector<32x128xf32>
    %c10 = arith.constant 10 : index
    %c0_186 = arith.constant 0 : index
    %c0_187 = arith.constant 0 : index
    %278 = vector.load %arg7[%c10, %c0_186, %c0_187] : memref<16x32x32xbf16, #tpu.memory_space<vmem>>, vector<1x32x32xbf16>
    %279 = vector.shape_cast %278 : vector<1x32x32xbf16> to vector<32x32xbf16>
    %280 = arith.truncf %277 : vector<32x128xf32> to vector<32x128xbf16>
    %cst_188 = arith.constant dense<0.000000e+00> : vector<32x128xf32>
    %281 = tpu.matmul %279, %280, %cst_188 {dimension_numbers = #tpu.dot_dimension_numbers<[1], [0], [0], [1], [0, 0, 1, 1], [], []>} : vector<32x32xbf16>, vector<32x128xbf16>, vector<32x128xf32> -> vector<32x128xf32>
    %c10_189 = arith.constant 10 : index
    %c0_190 = arith.constant 0 : index
    %c0_191 = arith.constant 0 : index
    %282 = vector.load %arg8[%c10_189, %c0_190, %c0_191] : memref<16x32x1xf32, #tpu.memory_space<vmem>>, vector<1x32x1xf32>
    %283 = vector.shape_cast %282 : vector<1x32x1xf32> to vector<32x1xf32>
    %284 = vector.broadcast %283 : vector<32x1xf32> to vector<32x128xf32>
    %285 = arith.addf %281, %284 : vector<32x128xf32>
    %cst_192 = arith.constant 0.000000e+00 : f32
    %286 = vector.broadcast %cst_192 : f32 to vector<32x128xf32>
    %287 = arith.maximumf %285, %286 : vector<32x128xf32>
    %c11 = arith.constant 11 : index
    %c0_193 = arith.constant 0 : index
    %c0_194 = arith.constant 0 : index
    %288 = vector.load %arg7[%c11, %c0_193, %c0_194] : memref<16x32x32xbf16, #tpu.memory_space<vmem>>, vector<1x32x32xbf16>
    %289 = vector.shape_cast %288 : vector<1x32x32xbf16> to vector<32x32xbf16>
    %290 = arith.truncf %287 : vector<32x128xf32> to vector<32x128xbf16>
    %cst_195 = arith.constant dense<0.000000e+00> : vector<32x128xf32>
    %291 = tpu.matmul %289, %290, %cst_195 {dimension_numbers = #tpu.dot_dimension_numbers<[1], [0], [0], [1], [0, 0, 1, 1], [], []>} : vector<32x32xbf16>, vector<32x128xbf16>, vector<32x128xf32> -> vector<32x128xf32>
    %c11_196 = arith.constant 11 : index
    %c0_197 = arith.constant 0 : index
    %c0_198 = arith.constant 0 : index
    %292 = vector.load %arg8[%c11_196, %c0_197, %c0_198] : memref<16x32x1xf32, #tpu.memory_space<vmem>>, vector<1x32x1xf32>
    %293 = vector.shape_cast %292 : vector<1x32x1xf32> to vector<32x1xf32>
    %294 = vector.broadcast %293 : vector<32x1xf32> to vector<32x128xf32>
    %295 = arith.addf %291, %294 : vector<32x128xf32>
    %296 = arith.addf %267, %295 : vector<32x128xf32>
    %c2_199 = arith.constant 2 : index
    %c0_200 = arith.constant 0 : index
    %c0_201 = arith.constant 0 : index
    %297 = vector.load %arg9[%c2_199, %c0_200, %c0_201] : memref<4x32x32xbf16, #tpu.memory_space<vmem>>, vector<1x32x32xbf16>
    %298 = vector.shape_cast %297 : vector<1x32x32xbf16> to vector<32x32xbf16>
    %299 = arith.truncf %296 : vector<32x128xf32> to vector<32x128xbf16>
    %cst_202 = arith.constant dense<0.000000e+00> : vector<32x128xf32>
    %300 = tpu.matmul %298, %299, %cst_202 {dimension_numbers = #tpu.dot_dimension_numbers<[1], [0], [0], [1], [0, 0, 1, 1], [], []>} : vector<32x32xbf16>, vector<32x128xbf16>, vector<32x128xf32> -> vector<32x128xf32>
    %c2_203 = arith.constant 2 : index
    %c0_204 = arith.constant 0 : index
    %c0_205 = arith.constant 0 : index
    %301 = vector.load %arg10[%c2_203, %c0_204, %c0_205] : memref<4x32x1xf32, #tpu.memory_space<vmem>>, vector<1x32x1xf32>
    %302 = vector.shape_cast %301 : vector<1x32x1xf32> to vector<32x1xf32>
    %303 = vector.broadcast %302 : vector<32x1xf32> to vector<32x128xf32>
    %304 = arith.addf %300, %303 : vector<32x128xf32>
    %305 = vector.extract_strided_slice %304 {offsets = [0, 0], sizes = [16, 128], strides = [1, 1]} : vector<32x128xf32> to vector<16x128xf32>
    %306 = vector.extract_strided_slice %304 {offsets = [16, 0], sizes = [16, 128], strides = [1, 1]} : vector<32x128xf32> to vector<16x128xf32>
    %cst_206 = arith.constant 2.000000e+00 : f32
    %307 = vector.broadcast %cst_206 : f32 to vector<16x128xf32>
    %308 = arith.addf %306, %307 : vector<16x128xf32>
    %cst_207 = arith.constant 0.000000e+00 : f32
    %309 = vector.broadcast %cst_207 : f32 to vector<16x128xf32>
    %310 = arith.subf %309, %308 : vector<16x128xf32>
    %311 = math.exp %310 : vector<16x128xf32>
    %cst_208 = arith.constant 1.000000e+00 : f32
    %312 = vector.broadcast %cst_208 : f32 to vector<16x128xf32>
    %313 = arith.addf %312, %311 : vector<16x128xf32>
    %314 = tpu.reciprocal %313 {approx = true} : vector<16x128xf32> -> vector<16x128xf32>
    %cst_209 = arith.constant 1.000000e-03 : f32
    %315 = vector.broadcast %cst_209 : f32 to vector<16x128xf32>
    %316 = arith.addf %314, %315 : vector<16x128xf32>
    %cst_210 = arith.constant 5.000000e-01 : f32
    %317 = vector.broadcast %cst_210 : f32 to vector<16x1xf32>
    %318 = arith.cmpf ogt, %230, %317 : vector<16x1xf32>
    %cst_211 = arith.constant 1.000000e+00 : f32
    %319 = vector.shape_cast %318 : vector<16x1xi1> to vector<16x1xi1>
    %320 = vector.broadcast %319 : vector<16x1xi1> to vector<16x128xi1>
    %321 = vector.broadcast %cst_211 : f32 to vector<16x128xf32>
    %322 = arith.select %320, %316, %321 : vector<16x128xi1>, vector<16x128xf32>
    %c2_212 = arith.constant 2 : index
    %c0_213 = arith.constant 0 : index
    %c0_214 = arith.constant 0 : index
    %323 = vector.load %arg11[%c2_212, %c0_213, %c0_214] : memref<4x16x1xf32, #tpu.memory_space<vmem>>, vector<1x16x1xf32>
    %324 = vector.shape_cast %323 : vector<1x16x1xf32> to vector<16x1xf32>
    %325 = vector.broadcast %324 : vector<16x1xf32> to vector<16x128xf32>
    %326 = arith.mulf %322, %325 : vector<16x128xf32>
    %cst_215 = arith.constant 5.000000e-01 : f32
    %327 = vector.broadcast %cst_215 : f32 to vector<16x1xf32>
    %328 = arith.cmpf ogt, %230, %327 : vector<16x1xf32>
    %cst_216 = arith.constant 0.000000e+00 : f32
    %329 = vector.shape_cast %328 : vector<16x1xi1> to vector<16x1xi1>
    %330 = vector.broadcast %329 : vector<16x1xi1> to vector<16x128xi1>
    %331 = vector.broadcast %cst_216 : f32 to vector<16x128xf32>
    %332 = arith.select %330, %305, %331 : vector<16x128xi1>, vector<16x128xf32>
    %c2_217 = arith.constant 2 : index
    %c0_218 = arith.constant 0 : index
    %c0_219 = arith.constant 0 : index
    %333 = vector.load %arg11[%c2_217, %c0_218, %c0_219] : memref<4x16x1xf32, #tpu.memory_space<vmem>>, vector<1x16x1xf32>
    %334 = vector.shape_cast %333 : vector<1x16x1xf32> to vector<16x1xf32>
    %335 = vector.broadcast %334 : vector<16x1xf32> to vector<16x128xf32>
    %336 = arith.mulf %332, %335 : vector<16x128xf32>
    %c2_220 = arith.constant 2 : index
    %c0_221 = arith.constant 0 : index
    %c0_222 = arith.constant 0 : index
    %337 = vector.load %arg12[%c2_220, %c0_221, %c0_222] : memref<4x16x1xf32, #tpu.memory_space<vmem>>, vector<1x16x1xf32>
    %338 = vector.shape_cast %337 : vector<1x16x1xf32> to vector<16x1xf32>
    %339 = vector.broadcast %338 : vector<16x1xf32> to vector<16x128xf32>
    %340 = arith.addf %336, %339 : vector<16x128xf32>
    %341 = arith.mulf %228, %326 : vector<16x128xf32>
    %342 = arith.addf %341, %340 : vector<16x128xf32>
    %c3_223 = arith.constant 3 : index
    %c0_224 = arith.constant 0 : index
    %c0_225 = arith.constant 0 : index
    %343 = vector.load %arg2[%c3_223, %c0_224, %c0_225] : memref<4x16x1xf32, #tpu.memory_space<vmem>>, vector<1x16x1xf32>
    %344 = vector.shape_cast %343 : vector<1x16x1xf32> to vector<16x1xf32>
    %c3_226 = arith.constant 3 : index
    %c0_227 = arith.constant 0 : index
    %c0_228 = arith.constant 0 : index
    %345 = vector.load %arg3[%c3_226, %c0_227, %c0_228] : memref<4x32x16xbf16, #tpu.memory_space<vmem>>, vector<1x32x16xbf16>
    %346 = vector.shape_cast %345 : vector<1x32x16xbf16> to vector<32x16xbf16>
    %347 = arith.truncf %342 : vector<16x128xf32> to vector<16x128xbf16>
    %cst_229 = arith.constant dense<0.000000e+00> : vector<32x128xf32>
    %348 = tpu.matmul %346, %347, %cst_229 {dimension_numbers = #tpu.dot_dimension_numbers<[1], [0], [0], [1], [0, 0, 1, 1], [], []>} : vector<32x16xbf16>, vector<16x128xbf16>, vector<32x128xf32> -> vector<32x128xf32>
    %c3_230 = arith.constant 3 : index
    %c0_231 = arith.constant 0 : index
    %c0_232 = arith.constant 0 : index
    %349 = vector.load %arg4[%c3_230, %c0_231, %c0_232] : memref<4x32x1xf32, #tpu.memory_space<vmem>>, vector<1x32x1xf32>
    %350 = vector.shape_cast %349 : vector<1x32x1xf32> to vector<32x1xf32>
    %351 = vector.broadcast %350 : vector<32x1xf32> to vector<32x128xf32>
    %352 = arith.addf %348, %351 : vector<32x128xf32>
    %c6_233 = arith.constant 6 : index
    %c0_234 = arith.constant 0 : index
    %c0_235 = arith.constant 0 : index
    %353 = vector.load %arg5[%c6_233, %c0_234, %c0_235] : memref<8x32x1xf32, #tpu.memory_space<vmem>>, vector<1x32x1xf32>
    %354 = vector.shape_cast %353 : vector<1x32x1xf32> to vector<32x1xf32>
    %355 = vector.broadcast %354 : vector<32x1xf32> to vector<32x128xf32>
    %356 = arith.mulf %352, %355 : vector<32x128xf32>
    %c6_236 = arith.constant 6 : index
    %c0_237 = arith.constant 0 : index
    %c0_238 = arith.constant 0 : index
    %357 = vector.load %arg6[%c6_236, %c0_237, %c0_238] : memref<8x32x1xf32, #tpu.memory_space<vmem>>, vector<1x32x1xf32>
    %358 = vector.shape_cast %357 : vector<1x32x1xf32> to vector<32x1xf32>
    %359 = vector.broadcast %358 : vector<32x1xf32> to vector<32x128xf32>
    %360 = arith.addf %356, %359 : vector<32x128xf32>
    %cst_239 = arith.constant 0.000000e+00 : f32
    %361 = vector.broadcast %cst_239 : f32 to vector<32x128xf32>
    %362 = arith.maximumf %360, %361 : vector<32x128xf32>
    %c12 = arith.constant 12 : index
    %c0_240 = arith.constant 0 : index
    %c0_241 = arith.constant 0 : index
    %363 = vector.load %arg7[%c12, %c0_240, %c0_241] : memref<16x32x32xbf16, #tpu.memory_space<vmem>>, vector<1x32x32xbf16>
    %364 = vector.shape_cast %363 : vector<1x32x32xbf16> to vector<32x32xbf16>
    %365 = arith.truncf %362 : vector<32x128xf32> to vector<32x128xbf16>
    %cst_242 = arith.constant dense<0.000000e+00> : vector<32x128xf32>
    %366 = tpu.matmul %364, %365, %cst_242 {dimension_numbers = #tpu.dot_dimension_numbers<[1], [0], [0], [1], [0, 0, 1, 1], [], []>} : vector<32x32xbf16>, vector<32x128xbf16>, vector<32x128xf32> -> vector<32x128xf32>
    %c12_243 = arith.constant 12 : index
    %c0_244 = arith.constant 0 : index
    %c0_245 = arith.constant 0 : index
    %367 = vector.load %arg8[%c12_243, %c0_244, %c0_245] : memref<16x32x1xf32, #tpu.memory_space<vmem>>, vector<1x32x1xf32>
    %368 = vector.shape_cast %367 : vector<1x32x1xf32> to vector<32x1xf32>
    %369 = vector.broadcast %368 : vector<32x1xf32> to vector<32x128xf32>
    %370 = arith.addf %366, %369 : vector<32x128xf32>
    %cst_246 = arith.constant 0.000000e+00 : f32
    %371 = vector.broadcast %cst_246 : f32 to vector<32x128xf32>
    %372 = arith.maximumf %370, %371 : vector<32x128xf32>
    %c13 = arith.constant 13 : index
    %c0_247 = arith.constant 0 : index
    %c0_248 = arith.constant 0 : index
    %373 = vector.load %arg7[%c13, %c0_247, %c0_248] : memref<16x32x32xbf16, #tpu.memory_space<vmem>>, vector<1x32x32xbf16>
    %374 = vector.shape_cast %373 : vector<1x32x32xbf16> to vector<32x32xbf16>
    %375 = arith.truncf %372 : vector<32x128xf32> to vector<32x128xbf16>
    %cst_249 = arith.constant dense<0.000000e+00> : vector<32x128xf32>
    %376 = tpu.matmul %374, %375, %cst_249 {dimension_numbers = #tpu.dot_dimension_numbers<[1], [0], [0], [1], [0, 0, 1, 1], [], []>} : vector<32x32xbf16>, vector<32x128xbf16>, vector<32x128xf32> -> vector<32x128xf32>
    %c13_250 = arith.constant 13 : index
    %c0_251 = arith.constant 0 : index
    %c0_252 = arith.constant 0 : index
    %377 = vector.load %arg8[%c13_250, %c0_251, %c0_252] : memref<16x32x1xf32, #tpu.memory_space<vmem>>, vector<1x32x1xf32>
    %378 = vector.shape_cast %377 : vector<1x32x1xf32> to vector<32x1xf32>
    %379 = vector.broadcast %378 : vector<32x1xf32> to vector<32x128xf32>
    %380 = arith.addf %376, %379 : vector<32x128xf32>
    %381 = arith.addf %352, %380 : vector<32x128xf32>
    %c7_253 = arith.constant 7 : index
    %c0_254 = arith.constant 0 : index
    %c0_255 = arith.constant 0 : index
    %382 = vector.load %arg5[%c7_253, %c0_254, %c0_255] : memref<8x32x1xf32, #tpu.memory_space<vmem>>, vector<1x32x1xf32>
    %383 = vector.shape_cast %382 : vector<1x32x1xf32> to vector<32x1xf32>
    %384 = vector.broadcast %383 : vector<32x1xf32> to vector<32x128xf32>
    %385 = arith.mulf %381, %384 : vector<32x128xf32>
    %c7_256 = arith.constant 7 : index
    %c0_257 = arith.constant 0 : index
    %c0_258 = arith.constant 0 : index
    %386 = vector.load %arg6[%c7_256, %c0_257, %c0_258] : memref<8x32x1xf32, #tpu.memory_space<vmem>>, vector<1x32x1xf32>
    %387 = vector.shape_cast %386 : vector<1x32x1xf32> to vector<32x1xf32>
    %388 = vector.broadcast %387 : vector<32x1xf32> to vector<32x128xf32>
    %389 = arith.addf %385, %388 : vector<32x128xf32>
    %cst_259 = arith.constant 0.000000e+00 : f32
    %390 = vector.broadcast %cst_259 : f32 to vector<32x128xf32>
    %391 = arith.maximumf %389, %390 : vector<32x128xf32>
    %c14 = arith.constant 14 : index
    %c0_260 = arith.constant 0 : index
    %c0_261 = arith.constant 0 : index
    %392 = vector.load %arg7[%c14, %c0_260, %c0_261] : memref<16x32x32xbf16, #tpu.memory_space<vmem>>, vector<1x32x32xbf16>
    %393 = vector.shape_cast %392 : vector<1x32x32xbf16> to vector<32x32xbf16>
    %394 = arith.truncf %391 : vector<32x128xf32> to vector<32x128xbf16>
    %cst_262 = arith.constant dense<0.000000e+00> : vector<32x128xf32>
    %395 = tpu.matmul %393, %394, %cst_262 {dimension_numbers = #tpu.dot_dimension_numbers<[1], [0], [0], [1], [0, 0, 1, 1], [], []>} : vector<32x32xbf16>, vector<32x128xbf16>, vector<32x128xf32> -> vector<32x128xf32>
    %c14_263 = arith.constant 14 : index
    %c0_264 = arith.constant 0 : index
    %c0_265 = arith.constant 0 : index
    %396 = vector.load %arg8[%c14_263, %c0_264, %c0_265] : memref<16x32x1xf32, #tpu.memory_space<vmem>>, vector<1x32x1xf32>
    %397 = vector.shape_cast %396 : vector<1x32x1xf32> to vector<32x1xf32>
    %398 = vector.broadcast %397 : vector<32x1xf32> to vector<32x128xf32>
    %399 = arith.addf %395, %398 : vector<32x128xf32>
    %cst_266 = arith.constant 0.000000e+00 : f32
    %400 = vector.broadcast %cst_266 : f32 to vector<32x128xf32>
    %401 = arith.maximumf %399, %400 : vector<32x128xf32>
    %c15 = arith.constant 15 : index
    %c0_267 = arith.constant 0 : index
    %c0_268 = arith.constant 0 : index
    %402 = vector.load %arg7[%c15, %c0_267, %c0_268] : memref<16x32x32xbf16, #tpu.memory_space<vmem>>, vector<1x32x32xbf16>
    %403 = vector.shape_cast %402 : vector<1x32x32xbf16> to vector<32x32xbf16>
    %404 = arith.truncf %401 : vector<32x128xf32> to vector<32x128xbf16>
    %cst_269 = arith.constant dense<0.000000e+00> : vector<32x128xf32>
    %405 = tpu.matmul %403, %404, %cst_269 {dimension_numbers = #tpu.dot_dimension_numbers<[1], [0], [0], [1], [0, 0, 1, 1], [], []>} : vector<32x32xbf16>, vector<32x128xbf16>, vector<32x128xf32> -> vector<32x128xf32>
    %c15_270 = arith.constant 15 : index
    %c0_271 = arith.constant 0 : index
    %c0_272 = arith.constant 0 : index
    %406 = vector.load %arg8[%c15_270, %c0_271, %c0_272] : memref<16x32x1xf32, #tpu.memory_space<vmem>>, vector<1x32x1xf32>
    %407 = vector.shape_cast %406 : vector<1x32x1xf32> to vector<32x1xf32>
    %408 = vector.broadcast %407 : vector<32x1xf32> to vector<32x128xf32>
    %409 = arith.addf %405, %408 : vector<32x128xf32>
    %410 = arith.addf %381, %409 : vector<32x128xf32>
    %c3_273 = arith.constant 3 : index
    %c0_274 = arith.constant 0 : index
    %c0_275 = arith.constant 0 : index
    %411 = vector.load %arg9[%c3_273, %c0_274, %c0_275] : memref<4x32x32xbf16, #tpu.memory_space<vmem>>, vector<1x32x32xbf16>
    %412 = vector.shape_cast %411 : vector<1x32x32xbf16> to vector<32x32xbf16>
    %413 = arith.truncf %410 : vector<32x128xf32> to vector<32x128xbf16>
    %cst_276 = arith.constant dense<0.000000e+00> : vector<32x128xf32>
    %414 = tpu.matmul %412, %413, %cst_276 {dimension_numbers = #tpu.dot_dimension_numbers<[1], [0], [0], [1], [0, 0, 1, 1], [], []>} : vector<32x32xbf16>, vector<32x128xbf16>, vector<32x128xf32> -> vector<32x128xf32>
    %c3_277 = arith.constant 3 : index
    %c0_278 = arith.constant 0 : index
    %c0_279 = arith.constant 0 : index
    %415 = vector.load %arg10[%c3_277, %c0_278, %c0_279] : memref<4x32x1xf32, #tpu.memory_space<vmem>>, vector<1x32x1xf32>
    %416 = vector.shape_cast %415 : vector<1x32x1xf32> to vector<32x1xf32>
    %417 = vector.broadcast %416 : vector<32x1xf32> to vector<32x128xf32>
    %418 = arith.addf %414, %417 : vector<32x128xf32>
    %419 = vector.extract_strided_slice %418 {offsets = [0, 0], sizes = [16, 128], strides = [1, 1]} : vector<32x128xf32> to vector<16x128xf32>
    %420 = vector.extract_strided_slice %418 {offsets = [16, 0], sizes = [16, 128], strides = [1, 1]} : vector<32x128xf32> to vector<16x128xf32>
    %cst_280 = arith.constant 2.000000e+00 : f32
    %421 = vector.broadcast %cst_280 : f32 to vector<16x128xf32>
    %422 = arith.addf %420, %421 : vector<16x128xf32>
    %cst_281 = arith.constant 0.000000e+00 : f32
    %423 = vector.broadcast %cst_281 : f32 to vector<16x128xf32>
    %424 = arith.subf %423, %422 : vector<16x128xf32>
    %425 = math.exp %424 : vector<16x128xf32>
    %cst_282 = arith.constant 1.000000e+00 : f32
    %426 = vector.broadcast %cst_282 : f32 to vector<16x128xf32>
    %427 = arith.addf %426, %425 : vector<16x128xf32>
    %428 = tpu.reciprocal %427 {approx = true} : vector<16x128xf32> -> vector<16x128xf32>
    %cst_283 = arith.constant 1.000000e-03 : f32
    %429 = vector.broadcast %cst_283 : f32 to vector<16x128xf32>
    %430 = arith.addf %428, %429 : vector<16x128xf32>
    %cst_284 = arith.constant 5.000000e-01 : f32
    %431 = vector.broadcast %cst_284 : f32 to vector<16x1xf32>
    %432 = arith.cmpf ogt, %344, %431 : vector<16x1xf32>
    %cst_285 = arith.constant 1.000000e+00 : f32
    %433 = vector.shape_cast %432 : vector<16x1xi1> to vector<16x1xi1>
    %434 = vector.broadcast %433 : vector<16x1xi1> to vector<16x128xi1>
    %435 = vector.broadcast %cst_285 : f32 to vector<16x128xf32>
    %436 = arith.select %434, %430, %435 : vector<16x128xi1>, vector<16x128xf32>
    %c3_286 = arith.constant 3 : index
    %c0_287 = arith.constant 0 : index
    %c0_288 = arith.constant 0 : index
    %437 = vector.load %arg11[%c3_286, %c0_287, %c0_288] : memref<4x16x1xf32, #tpu.memory_space<vmem>>, vector<1x16x1xf32>
    %438 = vector.shape_cast %437 : vector<1x16x1xf32> to vector<16x1xf32>
    %439 = vector.broadcast %438 : vector<16x1xf32> to vector<16x128xf32>
    %440 = arith.mulf %436, %439 : vector<16x128xf32>
    %cst_289 = arith.constant 5.000000e-01 : f32
    %441 = vector.broadcast %cst_289 : f32 to vector<16x1xf32>
    %442 = arith.cmpf ogt, %344, %441 : vector<16x1xf32>
    %cst_290 = arith.constant 0.000000e+00 : f32
    %443 = vector.shape_cast %442 : vector<16x1xi1> to vector<16x1xi1>
    %444 = vector.broadcast %443 : vector<16x1xi1> to vector<16x128xi1>
    %445 = vector.broadcast %cst_290 : f32 to vector<16x128xf32>
    %446 = arith.select %444, %419, %445 : vector<16x128xi1>, vector<16x128xf32>
    %c3_291 = arith.constant 3 : index
    %c0_292 = arith.constant 0 : index
    %c0_293 = arith.constant 0 : index
    %447 = vector.load %arg11[%c3_291, %c0_292, %c0_293] : memref<4x16x1xf32, #tpu.memory_space<vmem>>, vector<1x16x1xf32>
    %448 = vector.shape_cast %447 : vector<1x16x1xf32> to vector<16x1xf32>
    %449 = vector.broadcast %448 : vector<16x1xf32> to vector<16x128xf32>
    %450 = arith.mulf %446, %449 : vector<16x128xf32>
    %c3_294 = arith.constant 3 : index
    %c0_295 = arith.constant 0 : index
    %c0_296 = arith.constant 0 : index
    %451 = vector.load %arg12[%c3_294, %c0_295, %c0_296] : memref<4x16x1xf32, #tpu.memory_space<vmem>>, vector<1x16x1xf32>
    %452 = vector.shape_cast %451 : vector<1x16x1xf32> to vector<16x1xf32>
    %453 = vector.broadcast %452 : vector<16x1xf32> to vector<16x128xf32>
    %454 = arith.addf %450, %453 : vector<16x128xf32>
    %455 = arith.mulf %342, %440 : vector<16x128xf32>
    %456 = arith.addf %455, %454 : vector<16x128xf32>
    %cst_297 = arith.constant 0.000000e+00 : f32
    %cst_298 = arith.constant 1.000000e+00 : f32
    %457 = vector.broadcast %cst_297 : f32 to vector<16x128xf32>
    %458 = arith.maximumf %457, %456 : vector<16x128xf32>
    %459 = vector.broadcast %cst_298 : f32 to vector<16x128xf32>
    %460 = arith.minimumf %459, %458 : vector<16x128xf32>
    %c0_299 = arith.constant 0 : index
    %c0_300 = arith.constant 0 : index
    %461 = vector.load %arg13[%c0_299, %c0_300] : memref<16x128xf32, #tpu.memory_space<vmem>>, vector<16x128xf32>
    tpu.vector_store %arg13[%c0_299, %c0_300], %460 {strides = array<i32>} : memref<16x128xf32, #tpu.memory_space<vmem>>, vector<16x128xf32>,
    return
  }
  func.func @transform_0(%arg0: i32) -> (i32, i32) {
    %c0_i32 = arith.constant 0 : i32
    %c0_i32_0 = arith.constant 0 : i32
    return %c0_i32, %arg0 : i32, i32
  }
  func.func @transform_1(%arg0: i32) -> (i32, i32, i32) {
    %c0_i32 = arith.constant 0 : i32
    %c0_i32_0 = arith.constant 0 : i32
    %c0_i32_1 = arith.constant 0 : i32
    %c0_i32_2 = arith.constant 0 : i32
    return %c0_i32, %c0_i32_0, %c0_i32_1 : i32, i32, i32
  }
  func.func @transform_2(%arg0: i32) -> (i32, i32, i32) {
    %c0_i32 = arith.constant 0 : i32
    %c0_i32_0 = arith.constant 0 : i32
    %c0_i32_1 = arith.constant 0 : i32
    %c0_i32_2 = arith.constant 0 : i32
    return %c0_i32, %c0_i32_0, %c0_i32_1 : i32, i32, i32
  }
  func.func @transform_3(%arg0: i32) -> (i32, i32, i32) {
    %c0_i32 = arith.constant 0 : i32
    %c0_i32_0 = arith.constant 0 : i32
    %c0_i32_1 = arith.constant 0 : i32
    %c0_i32_2 = arith.constant 0 : i32
    return %c0_i32, %c0_i32_0, %c0_i32_1 : i32, i32, i32
  }
  func.func @transform_4(%arg0: i32) -> (i32, i32, i32) {
    %c0_i32 = arith.constant 0 : i32
    %c0_i32_0 = arith.constant 0 : i32
    %c0_i32_1 = arith.constant 0 : i32
    %c0_i32_2 = arith.constant 0 : i32
    return %c0_i32, %c0_i32_0, %c0_i32_1 : i32, i32, i32
  }
  func.func @transform_5(%arg0: i32) -> (i32, i32, i32) {
    %c0_i32 = arith.constant 0 : i32
    %c0_i32_0 = arith.constant 0 : i32
    %c0_i32_1 = arith.constant 0 : i32
    %c0_i32_2 = arith.constant 0 : i32
    return %c0_i32, %c0_i32_0, %c0_i32_1 : i32, i32, i32
  }
  func.func @transform_6(%arg0: i32) -> (i32, i32, i32) {
    %c0_i32 = arith.constant 0 : i32
    %c0_i32_0 = arith.constant 0 : i32
    %c0_i32_1 = arith.constant 0 : i32
    %c0_i32_2 = arith.constant 0 : i32
    return %c0_i32, %c0_i32_0, %c0_i32_1 : i32, i32, i32
  }
  func.func @transform_7(%arg0: i32) -> (i32, i32, i32) {
    %c0_i32 = arith.constant 0 : i32
    %c0_i32_0 = arith.constant 0 : i32
    %c0_i32_1 = arith.constant 0 : i32
    %c0_i32_2 = arith.constant 0 : i32
    return %c0_i32, %c0_i32_0, %c0_i32_1 : i32, i32, i32
  }
  func.func @transform_8(%arg0: i32) -> (i32, i32, i32) {
    %c0_i32 = arith.constant 0 : i32
    %c0_i32_0 = arith.constant 0 : i32
    %c0_i32_1 = arith.constant 0 : i32
    %c0_i32_2 = arith.constant 0 : i32
    return %c0_i32, %c0_i32_0, %c0_i32_1 : i32, i32, i32
  }
  func.func @transform_9(%arg0: i32) -> (i32, i32, i32) {
    %c0_i32 = arith.constant 0 : i32
    %c0_i32_0 = arith.constant 0 : i32
    %c0_i32_1 = arith.constant 0 : i32
    %c0_i32_2 = arith.constant 0 : i32
    return %c0_i32, %c0_i32_0, %c0_i32_1 : i32, i32, i32
  }
  func.func @transform_10(%arg0: i32) -> (i32, i32, i32) {
    %c0_i32 = arith.constant 0 : i32
    %c0_i32_0 = arith.constant 0 : i32
    %c0_i32_1 = arith.constant 0 : i32
    %c0_i32_2 = arith.constant 0 : i32
    return %c0_i32, %c0_i32_0, %c0_i32_1 : i32, i32, i32
  }
  func.func @transform_11(%arg0: i32) -> (i32, i32, i32) {
    %c0_i32 = arith.constant 0 : i32
    %c0_i32_0 = arith.constant 0 : i32
    %c0_i32_1 = arith.constant 0 : i32
    %c0_i32_2 = arith.constant 0 : i32
    return %c0_i32, %c0_i32_0, %c0_i32_1 : i32, i32, i32
  }
  func.func @transform_12(%arg0: i32) -> (i32, i32) {
    %c0_i32 = arith.constant 0 : i32
    %c0_i32_0 = arith.constant 0 : i32
    return %c0_i32, %arg0 : i32, i32
  }
}

module attributes {stable_mosaic.version = 11 : i64} {
  func.func @_flow_regression_kernel(%arg0: i32, %arg1: memref<16x128xf32, #tpu.memory_space<vmem>>, %arg2: memref<4x16x1xf32, #tpu.memory_space<vmem>>, %arg3: memref<4x32x16xbf16, #tpu.memory_space<vmem>>, %arg4: memref<4x32x1xf32, #tpu.memory_space<vmem>>, %arg5: memref<8x32x1xf32, #tpu.memory_space<vmem>>, %arg6: memref<8x32x1xf32, #tpu.memory_space<vmem>>, %arg7: memref<16x32x32xbf16, #tpu.memory_space<vmem>>, %arg8: memref<16x32x1xf32, #tpu.memory_space<vmem>>, %arg9: memref<4x32x32xbf16, #tpu.memory_space<vmem>>, %arg10: memref<4x32x1xf32, #tpu.memory_space<vmem>>, %arg11: memref<4x16x1xf32, #tpu.memory_space<vmem>>, %arg12: memref<4x16x1xf32, #tpu.memory_space<vmem>>, %arg13: memref<16x128xf32, #tpu.memory_space<vmem>>) attributes {dimension_semantics = [#tpu.dimension_semantics<parallel>], iteration_bounds = array<i64: 1>, scalar_prefetch = 0 : i64, scratch_operands = 0 : i64, tpu.core_type = #tpu.core_type<tc>, window_params = [{transform_indices = @transform_0, window_bounds = array<i64: 16, 128>}, {pipeline_mode = #tpu.pipeline_mode<synchronous>, transform_indices = @transform_1, window_bounds = array<i64: 4, 16, 1>}, {pipeline_mode = #tpu.pipeline_mode<synchronous>, transform_indices = @transform_2, window_bounds = array<i64: 4, 32, 16>}, {pipeline_mode = #tpu.pipeline_mode<synchronous>, transform_indices = @transform_3, window_bounds = array<i64: 4, 32, 1>}, {pipeline_mode = #tpu.pipeline_mode<synchronous>, transform_indices = @transform_4, window_bounds = array<i64: 8, 32, 1>}, {pipeline_mode = #tpu.pipeline_mode<synchronous>, transform_indices = @transform_5, window_bounds = array<i64: 8, 32, 1>}, {pipeline_mode = #tpu.pipeline_mode<synchronous>, transform_indices = @transform_6, window_bounds = array<i64: 16, 32, 32>}, {pipeline_mode = #tpu.pipeline_mode<synchronous>, transform_indices = @transform_7, window_bounds = array<i64: 16, 32, 1>}, {pipeline_mode = #tpu.pipeline_mode<synchronous>, transform_indices = @transform_8, window_bounds = array<i64: 4, 32, 32>}, {pipeline_mode = #tpu.pipeline_mode<synchronous>, transform_indices = @transform_9, window_bounds = array<i64: 4, 32, 1>}, {pipeline_mode = #tpu.pipeline_mode<synchronous>, transform_indices = @transform_10, window_bounds = array<i64: 4, 16, 1>}, {pipeline_mode = #tpu.pipeline_mode<synchronous>, transform_indices = @transform_11, window_bounds = array<i64: 4, 16, 1>}, {transform_indices = @transform_12, window_bounds = array<i64: 16, 128>}]} {
    %c0 = arith.constant 0 : index
    %c0_0 = arith.constant 0 : index
    %0 = vector.load %arg1[%c0, %c0_0] : memref<16x128xf32, #tpu.memory_space<vmem>>, vector<16x128xf32>
    %c0_1 = arith.constant 0 : index
    %c0_2 = arith.constant 0 : index
    %c0_3 = arith.constant 0 : index
    %1 = vector.load %arg2[%c0_1, %c0_2, %c0_3] : memref<4x16x1xf32, #tpu.memory_space<vmem>>, vector<1x16x1xf32>
    %2 = vector.shape_cast %1 : vector<1x16x1xf32> to vector<16x1xf32>
    %c0_4 = arith.constant 0 : index
    %c0_5 = arith.constant 0 : index
    %c0_6 = arith.constant 0 : index
    %3 = vector.load %arg3[%c0_4, %c0_5, %c0_6] : memref<4x32x16xbf16, #tpu.memory_space<vmem>>, vector<1x32x16xbf16>
    %4 = vector.shape_cast %3 : vector<1x32x16xbf16> to vector<32x16xbf16>
    %5 = arith.truncf %0 : vector<16x128xf32> to vector<16x128xbf16>
    %cst = arith.constant dense<0.000000e+00> : vector<32x128xf32>
    %6 = tpu.matmul %4, %5, %cst {dimension_numbers = #tpu.dot_dimension_numbers<[1], [0], [0], [1], [0, 0, 1, 1], [], []>} : vector<32x16xbf16>, vector<16x128xbf16>, vector<32x128xf32> -> vector<32x128xf32>
    %c0_7 = arith.constant 0 : index
    %c0_8 = arith.constant 0 : index
    %c0_9 = arith.constant 0 : index
    %7 = vector.load %arg4[%c0_7, %c0_8, %c0_9] : memref<4x32x1xf32, #tpu.memory_space<vmem>>, vector<1x32x1xf32>
    %8 = vector.shape_cast %7 : vector<1x32x1xf32> to vector<32x1xf32>
    %9 = vector.broadcast %8 : vector<32x1xf32> to vector<32x128xf32>
    %10 = arith.addf %6, %9 : vector<32x128xf32>
    %c0_10 = arith.constant 0 : index
    %c0_11 = arith.constant 0 : index
    %c0_12 = arith.constant 0 : index
    %11 = vector.load %arg5[%c0_10, %c0_11, %c0_12] : memref<8x32x1xf32, #tpu.memory_space<vmem>>, vector<1x32x1xf32>
    %12 = vector.shape_cast %11 : vector<1x32x1xf32> to vector<32x1xf32>
    %13 = vector.broadcast %12 : vector<32x1xf32> to vector<32x128xf32>
    %14 = arith.mulf %10, %13 : vector<32x128xf32>
    %c0_13 = arith.constant 0 : index
    %c0_14 = arith.constant 0 : index
    %c0_15 = arith.constant 0 : index
    %15 = vector.load %arg6[%c0_13, %c0_14, %c0_15] : memref<8x32x1xf32, #tpu.memory_space<vmem>>, vector<1x32x1xf32>
    %16 = vector.shape_cast %15 : vector<1x32x1xf32> to vector<32x1xf32>
    %17 = vector.broadcast %16 : vector<32x1xf32> to vector<32x128xf32>
    %18 = arith.addf %14, %17 : vector<32x128xf32>
    %cst_16 = arith.constant 0.000000e+00 : f32
    %19 = vector.broadcast %cst_16 : f32 to vector<32x128xf32>
    %20 = arith.maximumf %18, %19 : vector<32x128xf32>
    %c0_17 = arith.constant 0 : index
    %c0_18 = arith.constant 0 : index
    %c0_19 = arith.constant 0 : index
    %21 = vector.load %arg7[%c0_17, %c0_18, %c0_19] : memref<16x32x32xbf16, #tpu.memory_space<vmem>>, vector<1x32x32xbf16>
    %22 = vector.shape_cast %21 : vector<1x32x32xbf16> to vector<32x32xbf16>
    %23 = arith.truncf %20 : vector<32x128xf32> to vector<32x128xbf16>
    %cst_20 = arith.constant dense<0.000000e+00> : vector<32x128xf32>
    %24 = tpu.matmul %22, %23, %cst_20 {dimension_numbers = #tpu.dot_dimension_numbers<[1], [0], [0], [1], [0, 0, 1, 1], [], []>} : vector<32x32xbf16>, vector<32x128xbf16>, vector<32x128xf32> -> vector<32x128xf32>
    %c0_21 = arith.constant 0 : index
    %c0_22 = arith.constant 0 : index
    %c0_23 = arith.constant 0 : index
    %25 = vector.load %arg8[%c0_21, %c0_22, %c0_23] : memref<16x32x1xf32, #tpu.memory_space<vmem>>, vector<1x32x1xf32>
    %26 = vector.shape_cast %25 : vector<1x32x1xf32> to vector<32x1xf32>
    %27 = vector.broadcast %26 : vector<32x1xf32> to vector<32x128xf32>
    %28 = arith.addf %24, %27 : vector<32x128xf32>
    %cst_24 = arith.constant 0.000000e+00 : f32
    %29 = vector.broadcast %cst_24 : f32 to vector<32x128xf32>
    %30 = arith.maximumf %28, %29 : vector<32x128xf32>
    %c1 = arith.constant 1 : index
    %c0_25 = arith.constant 0 : index
    %c0_26 = arith.constant 0 : index
    %31 = vector.load %arg7[%c1, %c0_25, %c0_26] : memref<16x32x32xbf16, #tpu.memory_space<vmem>>, vector<1x32x32xbf16>
    %32 = vector.shape_cast %31 : vector<1x32x32xbf16> to vector<32x32xbf16>
    %33 = arith.truncf %30 : vector<32x128xf32> to vector<32x128xbf16>
    %cst_27 = arith.constant dense<0.000000e+00> : vector<32x128xf32>
    %34 = tpu.matmul %32, %33, %cst_27 {dimension_numbers = #tpu.dot_dimension_numbers<[1], [0], [0], [1], [0, 0, 1, 1], [], []>} : vector<32x32xbf16>, vector<32x128xbf16>, vector<32x128xf32> -> vector<32x128xf32>
    %c1_28 = arith.constant 1 : index
    %c0_29 = arith.constant 0 : index
    %c0_30 = arith.constant 0 : index
    %35 = vector.load %arg8[%c1_28, %c0_29, %c0_30] : memref<16x32x1xf32, #tpu.memory_space<vmem>>, vector<1x32x1xf32>
    %36 = vector.shape_cast %35 : vector<1x32x1xf32> to vector<32x1xf32>
    %37 = vector.broadcast %36 : vector<32x1xf32> to vector<32x128xf32>
    %38 = arith.addf %34, %37 : vector<32x128xf32>
    %39 = arith.addf %10, %38 : vector<32x128xf32>
    %c1_31 = arith.constant 1 : index
    %c0_32 = arith.constant 0 : index
    %c0_33 = arith.constant 0 : index
    %40 = vector.load %arg5[%c1_31, %c0_32, %c0_33] : memref<8x32x1xf32, #tpu.memory_space<vmem>>, vector<1x32x1xf32>
    %41 = vector.shape_cast %40 : vector<1x32x1xf32> to vector<32x1xf32>
    %42 = vector.broadcast %41 : vector<32x1xf32> to vector<32x128xf32>
    %43 = arith.mulf %39, %42 : vector<32x128xf32>
    %c1_34 = arith.constant 1 : index
    %c0_35 = arith.constant 0 : index
    %c0_36 = arith.constant 0 : index
    %44 = vector.load %arg6[%c1_34, %c0_35, %c0_36] : memref<8x32x1xf32, #tpu.memory_space<vmem>>, vector<1x32x1xf32>
    %45 = vector.shape_cast %44 : vector<1x32x1xf32> to vector<32x1xf32>
    %46 = vector.broadcast %45 : vector<32x1xf32> to vector<32x128xf32>
    %47 = arith.addf %43, %46 : vector<32x128xf32>
    %cst_37 = arith.constant 0.000000e+00 : f32
    %48 = vector.broadcast %cst_37 : f32 to vector<32x128xf32>
    %49 = arith.maximumf %47, %48 : vector<32x128xf32>
    %c2 = arith.constant 2 : index
    %c0_38 = arith.constant 0 : index
    %c0_39 = arith.constant 0 : index
    %50 = vector.load %arg7[%c2, %c0_38, %c0_39] : memref<16x32x32xbf16, #tpu.memory_space<vmem>>, vector<1x32x32xbf16>
    %51 = vector.shape_cast %50 : vector<1x32x32xbf16> to vector<32x32xbf16>
    %52 = arith.truncf %49 : vector<32x128xf32> to vector<32x128xbf16>
    %cst_40 = arith.constant dense<0.000000e+00> : vector<32x128xf32>
    %53 = tpu.matmul %51, %52, %cst_40 {dimension_numbers = #tpu.dot_dimension_numbers<[1], [0], [0], [1], [0, 0, 1, 1], [], []>} : vector<32x32xbf16>, vector<32x128xbf16>, vector<32x128xf32> -> vector<32x128xf32>
    %c2_41 = arith.constant 2 : index
    %c0_42 = arith.constant 0 : index
    %c0_43 = arith.constant 0 : index
    %54 = vector.load %arg8[%c2_41, %c0_42, %c0_43] : memref<16x32x1xf32, #tpu.memory_space<vmem>>, vector<1x32x1xf32>
    %55 = vector.shape_cast %54 : vector<1x32x1xf32> to vector<32x1xf32>
    %56 = vector.broadcast %55 : vector<32x1xf32> to vector<32x128xf32>
    %57 = arith.addf %53, %56 : vector<32x128xf32>
    %cst_44 = arith.constant 0.000000e+00 : f32
    %58 = vector.broadcast %cst_44 : f32 to vector<32x128xf32>
    %59 = arith.maximumf %57, %58 : vector<32x128xf32>
    %c3 = arith.constant 3 : index
    %c0_45 = arith.constant 0 : index
    %c0_46 = arith.constant 0 : index
    %60 = vector.load %arg7[%c3, %c0_45, %c0_46] : memref<16x32x32xbf16, #tpu.memory_space<vmem>>, vector<1x32x32xbf16>
    %61 = vector.shape_cast %60 : vector<1x32x32xbf16> to vector<32x32xbf16>
    %62 = arith.truncf %59 : vector<32x128xf32> to vector<32x128xbf16>
    %cst_47 = arith.constant dense<0.000000e+00> : vector<32x128xf32>
    %63 = tpu.matmul %61, %62, %cst_47 {dimension_numbers = #tpu.dot_dimension_numbers<[1], [0], [0], [1], [0, 0, 1, 1], [], []>} : vector<32x32xbf16>, vector<32x128xbf16>, vector<32x128xf32> -> vector<32x128xf32>
    %c3_48 = arith.constant 3 : index
    %c0_49 = arith.constant 0 : index
    %c0_50 = arith.constant 0 : index
    %64 = vector.load %arg8[%c3_48, %c0_49, %c0_50] : memref<16x32x1xf32, #tpu.memory_space<vmem>>, vector<1x32x1xf32>
    %65 = vector.shape_cast %64 : vector<1x32x1xf32> to vector<32x1xf32>
    %66 = vector.broadcast %65 : vector<32x1xf32> to vector<32x128xf32>
    %67 = arith.addf %63, %66 : vector<32x128xf32>
    %68 = arith.addf %39, %67 : vector<32x128xf32>
    %c0_51 = arith.constant 0 : index
    %c0_52 = arith.constant 0 : index
    %c0_53 = arith.constant 0 : index
    %69 = vector.load %arg9[%c0_51, %c0_52, %c0_53] : memref<4x32x32xbf16, #tpu.memory_space<vmem>>, vector<1x32x32xbf16>
    %70 = vector.shape_cast %69 : vector<1x32x32xbf16> to vector<32x32xbf16>
    %71 = arith.truncf %68 : vector<32x128xf32> to vector<32x128xbf16>
    %cst_54 = arith.constant dense<0.000000e+00> : vector<32x128xf32>
    %72 = tpu.matmul %70, %71, %cst_54 {dimension_numbers = #tpu.dot_dimension_numbers<[1], [0], [0], [1], [0, 0, 1, 1], [], []>} : vector<32x32xbf16>, vector<32x128xbf16>, vector<32x128xf32> -> vector<32x128xf32>
    %c0_55 = arith.constant 0 : index
    %c0_56 = arith.constant 0 : index
    %c0_57 = arith.constant 0 : index
    %73 = vector.load %arg10[%c0_55, %c0_56, %c0_57] : memref<4x32x1xf32, #tpu.memory_space<vmem>>, vector<1x32x1xf32>
    %74 = vector.shape_cast %73 : vector<1x32x1xf32> to vector<32x1xf32>
    %75 = vector.broadcast %74 : vector<32x1xf32> to vector<32x128xf32>
    %76 = arith.addf %72, %75 : vector<32x128xf32>
    %77 = vector.extract_strided_slice %76 {offsets = [0, 0], sizes = [16, 128], strides = [1, 1]} : vector<32x128xf32> to vector<16x128xf32>
    %78 = vector.extract_strided_slice %76 {offsets = [16, 0], sizes = [16, 128], strides = [1, 1]} : vector<32x128xf32> to vector<16x128xf32>
    %cst_58 = arith.constant 2.000000e+00 : f32
    %79 = vector.broadcast %cst_58 : f32 to vector<16x128xf32>
    %80 = arith.addf %78, %79 : vector<16x128xf32>
    %cst_59 = arith.constant 0.000000e+00 : f32
    %81 = vector.broadcast %cst_59 : f32 to vector<16x128xf32>
    %82 = arith.subf %81, %80 : vector<16x128xf32>
    %83 = math.exp %82 : vector<16x128xf32>
    %cst_60 = arith.constant 1.000000e+00 : f32
    %84 = vector.broadcast %cst_60 : f32 to vector<16x128xf32>
    %85 = arith.addf %84, %83 : vector<16x128xf32>
    %86 = tpu.reciprocal %85 {approx = true} : vector<16x128xf32> -> vector<16x128xf32>
    %cst_61 = arith.constant 1.000000e-03 : f32
    %87 = vector.broadcast %cst_61 : f32 to vector<16x128xf32>
    %88 = arith.addf %86, %87 : vector<16x128xf32>
    %cst_62 = arith.constant 5.000000e-01 : f32
    %89 = vector.broadcast %cst_62 : f32 to vector<16x1xf32>
    %90 = arith.cmpf ogt, %2, %89 : vector<16x1xf32>
    %cst_63 = arith.constant 1.000000e+00 : f32
    %91 = vector.shape_cast %90 : vector<16x1xi1> to vector<16x1xi1>
    %92 = vector.broadcast %91 : vector<16x1xi1> to vector<16x128xi1>
    %93 = vector.broadcast %cst_63 : f32 to vector<16x128xf32>
    %94 = arith.select %92, %88, %93 : vector<16x128xi1>, vector<16x128xf32>
    %c0_64 = arith.constant 0 : index
    %c0_65 = arith.constant 0 : index
    %c0_66 = arith.constant 0 : index
    %95 = vector.load %arg11[%c0_64, %c0_65, %c0_66] : memref<4x16x1xf32, #tpu.memory_space<vmem>>, vector<1x16x1xf32>
    %96 = vector.shape_cast %95 : vector<1x16x1xf32> to vector<16x1xf32>
    %97 = vector.broadcast %96 : vector<16x1xf32> to vector<16x128xf32>
    %98 = arith.mulf %94, %97 : vector<16x128xf32>
    %cst_67 = arith.constant 5.000000e-01 : f32
    %99 = vector.broadcast %cst_67 : f32 to vector<16x1xf32>
    %100 = arith.cmpf ogt, %2, %99 : vector<16x1xf32>
    %cst_68 = arith.constant 0.000000e+00 : f32
    %101 = vector.shape_cast %100 : vector<16x1xi1> to vector<16x1xi1>
    %102 = vector.broadcast %101 : vector<16x1xi1> to vector<16x128xi1>
    %103 = vector.broadcast %cst_68 : f32 to vector<16x128xf32>
    %104 = arith.select %102, %77, %103 : vector<16x128xi1>, vector<16x128xf32>
    %c0_69 = arith.constant 0 : index
    %c0_70 = arith.constant 0 : index
    %c0_71 = arith.constant 0 : index
    %105 = vector.load %arg11[%c0_69, %c0_70, %c0_71] : memref<4x16x1xf32, #tpu.memory_space<vmem>>, vector<1x16x1xf32>
    %106 = vector.shape_cast %105 : vector<1x16x1xf32> to vector<16x1xf32>
    %107 = vector.broadcast %106 : vector<16x1xf32> to vector<16x128xf32>
    %108 = arith.mulf %104, %107 : vector<16x128xf32>
    %c0_72 = arith.constant 0 : index
    %c0_73 = arith.constant 0 : index
    %c0_74 = arith.constant 0 : index
    %109 = vector.load %arg12[%c0_72, %c0_73, %c0_74] : memref<4x16x1xf32, #tpu.memory_space<vmem>>, vector<1x16x1xf32>
    %110 = vector.shape_cast %109 : vector<1x16x1xf32> to vector<16x1xf32>
    %111 = vector.broadcast %110 : vector<16x1xf32> to vector<16x128xf32>
    %112 = arith.addf %108, %111 : vector<16x128xf32>
    %113 = arith.mulf %0, %98 : vector<16x128xf32>
    %114 = arith.addf %113, %112 : vector<16x128xf32>
    %c1_75 = arith.constant 1 : index
    %c0_76 = arith.constant 0 : index
    %c0_77 = arith.constant 0 : index
    %115 = vector.load %arg2[%c1_75, %c0_76, %c0_77] : memref<4x16x1xf32, #tpu.memory_space<vmem>>, vector<1x16x1xf32>
    %116 = vector.shape_cast %115 : vector<1x16x1xf32> to vector<16x1xf32>
    %c1_78 = arith.constant 1 : index
    %c0_79 = arith.constant 0 : index
    %c0_80 = arith.constant 0 : index
    %117 = vector.load %arg3[%c1_78, %c0_79, %c0_80] : memref<4x32x16xbf16, #tpu.memory_space<vmem>>, vector<1x32x16xbf16>
    %118 = vector.shape_cast %117 : vector<1x32x16xbf16> to vector<32x16xbf16>
    %119 = arith.truncf %114 : vector<16x128xf32> to vector<16x128xbf16>
    %cst_81 = arith.constant dense<0.000000e+00> : vector<32x128xf32>
    %120 = tpu.matmul %118, %119, %cst_81 {dimension_numbers = #tpu.dot_dimension_numbers<[1], [0], [0], [1], [0, 0, 1, 1], [], []>} : vector<32x16xbf16>, vector<16x128xbf16>, vector<32x128xf32> -> vector<32x128xf32>
    %c1_82 = arith.constant 1 : index
    %c0_83 = arith.constant 0 : index
    %c0_84 = arith.constant 0 : index
    %121 = vector.load %arg4[%c1_82, %c0_83, %c0_84] : memref<4x32x1xf32, #tpu.memory_space<vmem>>, vector<1x32x1xf32>
    %122 = vector.shape_cast %121 : vector<1x32x1xf32> to vector<32x1xf32>
    %123 = vector.broadcast %122 : vector<32x1xf32> to vector<32x128xf32>
    %124 = arith.addf %120, %123 : vector<32x128xf32>
    %c2_85 = arith.constant 2 : index
    %c0_86 = arith.constant 0 : index
    %c0_87 = arith.constant 0 : index
    %125 = vector.load %arg5[%c2_85, %c0_86, %c0_87] : memref<8x32x1xf32, #tpu.memory_space<vmem>>, vector<1x32x1xf32>
    %126 = vector.shape_cast %125 : vector<1x32x1xf32> to vector<32x1xf32>
    %127 = vector.broadcast %126 : vector<32x1xf32> to vector<32x128xf32>
    %128 = arith.mulf %124, %127 : vector<32x128xf32>
    %c2_88 = arith.constant 2 : index
    %c0_89 = arith.constant 0 : index
    %c0_90 = arith.constant 0 : index
    %129 = vector.load %arg6[%c2_88, %c0_89, %c0_90] : memref<8x32x1xf32, #tpu.memory_space<vmem>>, vector<1x32x1xf32>
    %130 = vector.shape_cast %129 : vector<1x32x1xf32> to vector<32x1xf32>
    %131 = vector.broadcast %130 : vector<32x1xf32> to vector<32x128xf32>
    %132 = arith.addf %128, %131 : vector<32x128xf32>
    %cst_91 = arith.constant 0.000000e+00 : f32
    %133 = vector.broadcast %cst_91 : f32 to vector<32x128xf32>
    %134 = arith.maximumf %132, %133 : vector<32x128xf32>
    %c4 = arith.constant 4 : index
    %c0_92 = arith.constant 0 : index
    %c0_93 = arith.constant 0 : index
    %135 = vector.load %arg7[%c4, %c0_92, %c0_93] : memref<16x32x32xbf16, #tpu.memory_space<vmem>>, vector<1x32x32xbf16>
    %136 = vector.shape_cast %135 : vector<1x32x32xbf16> to vector<32x32xbf16>
    %137 = arith.truncf %134 : vector<32x128xf32> to vector<32x128xbf16>
    %cst_94 = arith.constant dense<0.000000e+00> : vector<32x128xf32>
    %138 = tpu.matmul %136, %137, %cst_94 {dimension_numbers = #tpu.dot_dimension_numbers<[1], [0], [0], [1], [0, 0, 1, 1], [], []>} : vector<32x32xbf16>, vector<32x128xbf16>, vector<32x128xf32> -> vector<32x128xf32>
    %c4_95 = arith.constant 4 : index
    %c0_96 = arith.constant 0 : index
    %c0_97 = arith.constant 0 : index
    %139 = vector.load %arg8[%c4_95, %c0_96, %c0_97] : memref<16x32x1xf32, #tpu.memory_space<vmem>>, vector<1x32x1xf32>
    %140 = vector.shape_cast %139 : vector<1x32x1xf32> to vector<32x1xf32>
    %141 = vector.broadcast %140 : vector<32x1xf32> to vector<32x128xf32>
    %142 = arith.addf %138, %141 : vector<32x128xf32>
    %cst_98 = arith.constant 0.000000e+00 : f32
    %143 = vector.broadcast %cst_98 : f32 to vector<32x128xf32>
    %144 = arith.maximumf %142, %143 : vector<32x128xf32>
    %c5 = arith.constant 5 : index
    %c0_99 = arith.constant 0 : index
    %c0_100 = arith.constant 0 : index
    %145 = vector.load %arg7[%c5, %c0_99, %c0_100] : memref<16x32x32xbf16, #tpu.memory_space<vmem>>, vector<1x32x32xbf16>
    %146 = vector.shape_cast %145 : vector<1x32x32xbf16> to vector<32x32xbf16>
    %147 = arith.truncf %144 : vector<32x128xf32> to vector<32x128xbf16>
    %cst_101 = arith.constant dense<0.000000e+00> : vector<32x128xf32>
    %148 = tpu.matmul %146, %147, %cst_101 {dimension_numbers = #tpu.dot_dimension_numbers<[1], [0], [0], [1], [0, 0, 1, 1], [], []>} : vector<32x32xbf16>, vector<32x128xbf16>, vector<32x128xf32> -> vector<32x128xf32>
    %c5_102 = arith.constant 5 : index
    %c0_103 = arith.constant 0 : index
    %c0_104 = arith.constant 0 : index
    %149 = vector.load %arg8[%c5_102, %c0_103, %c0_104] : memref<16x32x1xf32, #tpu.memory_space<vmem>>, vector<1x32x1xf32>
    %150 = vector.shape_cast %149 : vector<1x32x1xf32> to vector<32x1xf32>
    %151 = vector.broadcast %150 : vector<32x1xf32> to vector<32x128xf32>
    %152 = arith.addf %148, %151 : vector<32x128xf32>
    %153 = arith.addf %124, %152 : vector<32x128xf32>
    %c3_105 = arith.constant 3 : index
    %c0_106 = arith.constant 0 : index
    %c0_107 = arith.constant 0 : index
    %154 = vector.load %arg5[%c3_105, %c0_106, %c0_107] : memref<8x32x1xf32, #tpu.memory_space<vmem>>, vector<1x32x1xf32>
    %155 = vector.shape_cast %154 : vector<1x32x1xf32> to vector<32x1xf32>
    %156 = vector.broadcast %155 : vector<32x1xf32> to vector<32x128xf32>
    %157 = arith.mulf %153, %156 : vector<32x128xf32>
    %c3_108 = arith.constant 3 : index
    %c0_109 = arith.constant 0 : index
    %c0_110 = arith.constant 0 : index
    %158 = vector.load %arg6[%c3_108, %c0_109, %c0_110] : memref<8x32x1xf32, #tpu.memory_space<vmem>>, vector<1x32x1xf32>
    %159 = vector.shape_cast %158 : vector<1x32x1xf32> to vector<32x1xf32>
    %160 = vector.broadcast %159 : vector<32x1xf32> to vector<32x128xf32>
    %161 = arith.addf %157, %160 : vector<32x128xf32>
    %cst_111 = arith.constant 0.000000e+00 : f32
    %162 = vector.broadcast %cst_111 : f32 to vector<32x128xf32>
    %163 = arith.maximumf %161, %162 : vector<32x128xf32>
    %c6 = arith.constant 6 : index
    %c0_112 = arith.constant 0 : index
    %c0_113 = arith.constant 0 : index
    %164 = vector.load %arg7[%c6, %c0_112, %c0_113] : memref<16x32x32xbf16, #tpu.memory_space<vmem>>, vector<1x32x32xbf16>
    %165 = vector.shape_cast %164 : vector<1x32x32xbf16> to vector<32x32xbf16>
    %166 = arith.truncf %163 : vector<32x128xf32> to vector<32x128xbf16>
    %cst_114 = arith.constant dense<0.000000e+00> : vector<32x128xf32>
    %167 = tpu.matmul %165, %166, %cst_114 {dimension_numbers = #tpu.dot_dimension_numbers<[1], [0], [0], [1], [0, 0, 1, 1], [], []>} : vector<32x32xbf16>, vector<32x128xbf16>, vector<32x128xf32> -> vector<32x128xf32>
    %c6_115 = arith.constant 6 : index
    %c0_116 = arith.constant 0 : index
    %c0_117 = arith.constant 0 : index
    %168 = vector.load %arg8[%c6_115, %c0_116, %c0_117] : memref<16x32x1xf32, #tpu.memory_space<vmem>>, vector<1x32x1xf32>
    %169 = vector.shape_cast %168 : vector<1x32x1xf32> to vector<32x1xf32>
    %170 = vector.broadcast %169 : vector<32x1xf32> to vector<32x128xf32>
    %171 = arith.addf %167, %170 : vector<32x128xf32>
    %cst_118 = arith.constant 0.000000e+00 : f32
    %172 = vector.broadcast %cst_118 : f32 to vector<32x128xf32>
    %173 = arith.maximumf %171, %172 : vector<32x128xf32>
    %c7 = arith.constant 7 : index
    %c0_119 = arith.constant 0 : index
    %c0_120 = arith.constant 0 : index
    %174 = vector.load %arg7[%c7, %c0_119, %c0_120] : memref<16x32x32xbf16, #tpu.memory_space<vmem>>, vector<1x32x32xbf16>
    %175 = vector.shape_cast %174 : vector<1x32x32xbf16> to vector<32x32xbf16>
    %176 = arith.truncf %173 : vector<32x128xf32> to vector<32x128xbf16>
    %cst_121 = arith.constant dense<0.000000e+00> : vector<32x128xf32>
    %177 = tpu.matmul %175, %176, %cst_121 {dimension_numbers = #tpu.dot_dimension_numbers<[1], [0], [0], [1], [0, 0, 1, 1], [], []>} : vector<32x32xbf16>, vector<32x128xbf16>, vector<32x128xf32> -> vector<32x128xf32>
    %c7_122 = arith.constant 7 : index
    %c0_123 = arith.constant 0 : index
    %c0_124 = arith.constant 0 : index
    %178 = vector.load %arg8[%c7_122, %c0_123, %c0_124] : memref<16x32x1xf32, #tpu.memory_space<vmem>>, vector<1x32x1xf32>
    %179 = vector.shape_cast %178 : vector<1x32x1xf32> to vector<32x1xf32>
    %180 = vector.broadcast %179 : vector<32x1xf32> to vector<32x128xf32>
    %181 = arith.addf %177, %180 : vector<32x128xf32>
    %182 = arith.addf %153, %181 : vector<32x128xf32>
    %c1_125 = arith.constant 1 : index
    %c0_126 = arith.constant 0 : index
    %c0_127 = arith.constant 0 : index
    %183 = vector.load %arg9[%c1_125, %c0_126, %c0_127] : memref<4x32x32xbf16, #tpu.memory_space<vmem>>, vector<1x32x32xbf16>
    %184 = vector.shape_cast %183 : vector<1x32x32xbf16> to vector<32x32xbf16>
    %185 = arith.truncf %182 : vector<32x128xf32> to vector<32x128xbf16>
    %cst_128 = arith.constant dense<0.000000e+00> : vector<32x128xf32>
    %186 = tpu.matmul %184, %185, %cst_128 {dimension_numbers = #tpu.dot_dimension_numbers<[1], [0], [0], [1], [0, 0, 1, 1], [], []>} : vector<32x32xbf16>, vector<32x128xbf16>, vector<32x128xf32> -> vector<32x128xf32>
    %c1_129 = arith.constant 1 : index
    %c0_130 = arith.constant 0 : index
    %c0_131 = arith.constant 0 : index
    %187 = vector.load %arg10[%c1_129, %c0_130, %c0_131] : memref<4x32x1xf32, #tpu.memory_space<vmem>>, vector<1x32x1xf32>
    %188 = vector.shape_cast %187 : vector<1x32x1xf32> to vector<32x1xf32>
    %189 = vector.broadcast %188 : vector<32x1xf32> to vector<32x128xf32>
    %190 = arith.addf %186, %189 : vector<32x128xf32>
    %191 = vector.extract_strided_slice %190 {offsets = [0, 0], sizes = [16, 128], strides = [1, 1]} : vector<32x128xf32> to vector<16x128xf32>
    %192 = vector.extract_strided_slice %190 {offsets = [16, 0], sizes = [16, 128], strides = [1, 1]} : vector<32x128xf32> to vector<16x128xf32>
    %cst_132 = arith.constant 2.000000e+00 : f32
    %193 = vector.broadcast %cst_132 : f32 to vector<16x128xf32>
    %194 = arith.addf %192, %193 : vector<16x128xf32>
    %cst_133 = arith.constant 0.000000e+00 : f32
    %195 = vector.broadcast %cst_133 : f32 to vector<16x128xf32>
    %196 = arith.subf %195, %194 : vector<16x128xf32>
    %197 = math.exp %196 : vector<16x128xf32>
    %cst_134 = arith.constant 1.000000e+00 : f32
    %198 = vector.broadcast %cst_134 : f32 to vector<16x128xf32>
    %199 = arith.addf %198, %197 : vector<16x128xf32>
    %200 = tpu.reciprocal %199 {approx = true} : vector<16x128xf32> -> vector<16x128xf32>
    %cst_135 = arith.constant 1.000000e-03 : f32
    %201 = vector.broadcast %cst_135 : f32 to vector<16x128xf32>
    %202 = arith.addf %200, %201 : vector<16x128xf32>
    %cst_136 = arith.constant 5.000000e-01 : f32
    %203 = vector.broadcast %cst_136 : f32 to vector<16x1xf32>
    %204 = arith.cmpf ogt, %116, %203 : vector<16x1xf32>
    %cst_137 = arith.constant 1.000000e+00 : f32
    %205 = vector.shape_cast %204 : vector<16x1xi1> to vector<16x1xi1>
    %206 = vector.broadcast %205 : vector<16x1xi1> to vector<16x128xi1>
    %207 = vector.broadcast %cst_137 : f32 to vector<16x128xf32>
    %208 = arith.select %206, %202, %207 : vector<16x128xi1>, vector<16x128xf32>
    %c1_138 = arith.constant 1 : index
    %c0_139 = arith.constant 0 : index
    %c0_140 = arith.constant 0 : index
    %209 = vector.load %arg11[%c1_138, %c0_139, %c0_140] : memref<4x16x1xf32, #tpu.memory_space<vmem>>, vector<1x16x1xf32>
    %210 = vector.shape_cast %209 : vector<1x16x1xf32> to vector<16x1xf32>
    %211 = vector.broadcast %210 : vector<16x1xf32> to vector<16x128xf32>
    %212 = arith.mulf %208, %211 : vector<16x128xf32>
    %cst_141 = arith.constant 5.000000e-01 : f32
    %213 = vector.broadcast %cst_141 : f32 to vector<16x1xf32>
    %214 = arith.cmpf ogt, %116, %213 : vector<16x1xf32>
    %cst_142 = arith.constant 0.000000e+00 : f32
    %215 = vector.shape_cast %214 : vector<16x1xi1> to vector<16x1xi1>
    %216 = vector.broadcast %215 : vector<16x1xi1> to vector<16x128xi1>
    %217 = vector.broadcast %cst_142 : f32 to vector<16x128xf32>
    %218 = arith.select %216, %191, %217 : vector<16x128xi1>, vector<16x128xf32>
    %c1_143 = arith.constant 1 : index
    %c0_144 = arith.constant 0 : index
    %c0_145 = arith.constant 0 : index
    %219 = vector.load %arg11[%c1_143, %c0_144, %c0_145] : memref<4x16x1xf32, #tpu.memory_space<vmem>>, vector<1x16x1xf32>
    %220 = vector.shape_cast %219 : vector<1x16x1xf32> to vector<16x1xf32>
    %221 = vector.broadcast %220 : vector<16x1xf32> to vector<16x128xf32>
    %222 = arith.mulf %218, %221 : vector<16x128xf32>
    %c1_146 = arith.constant 1 : index
    %c0_147 = arith.constant 0 : index
    %c0_148 = arith.constant 0 : index
    %223 = vector.load %arg12[%c1_146, %c0_147, %c0_148] : memref<4x16x1xf32, #tpu.memory_space<vmem>>, vector<1x16x1xf32>
    %224 = vector.shape_cast %223 : vector<1x16x1xf32> to vector<16x1xf32>
    %225 = vector.broadcast %224 : vector<16x1xf32> to vector<16x128xf32>
    %226 = arith.addf %222, %225 : vector<16x128xf32>
    %227 = arith.mulf %114, %212 : vector<16x128xf32>
    %228 = arith.addf %227, %226 : vector<16x128xf32>
    %c2_149 = arith.constant 2 : index
    %c0_150 = arith.constant 0 : index
    %c0_151 = arith.constant 0 : index
    %229 = vector.load %arg2[%c2_149, %c0_150, %c0_151] : memref<4x16x1xf32, #tpu.memory_space<vmem>>, vector<1x16x1xf32>
    %230 = vector.shape_cast %229 : vector<1x16x1xf32> to vector<16x1xf32>
    %c2_152 = arith.constant 2 : index
    %c0_153 = arith.constant 0 : index
    %c0_154 = arith.constant 0 : index
    %231 = vector.load %arg3[%c2_152, %c0_153, %c0_154] : memref<4x32x16xbf16, #tpu.memory_space<vmem>>, vector<1x32x16xbf16>
    %232 = vector.shape_cast %231 : vector<1x32x16xbf16> to vector<32x16xbf16>
    %233 = arith.truncf %228 : vector<16x128xf32> to vector<16x128xbf16>
    %cst_155 = arith.constant dense<0.000000e+00> : vector<32x128xf32>
    %234 = tpu.matmul %232, %233, %cst_155 {dimension_numbers = #tpu.dot_dimension_numbers<[1], [0], [0], [1], [0, 0, 1, 1], [], []>} : vector<32x16xbf16>, vector<16x128xbf16>, vector<32x128xf32> -> vector<32x128xf32>
    %c2_156 = arith.constant 2 : index
    %c0_157 = arith.constant 0 : index
    %c0_158 = arith.constant 0 : index
    %235 = vector.load %arg4[%c2_156, %c0_157, %c0_158] : memref<4x32x1xf32, #tpu.memory_space<vmem>>, vector<1x32x1xf32>
    %236 = vector.shape_cast %235 : vector<1x32x1xf32> to vector<32x1xf32>
    %237 = vector.broadcast %236 : vector<32x1xf32> to vector<32x128xf32>
    %238 = arith.addf %234, %237 : vector<32x128xf32>
    %c4_159 = arith.constant 4 : index
    %c0_160 = arith.constant 0 : index
    %c0_161 = arith.constant 0 : index
    %239 = vector.load %arg5[%c4_159, %c0_160, %c0_161] : memref<8x32x1xf32, #tpu.memory_space<vmem>>, vector<1x32x1xf32>
    %240 = vector.shape_cast %239 : vector<1x32x1xf32> to vector<32x1xf32>
    %241 = vector.broadcast %240 : vector<32x1xf32> to vector<32x128xf32>
    %242 = arith.mulf %238, %241 : vector<32x128xf32>
    %c4_162 = arith.constant 4 : index
    %c0_163 = arith.constant 0 : index
    %c0_164 = arith.constant 0 : index
    %243 = vector.load %arg6[%c4_162, %c0_163, %c0_164] : memref<8x32x1xf32, #tpu.memory_space<vmem>>, vector<1x32x1xf32>
    %244 = vector.shape_cast %243 : vector<1x32x1xf32> to vector<32x1xf32>
    %245 = vector.broadcast %244 : vector<32x1xf32> to vector<32x128xf32>
    %246 = arith.addf %242, %245 : vector<32x128xf32>
    %cst_165 = arith.constant 0.000000e+00 : f32
    %247 = vector.broadcast %cst_165 : f32 to vector<32x128xf32>
    %248 = arith.maximumf %246, %247 : vector<32x128xf32>
    %c8 = arith.constant 8 : index
    %c0_166 = arith.constant 0 : index
    %c0_167 = arith.constant 0 : index
    %249 = vector.load %arg7[%c8, %c0_166, %c0_167] : memref<16x32x32xbf16, #tpu.memory_space<vmem>>, vector<1x32x32xbf16>
    %250 = vector.shape_cast %249 : vector<1x32x32xbf16> to vector<32x32xbf16>
    %251 = arith.truncf %248 : vector<32x128xf32> to vector<32x128xbf16>
    %cst_168 = arith.constant dense<0.000000e+00> : vector<32x128xf32>
    %252 = tpu.matmul %250, %251, %cst_168 {dimension_numbers = #tpu.dot_dimension_numbers<[1], [0], [0], [1], [0, 0, 1, 1], [], []>} : vector<32x32xbf16>, vector<32x128xbf16>, vector<32x128xf32> -> vector<32x128xf32>
    %c8_169 = arith.constant 8 : index
    %c0_170 = arith.constant 0 : index
    %c0_171 = arith.constant 0 : index
    %253 = vector.load %arg8[%c8_169, %c0_170, %c0_171] : memref<16x32x1xf32, #tpu.memory_space<vmem>>, vector<1x32x1xf32>
    %254 = vector.shape_cast %253 : vector<1x32x1xf32> to vector<32x1xf32>
    %255 = vector.broadcast %254 : vector<32x1xf32> to vector<32x128xf32>
    %256 = arith.addf %252, %255 : vector<32x128xf32>
    %cst_172 = arith.constant 0.000000e+00 : f32
    %257 = vector.broadcast %cst_172 : f32 to vector<32x128xf32>
    %258 = arith.maximumf %256, %257 : vector<32x128xf32>
    %c9 = arith.constant 9 : index
    %c0_173 = arith.constant 0 : index
    %c0_174 = arith.constant 0 : index
    %259 = vector.load %arg7[%c9, %c0_173, %c0_174] : memref<16x32x32xbf16, #tpu.memory_space<vmem>>, vector<1x32x32xbf16>
    %260 = vector.shape_cast %259 : vector<1x32x32xbf16> to vector<32x32xbf16>
    %261 = arith.truncf %258 : vector<32x128xf32> to vector<32x128xbf16>
    %cst_175 = arith.constant dense<0.000000e+00> : vector<32x128xf32>
    %262 = tpu.matmul %260, %261, %cst_175 {dimension_numbers = #tpu.dot_dimension_numbers<[1], [0], [0], [1], [0, 0, 1, 1], [], []>} : vector<32x32xbf16>, vector<32x128xbf16>, vector<32x128xf32> -> vector<32x128xf32>
    %c9_176 = arith.constant 9 : index
    %c0_177 = arith.constant 0 : index
    %c0_178 = arith.constant 0 : index
    %263 = vector.load %arg8[%c9_176, %c0_177, %c0_178] : memref<16x32x1xf32, #tpu.memory_space<vmem>>, vector<1x32x1xf32>
    %264 = vector.shape_cast %263 : vector<1x32x1xf32> to vector<32x1xf32>
    %265 = vector.broadcast %264 : vector<32x1xf32> to vector<32x128xf32>
    %266 = arith.addf %262, %265 : vector<32x128xf32>
    %267 = arith.addf %238, %266 : vector<32x128xf32>
    %c5_179 = arith.constant 5 : index
    %c0_180 = arith.constant 0 : index
    %c0_181 = arith.constant 0 : index
    %268 = vector.load %arg5[%c5_179, %c0_180, %c0_181] : memref<8x32x1xf32, #tpu.memory_space<vmem>>, vector<1x32x1xf32>
    %269 = vector.shape_cast %268 : vector<1x32x1xf32> to vector<32x1xf32>
    %270 = vector.broadcast %269 : vector<32x1xf32> to vector<32x128xf32>
    %271 = arith.mulf %267, %270 : vector<32x128xf32>
    %c5_182 = arith.constant 5 : index
    %c0_183 = arith.constant 0 : index
    %c0_184 = arith.constant 0 : index
    %272 = vector.load %arg6[%c5_182, %c0_183, %c0_184] : memref<8x32x1xf32, #tpu.memory_space<vmem>>, vector<1x32x1xf32>
    %273 = vector.shape_cast %272 : vector<1x32x1xf32> to vector<32x1xf32>
    %274 = vector.broadcast %273 : vector<32x1xf32> to vector<32x128xf32>
    %275 = arith.addf %271, %274 : vector<32x128xf32>
    %cst_185 = arith.constant 0.000000e+00 : f32
    %276 = vector.broadcast %cst_185 : f32 to vector<32x128xf32>
    %277 = arith.maximumf %275, %276 : vector<32x128xf32>
    %c10 = arith.constant 10 : index
    %c0_186 = arith.constant 0 : index
    %c0_187 = arith.constant 0 : index
    %278 = vector.load %arg7[%c10, %c0_186, %c0_187] : memref<16x32x32xbf16, #tpu.memory_space<vmem>>, vector<1x32x32xbf16>
    %279 = vector.shape_cast %278 : vector<1x32x32xbf16> to vector<32x32xbf16>
    %280 = arith.truncf %277 : vector<32x128xf32> to vector<32x128xbf16>
    %cst_188 = arith.constant dense<0.000000e+00> : vector<32x128xf32>
    %281 = tpu.matmul %279, %280, %cst_188 {dimension_numbers = #tpu.dot_dimension_numbers<[1], [0], [0], [1], [0, 0, 1, 1], [], []>} : vector<32x32xbf16>, vector<32x128xbf16>, vector<32x128xf32> -> vector<32x128xf32>
    %c10_189 = arith.constant 10 : index
    %c0_190 = arith.constant 0 : index
    %c0_191 = arith.constant 0 : index
    %282 = vector.load %arg8[%c10_189, %c0_190, %c0_191] : memref<16x32x1xf32, #tpu.memory_space<vmem>>, vector<1x32x1xf32>
    %283 = vector.shape_cast %282 : vector<1x32x1xf32> to vector<32x1xf32>
    %284 = vector.broadcast %283 : vector<32x1xf32> to vector<32x128xf32>
    %285 = arith.addf %281, %284 : vector<32x128xf32>
    %cst_192 = arith.constant 0.000000e+00 : f32
    %286 = vector.broadcast %cst_192 : f32 to vector<32x128xf32>
    %287 = arith.maximumf %285, %286 : vector<32x128xf32>
    %c11 = arith.constant 11 : index
    %c0_193 = arith.constant 0 : index
    %c0_194 = arith.constant 0 : index
    %288 = vector.load %arg7[%c11, %c0_193, %c0_194] : memref<16x32x32xbf16, #tpu.memory_space<vmem>>, vector<1x32x32xbf16>
    %289 = vector.shape_cast %288 : vector<1x32x32xbf16> to vector<32x32xbf16>
    %290 = arith.truncf %287 : vector<32x128xf32> to vector<32x128xbf16>
    %cst_195 = arith.constant dense<0.000000e+00> : vector<32x128xf32>
    %291 = tpu.matmul %289, %290, %cst_195 {dimension_numbers = #tpu.dot_dimension_numbers<[1], [0], [0], [1], [0, 0, 1, 1], [], []>} : vector<32x32xbf16>, vector<32x128xbf16>, vector<32x128xf32> -> vector<32x128xf32>
    %c11_196 = arith.constant 11 : index
    %c0_197 = arith.constant 0 : index
    %c0_198 = arith.constant 0 : index
    %292 = vector.load %arg8[%c11_196, %c0_197, %c0_198] : memref<16x32x1xf32, #tpu.memory_space<vmem>>, vector<1x32x1xf32>
    %293 = vector.shape_cast %292 : vector<1x32x1xf32> to vector<32x1xf32>
    %294 = vector.broadcast %293 : vector<32x1xf32> to vector<32x128xf32>
    %295 = arith.addf %291, %294 : vector<32x128xf32>
    %296 = arith.addf %267, %295 : vector<32x128xf32>
    %c2_199 = arith.constant 2 : index
    %c0_200 = arith.constant 0 : index
    %c0_201 = arith.constant 0 : index
    %297 = vector.load %arg9[%c2_199, %c0_200, %c0_201] : memref<4x32x32xbf16, #tpu.memory_space<vmem>>, vector<1x32x32xbf16>
    %298 = vector.shape_cast %297 : vector<1x32x32xbf16> to vector<32x32xbf16>
    %299 = arith.truncf %296 : vector<32x128xf32> to vector<32x128xbf16>
    %cst_202 = arith.constant dense<0.000000e+00> : vector<32x128xf32>
    %300 = tpu.matmul %298, %299, %cst_202 {dimension_numbers = #tpu.dot_dimension_numbers<[1], [0], [0], [1], [0, 0, 1, 1], [], []>} : vector<32x32xbf16>, vector<32x128xbf16>, vector<32x128xf32> -> vector<32x128xf32>
    %c2_203 = arith.constant 2 : index
    %c0_204 = arith.constant 0 : index
    %c0_205 = arith.constant 0 : index
    %301 = vector.load %arg10[%c2_203, %c0_204, %c0_205] : memref<4x32x1xf32, #tpu.memory_space<vmem>>, vector<1x32x1xf32>
    %302 = vector.shape_cast %301 : vector<1x32x1xf32> to vector<32x1xf32>
    %303 = vector.broadcast %302 : vector<32x1xf32> to vector<32x128xf32>
    %304 = arith.addf %300, %303 : vector<32x128xf32>
    %305 = vector.extract_strided_slice %304 {offsets = [0, 0], sizes = [16, 128], strides = [1, 1]} : vector<32x128xf32> to vector<16x128xf32>
    %306 = vector.extract_strided_slice %304 {offsets = [16, 0], sizes = [16, 128], strides = [1, 1]} : vector<32x128xf32> to vector<16x128xf32>
    %cst_206 = arith.constant 2.000000e+00 : f32
    %307 = vector.broadcast %cst_206 : f32 to vector<16x128xf32>
    %308 = arith.addf %306, %307 : vector<16x128xf32>
    %cst_207 = arith.constant 0.000000e+00 : f32
    %309 = vector.broadcast %cst_207 : f32 to vector<16x128xf32>
    %310 = arith.subf %309, %308 : vector<16x128xf32>
    %311 = math.exp %310 : vector<16x128xf32>
    %cst_208 = arith.constant 1.000000e+00 : f32
    %312 = vector.broadcast %cst_208 : f32 to vector<16x128xf32>
    %313 = arith.addf %312, %311 : vector<16x128xf32>
    %314 = tpu.reciprocal %313 {approx = true} : vector<16x128xf32> -> vector<16x128xf32>
    %cst_209 = arith.constant 1.000000e-03 : f32
    %315 = vector.broadcast %cst_209 : f32 to vector<16x128xf32>
    %316 = arith.addf %314, %315 : vector<16x128xf32>
    %cst_210 = arith.constant 5.000000e-01 : f32
    %317 = vector.broadcast %cst_210 : f32 to vector<16x1xf32>
    %318 = arith.cmpf ogt, %230, %317 : vector<16x1xf32>
    %cst_211 = arith.constant 1.000000e+00 : f32
    %319 = vector.shape_cast %318 : vector<16x1xi1> to vector<16x1xi1>
    %320 = vector.broadcast %319 : vector<16x1xi1> to vector<16x128xi1>
    %321 = vector.broadcast %cst_211 : f32 to vector<16x128xf32>
    %322 = arith.select %320, %316, %321 : vector<16x128xi1>, vector<16x128xf32>
    %c2_212 = arith.constant 2 : index
    %c0_213 = arith.constant 0 : index
    %c0_214 = arith.constant 0 : index
    %323 = vector.load %arg11[%c2_212, %c0_213, %c0_214] : memref<4x16x1xf32, #tpu.memory_space<vmem>>, vector<1x16x1xf32>
    %324 = vector.shape_cast %323 : vector<1x16x1xf32> to vector<16x1xf32>
    %325 = vector.broadcast %324 : vector<16x1xf32> to vector<16x128xf32>
    %326 = arith.mulf %322, %325 : vector<16x128xf32>
    %cst_215 = arith.constant 5.000000e-01 : f32
    %327 = vector.broadcast %cst_215 : f32 to vector<16x1xf32>
    %328 = arith.cmpf ogt, %230, %327 : vector<16x1xf32>
    %cst_216 = arith.constant 0.000000e+00 : f32
    %329 = vector.shape_cast %328 : vector<16x1xi1> to vector<16x1xi1>
    %330 = vector.broadcast %329 : vector<16x1xi1> to vector<16x128xi1>
    %331 = vector.broadcast %cst_216 : f32 to vector<16x128xf32>
    %332 = arith.select %330, %305, %331 : vector<16x128xi1>, vector<16x128xf32>
    %c2_217 = arith.constant 2 : index
    %c0_218 = arith.constant 0 : index
    %c0_219 = arith.constant 0 : index
    %333 = vector.load %arg11[%c2_217, %c0_218, %c0_219] : memref<4x16x1xf32, #tpu.memory_space<vmem>>, vector<1x16x1xf32>
    %334 = vector.shape_cast %333 : vector<1x16x1xf32> to vector<16x1xf32>
    %335 = vector.broadcast %334 : vector<16x1xf32> to vector<16x128xf32>
    %336 = arith.mulf %332, %335 : vector<16x128xf32>
    %c2_220 = arith.constant 2 : index
    %c0_221 = arith.constant 0 : index
    %c0_222 = arith.constant 0 : index
    %337 = vector.load %arg12[%c2_220, %c0_221, %c0_222] : memref<4x16x1xf32, #tpu.memory_space<vmem>>, vector<1x16x1xf32>
    %338 = vector.shape_cast %337 : vector<1x16x1xf32> to vector<16x1xf32>
    %339 = vector.broadcast %338 : vector<16x1xf32> to vector<16x128xf32>
    %340 = arith.addf %336, %339 : vector<16x128xf32>
    %341 = arith.mulf %228, %326 : vector<16x128xf32>
    %342 = arith.addf %341, %340 : vector<16x128xf32>
    %c3_223 = arith.constant 3 : index
    %c0_224 = arith.constant 0 : index
    %c0_225 = arith.constant 0 : index
    %343 = vector.load %arg2[%c3_223, %c0_224, %c0_225] : memref<4x16x1xf32, #tpu.memory_space<vmem>>, vector<1x16x1xf32>
    %344 = vector.shape_cast %343 : vector<1x16x1xf32> to vector<16x1xf32>
    %c3_226 = arith.constant 3 : index
    %c0_227 = arith.constant 0 : index
    %c0_228 = arith.constant 0 : index
    %345 = vector.load %arg3[%c3_226, %c0_227, %c0_228] : memref<4x32x16xbf16, #tpu.memory_space<vmem>>, vector<1x32x16xbf16>
    %346 = vector.shape_cast %345 : vector<1x32x16xbf16> to vector<32x16xbf16>
    %347 = arith.truncf %342 : vector<16x128xf32> to vector<16x128xbf16>
    %cst_229 = arith.constant dense<0.000000e+00> : vector<32x128xf32>
    %348 = tpu.matmul %346, %347, %cst_229 {dimension_numbers = #tpu.dot_dimension_numbers<[1], [0], [0], [1], [0, 0, 1, 1], [], []>} : vector<32x16xbf16>, vector<16x128xbf16>, vector<32x128xf32> -> vector<32x128xf32>
    %c3_230 = arith.constant 3 : index
    %c0_231 = arith.constant 0 : index
    %c0_232 = arith.constant 0 : index
    %349 = vector.load %arg4[%c3_230, %c0_231, %c0_232] : memref<4x32x1xf32, #tpu.memory_space<vmem>>, vector<1x32x1xf32>
    %350 = vector.shape_cast %349 : vector<1x32x1xf32> to vector<32x1xf32>
    %351 = vector.broadcast %350 : vector<32x1xf32> to vector<32x128xf32>
    %352 = arith.addf %348, %351 : vector<32x128xf32>
    %c6_233 = arith.constant 6 : index
    %c0_234 = arith.constant 0 : index
    %c0_235 = arith.constant 0 : index
    %353 = vector.load %arg5[%c6_233, %c0_234, %c0_235] : memref<8x32x1xf32, #tpu.memory_space<vmem>>, vector<1x32x1xf32>
    %354 = vector.shape_cast %353 : vector<1x32x1xf32> to vector<32x1xf32>
    %355 = vector.broadcast %354 : vector<32x1xf32> to vector<32x128xf32>
    %356 = arith.mulf %352, %355 : vector<32x128xf32>
    %c6_236 = arith.constant 6 : index
    %c0_237 = arith.constant 0 : index
    %c0_238 = arith.constant 0 : index
    %357 = vector.load %arg6[%c6_236, %c0_237, %c0_238] : memref<8x32x1xf32, #tpu.memory_space<vmem>>, vector<1x32x1xf32>
    %358 = vector.shape_cast %357 : vector<1x32x1xf32> to vector<32x1xf32>
    %359 = vector.broadcast %358 : vector<32x1xf32> to vector<32x128xf32>
    %360 = arith.addf %356, %359 : vector<32x128xf32>
    %cst_239 = arith.constant 0.000000e+00 : f32
    %361 = vector.broadcast %cst_239 : f32 to vector<32x128xf32>
    %362 = arith.maximumf %360, %361 : vector<32x128xf32>
    %c12 = arith.constant 12 : index
    %c0_240 = arith.constant 0 : index
    %c0_241 = arith.constant 0 : index
    %363 = vector.load %arg7[%c12, %c0_240, %c0_241] : memref<16x32x32xbf16, #tpu.memory_space<vmem>>, vector<1x32x32xbf16>
    %364 = vector.shape_cast %363 : vector<1x32x32xbf16> to vector<32x32xbf16>
    %365 = arith.truncf %362 : vector<32x128xf32> to vector<32x128xbf16>
    %cst_242 = arith.constant dense<0.000000e+00> : vector<32x128xf32>
    %366 = tpu.matmul %364, %365, %cst_242 {dimension_numbers = #tpu.dot_dimension_numbers<[1], [0], [0], [1], [0, 0, 1, 1], [], []>} : vector<32x32xbf16>, vector<32x128xbf16>, vector<32x128xf32> -> vector<32x128xf32>
    %c12_243 = arith.constant 12 : index
    %c0_244 = arith.constant 0 : index
    %c0_245 = arith.constant 0 : index
    %367 = vector.load %arg8[%c12_243, %c0_244, %c0_245] : memref<16x32x1xf32, #tpu.memory_space<vmem>>, vector<1x32x1xf32>
    %368 = vector.shape_cast %367 : vector<1x32x1xf32> to vector<32x1xf32>
    %369 = vector.broadcast %368 : vector<32x1xf32> to vector<32x128xf32>
    %370 = arith.addf %366, %369 : vector<32x128xf32>
    %cst_246 = arith.constant 0.000000e+00 : f32
    %371 = vector.broadcast %cst_246 : f32 to vector<32x128xf32>
    %372 = arith.maximumf %370, %371 : vector<32x128xf32>
    %c13 = arith.constant 13 : index
    %c0_247 = arith.constant 0 : index
    %c0_248 = arith.constant 0 : index
    %373 = vector.load %arg7[%c13, %c0_247, %c0_248] : memref<16x32x32xbf16, #tpu.memory_space<vmem>>, vector<1x32x32xbf16>
    %374 = vector.shape_cast %373 : vector<1x32x32xbf16> to vector<32x32xbf16>
    %375 = arith.truncf %372 : vector<32x128xf32> to vector<32x128xbf16>
    %cst_249 = arith.constant dense<0.000000e+00> : vector<32x128xf32>
    %376 = tpu.matmul %374, %375, %cst_249 {dimension_numbers = #tpu.dot_dimension_numbers<[1], [0], [0], [1], [0, 0, 1, 1], [], []>} : vector<32x32xbf16>, vector<32x128xbf16>, vector<32x128xf32> -> vector<32x128xf32>
    %c13_250 = arith.constant 13 : index
    %c0_251 = arith.constant 0 : index
    %c0_252 = arith.constant 0 : index
    %377 = vector.load %arg8[%c13_250, %c0_251, %c0_252] : memref<16x32x1xf32, #tpu.memory_space<vmem>>, vector<1x32x1xf32>
    %378 = vector.shape_cast %377 : vector<1x32x1xf32> to vector<32x1xf32>
    %379 = vector.broadcast %378 : vector<32x1xf32> to vector<32x128xf32>
    %380 = arith.addf %376, %379 : vector<32x128xf32>
    %381 = arith.addf %352, %380 : vector<32x128xf32>
    %c7_253 = arith.constant 7 : index
    %c0_254 = arith.constant 0 : index
    %c0_255 = arith.constant 0 : index
    %382 = vector.load %arg5[%c7_253, %c0_254, %c0_255] : memref<8x32x1xf32, #tpu.memory_space<vmem>>, vector<1x32x1xf32>
    %383 = vector.shape_cast %382 : vector<1x32x1xf32> to vector<32x1xf32>
    %384 = vector.broadcast %383 : vector<32x1xf32> to vector<32x128xf32>
    %385 = arith.mulf %381, %384 : vector<32x128xf32>
    %c7_256 = arith.constant 7 : index
    %c0_257 = arith.constant 0 : index
    %c0_258 = arith.constant 0 : index
    %386 = vector.load %arg6[%c7_256, %c0_257, %c0_258] : memref<8x32x1xf32, #tpu.memory_space<vmem>>, vector<1x32x1xf32>
    %387 = vector.shape_cast %386 : vector<1x32x1xf32> to vector<32x1xf32>
    %388 = vector.broadcast %387 : vector<32x1xf32> to vector<32x128xf32>
    %389 = arith.addf %385, %388 : vector<32x128xf32>
    %cst_259 = arith.constant 0.000000e+00 : f32
    %390 = vector.broadcast %cst_259 : f32 to vector<32x128xf32>
    %391 = arith.maximumf %389, %390 : vector<32x128xf32>
    %c14 = arith.constant 14 : index
    %c0_260 = arith.constant 0 : index
    %c0_261 = arith.constant 0 : index
    %392 = vector.load %arg7[%c14, %c0_260, %c0_261] : memref<16x32x32xbf16, #tpu.memory_space<vmem>>, vector<1x32x32xbf16>
    %393 = vector.shape_cast %392 : vector<1x32x32xbf16> to vector<32x32xbf16>
    %394 = arith.truncf %391 : vector<32x128xf32> to vector<32x128xbf16>
    %cst_262 = arith.constant dense<0.000000e+00> : vector<32x128xf32>
    %395 = tpu.matmul %393, %394, %cst_262 {dimension_numbers = #tpu.dot_dimension_numbers<[1], [0], [0], [1], [0, 0, 1, 1], [], []>} : vector<32x32xbf16>, vector<32x128xbf16>, vector<32x128xf32> -> vector<32x128xf32>
    %c14_263 = arith.constant 14 : index
    %c0_264 = arith.constant 0 : index
    %c0_265 = arith.constant 0 : index
    %396 = vector.load %arg8[%c14_263, %c0_264, %c0_265] : memref<16x32x1xf32, #tpu.memory_space<vmem>>, vector<1x32x1xf32>
    %397 = vector.shape_cast %396 : vector<1x32x1xf32> to vector<32x1xf32>
    %398 = vector.broadcast %397 : vector<32x1xf32> to vector<32x128xf32>
    %399 = arith.addf %395, %398 : vector<32x128xf32>
    %cst_266 = arith.constant 0.000000e+00 : f32
    %400 = vector.broadcast %cst_266 : f32 to vector<32x128xf32>
    %401 = arith.maximumf %399, %400 : vector<32x128xf32>
    %c15 = arith.constant 15 : index
    %c0_267 = arith.constant 0 : index
    %c0_268 = arith.constant 0 : index
    %402 = vector.load %arg7[%c15, %c0_267, %c0_268] : memref<16x32x32xbf16, #tpu.memory_space<vmem>>, vector<1x32x32xbf16>
    %403 = vector.shape_cast %402 : vector<1x32x32xbf16> to vector<32x32xbf16>
    %404 = arith.truncf %401 : vector<32x128xf32> to vector<32x128xbf16>
    %cst_269 = arith.constant dense<0.000000e+00> : vector<32x128xf32>
    %405 = tpu.matmul %403, %404, %cst_269 {dimension_numbers = #tpu.dot_dimension_numbers<[1], [0], [0], [1], [0, 0, 1, 1], [], []>} : vector<32x32xbf16>, vector<32x128xbf16>, vector<32x128xf32> -> vector<32x128xf32>
    %c15_270 = arith.constant 15 : index
    %c0_271 = arith.constant 0 : index
    %c0_272 = arith.constant 0 : index
    %406 = vector.load %arg8[%c15_270, %c0_271, %c0_272] : memref<16x32x1xf32, #tpu.memory_space<vmem>>, vector<1x32x1xf32>
    %407 = vector.shape_cast %406 : vector<1x32x1xf32> to vector<32x1xf32>
    %408 = vector.broadcast %407 : vector<32x1xf32> to vector<32x128xf32>
    %409 = arith.addf %405, %408 : vector<32x128xf32>
    %410 = arith.addf %381, %409 : vector<32x128xf32>
    %c3_273 = arith.constant 3 : index
    %c0_274 = arith.constant 0 : index
    %c0_275 = arith.constant 0 : index
    %411 = vector.load %arg9[%c3_273, %c0_274, %c0_275] : memref<4x32x32xbf16, #tpu.memory_space<vmem>>, vector<1x32x32xbf16>
    %412 = vector.shape_cast %411 : vector<1x32x32xbf16> to vector<32x32xbf16>
    %413 = arith.truncf %410 : vector<32x128xf32> to vector<32x128xbf16>
    %cst_276 = arith.constant dense<0.000000e+00> : vector<32x128xf32>
    %414 = tpu.matmul %412, %413, %cst_276 {dimension_numbers = #tpu.dot_dimension_numbers<[1], [0], [0], [1], [0, 0, 1, 1], [], []>} : vector<32x32xbf16>, vector<32x128xbf16>, vector<32x128xf32> -> vector<32x128xf32>
    %c3_277 = arith.constant 3 : index
    %c0_278 = arith.constant 0 : index
    %c0_279 = arith.constant 0 : index
    %415 = vector.load %arg10[%c3_277, %c0_278, %c0_279] : memref<4x32x1xf32, #tpu.memory_space<vmem>>, vector<1x32x1xf32>
    %416 = vector.shape_cast %415 : vector<1x32x1xf32> to vector<32x1xf32>
    %417 = vector.broadcast %416 : vector<32x1xf32> to vector<32x128xf32>
    %418 = arith.addf %414, %417 : vector<32x128xf32>
    %419 = vector.extract_strided_slice %418 {offsets = [0, 0], sizes = [16, 128], strides = [1, 1]} : vector<32x128xf32> to vector<16x128xf32>
    %420 = vector.extract_strided_slice %418 {offsets = [16, 0], sizes = [16, 128], strides = [1, 1]} : vector<32x128xf32> to vector<16x128xf32>
    %cst_280 = arith.constant 2.000000e+00 : f32
    %421 = vector.broadcast %cst_280 : f32 to vector<16x128xf32>
    %422 = arith.addf %420, %421 : vector<16x128xf32>
    %cst_281 = arith.constant 0.000000e+00 : f32
    %423 = vector.broadcast %cst_281 : f32 to vector<16x128xf32>
    %424 = arith.subf %423, %422 : vector<16x128xf32>
    %425 = math.exp %424 : vector<16x128xf32>
    %cst_282 = arith.constant 1.000000e+00 : f32
    %426 = vector.broadcast %cst_282 : f32 to vector<16x128xf32>
    %427 = arith.addf %426, %425 : vector<16x128xf32>
    %428 = tpu.reciprocal %427 {approx = true} : vector<16x128xf32> -> vector<16x128xf32>
    %cst_283 = arith.constant 1.000000e-03 : f32
    %429 = vector.broadcast %cst_283 : f32 to vector<16x128xf32>
    %430 = arith.addf %428, %429 : vector<16x128xf32>
    %cst_284 = arith.constant 5.000000e-01 : f32
    %431 = vector.broadcast %cst_284 : f32 to vector<16x1xf32>
    %432 = arith.cmpf ogt, %344, %431 : vector<16x1xf32>
    %cst_285 = arith.constant 1.000000e+00 : f32
    %433 = vector.shape_cast %432 : vector<16x1xi1> to vector<16x1xi1>
    %434 = vector.broadcast %433 : vector<16x1xi1> to vector<16x128xi1>
    %435 = vector.broadcast %cst_285 : f32 to vector<16x128xf32>
    %436 = arith.select %434, %430, %435 : vector<16x128xi1>, vector<16x128xf32>
    %c3_286 = arith.constant 3 : index
    %c0_287 = arith.constant 0 : index
    %c0_288 = arith.constant 0 : index
    %437 = vector.load %arg11[%c3_286, %c0_287, %c0_288] : memref<4x16x1xf32, #tpu.memory_space<vmem>>, vector<1x16x1xf32>
    %438 = vector.shape_cast %437 : vector<1x16x1xf32> to vector<16x1xf32>
    %439 = vector.broadcast %438 : vector<16x1xf32> to vector<16x128xf32>
    %440 = arith.mulf %436, %439 : vector<16x128xf32>
    %cst_289 = arith.constant 5.000000e-01 : f32
    %441 = vector.broadcast %cst_289 : f32 to vector<16x1xf32>
    %442 = arith.cmpf ogt, %344, %441 : vector<16x1xf32>
    %cst_290 = arith.constant 0.000000e+00 : f32
    %443 = vector.shape_cast %442 : vector<16x1xi1> to vector<16x1xi1>
    %444 = vector.broadcast %443 : vector<16x1xi1> to vector<16x128xi1>
    %445 = vector.broadcast %cst_290 : f32 to vector<16x128xf32>
    %446 = arith.select %444, %419, %445 : vector<16x128xi1>, vector<16x128xf32>
    %c3_291 = arith.constant 3 : index
    %c0_292 = arith.constant 0 : index
    %c0_293 = arith.constant 0 : index
    %447 = vector.load %arg11[%c3_291, %c0_292, %c0_293] : memref<4x16x1xf32, #tpu.memory_space<vmem>>, vector<1x16x1xf32>
    %448 = vector.shape_cast %447 : vector<1x16x1xf32> to vector<16x1xf32>
    %449 = vector.broadcast %448 : vector<16x1xf32> to vector<16x128xf32>
    %450 = arith.mulf %446, %449 : vector<16x128xf32>
    %c3_294 = arith.constant 3 : index
    %c0_295 = arith.constant 0 : index
    %c0_296 = arith.constant 0 : index
    %451 = vector.load %arg12[%c3_294, %c0_295, %c0_296] : memref<4x16x1xf32, #tpu.memory_space<vmem>>, vector<1x16x1xf32>
    %452 = vector.shape_cast %451 : vector<1x16x1xf32> to vector<16x1xf32>
    %453 = vector.broadcast %452 : vector<16x1xf32> to vector<16x128xf32>
    %454 = arith.addf %450, %453 : vector<16x128xf32>
    %455 = arith.mulf %342, %440 : vector<16x128xf32>
    %456 = arith.addf %455, %454 : vector<16x128xf32>
    %cst_297 = arith.constant 0.000000e+00 : f32
    %cst_298 = arith.constant 1.000000e+00 : f32
    %457 = vector.broadcast %cst_297 : f32 to vector<16x128xf32>
    %458 = arith.maximumf %457, %456 : vector<16x128xf32>
    %459 = vector.broadcast %cst_298 : f32 to vector<16x128xf32>
    %460 = arith.minimumf %459, %458 : vector<16x128xf32>
    %c0_299 = arith.constant 0 : index
    %c0_300 = arith.constant 0 : index
    %461 = vector.load %arg13[%c0_299, %c0_300] : memref<16x128xf32, #tpu.memory_space<vmem>>, vector<16x128xf32>
    tpu.vector_store %arg13[%c0_299, %c0_300], %460 {strides = array<i32>} : memref<16x128xf32, #tpu.memory_space<vmem>>, vector<16x128xf32>,
    return
  }
  func.func @transform_0(%arg0: i32) -> (i32, i32) {
    %c0_i32 = arith.constant 0 : i32
    %c0_i32_0 = arith.constant 0 : i32
    return %c0_i32, %arg0 : i32, i32
  }
  func.func @transform_1(%arg0: i32) -> (i32, i32, i32) {
    %c0_i32 = arith.constant 0 : i32
    %c0_i32_0 = arith.constant 0 : i32
    %c0_i32_1 = arith.constant 0 : i32
    %c0_i32_2 = arith.constant 0 : i32
    return %c0_i32, %c0_i32_0, %c0_i32_1 : i32, i32, i32
  }
  func.func @transform_2(%arg0: i32) -> (i32, i32, i32) {
    %c0_i32 = arith.constant 0 : i32
    %c0_i32_0 = arith.constant 0 : i32
    %c0_i32_1 = arith.constant 0 : i32
    %c0_i32_2 = arith.constant 0 : i32
    return %c0_i32, %c0_i32_0, %c0_i32_1 : i32, i32, i32
  }
  func.func @transform_3(%arg0: i32) -> (i32, i32, i32) {
    %c0_i32 = arith.constant 0 : i32
    %c0_i32_0 = arith.constant 0 : i32
    %c0_i32_1 = arith.constant 0 : i32
    %c0_i32_2 = arith.constant 0 : i32
    return %c0_i32, %c0_i32_0, %c0_i32_1 : i32, i32, i32
  }
  func.func @transform_4(%arg0: i32) -> (i32, i32, i32) {
    %c0_i32 = arith.constant 0 : i32
    %c0_i32_0 = arith.constant 0 : i32
    %c0_i32_1 = arith.constant 0 : i32
    %c0_i32_2 = arith.constant 0 : i32
    return %c0_i32, %c0_i32_0, %c0_i32_1 : i32, i32, i32
  }
  func.func @transform_5(%arg0: i32) -> (i32, i32, i32) {
    %c0_i32 = arith.constant 0 : i32
    %c0_i32_0 = arith.constant 0 : i32
    %c0_i32_1 = arith.constant 0 : i32
    %c0_i32_2 = arith.constant 0 : i32
    return %c0_i32, %c0_i32_0, %c0_i32_1 : i32, i32, i32
  }
  func.func @transform_6(%arg0: i32) -> (i32, i32, i32) {
    %c0_i32 = arith.constant 0 : i32
    %c0_i32_0 = arith.constant 0 : i32
    %c0_i32_1 = arith.constant 0 : i32
    %c0_i32_2 = arith.constant 0 : i32
    return %c0_i32, %c0_i32_0, %c0_i32_1 : i32, i32, i32
  }
  func.func @transform_7(%arg0: i32) -> (i32, i32, i32) {
    %c0_i32 = arith.constant 0 : i32
    %c0_i32_0 = arith.constant 0 : i32
    %c0_i32_1 = arith.constant 0 : i32
    %c0_i32_2 = arith.constant 0 : i32
    return %c0_i32, %c0_i32_0, %c0_i32_1 : i32, i32, i32
  }
  func.func @transform_8(%arg0: i32) -> (i32, i32, i32) {
    %c0_i32 = arith.constant 0 : i32
    %c0_i32_0 = arith.constant 0 : i32
    %c0_i32_1 = arith.constant 0 : i32
    %c0_i32_2 = arith.constant 0 : i32
    return %c0_i32, %c0_i32_0, %c0_i32_1 : i32, i32, i32
  }
  func.func @transform_9(%arg0: i32) -> (i32, i32, i32) {
    %c0_i32 = arith.constant 0 : i32
    %c0_i32_0 = arith.constant 0 : i32
    %c0_i32_1 = arith.constant 0 : i32
    %c0_i32_2 = arith.constant 0 : i32
    return %c0_i32, %c0_i32_0, %c0_i32_1 : i32, i32, i32
  }
  func.func @transform_10(%arg0: i32) -> (i32, i32, i32) {
    %c0_i32 = arith.constant 0 : i32
    %c0_i32_0 = arith.constant 0 : i32
    %c0_i32_1 = arith.constant 0 : i32
    %c0_i32_2 = arith.constant 0 : i32
    return %c0_i32, %c0_i32_0, %c0_i32_1 : i32, i32, i32
  }
  func.func @transform_11(%arg0: i32) -> (i32, i32, i32) {
    %c0_i32 = arith.constant 0 : i32
    %c0_i32_0 = arith.constant 0 : i32
    %c0_i32_1 = arith.constant 0 : i32
    %c0_i32_2 = arith.constant 0 : i32
    return %c0_i32, %c0_i32_0, %c0_i32_1 : i32, i32, i32
  }
  func.func @transform_12(%arg0: i32) -> (i32, i32) {
    %c0_i32 = arith.constant 0 : i32
    %c0_i32_0 = arith.constant 0 : i32
    return %c0_i32, %arg0 : i32, i32
  }
}

</mosaic_0001>

<bundles_post_ra>
// kernel: tpu_custom_call.1
= control target key start
LH: loop header
LB: loop body
LE: loop exit
PB: predicated region body
PF: predicated region fallthrough
CT: control target
= control target key end

     0   :  { %v5168_v3 = vmov 0   ;;  %vm86_vm0 = vcmask 130048   ;;  %s5155_s0 = inlined_call_operand.vmem [shape: f32[16,128], index: 0, kind: input, shape index: {}]   ;;  %s5156_s1 = inlined_call_operand.vmem [shape: f32[4,16,1], index: 1, kind: input, shape index: {}]   ;;  %s5157_s2 = inlined_call_operand.vmem [shape: bf16[4,32,16], index: 2, kind: input, shape index: {}]   ;;  %s5158_s3 = inlined_call_operand.vmem [shape: f32[4,32,1], index: 3, kind: input, shape index: {}]   ;;  %s5159_s4 = inlined_call_operand.vmem [shape: f32[8,32,1], index: 4, kind: input, shape index: {}]   ;;  %s5160_s5 = inlined_call_operand.vmem [shape: f32[8,32,1], index: 5, kind: input, shape index: {}]   ;;  %s5161_s6 = inlined_call_operand.vmem [shape: bf16[16,32,32], index: 6, kind: input, shape index: {}]   ;;  %s5162_s7 = inlined_call_operand.vmem [shape: f32[16,32,1], index: 7, kind: input, shape index: {}]   ;;  %s5163_s8 = inlined_call_operand.vmem [shape: bf16[4,32,32], index: 8, kind: input, shape index: {}]   ;;  %s5164_s9 = inlined_call_operand.vmem [shape: f32[4,32,1], index: 9, kind: input, shape index: {}]   ;;  %s5165_s10 = inlined_call_operand.vmem [shape: f32[4,16,1], index: 10, kind: input, shape index: {}]   ;;  %s5166_s11 = inlined_call_operand.vmem [shape: f32[4,16,1], index: 11, kind: input, shape index: {}]   ;;  %s5167_s12 = inlined_call_operand.hbm [shape: f32[16,128], index: 12, kind: output, shape index: {}]  }
   0x1   :  { %v142_v0 = vld [vmem:[%s5159_s4] sm:$0xff]  ;;  %3837 = vset.pattern.permute.xlu1 %v5168_v3  ;;  %3836 = vset.pattern.permute.xlu0 %v5168_v3  ;;  %v44_v4 = vld [vmem:[%s5155_s0 + $0x8] sm:$0xff]  ;;  %v55_v10 = vld [vmem:[%s5158_s3 + $0x18] sm:$0xff] }
   0x2   :  { %v52_v1 = vld [vmem:[%s5158_s3] sm:$0xff]  ;;  %v143_v5 = vld [vmem:[%s5159_s4 + $0x8] sm:$0xff]  ;;  %148 = vperm.xlu1 %3837, %v142_v0   ;;  %v54_v11 = vld [vmem:[%s5158_s3 + $0x10] sm:$0xff] }
   0x3   :  { %v43_v2 = vld [vmem:[%s5155_s0] sm:$0xff]  ;;  %58 = vperm.xlu0 %3836, %v52_v1   ;;  %v53_v8 = vld [vmem:[%s5158_s3 + $0x8] sm:$0xff]  ;;  %v145_v14 = vld [vmem:[%s5159_s4 + $0x18] sm:$0xff] }
   0x4   :  { %v51_v6 = vpack.c.bf16 %v44_v4, %v43_v2  ;;  %v3838_v7 = vld [vmem:[%s5157_s2] sm:$0xff]   ;;  %v3839_v9 = vld [vmem:[%s5157_s2 + $0x8] sm:$0xff]   ;;  %v144_v15 = vld [vmem:[%s5159_s4 + $0x10] sm:$0xff] }
   0x5   :  { %3650 = vmatprep.mubr.msk.bf16.mxu0 %vm86_vm0, %v3838_v7  ;;  %v171_v12 = vld [vmem:[%s5160_s5 + $0x8] sm:$0xff]  ;;  %v170_v13 = vld [vmem:[%s5160_s5] sm:$0xff]  ;;  %v173_v16 = vld [vmem:[%s5160_s5 + $0x18] sm:$0xff] }
   0x6   :  { %3648 = vmatprep.subr.bf16.mxu0 %v51_v6  ;;  %153 = vperm.xlu1 %3837, %v143_v5   ;;  %v172_v17 = vld [vmem:[%s5160_s5 + $0x10] sm:$0xff]  ;;  %v209_v18 = vld [vmem:[%s5162_s7 + $0x8] sm:$0xff]  ;;  %v208_v19 = vld [vmem:[%s5162_s7] sm:$0xff] }
   0x7   :  { %3649 = vmatpush3.bf16.msra.mxu0 %v51_v6  ;;  %63 = vperm.xlu0 %3836, %v53_v8   ;;  %v211_v20 = vld [vmem:[%s5162_s7 + $0x18] sm:$0xff]  ;;  %v210_v21 = vld [vmem:[%s5162_s7 + $0x10] sm:$0xff]  ;;  %v3231_v22 = vld [vmem:[%s5162_s7 + $0x28] sm:$0xff] }
   0x8   :  { %v3230_v23 = vld [vmem:[%s5162_s7 + $0x20] sm:$0xff]  ;;  %v3233_v24 = vld [vmem:[%s5162_s7 + $0x38] sm:$0xff]  ;;  %v3232_v25 = vld [vmem:[%s5162_s7 + $0x30] sm:$0xff] }
   0x9   :  { %v3239_v26 = vld [vmem:[%s5159_s4 + $0x28] sm:$0xff]  ;;  %v3238_v27 = vld [vmem:[%s5159_s4 + $0x20] sm:$0xff]  ;;  %v3241_v30 = vld [vmem:[%s5159_s4 + $0x38] sm:$0xff] }
   0xa   :  { %3651 = vmatmul.mubr.msk.bf16.vlgmr.msra.gmra.mrb[0].mxu0 %vm86_vm0, %v3839_v9  ;;  %73 = vperm.xlu1 %3837, %v55_v10   ;;  %v3243_v28 = vld [vmem:[%s5160_s5 + $0x28] sm:$0xff]  ;;  %v3242_v29 = vld [vmem:[%s5160_s5 + $0x20] sm:$0xff]  ;;  %v3240_v31 = vld [vmem:[%s5159_s4 + $0x30] sm:$0xff] }
   0xb   :  { %68 = vperm.xlu0 %3836, %v54_v11   ;;  %v3245_v32 = vld [vmem:[%s5160_s5 + $0x38] sm:$0xff]  ;;  %v3244_v33 = vld [vmem:[%s5160_s5 + $0x30] sm:$0xff]  ;;  %v3251_v34 = vld [vmem:[%s5162_s7 + $0x48] sm:$0xff] }
   0xc   :  { %v3250_v35 = vld [vmem:[%s5162_s7 + $0x40] sm:$0xff]  ;;  %v3253_v36 = vld [vmem:[%s5162_s7 + $0x58] sm:$0xff]  ;;  %v3252_v37 = vld [vmem:[%s5162_s7 + $0x50] sm:$0xff] }
   0xd   :  { %v3263_v38 = vld [vmem:[%s5162_s7 + $0x68] sm:$0xff]  ;;  %v3262_v39 = vld [vmem:[%s5162_s7 + $0x60] sm:$0xff] }
   0xe   :  { %181 = vperm.xlu1 %3837, %v171_v12  }
   0xf   :  { %176 = vperm.xlu0 %3836, %v170_v13  }
  0x12   :  { %163 = vperm.xlu1 %3837, %v145_v14  }
  0x13   :  { %158 = vperm.xlu0 %3836, %v144_v15  }
  0x16   :  { %191 = vperm.xlu1 %3837, %v173_v16  }
  0x17   :  { %186 = vperm.xlu0 %3836, %v172_v17  }
  0x1a   :  { %219 = vperm.xlu1 %3837, %v209_v18  }
  0x1b   :  { %214 = vperm.xlu0 %3836, %v208_v19  }
  0x1e   :  { %229 = vperm.xlu1 %3837, %v211_v20  }
  0x1f   :  { %224 = vperm.xlu0 %3836, %v210_v21  }
  0x22   :  { %321 = vperm.xlu1 %3837, %v3231_v22  }
  0x23   :  { %316 = vperm.xlu0 %3836, %v3230_v23  }
  0x26   :  { %331 = vperm.xlu1 %3837, %v3233_v24  }
  0x27   :  { %326 = vperm.xlu0 %3836, %v3232_v25  }
  0x2a   :  { %415 = vperm.xlu1 %3837, %v3239_v26  }
  0x2b   :  { %410 = vperm.xlu0 %3836, %v3238_v27  }
  0x2e   :  { %444 = vperm.xlu1 %3837, %v3243_v28  }
  0x2f   :  { %439 = vperm.xlu0 %3836, %v3242_v29  }
  0x32   :  { %425 = vperm.xlu1 %3837, %v3241_v30  }
  0x33   :  { %420 = vperm.xlu0 %3836, %v3240_v31  }
  0x36   :  { %454 = vperm.xlu1 %3837, %v3245_v32  }
  0x37   :  { %449 = vperm.xlu0 %3836, %v3244_v33  }
  0x3a   :  { %484 = vperm.xlu1 %3837, %v3251_v34  }
  0x3b   :  { %479 = vperm.xlu0 %3836, %v3250_v35  }
  0x3e   :  { %494 = vperm.xlu1 %3837, %v3253_v36  }
  0x3f   :  { %489 = vperm.xlu0 %3836, %v3252_v37  }
  0x42   :  { %585 = vperm.xlu1 %3837, %v3263_v38  }
  0x43   :  { %580 = vperm.xlu0 %3836, %v3262_v39  }
  0x44   :  { %17 = vsyncpa [#allocation3], 0  ;;  %v3265_v40 = vld [vmem:[%s5162_s7 + $0x78] sm:$0xff]  ;;  %v3264_v41 = vld [vmem:[%s5162_s7 + $0x70] sm:$0xff]  ;;  %vm242_vm3 = vcmask 261120  }
  0x45   :  { %v676_v42 = vld [vmem:[%s5164_s9 + $0x18] sm:$0xff]  ;;  %v675_v43 = vld [vmem:[%s5164_s9 + $0x10] sm:$0xff]  ;;  %v46_v44 = vld [vmem:[%s5156_s1 + $0x8] sm:$0xff] }
  0x46   :  { %595 = vperm.xlu1 %3837, %v3265_v40   ;;  %v45_v45 = vld [vmem:[%s5156_s1] sm:$0xff]  ;;  %v674_v46 = vld [vmem:[%s5164_s9 + $0x8] sm:$0xff]  ;;  %vm777_vm1 = vcmp.gt.f32.partialorder %v46_v44, 0.5  ;;  %v3283_v58 = vld [vmem:[%s5158_s3 + $0x38] sm:$0xff] }
  0x47   :  { %590 = vperm.xlu0 %3836, %v3264_v41   ;;  %v673_v47 = vld [vmem:[%s5164_s9] sm:$0xff]  ;;  %vm776_vm2 = vcmp.gt.f32.partialorder %v45_v45, 0.5  ;;  %v779_v48 = vsel %vm777_vm1, 1, %v5168_v3  ;;  %v791_v50 = vld [vmem:[%s5165_s10 + $0x8] sm:$0xff]  ;;  %v3282_v59 = vld [vmem:[%s5158_s3 + $0x30] sm:$0xff] }
  0x48   :  { %v778_v49 = vsel %vm776_vm2, 1, %v5168_v3  ;;  %v790_v51 = vld [vmem:[%s5165_s10] sm:$0xff]  ;;  %v809_v52 = vld [vmem:[%s5166_s11 + $0x8] sm:$0xff]  ;;  %v3291_v62 = vld [vmem:[%s5159_s4 + $0x58] sm:$0xff] }
  0x49   :  { %v808_v53 = vld [vmem:[%s5166_s11] sm:$0xff]  ;;  %v3281_v54 = vld [vmem:[%s5158_s3 + $0x28] sm:$0xff]  ;;  %v3290_v63 = vld [vmem:[%s5159_s4 + $0x50] sm:$0xff] }
  0x4a   :  { %694 = vperm.xlu1 %3837, %v676_v42   ;;  %v3280_v55 = vld [vmem:[%s5158_s3 + $0x20] sm:$0xff]  ;;  %v3289_v56 = vld [vmem:[%s5159_s4 + $0x48] sm:$0xff]  ;;  %v3295_v1 = vld [vmem:[%s5160_s5 + $0x58] sm:$0xff] }
  0x4b   :  { %689 = vperm.xlu0 %3836, %v675_v43   ;;  %v3288_v57 = vld [vmem:[%s5159_s4 + $0x40] sm:$0xff]  ;;  %v3293_v60 = vld [vmem:[%s5160_s5 + $0x48] sm:$0xff]  ;;  %v3294_v2 = vld [vmem:[%s5160_s5 + $0x50] sm:$0xff] }
  0x4c   :  { %v3292_v61 = vld [vmem:[%s5160_s5 + $0x40] sm:$0xff]  ;;  %v3301_v4 = vld [vmem:[%s5162_s7 + $0x88] sm:$0xff]  ;;  %v3303_v6 = vld [vmem:[%s5162_s7 + $0x98] sm:$0xff] }
  0x4d   :  { %v3840_v0 = vld [vmem:[%s5161_s6] sm:$0xff]   ;;  %v3302_v7 = vld [vmem:[%s5162_s7 + $0x90] sm:$0xff]  ;;  %v3313_v8 = vld [vmem:[%s5162_s7 + $0xa8] sm:$0xff] }
  0x4e   :  { %684 = vperm.xlu1 %3837, %v674_v46   ;;  %3658 = vmatprep.mubr.msk.bf16.mxu1 %vm242_vm3, %v3840_v0  ;;  %v3300_v5 = vld [vmem:[%s5162_s7 + $0x80] sm:$0xff]  ;;  %v3315_v10 = vld [vmem:[%s5162_s7 + $0xb8] sm:$0xff]  ;;  %v3314_v11 = vld [vmem:[%s5162_s7 + $0xb0] sm:$0xff] }
  0x4f   :  { %679 = vperm.xlu0 %3836, %v673_v47   ;;  %v3312_v9 = vld [vmem:[%s5162_s7 + $0xa0] sm:$0xff]  ;;  %v3321_v14 = vld [vmem:[%s5159_s4 + $0x68] sm:$0xff]  ;;  %v3323_v22 = vld [vmem:[%s5159_s4 + $0x78] sm:$0xff] }
  0x50   :  { %v3320_v15 = vld [vmem:[%s5159_s4 + $0x60] sm:$0xff]  ;;  %v3325_v18 = vld [vmem:[%s5160_s5 + $0x68] sm:$0xff]  ;;  %v3322_v23 = vld [vmem:[%s5159_s4 + $0x70] sm:$0xff] }
  0x51   :  { %v3324_v19 = vld [vmem:[%s5160_s5 + $0x60] sm:$0xff]  ;;  %v3327_v26 = vld [vmem:[%s5160_s5 + $0x78] sm:$0xff]  ;;  %v3326_v27 = vld [vmem:[%s5160_s5 + $0x70] sm:$0xff] }
  0x52   :  { %784 = vperm.xlu1 %3837, %v779_v48   ;;  %v3333_v30 = vld [vmem:[%s5162_s7 + $0xc8] sm:$0xff]  ;;  %v3332_v31 = vld [vmem:[%s5162_s7 + $0xc0] sm:$0xff]  ;;  %v3335_v34 = vld [vmem:[%s5162_s7 + $0xd8] sm:$0xff] }
  0x53   :  { %781 = vperm.xlu0 %3836, %v778_v49   ;;  %v3334_v35 = vld [vmem:[%s5162_s7 + $0xd0] sm:$0xff]  ;;  %v3345_v38 = vld [vmem:[%s5162_s7 + $0xe8] sm:$0xff]  ;;  %v3344_v39 = vld [vmem:[%s5162_s7 + $0xe0] sm:$0xff] }
  0x54   :  { %v3347_v42 = vld [vmem:[%s5162_s7 + $0xf8] sm:$0xff]  ;;  %v3346_v43 = vld [vmem:[%s5162_s7 + $0xf0] sm:$0xff]  ;;  %v3375_v0 = vld [vmem:[%s5158_s3 + $0x48] sm:$0xff] }
  0x55   :  { %v3359_v46 = vld [vmem:[%s5164_s9 + $0x38] sm:$0xff]  ;;  %v3358_v47 = vld [vmem:[%s5164_s9 + $0x30] sm:$0xff] }
  0x56   :  { %799 = vperm.xlu1 %3837, %v791_v50   ;;  %v3275_v48 = vld [vmem:[%s5156_s1 + $0x18] sm:$0xff]  ;;  %v3274_v49 = vld [vmem:[%s5156_s1 + $0x10] sm:$0xff]  ;;  %v3357_v50 = vld [vmem:[%s5164_s9 + $0x28] sm:$0xff] }
  0x57   :  { %794 = vperm.xlu0 %3836, %v790_v51   ;;  %v3356_v51 = vld [vmem:[%s5164_s9 + $0x20] sm:$0xff]  ;;  %vm1565_vm4 = vcmp.gt.f32.partialorder %v3275_v48, 0.5  ;;  %vm1564_vm5 = vcmp.gt.f32.partialorder %v3274_v49, 0.5 }
  0x5a   :  { %817 = vperm.xlu1 %3837, %v809_v52  }
  0x5b   :  { %812 = vperm.xlu0 %3836, %v808_v53  }
  0x5e   :  { %847 = vperm.xlu1 %3837, %v3281_v54   ;;  %v1567_v54 = vsel %vm1565_vm4, 1, %v5168_v3 }
  0x5f   :  { %842 = vperm.xlu0 %3836, %v3280_v55   ;;  %v1566_v55 = vsel %vm1564_vm5, 1, %v5168_v3 }
  0x62   :  { %937 = vperm.xlu1 %3837, %v3289_v56  }
  0x63   :  { %932 = vperm.xlu0 %3836, %v3288_v57  }
  0x66   :  { %857 = vperm.xlu1 %3837, %v3283_v58   ;;  %v3365_v58 = vld [vmem:[%s5165_s10 + $0x18] sm:$0xff] }
  0x67   :  { %852 = vperm.xlu0 %3836, %v3282_v59   ;;  %v3364_v59 = vld [vmem:[%s5165_s10 + $0x10] sm:$0xff] }
  0x6a   :  { %966 = vperm.xlu1 %3837, %v3293_v60   ;;  %v3367_v60 = vld [vmem:[%s5166_s11 + $0x18] sm:$0xff] }
  0x6b   :  { %961 = vperm.xlu0 %3836, %v3292_v61   ;;  %v3366_v61 = vld [vmem:[%s5166_s11 + $0x10] sm:$0xff] }
  0x6e   :  { %947 = vperm.xlu1 %3837, %v3291_v62  }
  0x6f   :  { %942 = vperm.xlu0 %3836, %v3290_v63  }
  0x72   :  { %976 = vperm.xlu1 %3837, %v3295_v1   ;;  %v3374_v1 = vld [vmem:[%s5158_s3 + $0x40] sm:$0xff] }
  0x73   :  { %971 = vperm.xlu0 %3836, %v3294_v2  }
  0x76   :  { %1006 = vperm.xlu1 %3837, %v3301_v4  }
  0x77   :  { %1001 = vperm.xlu0 %3836, %v3300_v5   ;;  %v3383_v5 = vld [vmem:[%s5159_s4 + $0x88] sm:$0xff] }
  0x7a   :  { %1016 = vperm.xlu1 %3837, %v3303_v6   ;;  %v3382_v6 = vld [vmem:[%s5159_s4 + $0x80] sm:$0xff] }
  0x7b   :  { %1011 = vperm.xlu0 %3836, %v3302_v7   ;;  %v3377_v7 = vld [vmem:[%s5158_s3 + $0x58] sm:$0xff] }
  0x7e   :  { %1107 = vperm.xlu1 %3837, %v3313_v8   ;;  %v3376_v8 = vld [vmem:[%s5158_s3 + $0x50] sm:$0xff] }
  0x7f   :  { %1102 = vperm.xlu0 %3836, %v3312_v9  }
  0x81   :  { %v4233_v12 = vpop.permute.xlu1 %148 }
  0x82   :  { %v4235_v13 = vpop.permute.xlu0 %58  ;;  %1117 = vperm.xlu1 %3837, %v3315_v10  }
  0x83   :  { %1112 = vperm.xlu0 %3836, %v3314_v11   ;;  %v3387_v11 = vld [vmem:[%s5160_s5 + $0x88] sm:$0xff] }
  0x85   :  { %v4243_v16 = vpop.permute.xlu1 %153 }
  0x86   :  { %v4245_v17 = vpop.permute.xlu0 %63  ;;  %1201 = vperm.xlu1 %3837, %v3321_v14   ;;  %v3386_v14 = vld [vmem:[%s5160_s5 + $0x80] sm:$0xff] }
  0x87   :  { %1196 = vperm.xlu0 %3836, %v3320_v15  }
  0x89   :  { %v4253_v20 = vpop.permute.xlu1 %73 }
  0x8a   :  { %v4255_v21 = vpop.permute.xlu0 %68  ;;  %1230 = vperm.xlu1 %3837, %v3325_v18  }
  0x8b   :  { %1225 = vperm.xlu0 %3836, %v3324_v19   ;;  %v3385_v19 = vld [vmem:[%s5159_s4 + $0x98] sm:$0xff] }
  0x8d   :  { %v4263_v24 = vpop.permute.xlu1 %181 }
  0x8e   :  { %v4265_v25 = vpop.permute.xlu0 %176  ;;  %1211 = vperm.xlu1 %3837, %v3323_v22   ;;  %v3384_v22 = vld [vmem:[%s5159_s4 + $0x90] sm:$0xff] }
  0x8f   :  { %1206 = vperm.xlu0 %3836, %v3322_v23   ;;  %v3389_v23 = vld [vmem:[%s5160_s5 + $0x98] sm:$0xff] }
  0x91   :  { %v4273_v28 = vpop.permute.xlu1 %163 }
  0x92   :  { %v4275_v29 = vpop.permute.xlu0 %158  ;;  %1240 = vperm.xlu1 %3837, %v3327_v26   ;;  %v3388_v26 = vld [vmem:[%s5160_s5 + $0x90] sm:$0xff] }
  0x93   :  { %1235 = vperm.xlu0 %3836, %v3326_v27  }
  0x95   :  { %v4283_v32 = vpop.permute.xlu1 %191 }
  0x96   :  { %v4285_v33 = vpop.permute.xlu0 %186  ;;  %1270 = vperm.xlu1 %3837, %v3333_v30  }
  0x97   :  { %1265 = vperm.xlu0 %3836, %v3332_v31   ;;  %v3395_v31 = vld [vmem:[%s5162_s7 + $0x108] sm:$0xff] }
  0x99   :  { %v4293_v36 = vpop.permute.xlu1 %219 }
  0x9a   :  { %v4295_v37 = vpop.permute.xlu0 %214  ;;  %1280 = vperm.xlu1 %3837, %v3335_v34   ;;  %v3394_v34 = vld [vmem:[%s5162_s7 + $0x100] sm:$0xff] }
  0x9b   :  { %1275 = vperm.xlu0 %3836, %v3334_v35  }
  0x9d   :  { %v4303_v40 = vpop.permute.xlu1 %229 }
  0x9e   :  { %v4305_v41 = vpop.permute.xlu0 %224  ;;  %1371 = vperm.xlu1 %3837, %v3345_v38  }
  0x9f   :  { %1366 = vperm.xlu0 %3836, %v3344_v39   ;;  %v3397_v39 = vld [vmem:[%s5162_s7 + $0x118] sm:$0xff] }
  0xa1   :  { %v4313_v44 = vpop.permute.xlu1 %321 }
  0xa2   :  { %1381 = vperm.xlu1 %3837, %v3347_v42   ;;  %v4315_v45 = vpop.permute.xlu0 %316  ;;  %v3396_v42 = vld [vmem:[%s5162_s7 + $0x110] sm:$0xff] }
  0xa3   :  { %1376 = vperm.xlu0 %3836, %v3346_v43   ;;  %v3407_v43 = vld [vmem:[%s5162_s7 + $0x128] sm:$0xff] }
  0xa5   :  { %v4335_v52 = vpop.permute.xlu1 %331 }
  0xa6   :  { %1482 = vperm.xlu1 %3837, %v3359_v46   ;;  %v4337_v53 = vpop.permute.xlu0 %326  ;;  %v3406_v46 = vld [vmem:[%s5162_s7 + $0x120] sm:$0xff] }
  0xa7   :  { %1477 = vperm.xlu0 %3836, %v3358_v47  }
  0xa9   :  { %v4341_v56 = vpop.permute.xlu1 %415 }
  0xaa   :  { %1472 = vperm.xlu1 %3837, %v3357_v50   ;;  %v4343_v57 = vpop.permute.xlu0 %410  ;;  %v3409_v50 = vld [vmem:[%s5162_s7 + $0x138] sm:$0xff] }
  0xab   :  { %1467 = vperm.xlu0 %3836, %v3356_v51   ;;  %v3408_v51 = vld [vmem:[%s5162_s7 + $0x130] sm:$0xff] }
  0xad   :  { %v4357_v62 = vpop.permute.xlu1 %444 }
  0xae   :  { %1572 = vperm.xlu1 %3837, %v1567_v54   ;;  %v4359_v63 = vpop.permute.xlu0 %439 }
  0xaf   :  { %1569 = vperm.xlu0 %3836, %v1566_v55  }
  0xb1   :  { %v4367_v2 = vpop.permute.xlu1 %425 }
  0xb2   :  { %1588 = vperm.xlu1 %3837, %v3365_v58   ;;  %v4369_v4 = vpop.permute.xlu0 %420 }
  0xb3   :  { %1583 = vperm.xlu0 %3836, %v3364_v59  }
  0xb5   :  { %v4383_v9 = vpop.permute.xlu1 %454 }
  0xb6   :  { %1607 = vperm.xlu1 %3837, %v3367_v60   ;;  %v4385_v10 = vpop.permute.xlu0 %449 }
  0xb7   :  { %1602 = vperm.xlu0 %3836, %v3366_v61  }
  0xb9   :  { %v4393_v15 = vpop.permute.xlu1 %484 }
  0xba   :  { %1637 = vperm.xlu1 %3837, %v3375_v0   ;;  %v4395_v18 = vpop.permute.xlu0 %479 }
  0xbb   :  { %1632 = vperm.xlu0 %3836, %v3374_v1  }
  0xbd   :  { %v4409_v27 = vpop.permute.xlu1 %494 }
  0xbe   :  { %1727 = vperm.xlu1 %3837, %v3383_v5   ;;  %v4411_v30 = vpop.permute.xlu0 %489 }
  0xbf   :  { %1722 = vperm.xlu0 %3836, %v3382_v6   ;;  %v3415_v6 = vld [vmem:[%s5159_s4 + $0xa8] sm:$0xff] }
  0xc1   :  { %v4419_v35 = vpop.permute.xlu1 %585 }
  0xc2   :  { %1647 = vperm.xlu1 %3837, %v3377_v7   ;;  %v4421_v38 = vpop.permute.xlu0 %580 }
  0xc3   :  { %1642 = vperm.xlu0 %3836, %v3376_v8  }
  0xc5   :  { %v4435_v47 = vpop.permute.xlu1 %595 }
  0xc6   :  { %1756 = vperm.xlu1 %3837, %v3387_v11   ;;  %v4437_v48 = vpop.permute.xlu0 %590  ;;  %v3419_v11 = vld [vmem:[%s5160_s5 + $0xa8] sm:$0xff] }
  0xc7   :  { %1751 = vperm.xlu0 %3836, %v3386_v14   ;;  %v3418_v14 = vld [vmem:[%s5160_s5 + $0xa0] sm:$0xff] }
  0xc9   :  { %v4451_v60 = vpop.permute.xlu1 %694 }
  0xca   :  { %1737 = vperm.xlu1 %3837, %v3385_v19   ;;  %v4456_v1 = vpop.permute.xlu0 %689 }
  0xcb   :  { %1732 = vperm.xlu0 %3836, %v3384_v22  }
  0xcd   :  { %v4485_v19 = vpop.permute.xlu1 %684 }
  0xce   :  { %1766 = vperm.xlu1 %3837, %v3389_v23  }
  0xcf   :  { %1761 = vperm.xlu0 %3836, %v3388_v26   ;;  %v3417_v26 = vld [vmem:[%s5159_s4 + $0xb8] sm:$0xff] }
  0xd2   :  { %1796 = vperm.xlu1 %3837, %v3395_v31   ;;  %v3416_v31 = vld [vmem:[%s5159_s4 + $0xb0] sm:$0xff] }
  0xd3   :  { %1791 = vperm.xlu0 %3836, %v3394_v34   ;;  %v4495_v34 = vpop.permute.xlu1 %784 }
  0xd4   :  { %vm787_vm11 = vcmp.eq.s32.totalorder %v4495_v34, 1  ;;  %v3918_v34 = vld [vmem:[%s5155_s0] sm:$0xff] }
  0xd6   :  { %1806 = vperm.xlu1 %3837, %v3397_v39  }
  0xd7   :  { %1801 = vperm.xlu0 %3836, %v3396_v42   ;;  %v3421_v42 = vld [vmem:[%s5160_s5 + $0xb8] sm:$0xff] }
  0xda   :  { %1897 = vperm.xlu1 %3837, %v3407_v43   ;;  %v3420_v43 = vld [vmem:[%s5160_s5 + $0xb0] sm:$0xff] }
  0xdb   :  { %1892 = vperm.xlu0 %3836, %v3406_v46   ;;  %v3841_v46 = vld [vmem:[%s5161_s6 + $0x8] sm:$0xff]  }
  0xdd   :  { %v3652_v49 = vpop.f32.mrb[0].mxu0 }
  0xde   :  { %v4446_v54 = vadd.f32 %v3652_v49, %v4255_v21  ;;  %v127_v55 = vpop.f32.mrb[1].mxu0  ;;  %1907 = vperm.xlu1 %3837, %v3409_v50   ;;  %v3427_v49 = vld [vmem:[%s5162_s7 + $0x148] sm:$0xff]  ;;  %v4511_v50 = vpop.permute.xlu1 %799 }
  0xdf   :  { %v4449_v58 = vadd.f32 %v127_v55, %v4235_v13  ;;  %v3653_v59 = vpop.f32.mrb[2].mxu0  ;;  %1902 = vperm.xlu0 %3836, %v3408_v51   ;;  %v3426_v51 = vld [vmem:[%s5162_s7 + $0x140] sm:$0xff] }
  0xe0   :  { %v4454_v61 = vadd.f32 %v3653_v59, %v4253_v20  ;;  %v130_v0 = vpop.f32.mrb[3].mxu0  ;;  %v168_v5 = vmul.f32 %v4275_v29, %v4446_v54  ;;  %v3414_v20 = vld [vmem:[%s5159_s4 + $0xa0] sm:$0xff]  ;;  %v3429_v59 = vld [vmem:[%s5162_s7 + $0x158] sm:$0xff] }
  0xe1   :  { %v166_v21 = vmul.f32 %v4233_v12, %v4449_v58  ;;  %v4463_v13 = vadd.f32 %v130_v0, %v4245_v17  ;;  %v3428_v0 = vld [vmem:[%s5162_s7 + $0x150] sm:$0xff] }
  0xe2   :  { %v169_v7 = vmul.f32 %v4273_v28, %v4454_v61  ;;  %1991 = vperm.xlu1 %3837, %v3415_v6   ;;  %v196_v17 = vadd.f32 %v4285_v33, %v168_v5  ;;  %v4525_v5 = vpop.permute.xlu1 %817  ;;  %v3439_v6 = vld [vmem:[%s5162_s7 + $0x168] sm:$0xff] }
  0xe3   :  { %v167_v29 = vmul.f32 %v4243_v16, %v4463_v13  ;;  %v194_v8 = vadd.f32 %v4265_v25, %v166_v21  ;;  %1986 = vperm.xlu0 %3836, %v3414_v20   ;;  %v4487_v16 = vpop.permute.xlu0 %679  ;;  %v3438_v20 = vld [vmem:[%s5162_s7 + $0x160] sm:$0xff] }
  0xe4   :  { %v197_v12 = vadd.f32 %v4283_v32, %v169_v7  ;;  %v200_v33 = vmax.f32 %v196_v17, 0.0  ;;  %v3441_v7 = vld [vmem:[%s5162_s7 + $0x178] sm:$0xff] }
  0xe5   :  { %v195_v28 = vadd.f32 %v4263_v24, %v167_v29  ;;  %v198_v32 = vmax.f32 %v194_v8, 0.0  ;;  %v3440_v8 = vld [vmem:[%s5162_s7 + $0x170] sm:$0xff]  ;;  %v3453_v17 = vld [vmem:[%s5164_s9 + $0x58] sm:$0xff] }
  0xe6   :  { %v201_v25 = vmax.f32 %v197_v12, 0.0  ;;  %2020 = vperm.xlu1 %3837, %v3419_v11   ;;  %v4538_v29 = vpop.permute.xlu1 %847  ;;  %v3452_v11 = vld [vmem:[%s5164_s9 + $0x50] sm:$0xff] }
  0xe7   :  { %v199_v22 = vmax.f32 %v195_v28, 0.0  ;;  %2015 = vperm.xlu0 %3836, %v3418_v14   ;;  %v4497_v39 = vpop.permute.xlu0 %781  ;;  %v3369_v14 = vld [vmem:[%s5156_s1 + $0x28] sm:$0xff] }
  0xe8   :  { %v207_v24 = vpack.c.bf16 %v201_v25, %v200_v33  ;;  %v3368_v25 = vld [vmem:[%s5156_s1 + $0x20] sm:$0xff]  ;;  %vm2355_vm6 = vcmp.gt.f32.partialorder %v3369_v14, 0.5  ;;  %vm786_vm10 = vcmp.eq.s32.totalorder %v4497_v39, 1 }
  0xe9   :  { %v206_v23 = vpack.c.bf16 %v199_v22, %v198_v32  ;;  %v3451_v22 = vld [vmem:[%s5164_s9 + $0x48] sm:$0xff]  ;;  %v3450_v33 = vld [vmem:[%s5164_s9 + $0x40] sm:$0xff]  ;;  %vm2354_vm7 = vcmp.gt.f32.partialorder %v3368_v25, 0.5  ;;  %v3471_v25 = vld [vmem:[%s5158_s3 + $0x78] sm:$0xff] }
  0xea   :  { %2001 = vperm.xlu1 %3837, %v3417_v26   ;;  %v4554_v28 = vpop.permute.xlu1 %937 }
  0xeb   :  { %3654 = vmatprep.subr.bf16.mxu1 %v206_v23  ;;  %1996 = vperm.xlu0 %3836, %v3416_v31   ;;  %v4516_v55 = vpop.permute.xlu0 %794  ;;  %v2356_v31 = vsel %vm2354_vm7, 1, %v5168_v3 }
  0xec   :  { %3655 = vmatpush3.bf16.msra.mxu1 %v206_v23  ;;  %v2357_v23 = vsel %vm2355_vm6, 1, %v5168_v3 }
  0xed   :  { %3656 = vmatprep.subr.bf16.mxu1 %v207_v24 }
  0xee   :  { %2030 = vperm.xlu1 %3837, %v3421_v42   ;;  %v4568_v26 = vpop.permute.xlu1 %857  ;;  %v3459_v42 = vld [vmem:[%s5165_s10 + $0x28] sm:$0xff] }
  0xef   :  { %2025 = vperm.xlu0 %3836, %v3420_v43   ;;  %v4527_v21 = vpop.permute.xlu0 %812  ;;  %v3458_v43 = vld [vmem:[%s5165_s10 + $0x20] sm:$0xff] }
  0xf0   :  { %3657 = vmatpush3.bf16.msra.mxu1 %v207_v24 }
  0xf2   :  { %2060 = vperm.xlu1 %3837, %v3427_v49  }
  0xf3   :  { %3659 = vmatmul.mubr.msk.bf16.vlgmr.msra.gmra.mrb[0].mxu1 %vm242_vm3, %v3841_v46  ;;  %2055 = vperm.xlu0 %3836, %v3426_v51   ;;  %v4543_v12 = vpop.permute.xlu0 %842  ;;  %v4579_v46 = vpop.permute.xlu1 %966  ;;  %v3461_v51 = vld [vmem:[%s5166_s11 + $0x28] sm:$0xff] }
  0xf4   :  { %5170 = vst [vmem:[#allocation5_spill] sm:$0xff] %v4579_v46 }
  0xf6   :  { %2070 = vperm.xlu1 %3837, %v3429_v59   ;;  %v3460_v59 = vld [vmem:[%s5166_s11 + $0x20] sm:$0xff] }
  0xf7   :  { %2065 = vperm.xlu0 %3836, %v3428_v0   ;;  %v4559_v32 = vpop.permute.xlu0 %932  ;;  %v3469_v0 = vld [vmem:[%s5158_s3 + $0x68] sm:$0xff] }
  0xfa   :  { %2161 = vperm.xlu1 %3837, %v3439_v6   ;;  %v4592_v6 = vpop.permute.xlu1 %947 }
  0xfb   :  { %2156 = vperm.xlu0 %3836, %v3438_v20   ;;  %v4571_v24 = vpop.permute.xlu0 %852  ;;  %v3468_v20 = vld [vmem:[%s5158_s3 + $0x60] sm:$0xff] }
  0xfe   :  { %2171 = vperm.xlu1 %3837, %v3441_v7  }
  0xff   :  { %2166 = vperm.xlu0 %3836, %v3440_v8   ;;  %v4581_v49 = vpop.permute.xlu0 %961  ;;  %v3477_v8 = vld [vmem:[%s5159_s4 + $0xc8] sm:$0xff] }
 0x102   :  { %2272 = vperm.xlu1 %3837, %v3453_v17   ;;  %v3476_v17 = vld [vmem:[%s5159_s4 + $0xc0] sm:$0xff] }
 0x103   :  { %2267 = vperm.xlu0 %3836, %v3452_v11   ;;  %v4597_v7 = vpop.permute.xlu0 %942  ;;  %v4605_v11 = vpop.permute.xlu1 %976 }
 0x106   :  { %2262 = vperm.xlu1 %3837, %v3451_v22   ;;  %v3470_v22 = vld [vmem:[%s5158_s3 + $0x70] sm:$0xff] }
 0x107   :  { %2257 = vperm.xlu0 %3836, %v3450_v33   ;;  %v4607_v14 = vpop.permute.xlu0 %971  ;;  %v3481_v33 = vld [vmem:[%s5160_s5 + $0xc8] sm:$0xff] }
 0x108   :  { %5171 = vst [vmem:[#allocation6_spill] sm:$0xff] %v4607_v14 }
 0x10a   :  { %2362 = vperm.xlu1 %3837, %v2357_v23   ;;  %v4618_v23 = vpop.permute.xlu1 %1006 }
 0x10b   :  { %2359 = vperm.xlu0 %3836, %v2356_v31   ;;  %5172 = vst [vmem:[#allocation7_spill] sm:$0xff] %v4618_v23  ;;  %v3480_v31 = vld [vmem:[%s5160_s5 + $0xc0] sm:$0xff] }
 0x10e   :  { %2378 = vperm.xlu1 %3837, %v3459_v42   ;;  %v4623_v42 = vpop.permute.xlu0 %1001 }
 0x10f   :  { %2373 = vperm.xlu0 %3836, %v3458_v43   ;;  %5173 = vst [vmem:[#allocation8_spill] sm:$0xff] %v4623_v42  ;;  %v3479_v43 = vld [vmem:[%s5159_s4 + $0xd8] sm:$0xff] }
 0x112   :  { %2397 = vperm.xlu1 %3837, %v3461_v51   ;;  %v3478_v51 = vld [vmem:[%s5159_s4 + $0xd0] sm:$0xff] }
 0x113   :  { %2392 = vperm.xlu0 %3836, %v3460_v59   ;;  %v4631_v59 = vpop.permute.xlu1 %1016 }
 0x114   :  { %5174 = vst [vmem:[#allocation9_spill] sm:$0xff] %v4631_v59 }
 0x116   :  { %2427 = vperm.xlu1 %3837, %v3469_v0   ;;  %v4633_v0 = vpop.permute.xlu0 %1011 }
 0x117   :  { %2422 = vperm.xlu0 %3836, %v3468_v20   ;;  %5175 = vst [vmem:[#allocation10_spill] sm:$0xff] %v4633_v0  ;;  %v3483_v20 = vld [vmem:[%s5160_s5 + $0xd8] sm:$0xff] }
 0x11a   :  { %2517 = vperm.xlu1 %3837, %v3477_v8   ;;  %v3482_v8 = vld [vmem:[%s5160_s5 + $0xd0] sm:$0xff] }
 0x11b   :  { %2512 = vperm.xlu0 %3836, %v3476_v17   ;;  %v3489_v17 = vld [vmem:[%s5162_s7 + $0x188] sm:$0xff] }
 0x11e   :  { %2437 = vperm.xlu1 %3837, %v3471_v25   ;;  %v4644_v25 = vpop.permute.xlu1 %1107 }
 0x11f   :  { %2432 = vperm.xlu0 %3836, %v3470_v22   ;;  %5176 = vst [vmem:[#allocation11_spill] sm:$0xff] %v4644_v25  ;;  %v3488_v22 = vld [vmem:[%s5162_s7 + $0x180] sm:$0xff]  ;;  %v3509_v25 = vld [vmem:[%s5159_s4 + $0xe8] sm:$0xff] }
 0x122   :  { %2546 = vperm.xlu1 %3837, %v3481_v33   ;;  %v4649_v33 = vpop.permute.xlu0 %1102 }
 0x123   :  { %2541 = vperm.xlu0 %3836, %v3480_v31   ;;  %5177 = vst [vmem:[#allocation12_spill] sm:$0xff] %v4649_v33  ;;  %v3491_v31 = vld [vmem:[%s5162_s7 + $0x198] sm:$0xff] }
 0x126   :  { %2527 = vperm.xlu1 %3837, %v3479_v43   ;;  %v3490_v43 = vld [vmem:[%s5162_s7 + $0x190] sm:$0xff] }
 0x127   :  { %2522 = vperm.xlu0 %3836, %v3478_v51   ;;  %v4657_v51 = vpop.permute.xlu1 %1117 }
 0x128   :  { %5178 = vst [vmem:[#allocation13_spill] sm:$0xff] %v4657_v51 }
 0x12a   :  { %2556 = vperm.xlu1 %3837, %v3483_v20   ;;  %v4659_v20 = vpop.permute.xlu0 %1112 }
 0x12b   :  { %2551 = vperm.xlu0 %3836, %v3482_v8   ;;  %5179 = vst [vmem:[#allocation14_spill] sm:$0xff] %v4659_v20  ;;  %v3501_v8 = vld [vmem:[%s5162_s7 + $0x1a8] sm:$0xff]  ;;  %v4670_v3 = vpop.permute.xlu1 %1201  ;;  %v3553_v20 = vld [vmem:[%s5165_s10 + $0x38] sm:$0xff] }
 0x12c   :  { %5180 = vst [vmem:[#allocation15_spill] sm:$0xff] %v4670_v3 }
 0x12e   :  { %2586 = vperm.xlu1 %3837, %v3489_v17   ;;  %v3500_v17 = vld [vmem:[%s5162_s7 + $0x1a0] sm:$0xff] }
 0x12f   :  { %2581 = vperm.xlu0 %3836, %v3488_v22   ;;  %v3503_v22 = vld [vmem:[%s5162_s7 + $0x1b8] sm:$0xff] }
 0x132   :  { %2596 = vperm.xlu1 %3837, %v3491_v31   ;;  %v3502_v31 = vld [vmem:[%s5162_s7 + $0x1b0] sm:$0xff] }
 0x133   :  { %2591 = vperm.xlu0 %3836, %v3490_v43   ;;  %v4675_v43 = vpop.permute.xlu0 %1196 }
 0x134   :  { %5181 = vst [vmem:[#allocation16_spill] sm:$0xff] %v4675_v43  ;;  %v3513_v43 = vld [vmem:[%s5160_s5 + $0xe8] sm:$0xff] }
 0x136   :  { %2687 = vperm.xlu1 %3837, %v3501_v8   ;;  %v3508_v8 = vld [vmem:[%s5159_s4 + $0xe0] sm:$0xff] }
 0x137   :  { %2682 = vperm.xlu0 %3836, %v3500_v17   ;;  %v4683_v17 = vpop.permute.xlu1 %1230  ;;  %v4685_v3 = vpop.permute.xlu0 %1225 }
 0x138   :  { %5182 = vst [vmem:[#allocation17_spill] sm:$0xff] %v4683_v17  ;;  %5183 = vst [vmem:[#allocation18_spill] sm:$0xff] %v4685_v3  ;;  %v3515_v17 = vld [vmem:[%s5160_s5 + $0xf8] sm:$0xff] }
 0x13a   :  { %2697 = vperm.xlu1 %3837, %v3503_v22   ;;  %v3512_v22 = vld [vmem:[%s5160_s5 + $0xe0] sm:$0xff] }
 0x13b   :  { %2692 = vperm.xlu0 %3836, %v3502_v31   ;;  %v3511_v31 = vld [vmem:[%s5159_s4 + $0xf8] sm:$0xff]  ;;  %v4696_v51 = vpop.permute.xlu1 %1211 }
 0x13c   :  { %5184 = vst [vmem:[#allocation19_spill] sm:$0xff] %v4696_v51  ;;  %v3521_v51 = vld [vmem:[%s5162_s7 + $0x1c8] sm:$0xff] }
 0x13e   :  { %2781 = vperm.xlu1 %3837, %v3509_v25   ;;  %v3510_v25 = vld [vmem:[%s5159_s4 + $0xf0] sm:$0xff] }
 0x13f   :  { %2776 = vperm.xlu0 %3836, %v3508_v8   ;;  %v4701_v8 = vpop.permute.xlu0 %1206 }
 0x140   :  { %5185 = vst [vmem:[#allocation20_spill] sm:$0xff] %v4701_v8 }
 0x142   :  { %2810 = vperm.xlu1 %3837, %v3513_v43   ;;  %v3514_v43 = vld [vmem:[%s5160_s5 + $0xf0] sm:$0xff] }
 0x143   :  { %2805 = vperm.xlu0 %3836, %v3512_v22   ;;  %v4709_v22 = vpop.permute.xlu1 %1240  ;;  %v4711_v3 = vpop.permute.xlu0 %1235 }
 0x144   :  { %5186 = vst [vmem:[#allocation21_spill] sm:$0xff] %v4709_v22  ;;  %5187 = vst [vmem:[#allocation22_spill] sm:$0xff] %v4711_v3  ;;  %v3533_v3 = vld [vmem:[%s5162_s7 + $0x1e8] sm:$0xff] }
 0x146   :  { %2791 = vperm.xlu1 %3837, %v3511_v31   ;;  %v3520_v31 = vld [vmem:[%s5162_s7 + $0x1c0] sm:$0xff] }
 0x147   :  { %2786 = vperm.xlu0 %3836, %v3510_v25   ;;  %v3523_v25 = vld [vmem:[%s5162_s7 + $0x1d8] sm:$0xff]  ;;  %v4722_v8 = vpop.permute.xlu1 %1270 }
 0x148   :  { %5188 = vst [vmem:[#allocation23_spill] sm:$0xff] %v4722_v8 }
 0x14a   :  { %2820 = vperm.xlu1 %3837, %v3515_v17   ;;  %v3522_v17 = vld [vmem:[%s5162_s7 + $0x1d0] sm:$0xff] }
 0x14b   :  { %2815 = vperm.xlu0 %3836, %v3514_v43   ;;  %v4727_v43 = vpop.permute.xlu0 %1265  ;;  %v4739_v8 = vpop.permute.xlu1 %1280 }
 0x14c   :  { %5189 = vst [vmem:[#allocation24_spill] sm:$0xff] %v4727_v43  ;;  %5190 = vst [vmem:[#allocation25_spill] sm:$0xff] %v4739_v8  ;;  %v3463_v8 = vld [vmem:[%s5156_s1 + $0x38] sm:$0xff] }
 0x14d   :  { %vm3145_vm8 = vcmp.gt.f32.partialorder %v3463_v8, 0.5  ;;  %v3552_v8 = vld [vmem:[%s5165_s10 + $0x30] sm:$0xff] }
 0x14e   :  { %2850 = vperm.xlu1 %3837, %v3521_v51   ;;  %v3842_v51 = vld [vmem:[%s5161_s6 + $0x10] sm:$0xff]  }
 0x14f   :  { %2845 = vperm.xlu0 %3836, %v3520_v31   ;;  %v3532_v31 = vld [vmem:[%s5162_s7 + $0x1e0] sm:$0xff]  ;;  %3666 = vmatprep.mubr.msk.bf16.mxu0 %vm242_vm3, %v3842_v51  ;;  %v4741_v43 = vpop.permute.xlu0 %1275  ;;  %v3547_v51 = vld [vmem:[%s5164_s9 + $0x78] sm:$0xff]  ;;  %v4752_v22 = vpop.permute.xlu1 %1371 }
 0x150   :  { %5191 = vst [vmem:[#allocation26_spill] sm:$0xff] %v4741_v43  ;;  %5192 = vst [vmem:[#allocation27_spill] sm:$0xff] %v4752_v22  ;;  %v3544_v22 = vld [vmem:[%s5164_s9 + $0x60] sm:$0xff] }
 0x152   :  { %2860 = vperm.xlu1 %3837, %v3523_v25   ;;  %v3535_v25 = vld [vmem:[%s5162_s7 + $0x1f8] sm:$0xff] }
 0x153   :  { %2855 = vperm.xlu0 %3836, %v3522_v17   ;;  %v3534_v17 = vld [vmem:[%s5162_s7 + $0x1f0] sm:$0xff] }
 0x156   :  { %2951 = vperm.xlu1 %3837, %v3533_v3   ;;  %v3546_v3 = vld [vmem:[%s5164_s9 + $0x70] sm:$0xff] }
 0x157   :  { %2946 = vperm.xlu0 %3836, %v3532_v31   ;;  %v4757_v31 = vpop.permute.xlu0 %1366 }
 0x158   :  { %5193 = vst [vmem:[#allocation28_spill] sm:$0xff] %v4757_v31  ;;  %v4771_v31 = vpop.permute.xlu1 %1381 }
 0x159   :  { %5194 = vst [vmem:[#allocation29_spill] sm:$0xff] %v4771_v31 }
 0x15a   :  { %2961 = vperm.xlu1 %3837, %v3535_v25   ;;  %v3462_v25 = vld [vmem:[%s5156_s1 + $0x30] sm:$0xff] }
 0x15b   :  { %2956 = vperm.xlu0 %3836, %v3534_v17   ;;  %v3545_v17 = vld [vmem:[%s5164_s9 + $0x68] sm:$0xff]  ;;  %vm3144_vm9 = vcmp.gt.f32.partialorder %v3462_v25, 0.5  ;;  %v4773_v43 = vpop.permute.xlu0 %1376 }
 0x15c   :  { %5195 = vst [vmem:[#allocation30_spill] sm:$0xff] %v4773_v43  ;;  %v4780_v23 = vpop.permute.xlu1 %1482 }
 0x15d   :  { %5197 = vst [vmem:[#allocation31_spill] sm:$0xff] %v4780_v23 }
 0x15e   :  { %3062 = vperm.xlu1 %3837, %v3547_v51   ;;  %v5196_v51 = vmov 0  }
 0x15f   :  { %3057 = vperm.xlu0 %3836, %v3546_v3   ;;  %v3147_v33 = vsel %vm3145_vm8, 1, %v5196_v51  ;;  %v3146_v3 = vsel %vm3144_vm9, 1, %v5196_v51  ;;  %v4785_v25 = vpop.permute.xlu0 %1477 }
 0x160   :  { %5198 = vst [vmem:[#allocation32_spill] sm:$0xff] %v4785_v25 }
 0x162   :  { %3052 = vperm.xlu1 %3837, %v3545_v17   ;;  %v4793_v17 = vpop.permute.xlu1 %1472 }
 0x163   :  { %3047 = vperm.xlu0 %3836, %v3544_v22   ;;  %v3555_v22 = vld [vmem:[%s5166_s11 + $0x38] sm:$0xff]  ;;  %5199 = vst [vmem:[#allocation33_spill] sm:$0xff] %v4793_v17  ;;  %v4795_v51 = vpop.permute.xlu0 %1467 }
 0x166   :  { %3152 = vperm.xlu1 %3837, %v3147_v33   ;;  %v3554_v33 = vld [vmem:[%s5166_s11 + $0x30] sm:$0xff] }
 0x167   :  { %3149 = vperm.xlu0 %3836, %v3146_v3  }
 0x16a   :  { %3168 = vperm.xlu1 %3837, %v3553_v20  }
 0x16b   :  { %3163 = vperm.xlu0 %3836, %v3552_v8  }
 0x16e   :  { %3187 = vperm.xlu1 %3837, %v3555_v22  }
 0x16f   :  { %3182 = vperm.xlu0 %3836, %v3554_v33  }
 0x1c6   :  { %v3660_v3 = vpop.f32.mrb[0].mxu1 }
 0x1c7   :  { %v292_v23 = vadd.f32 %v3660_v3, %v4305_v41  ;;  %v283_v25 = vpop.f32.mrb[1].mxu1  ;;  %v3843_v41 = vld [vmem:[%s5161_s6 + $0x18] sm:$0xff]  }
 0x1c8   :  { %v284_v20 = vadd.f32 %v283_v25, %v4295_v37  ;;  %v3661_v8 = vpop.f32.mrb[2].mxu1 }
 0x1c9   :  { %v295_v31 = vadd.f32 %v3661_v8, %v4303_v40  ;;  %v286_v43 = vpop.f32.mrb[3].mxu1  ;;  %v300_v42 = vmax.f32 %v292_v23, 0.0 }
 0x1ca   :  { %v287_v59 = vadd.f32 %v286_v43, %v4293_v36  ;;  %v298_v46 = vmax.f32 %v284_v20, 0.0  ;;  %v3844_v36 = vld [vmem:[%s5161_s6 + $0x20] sm:$0xff]  }
 0x1cb   :  { %v301_v0 = vmax.f32 %v295_v31, 0.0  ;;  %3674 = vmatprep.mubr.msk.bf16.mxu1 %vm242_vm3, %v3844_v36 }
 0x1cc   :  { %v299_v17 = vmax.f32 %v287_v59, 0.0 }
 0x1cd   :  { %v308_v22 = vpack.c.bf16 %v301_v0, %v300_v42 }
 0x1ce   :  { %v307_v14 = vpack.c.bf16 %v299_v17, %v298_v46 }
 0x1d0   :  { %3662 = vmatprep.subr.bf16.mxu0 %v307_v14 }
 0x1d1   :  { %3663 = vmatpush3.bf16.msra.mxu0 %v307_v14 }
 0x1d2   :  { %3664 = vmatprep.subr.bf16.mxu0 %v308_v22 }
 0x1d5   :  { %3665 = vmatpush3.bf16.msra.mxu0 %v308_v22 }
 0x1d8   :  { %3667 = vmatmul.mubr.msk.bf16.vlgmr.msra.gmra.mrb[4].mxu0 %vm242_vm3, %v3843_v41 }
 0x2ab   :  { %v3668_v37 = vpop.f32.mrb[4].mxu0 }
 0x2ac   :  { %v393_v40 = vadd.f32 %v3668_v37, %v4337_v53  ;;  %v384_v46 = vpop.f32.mrb[5].mxu0 }
 0x2ad   :  { %v385_v14 = vadd.f32 %v384_v46, %v4315_v45  ;;  %v3669_v23 = vpop.f32.mrb[6].mxu0 }
 0x2ae   :  { %v401_v42 = vadd.f32 %v393_v40, %v4446_v54  ;;  %v396_v59 = vadd.f32 %v3669_v23, %v4335_v52  ;;  %v387_v0 = vpop.f32.mrb[7].mxu0 }
 0x2af   :  { %v399_v43 = vadd.f32 %v385_v14, %v4449_v58  ;;  %v388_v31 = vadd.f32 %v387_v0, %v4313_v44 }
 0x2b0   :  { %v402_v25 = vadd.f32 %v396_v59, %v4454_v61  ;;  %v430_v33 = vmul.f32 %v4369_v4, %v401_v42 }
 0x2b1   :  { %v428_v17 = vmul.f32 %v4343_v57, %v399_v43  ;;  %v400_v53 = vadd.f32 %v388_v31, %v4463_v13 }
 0x2b2   :  { %v431_v45 = vmul.f32 %v4367_v2, %v402_v25  ;;  %v459_v44 = vadd.f32 %v4385_v10, %v430_v33 }
 0x2b3   :  { %v429_v3 = vmul.f32 %v4341_v56, %v400_v53  ;;  %v457_v54 = vadd.f32 %v4359_v63, %v428_v17  ;;  %v3845_v56 = vld [vmem:[%s5161_s6 + $0x28] sm:$0xff]  }
 0x2b4   :  { %v460_v52 = vadd.f32 %v4383_v9, %v431_v45  ;;  %v463_v22 = vmax.f32 %v459_v44, 0.0 }
 0x2b5   :  { %v458_v58 = vadd.f32 %v4357_v62, %v429_v3  ;;  %v461_v20 = vmax.f32 %v457_v54, 0.0  ;;  %v3846_v62 = vld [vmem:[%s5161_s6 + $0x30] sm:$0xff]  }
 0x2b6   :  { %v464_v8 = vmax.f32 %v460_v52, 0.0  ;;  %3682 = vmatprep.mubr.msk.bf16.mxu0 %vm242_vm3, %v3846_v62 }
 0x2b7   :  { %v462_v61 = vmax.f32 %v458_v58, 0.0 }
 0x2b8   :  { %v471_v57 = vpack.c.bf16 %v464_v8, %v463_v22 }
 0x2b9   :  { %v470_v4 = vpack.c.bf16 %v462_v61, %v461_v20 }
 0x2bb   :  { %3670 = vmatprep.subr.bf16.mxu1 %v470_v4 }
 0x2bc   :  { %3671 = vmatpush3.bf16.msra.mxu1 %v470_v4 }
 0x2bd   :  { %3672 = vmatprep.subr.bf16.mxu1 %v471_v57 }
 0x2c0   :  { %3673 = vmatpush3.bf16.msra.mxu1 %v471_v57 }
 0x2c3   :  { %3675 = vmatmul.mubr.msk.bf16.vlgmr.msra.gmra.mrb[4].mxu1 %vm242_vm3, %v3845_v56 }
 0x396   :  { %v3676_v63 = vpop.f32.mrb[4].mxu1 }
 0x397   :  { %v556_v2 = vadd.f32 %v3676_v63, %v4411_v30  ;;  %v547_v9 = vpop.f32.mrb[5].mxu1  ;;  %v3847_v30 = vld [vmem:[%s5161_s6 + $0x38] sm:$0xff]  }
 0x398   :  { %v548_v10 = vadd.f32 %v547_v9, %v4395_v18  ;;  %v3677_v13 = vpop.f32.mrb[6].mxu1 }
 0x399   :  { %v559_v41 = vadd.f32 %v3677_v13, %v4409_v27  ;;  %v550_v36 = vpop.f32.mrb[7].mxu1  ;;  %v564_v40 = vmax.f32 %v556_v2, 0.0 }
 0x39a   :  { %v551_v37 = vadd.f32 %v550_v36, %v4393_v15  ;;  %v562_v14 = vmax.f32 %v548_v10, 0.0  ;;  %v3848_v15 = vld [vmem:[%s5163_s8] sm:$0xff]  }
 0x39b   :  { %v565_v46 = vmax.f32 %v559_v41, 0.0  ;;  %3690 = vmatprep.mubr.msk.bf16.mxu1 %vm242_vm3, %v3848_v15 }
 0x39c   :  { %v563_v23 = vmax.f32 %v551_v37, 0.0 }
 0x39d   :  { %v572_v59 = vpack.c.bf16 %v565_v46, %v564_v40 }
 0x39e   :  { %v571_v0 = vpack.c.bf16 %v563_v23, %v562_v14 }
 0x3a0   :  { %3678 = vmatprep.subr.bf16.mxu0 %v571_v0 }
 0x3a1   :  { %3679 = vmatpush3.bf16.msra.mxu0 %v571_v0 }
 0x3a2   :  { %3680 = vmatprep.subr.bf16.mxu0 %v572_v59 }
 0x3a5   :  { %3681 = vmatpush3.bf16.msra.mxu0 %v572_v59 }
 0x3a8   :  { %3683 = vmatmul.mubr.msk.bf16.vlgmr.msra.gmra.mrb[8].mxu0 %vm242_vm3, %v3847_v30 }
 0x47b   :  { %v3684_v18 = vpop.f32.mrb[8].mxu0 }
 0x47c   :  { %v657_v27 = vadd.f32 %v3684_v18, %v4437_v48  ;;  %v648_v31 = vpop.f32.mrb[9].mxu0  ;;  %v3849_v48 = vld [vmem:[%s5163_s8 + $0x8] sm:$0xff]  }
 0x47d   :  { %v649_v33 = vadd.f32 %v648_v31, %v4421_v38  ;;  %v3685_v17 = vpop.f32.mrb[10].mxu0 }
 0x47e   :  { %v660_v45 = vadd.f32 %v3685_v17, %v4435_v47  ;;  %v651_v3 = vpop.f32.mrb[11].mxu0  ;;  %v665_v52 = vadd.f32 %v657_v27, %v401_v42  ;;  %v3919_v27 = vld [vmem:[%s5155_s0 + $0x8] sm:$0xff] }
 0x47f   :  { %v652_v54 = vadd.f32 %v651_v3, %v4419_v35  ;;  %v663_v44 = vadd.f32 %v649_v33, %v399_v43  ;;  %v3850_v35 = vld [vmem:[%s5157_s2 + $0x10] sm:$0xff]  }
 0x480   :  { %v666_v58 = vadd.f32 %v660_v45, %v402_v25  ;;  %3696 = vmatprep.mubr.msk.bf16.mxu0 %vm86_vm0, %v3850_v35 }
 0x481   :  { %v664_v20 = vadd.f32 %v652_v54, %v400_v53 }
 0x482   :  { %v672_v61 = vpack.c.bf16 %v666_v58, %v665_v52 }
 0x483   :  { %v671_v8 = vpack.c.bf16 %v664_v20, %v663_v44 }
 0x485   :  { %3686 = vmatprep.subr.bf16.mxu1 %v671_v8 }
 0x486   :  { %3687 = vmatpush3.bf16.msra.mxu1 %v671_v8 }
 0x487   :  { %3688 = vmatprep.subr.bf16.mxu1 %v672_v61 }
 0x48a   :  { %3689 = vmatpush3.bf16.msra.mxu1 %v672_v61 }
 0x48d   :  { %3691 = vmatmul.mubr.msk.bf16.vlgmr.msra.gmra.mrb[8].mxu1 %vm242_vm3, %v3849_v48 }
 0x560   :  { %v3692_v38 = vpop.f32.mrb[8].mxu1 }
 0x561   :  { %v756_v47 = vadd.f32 %v3692_v38, %v4456_v1  ;;  %v747_v42 = vpop.f32.mrb[9].mxu1 }
 0x562   :  { %v3693_v43 = vpop.f32.mrb[10].mxu1  ;;  %v748_v1 = vadd.f32 %v747_v42, %v4487_v16  ;;  %v5201_v42 = vld [vmem:[#allocation5_spill] sm:$0xff] }
 0x563   :  { %v762_v25 = vadd.f32 2.0, %v756_v47  ;;  %v759_v53 = vadd.f32 %v3693_v43, %v4451_v60  ;;  %v750_v4 = vpop.f32.mrb[11].mxu1  ;;  %v5200_v47 = vld [vmem:[#allocation6_spill] sm:$0xff] }
 0x564   :  { %v751_v41 = vadd.f32 %v750_v4, %v4485_v19  ;;  %v804_v60 = vsel %vm786_vm10, %v748_v1, 0.0 }
 0x565   :  { %v764_v22 = vsub.f32 0.0, %v762_v25  ;;  %v763_v57 = vadd.f32 2.0, %v759_v53  ;;  %v806_v14 = vmul.f32 %v804_v60, %v4516_v55 }
 0x566   :  { %v805_v40 = vsel %vm787_vm11, %v751_v41, 0.0 }
 0x567   :  { %v766_v56 = vmul.f32 1.442695, %v764_v22  ;;  %v765_v62 = vsub.f32 0.0, %v763_v57  ;;  %v807_v0 = vmul.f32 %v805_v40, %v4511_v50  ;;  %v820_v19 = vadd.f32 %v4527_v21, %v806_v14  ;;  %v5203_v57 = vld [vmem:[#allocation8_spill] sm:$0xff]  ;;  %v3856_v14 = vld [vmem:[%s5161_s6 + $0x60] sm:$0xff]  }
 0x569   :  { %3886 = vpow2.f32 %v766_v56  ;;  %v768_v63 = vmul.f32 1.442695, %v765_v62  ;;  %v821_v18 = vadd.f32 %v4525_v5, %v807_v0  ;;  %v3852_v5 = vld [vmem:[%s5161_s6 + $0x40] sm:$0xff]  }
 0x56a   :  { %3704 = vmatprep.mubr.msk.bf16.mxu1 %vm242_vm3, %v3852_v5 }
 0x56b   :  { %3888 = vpow2.f32 %v768_v63  ;;  %v5204_v63 = vld [vmem:[#allocation9_spill] sm:$0xff] }
 0x573   :  { %v3887_v2 = vpop.eup %3886 }
 0x574   :  { %v770_v9 = vadd.f32 1.0, %v3887_v2 }
 0x575   :  { %v3889_v10 = vpop.eup %3888 }
 0x576   :  { %3890 = vrcp.f32 %v770_v9  ;;  %v771_v13 = vadd.f32 1.0, %v3889_v10  ;;  %v5205_v10 = vld [vmem:[#allocation7_spill] sm:$0xff] }
 0x578   :  { %3892 = vrcp.f32 %v771_v13 }
 0x580   :  { %v3891_v36 = vpop.eup %3890 }
 0x581   :  { %v774_v37 = vadd.f32 0.001, %v3891_v36 }
 0x582   :  { %v3893_v46 = vpop.eup %3892 }
 0x583   :  { %v788_v23 = vsel %vm786_vm10, %v774_v37, 1.0  ;;  %v775_v59 = vadd.f32 0.001, %v3893_v46  ;;  %v3855_v46 = vld [vmem:[%s5161_s6 + $0x58] sm:$0xff]  }
 0x584   :  { %v802_v30 = vmul.f32 %v4516_v55, %v788_v23 }
 0x585   :  { %v789_v16 = vsel %vm787_vm11, %v775_v59, 1.0  ;;  %v5206_v59 = vld [vmem:[#allocation14_spill] sm:$0xff] }
 0x586   :  { %v803_v39 = vmul.f32 %v4511_v50, %v789_v16  ;;  %v822_v15 = vmul.f32 %v3918_v34, %v802_v30  ;;  %v3851_v50 = vld [vmem:[%s5157_s2 + $0x18] sm:$0xff]   ;;  %v5207_v16 = vld [vmem:[#allocation12_spill] sm:$0xff] }
 0x588   :  { %v823_v31 = vmul.f32 %v3919_v27, %v803_v39  ;;  %v4875_v33 = vadd.f32 %v822_v15, %v820_v19  ;;  %v5208_v15 = vld [vmem:[#allocation13_spill] sm:$0xff] }
 0x58a   :  { %v4877_v55 = vadd.f32 %v823_v31, %v821_v18 }
 0x58c   :  { %v834_v21 = vpack.c.bf16 %v4877_v55, %v4875_v33 }
 0x58e   :  { %3694 = vmatprep.subr.bf16.mxu0 %v834_v21 }
 0x58f   :  { %3695 = vmatpush3.bf16.msra.mxu0 %v834_v21  ;;  %v5209_v21 = vld [vmem:[#allocation11_spill] sm:$0xff] }
 0x592   :  { %3697 = vmatmul.mubr.msk.bf16.vlgmr.msra.gmra.mrb[12].mxu0 %vm86_vm0, %v3851_v50 }
 0x665   :  { %v3698_v17 = vpop.f32.mrb[12].mxu0 }
 0x666   :  { %v919_v45 = vadd.f32 %v3698_v17, %v4571_v24  ;;  %v910_v3 = vpop.f32.mrb[13].mxu0  ;;  %v5210_v17 = vld [vmem:[#allocation20_spill] sm:$0xff] }
 0x667   :  { %v911_v54 = vadd.f32 %v910_v3, %v4543_v12  ;;  %v3699_v52 = vpop.f32.mrb[14].mxu0 }
 0x668   :  { %v922_v58 = vadd.f32 %v3699_v52, %v4568_v26  ;;  %v913_v44 = vpop.f32.mrb[15].mxu0  ;;  %v952_v20 = vmul.f32 %v4597_v7, %v919_v45  ;;  %v5211_v52 = vld [vmem:[#allocation16_spill] sm:$0xff] }
 0x669   :  { %v950_v61 = vmul.f32 %v4559_v32, %v911_v54  ;;  %v914_v8 = vadd.f32 %v913_v44, %v4538_v29  ;;  %v3853_v29 = vld [vmem:[%s5161_s6 + $0x48] sm:$0xff]  }
 0x66a   :  { %v953_v48 = vmul.f32 %v4592_v6, %v922_v58  ;;  %v981_v12 = vadd.f32 %v5200_v47, %v952_v20  ;;  %v5202_v6 = vld [vmem:[#allocation10_spill] sm:$0xff] }
 0x66b   :  { %v979_v35 = vadd.f32 %v4581_v49, %v950_v61  ;;  %v951_v38 = vmul.f32 %v4554_v28, %v914_v8  ;;  %v3854_v28 = vld [vmem:[%s5161_s6 + $0x50] sm:$0xff]   ;;  %v5212_v61 = vld [vmem:[#allocation19_spill] sm:$0xff] }
 0x66c   :  { %v982_v24 = vadd.f32 %v4605_v11, %v953_v48  ;;  %v985_v7 = vmax.f32 %v981_v12, 0.0  ;;  %3712 = vmatprep.mubr.msk.bf16.mxu0 %vm242_vm3, %v3854_v28  ;;  %v5215_v12 = vld [vmem:[#allocation21_spill] sm:$0xff] }
 0x66d   :  { %v980_v43 = vadd.f32 %v5201_v42, %v951_v38  ;;  %v983_v26 = vmax.f32 %v979_v35, 0.0  ;;  %v5213_v35 = vld [vmem:[#allocation15_spill] sm:$0xff]  ;;  %v5216_v42 = vld [vmem:[#allocation17_spill] sm:$0xff] }
 0x66e   :  { %v986_v25 = vmax.f32 %v982_v24, 0.0  ;;  %v5214_v24 = vld [vmem:[#allocation18_spill] sm:$0xff] }
 0x66f   :  { %v984_v53 = vmax.f32 %v980_v43, 0.0 }
 0x670   :  { %v993_v32 = vpack.c.bf16 %v986_v25, %v985_v7 }
 0x671   :  { %v992_v4 = vpack.c.bf16 %v984_v53, %v983_v26  ;;  %v5217_v26 = vld [vmem:[#allocation22_spill] sm:$0xff] }
 0x673   :  { %3700 = vmatprep.subr.bf16.mxu1 %v992_v4 }
 0x674   :  { %3701 = vmatpush3.bf16.msra.mxu1 %v992_v4 }
 0x675   :  { %3702 = vmatprep.subr.bf16.mxu1 %v993_v32 }
 0x678   :  { %3703 = vmatpush3.bf16.msra.mxu1 %v993_v32 }
 0x67b   :  { %3705 = vmatmul.mubr.msk.bf16.vlgmr.msra.gmra.mrb[12].mxu1 %vm242_vm3, %v3853_v29  ;;  %v3858_v29 = vld [vmem:[%s5161_s6 + $0x70] sm:$0xff]  }
 0x67c   :  { %3720 = vmatprep.mubr.msk.bf16.mxu1 %vm242_vm3, %v3856_v14 }
 0x74e   :  { %v3706_v49 = vpop.f32.mrb[12].mxu1 }
 0x74f   :  { %v1078_v11 = vadd.f32 %v3706_v49, %v5202_v6  ;;  %v1069_v22 = vpop.f32.mrb[13].mxu1  ;;  %v5218_v49 = vld [vmem:[#allocation26_spill] sm:$0xff] }
 0x750   :  { %v1070_v56 = vadd.f32 %v1069_v22, %v5203_v57  ;;  %v3707_v62 = vpop.f32.mrb[14].mxu1  ;;  %v5219_v22 = vld [vmem:[#allocation24_spill] sm:$0xff] }
 0x751   :  { %v1081_v2 = vadd.f32 %v3707_v62, %v5204_v63  ;;  %v1072_v9 = vpop.f32.mrb[15].mxu1  ;;  %v1086_v1 = vmax.f32 %v1078_v11, 0.0  ;;  %v5220_v62 = vld [vmem:[#allocation25_spill] sm:$0xff] }
 0x752   :  { %v1073_v13 = vadd.f32 %v1072_v9, %v5205_v10  ;;  %v1084_v60 = vmax.f32 %v1070_v56, 0.0  ;;  %v5221_v9 = vld [vmem:[#allocation23_spill] sm:$0xff] }
 0x753   :  { %v1087_v41 = vmax.f32 %v1081_v2, 0.0 }
 0x754   :  { %v1085_v36 = vmax.f32 %v1073_v13, 0.0 }
 0x755   :  { %v1094_v37 = vpack.c.bf16 %v1087_v41, %v1086_v1 }
 0x756   :  { %v1093_v40 = vpack.c.bf16 %v1085_v36, %v1084_v60 }
 0x758   :  { %3708 = vmatprep.subr.bf16.mxu0 %v1093_v40 }
 0x759   :  { %3709 = vmatpush3.bf16.msra.mxu0 %v1093_v40  ;;  %v3859_v40 = vld [vmem:[%s5161_s6 + $0x78] sm:$0xff]  }
 0x75a   :  { %3710 = vmatprep.subr.bf16.mxu0 %v1094_v37 }
 0x75d   :  { %3711 = vmatpush3.bf16.msra.mxu0 %v1094_v37 }
 0x760   :  { %3713 = vmatmul.mubr.msk.bf16.vlgmr.msra.gmra.mrb[16].mxu0 %vm242_vm3, %v3855_v46  ;;  %v3860_v46 = vld [vmem:[%s5163_s8 + $0x10] sm:$0xff]  }
 0x761   :  { %3728 = vmatprep.mubr.msk.bf16.mxu0 %vm242_vm3, %v3858_v29 }
 0x833   :  { %v3714_v23 = vpop.f32.mrb[16].mxu0 }
 0x834   :  { %v1179_v0 = vadd.f32 %v3714_v23, %v5206_v59  ;;  %v1170_v30 = vpop.f32.mrb[17].mxu0  ;;  %v5222_v23 = vld [vmem:[#allocation30_spill] sm:$0xff] }
 0x835   :  { %v1171_v19 = vadd.f32 %v1170_v30, %v5207_v16  ;;  %v3715_v39 = vpop.f32.mrb[18].mxu0  ;;  %v5223_v30 = vld [vmem:[#allocation28_spill] sm:$0xff] }
 0x836   :  { %v1187_v34 = vadd.f32 %v1179_v0, %v919_v45  ;;  %v1182_v18 = vadd.f32 %v3715_v39, %v5208_v15  ;;  %v1173_v27 = vpop.f32.mrb[19].mxu0  ;;  %v5224_v39 = vld [vmem:[#allocation29_spill] sm:$0xff] }
 0x837   :  { %v1185_v31 = vadd.f32 %v1171_v19, %v911_v54  ;;  %v1174_v50 = vadd.f32 %v1173_v27, %v5209_v21  ;;  %v5225_v27 = vld [vmem:[#allocation27_spill] sm:$0xff] }
 0x838   :  { %v1188_v5 = vadd.f32 %v1182_v18, %v922_v58  ;;  %v1216_v3 = vmul.f32 %v5210_v17, %v1187_v34 }
 0x839   :  { %v1214_v44 = vmul.f32 %v5211_v52, %v1185_v31  ;;  %v1186_v20 = vadd.f32 %v1174_v50, %v914_v8  ;;  %v3857_v8 = vld [vmem:[%s5161_s6 + $0x68] sm:$0xff]  }
 0x83a   :  { %v1217_v48 = vmul.f32 %v5212_v61, %v1188_v5  ;;  %v1245_v54 = vadd.f32 %v5217_v26, %v1216_v3 }
 0x83b   :  { %v1215_v38 = vmul.f32 %v5213_v35, %v1186_v20  ;;  %v1243_v47 = vadd.f32 %v5214_v24, %v1214_v44  ;;  %v3862_v35 = vld [vmem:[%s5157_s2 + $0x20] sm:$0xff]  }
 0x83c   :  { %v1246_v45 = vadd.f32 %v5215_v12, %v1217_v48  ;;  %v1249_v4 = vmax.f32 %v1245_v54, 0.0  ;;  %v3861_v48 = vld [vmem:[%s5163_s8 + $0x18] sm:$0xff]  }
 0x83d   :  { %v1244_v43 = vadd.f32 %v5216_v42, %v1215_v38  ;;  %v1247_v25 = vmax.f32 %v1243_v47, 0.0  ;;  %v5227_v47 = vld [vmem:[#allocation31_spill] sm:$0xff] }
 0x83e   :  { %v1250_v58 = vmax.f32 %v1246_v45, 0.0 }
 0x83f   :  { %v1248_v53 = vmax.f32 %v1244_v43, 0.0 }
 0x840   :  { %v1257_v32 = vpack.c.bf16 %v1250_v58, %v1249_v4 }
 0x841   :  { %v1256_v7 = vpack.c.bf16 %v1248_v53, %v1247_v25 }
 0x843   :  { %3716 = vmatprep.subr.bf16.mxu1 %v1256_v7 }
 0x844   :  { %3717 = vmatpush3.bf16.msra.mxu1 %v1256_v7 }
 0x845   :  { %3718 = vmatprep.subr.bf16.mxu1 %v1257_v32 }
 0x848   :  { %3719 = vmatpush3.bf16.msra.mxu1 %v1257_v32  ;;  %v1570_v32 = vpop.permute.xlu0 %1569 }
 0x849   :  { %vm1574_vm12 = vcmp.eq.s32.totalorder %v1570_v32, 1  ;;  %v3865_v32 = vld [vmem:[%s5161_s6 + $0x88] sm:$0xff]  }
 0x84b   :  { %3721 = vmatmul.mubr.msk.bf16.vlgmr.msra.gmra.mrb[16].mxu1 %vm242_vm3, %v3857_v8  ;;  %v1573_v8 = vpop.permute.xlu1 %1572 }
 0x84c   :  { %3736 = vmatprep.mubr.msk.bf16.mxu1 %vm242_vm3, %v3860_v46  ;;  %vm1575_vm13 = vcmp.eq.s32.totalorder %v1573_v8, 1  ;;  %v3866_v8 = vld [vmem:[%s5161_s6 + $0x90] sm:$0xff]  }
 0x91e   :  { %v3722_v28 = vpop.f32.mrb[16].mxu1 }
 0x91f   :  { %v1342_v6 = vadd.f32 %v3722_v28, %v5218_v49  ;;  %v1333_v11 = vpop.f32.mrb[17].mxu1  ;;  %v5228_v28 = vld [vmem:[#allocation33_spill] sm:$0xff] }
 0x920   :  { %v1334_v57 = vadd.f32 %v1333_v11, %v5219_v22  ;;  %v3723_v56 = vpop.f32.mrb[18].mxu1 }
 0x921   :  { %v1345_v63 = vadd.f32 %v3723_v56, %v5220_v62  ;;  %v1336_v2 = vpop.f32.mrb[19].mxu1  ;;  %v1350_v13 = vmax.f32 %v1342_v6, 0.0  ;;  %v1584_v6 = vpop.permute.xlu0 %1583 }
 0x922   :  { %v1337_v10 = vadd.f32 %v1336_v2, %v5221_v9  ;;  %v1348_v41 = vmax.f32 %v1334_v57, 0.0  ;;  %v1589_v57 = vpop.permute.xlu1 %1588 }
 0x923   :  { %v1351_v1 = vmax.f32 %v1345_v63, 0.0 }
 0x924   :  { %v1349_v60 = vmax.f32 %v1337_v10, 0.0 }
 0x925   :  { %v1358_v36 = vpack.c.bf16 %v1351_v1, %v1350_v13 }
 0x926   :  { %v1357_v37 = vpack.c.bf16 %v1349_v60, %v1348_v41  ;;  %v1603_v41 = vpop.permute.xlu0 %1602 }
 0x928   :  { %3724 = vmatprep.subr.bf16.mxu0 %v1357_v37 }
 0x929   :  { %3725 = vmatpush3.bf16.msra.mxu0 %v1357_v37 }
 0x92a   :  { %3726 = vmatprep.subr.bf16.mxu0 %v1358_v36 }
 0x92d   :  { %3727 = vmatpush3.bf16.msra.mxu0 %v1358_v36 }
 0x930   :  { %3729 = vmatmul.mubr.msk.bf16.vlgmr.msra.gmra.mrb[20].mxu0 %vm242_vm3, %v3859_v40  ;;  %v1608_v40 = vpop.permute.xlu1 %1607 }
 0x931   :  { %3742 = vmatprep.mubr.msk.bf16.mxu0 %vm86_vm0, %v3862_v35 }
 0xa03   :  { %v3730_v14 = vpop.f32.mrb[20].mxu0 }
 0xa04   :  { %v1443_v59 = vadd.f32 %v3730_v14, %v5222_v23  ;;  %v1434_v0 = vpop.f32.mrb[21].mxu0 }
 0xa05   :  { %v1435_v16 = vadd.f32 %v1434_v0, %v5223_v30  ;;  %v3731_v19 = vpop.f32.mrb[22].mxu0  ;;  %v3863_v30 = vld [vmem:[%s5157_s2 + $0x28] sm:$0xff]  }
 0xa06   :  { %v1446_v15 = vadd.f32 %v3731_v19, %v5224_v39  ;;  %v1437_v18 = vpop.f32.mrb[23].mxu0  ;;  %v1451_v50 = vadd.f32 %v1443_v59, %v1187_v34 }
 0xa07   :  { %v1438_v21 = vadd.f32 %v1437_v18, %v5225_v27  ;;  %v1449_v3 = vadd.f32 %v1435_v16, %v1185_v31  ;;  %v5226_v31 = vld [vmem:[#allocation32_spill] sm:$0xff]  ;;  %v1633_v16 = vpop.permute.xlu0 %1632 }
 0xa08   :  { %v1452_v17 = vadd.f32 %v1446_v15, %v1188_v5 }
 0xa09   :  { %v1450_v52 = vadd.f32 %v1438_v21, %v1186_v20 }
 0xa0a   :  { %v1459_v44 = vpack.c.bf16 %v1452_v17, %v1451_v50 }
 0xa0b   :  { %v1458_v61 = vpack.c.bf16 %v1450_v52, %v1449_v3  ;;  %v1723_v39 = vpop.permute.xlu0 %1722 }
 0xa0d   :  { %3732 = vmatprep.subr.bf16.mxu1 %v1458_v61 }
 0xa0e   :  { %3733 = vmatpush3.bf16.msra.mxu1 %v1458_v61 }
 0xa0f   :  { %3734 = vmatprep.subr.bf16.mxu1 %v1459_v44  ;;  %v1643_v18 = vpop.permute.xlu0 %1642 }
 0xa12   :  { %3735 = vmatpush3.bf16.msra.mxu1 %v1459_v44 }
 0xa13   :  { %v1752_v21 = vpop.permute.xlu0 %1751 }
 0xa15   :  { %3737 = vmatmul.mubr.msk.bf16.vlgmr.msra.gmra.mrb[20].mxu1 %vm242_vm3, %v3861_v48 }
 0xa17   :  { %v1733_v3 = vpop.permute.xlu0 %1732 }
 0xae8   :  { %v3738_v34 = vpop.f32.mrb[20].mxu1 }
 0xae9   :  { %v1544_v5 = vadd.f32 %v3738_v34, %v5226_v31  ;;  %v1535_v20 = vpop.f32.mrb[21].mxu1 }
 0xaea   :  { %v3739_v38 = vpop.f32.mrb[22].mxu1  ;;  %v1536_v29 = vadd.f32 %v1535_v20, %v4795_v51 }
 0xaeb   :  { %v1550_v24 = vadd.f32 2.0, %v1544_v5  ;;  %v1547_v12 = vadd.f32 %v3739_v38, %v5227_v47  ;;  %v1538_v45 = vpop.f32.mrb[23].mxu1 }
 0xaec   :  { %v1539_v49 = vadd.f32 %v1538_v45, %v5228_v28  ;;  %v1593_v11 = vsel %vm1574_vm12, %v1536_v29, 0.0  ;;  %v1762_v45 = vpop.permute.xlu0 %1761 }
 0xaed   :  { %v1552_v42 = vsub.f32 0.0, %v1550_v24  ;;  %v1551_v43 = vadd.f32 2.0, %v1547_v12  ;;  %v1595_v2 = vmul.f32 %v1593_v11, %v1584_v6 }
 0xaee   :  { %v1594_v62 = vsel %vm1575_vm13, %v1539_v49, 0.0 }
 0xaef   :  { %v1554_v26 = vmul.f32 1.442695, %v1552_v42  ;;  %v1553_v54 = vsub.f32 0.0, %v1551_v43  ;;  %v1596_v13 = vmul.f32 %v1594_v62, %v1589_v57  ;;  %v1610_v36 = vadd.f32 %v1603_v41, %v1595_v2 }
 0xaf0   :  { %v1792_v29 = vpop.permute.xlu0 %1791 }
 0xaf1   :  { %3894 = vpow2.f32 %v1554_v26  ;;  %v1556_v25 = vmul.f32 1.442695, %v1553_v54  ;;  %v1611_v46 = vadd.f32 %v1608_v40, %v1596_v13 }
 0xaf3   :  { %3896 = vpow2.f32 %v1556_v25 }
 0xaf4   :  { %v1802_v49 = vpop.permute.xlu0 %1801 }
 0xafb   :  { %v3895_v53 = vpop.eup %3894 }
 0xafc   :  { %v1558_v58 = vadd.f32 1.0, %v3895_v53 }
 0xafd   :  { %v3897_v7 = vpop.eup %3896 }
 0xafe   :  { %3898 = vrcp.f32 %v1558_v58  ;;  %v1559_v4 = vadd.f32 1.0, %v3897_v7 }
 0xb00   :  { %3900 = vrcp.f32 %v1559_v4 }
 0xb08   :  { %v3899_v22 = vpop.eup %3898 }
 0xb09   :  { %v1562_v56 = vadd.f32 0.001, %v3899_v22 }
 0xb0a   :  { %v3901_v63 = vpop.eup %3900 }
 0xb0b   :  { %v1576_v9 = vsel %vm1574_vm12, %v1562_v56, 1.0  ;;  %v1563_v10 = vadd.f32 0.001, %v3901_v63 }
 0xb0c   :  { %v1591_v1 = vmul.f32 %v1584_v6, %v1576_v9 }
 0xb0d   :  { %v1577_v60 = vsel %vm1575_vm13, %v1563_v10, 1.0 }
 0xb0e   :  { %v1592_v51 = vmul.f32 %v1589_v57, %v1577_v60  ;;  %v1612_v37 = vmul.f32 %v1591_v1, %v4875_v33  ;;  %v3864_v33 = vld [vmem:[%s5161_s6 + $0x80] sm:$0xff]  }
 0xb0f   :  { %3750 = vmatprep.mubr.msk.bf16.mxu1 %vm242_vm3, %v3864_v33 }
 0xb10   :  { %v1613_v14 = vmul.f32 %v1592_v51, %v4877_v55  ;;  %v4971_v23 = vadd.f32 %v1612_v37, %v1610_v36  ;;  %v1638_v55 = vpop.permute.xlu1 %1637  ;;  %v3867_v51 = vld [vmem:[%s5161_s6 + $0x98] sm:$0xff]   ;;  %v3868_v37 = vld [vmem:[%s5161_s6 + $0xa0] sm:$0xff]  }
 0xb12   :  { %v4973_v59 = vadd.f32 %v1613_v14, %v1611_v46  ;;  %v1893_v46 = vpop.permute.xlu0 %1892 }
 0xb14   :  { %v1624_v0 = vpack.c.bf16 %v4973_v59, %v4971_v23  ;;  %v1728_v19 = vpop.permute.xlu1 %1727 }
 0xb16   :  { %3740 = vmatprep.subr.bf16.mxu0 %v1624_v0 }
 0xb17   :  { %3741 = vmatpush3.bf16.msra.mxu0 %v1624_v0  ;;  %v1903_v0 = vpop.permute.xlu0 %1902 }
 0xb18   :  { %v1648_v15 = vpop.permute.xlu1 %1647 }
 0xb1a   :  { %3743 = vmatmul.mubr.msk.bf16.vlgmr.msra.gmra.mrb[24].mxu0 %vm86_vm0, %v3863_v30 }
 0xb1b   :  { %3758 = vmatprep.mubr.msk.bf16.mxu0 %vm242_vm3, %v3866_v8  ;;  %v1987_v33 = vpop.permute.xlu0 %1986 }
 0xb1c   :  { %v1757_v27 = vpop.permute.xlu1 %1756 }
 0xb20   :  { %v1738_v50 = vpop.permute.xlu1 %1737 }
 0xb24   :  { %v1767_v24 = vpop.permute.xlu1 %1766 }
 0xb28   :  { %v1797_v28 = vpop.permute.xlu1 %1796 }
 0xb2c   :  { %v1807_v57 = vpop.permute.xlu1 %1806 }
 0xb30   :  { %v1898_v40 = vpop.permute.xlu1 %1897 }
 0xb34   :  { %v1908_v14 = vpop.permute.xlu1 %1907 }
 0xb38   :  { %v1992_v30 = vpop.permute.xlu1 %1991 }
 0xbed   :  { %v3744_v17 = vpop.f32.mrb[24].mxu0 }
 0xbee   :  { %v4985_v52 = vadd.f32 %v3744_v17, %v1643_v18  ;;  %v1700_v44 = vpop.f32.mrb[25].mxu0 }
 0xbef   :  { %v4987_v61 = vadd.f32 %v1700_v44, %v1633_v16  ;;  %v3745_v48 = vpop.f32.mrb[26].mxu0  ;;  %v2016_v16 = vpop.permute.xlu0 %2015 }
 0xbf0   :  { %v4989_v35 = vadd.f32 %v3745_v48, %v1648_v15  ;;  %v1703_v34 = vpop.f32.mrb[27].mxu0  ;;  %v1742_v31 = vmul.f32 %v1733_v3, %v4985_v52 }
 0xbf1   :  { %v1740_v5 = vmul.f32 %v1723_v39, %v4987_v61  ;;  %v4993_v20 = vadd.f32 %v1703_v34, %v1638_v55  ;;  %v2021_v55 = vpop.permute.xlu1 %2020 }
 0xbf2   :  { %v1743_v38 = vmul.f32 %v1738_v50, %v4989_v35  ;;  %v1771_v43 = vadd.f32 %v1762_v45, %v1742_v31 }
 0xbf3   :  { %v1769_v47 = vadd.f32 %v1752_v21, %v1740_v5  ;;  %v1741_v12 = vmul.f32 %v1728_v19, %v4993_v20  ;;  %v1997_v50 = vpop.permute.xlu0 %1996 }
 0xbf4   :  { %v1772_v42 = vadd.f32 %v1767_v24, %v1743_v38  ;;  %v1775_v58 = vmax.f32 %v1771_v43, 0.0 }
 0xbf5   :  { %v1770_v26 = vadd.f32 %v1757_v27, %v1741_v12  ;;  %v1773_v54 = vmax.f32 %v1769_v47, 0.0  ;;  %v2002_v18 = vpop.permute.xlu1 %2001 }
 0xbf6   :  { %v1776_v25 = vmax.f32 %v1772_v42, 0.0 }
 0xbf7   :  { %v1774_v53 = vmax.f32 %v1770_v26, 0.0  ;;  %v2026_v42 = vpop.permute.xlu0 %2025 }
 0xbf8   :  { %v1783_v4 = vpack.c.bf16 %v1776_v25, %v1775_v58 }
 0xbf9   :  { %v1782_v7 = vpack.c.bf16 %v1774_v53, %v1773_v54 }
 0xbfb   :  { %3746 = vmatprep.subr.bf16.mxu1 %v1782_v7 }
 0xbfc   :  { %3747 = vmatpush3.bf16.msra.mxu1 %v1782_v7 }
 0xbfd   :  { %3748 = vmatprep.subr.bf16.mxu1 %v1783_v4 }
 0xc00   :  { %3749 = vmatpush3.bf16.msra.mxu1 %v1783_v4  ;;  %v3870_v4 = vld [vmem:[%s5161_s6 + $0xb0] sm:$0xff]  }
 0xc03   :  { %3751 = vmatmul.mubr.msk.bf16.vlgmr.msra.gmra.mrb[24].mxu1 %vm242_vm3, %v3865_v32  ;;  %v2056_v32 = vpop.permute.xlu0 %2055 }
 0xc04   :  { %3766 = vmatprep.mubr.msk.bf16.mxu1 %vm242_vm3, %v3868_v37 }
 0xcd6   :  { %v3752_v6 = vpop.f32.mrb[24].mxu1 }
 0xcd7   :  { %v1868_v11 = vadd.f32 %v3752_v6, %v1802_v49  ;;  %v1859_v22 = vpop.f32.mrb[25].mxu1 }
 0xcd8   :  { %v1860_v56 = vadd.f32 %v1859_v22, %v1792_v29  ;;  %v3753_v62 = vpop.f32.mrb[26].mxu1  ;;  %v2066_v29 = vpop.permute.xlu0 %2065 }
 0xcd9   :  { %v1871_v63 = vadd.f32 %v3753_v62, %v1807_v57  ;;  %v1862_v2 = vpop.f32.mrb[27].mxu1  ;;  %v1876_v10 = vmax.f32 %v1868_v11, 0.0 }
 0xcda   :  { %v1863_v9 = vadd.f32 %v1862_v2, %v1797_v28  ;;  %v1874_v1 = vmax.f32 %v1860_v56, 0.0 }
 0xcdb   :  { %v1877_v13 = vmax.f32 %v1871_v63, 0.0 }
 0xcdc   :  { %v1875_v41 = vmax.f32 %v1863_v9, 0.0 }
 0xcdd   :  { %v1884_v60 = vpack.c.bf16 %v1877_v13, %v1876_v10 }
 0xcde   :  { %v1883_v36 = vpack.c.bf16 %v1875_v41, %v1874_v1 }
 0xce0   :  { %3754 = vmatprep.subr.bf16.mxu0 %v1883_v36 }
 0xce1   :  { %3755 = vmatpush3.bf16.msra.mxu0 %v1883_v36  ;;  %v3872_v36 = vld [vmem:[%s5163_s8 + $0x20] sm:$0xff]  }
 0xce2   :  { %3756 = vmatprep.subr.bf16.mxu0 %v1884_v60 }
 0xce5   :  { %3757 = vmatpush3.bf16.msra.mxu0 %v1884_v60  ;;  %v3871_v60 = vld [vmem:[%s5161_s6 + $0xb8] sm:$0xff]  }
 0xce8   :  { %3759 = vmatmul.mubr.msk.bf16.vlgmr.msra.gmra.mrb[28].mxu0 %vm242_vm3, %v3867_v51  ;;  %v2157_v51 = vpop.permute.xlu0 %2156 }
 0xce9   :  { %3774 = vmatprep.mubr.msk.bf16.mxu0 %vm242_vm3, %v3870_v4 }
 0xdbb   :  { %v3760_v19 = vpop.f32.mrb[28].mxu0 }
 0xdbc   :  { %v1969_v39 = vadd.f32 %v3760_v19, %v1903_v0  ;;  %v1960_v15 = vpop.f32.mrb[29].mxu0 }
 0xdbd   :  { %v1961_v27 = vadd.f32 %v1960_v15, %v1893_v46  ;;  %v3761_v21 = vpop.f32.mrb[30].mxu0 }
 0xdbe   :  { %v5014_v17 = vadd.f32 %v1969_v39, %v4985_v52  ;;  %v1972_v3 = vadd.f32 %v3761_v21, %v1908_v14  ;;  %v1963_v44 = vpop.f32.mrb[31].mxu0  ;;  %v2031_v52 = vpop.permute.xlu1 %2030 }
 0xdbf   :  { %v5017_v48 = vadd.f32 %v1961_v27, %v4987_v61  ;;  %v1964_v34 = vadd.f32 %v1963_v44, %v1898_v40  ;;  %v2167_v40 = vpop.permute.xlu0 %2166  ;;  %v3873_v44 = vld [vmem:[%s5163_s8 + $0x28] sm:$0xff]  }
 0xdc0   :  { %v5020_v31 = vadd.f32 %v1972_v3, %v4989_v35  ;;  %v2006_v5 = vmul.f32 %v1997_v50, %v5014_v17 }
 0xdc1   :  { %v2004_v38 = vmul.f32 %v1987_v33, %v5017_v48  ;;  %v5025_v24 = vadd.f32 %v1964_v34, %v4993_v20  ;;  %v3869_v20 = vld [vmem:[%s5161_s6 + $0xa8] sm:$0xff]  }
 0xdc2   :  { %v2007_v47 = vmul.f32 %v2002_v18, %v5020_v31  ;;  %v2035_v26 = vadd.f32 %v2026_v42, %v2006_v5  ;;  %v2061_v8 = vpop.permute.xlu1 %2060 }
 0xdc3   :  { %v2005_v12 = vmul.f32 %v1992_v30, %v5025_v24  ;;  %v2033_v45 = vadd.f32 %v2016_v16, %v2004_v38 }
 0xdc4   :  { %v2036_v61 = vadd.f32 %v2031_v52, %v2007_v47  ;;  %v2039_v58 = vmax.f32 %v2035_v26, 0.0 }
 0xdc5   :  { %v2034_v43 = vadd.f32 %v2021_v55, %v2005_v12  ;;  %v2037_v54 = vmax.f32 %v2033_v45, 0.0 }
 0xdc6   :  { %v2040_v25 = vmax.f32 %v2036_v61, 0.0  ;;  %v2071_v11 = vpop.permute.xlu1 %2070 }
 0xdc7   :  { %v2038_v35 = vmax.f32 %v2034_v43, 0.0 }
 0xdc8   :  { %v2047_v7 = vpack.c.bf16 %v2040_v25, %v2039_v58 }
 0xdc9   :  { %v2046_v53 = vpack.c.bf16 %v2038_v35, %v2037_v54 }
 0xdca   :  { %v2162_v37 = vpop.permute.xlu1 %2161 }
 0xdcb   :  { %3762 = vmatprep.subr.bf16.mxu1 %v2046_v53 }
 0xdcc   :  { %3763 = vmatpush3.bf16.msra.mxu1 %v2046_v53 }
 0xdcd   :  { %3764 = vmatprep.subr.bf16.mxu1 %v2047_v7 }
 0xdce   :  { %v2172_v30 = vpop.permute.xlu1 %2171 }
 0xdd0   :  { %3765 = vmatpush3.bf16.msra.mxu1 %v2047_v7 }
 0xdd2   :  { %v2273_v38 = vpop.permute.xlu1 %2272 }
 0xdd3   :  { %3767 = vmatmul.mubr.msk.bf16.vlgmr.msra.gmra.mrb[28].mxu1 %vm242_vm3, %v3869_v20 }
 0xdd4   :  { %3782 = vmatprep.mubr.msk.bf16.mxu1 %vm242_vm3, %v3872_v36 }
 0xdd6   :  { %v2263_v58 = vpop.permute.xlu1 %2262 }
 0xdda   :  { %v2363_v4 = vpop.permute.xlu1 %2362 }
 0xddb   :  { %vm2365_vm15 = vcmp.eq.s32.totalorder %v2363_v4, 1 }
 0xea6   :  { %v3768_v28 = vpop.f32.mrb[28].mxu1 }
 0xea7   :  { %v2132_v49 = vadd.f32 %v3768_v28, %v2066_v29  ;;  %v2123_v6 = vpop.f32.mrb[29].mxu1 }
 0xea8   :  { %v2124_v22 = vadd.f32 %v2123_v6, %v2056_v32  ;;  %v3769_v57 = vpop.f32.mrb[30].mxu1  ;;  %v2379_v6 = vpop.permute.xlu1 %2378 }
 0xea9   :  { %v2135_v56 = vadd.f32 %v3769_v57, %v2071_v11  ;;  %v2126_v62 = vpop.f32.mrb[31].mxu1  ;;  %v2140_v2 = vmax.f32 %v2132_v49, 0.0 }
 0xeaa   :  { %v2127_v63 = vadd.f32 %v2126_v62, %v2061_v8  ;;  %v2138_v10 = vmax.f32 %v2124_v22, 0.0 }
 0xeab   :  { %v2141_v9 = vmax.f32 %v2135_v56, 0.0 }
 0xeac   :  { %v2139_v13 = vmax.f32 %v2127_v63, 0.0  ;;  %v2398_v36 = vpop.permute.xlu1 %2397 }
 0xead   :  { %v2148_v1 = vpack.c.bf16 %v2141_v9, %v2140_v2 }
 0xeae   :  { %v2147_v41 = vpack.c.bf16 %v2139_v13, %v2138_v10 }
 0xeb0   :  { %3770 = vmatprep.subr.bf16.mxu0 %v2147_v41 }
 0xeb1   :  { %3771 = vmatpush3.bf16.msra.mxu0 %v2147_v41 }
 0xeb2   :  { %3772 = vmatprep.subr.bf16.mxu0 %v2148_v1 }
 0xeb5   :  { %3773 = vmatpush3.bf16.msra.mxu0 %v2148_v1 }
 0xeb8   :  { %3775 = vmatmul.mubr.msk.bf16.vlgmr.msra.gmra.mrb[32].mxu0 %vm242_vm3, %v3871_v60 }
 0xf8b   :  { %v3776_v46 = vpop.f32.mrb[32].mxu0 }
 0xf8c   :  { %v2233_v14 = vadd.f32 %v3776_v46, %v2167_v40  ;;  %v2224_v0 = vpop.f32.mrb[33].mxu0 }
 0xf8d   :  { %v2225_v33 = vadd.f32 %v2224_v0, %v2157_v51  ;;  %v3777_v55 = vpop.f32.mrb[34].mxu0  ;;  %v3875_v0 = vld [vmem:[%s5157_s2 + $0x38] sm:$0xff]  }
 0xf8e   :  { %v2236_v16 = vadd.f32 %v3777_v55, %v2172_v30  ;;  %v2227_v19 = vpop.f32.mrb[35].mxu0  ;;  %v2241_v15 = vadd.f32 %v2233_v14, %v5014_v17  ;;  %v3874_v17 = vld [vmem:[%s5157_s2 + $0x30] sm:$0xff]  }
 0xf8f   :  { %v2228_v39 = vadd.f32 %v2227_v19, %v2162_v37  ;;  %v2239_v27 = vadd.f32 %v2225_v33, %v5017_v48  ;;  %3788 = vmatprep.mubr.msk.bf16.mxu0 %vm86_vm0, %v3874_v17  ;;  %v2268_v48 = vpop.permute.xlu0 %2267 }
 0xf90   :  { %v2242_v18 = vadd.f32 %v2236_v16, %v5020_v31 }
 0xf91   :  { %v2240_v21 = vadd.f32 %v2228_v39, %v5025_v24 }
 0xf92   :  { %v2249_v50 = vpack.c.bf16 %v2242_v18, %v2241_v15 }
 0xf93   :  { %v2248_v3 = vpack.c.bf16 %v2240_v21, %v2239_v27  ;;  %v2258_v35 = vpop.permute.xlu0 %2257 }
 0xf95   :  { %3778 = vmatprep.subr.bf16.mxu1 %v2248_v3 }
 0xf96   :  { %3779 = vmatpush3.bf16.msra.mxu1 %v2248_v3 }
 0xf97   :  { %3780 = vmatprep.subr.bf16.mxu1 %v2249_v50  ;;  %v2360_v20 = vpop.permute.xlu0 %2359 }
 0xf98   :  { %vm2364_vm14 = vcmp.eq.s32.totalorder %v2360_v20, 1  ;;  %v3878_v20 = vld [vmem:[%s5161_s6 + $0xd0] sm:$0xff]  }
 0xf9a   :  { %3781 = vmatpush3.bf16.msra.mxu1 %v2249_v50 }
 0xf9b   :  { %v2374_v29 = vpop.permute.xlu0 %2373 }
 0xf9d   :  { %3783 = vmatmul.mubr.msk.bf16.vlgmr.msra.gmra.mrb[32].mxu1 %vm242_vm3, %v3873_v44 }
 0xf9f   :  { %v2393_v10 = vpop.permute.xlu0 %2392 }
 0xfa3   :  { %v2423_v30 = vpop.permute.xlu0 %2422 }
 0xfa7   :  { %v2513_v55 = vpop.permute.xlu0 %2512 }
 0xfab   :  { %v2433_v19 = vpop.permute.xlu0 %2432 }
 0xfaf   :  { %v2542_v15 = vpop.permute.xlu0 %2541 }
 0xfb3   :  { %v2523_v21 = vpop.permute.xlu0 %2522 }
0x1070   :  { %v3784_v34 = vpop.f32.mrb[32].mxu1 }
0x1071   :  { %v2334_v31 = vadd.f32 %v3784_v34, %v2268_v48  ;;  %v2325_v5 = vpop.f32.mrb[33].mxu1 }
0x1072   :  { %v3785_v24 = vpop.f32.mrb[34].mxu1  ;;  %v2326_v32 = vadd.f32 %v2325_v5, %v2258_v35 }
0x1073   :  { %v2340_v47 = vadd.f32 2.0, %v2334_v31  ;;  %v2337_v52 = vadd.f32 %v3785_v24, %v2273_v38  ;;  %v2328_v12 = vpop.f32.mrb[35].mxu1 }
0x1074   :  { %v2329_v8 = vadd.f32 %v2328_v12, %v2263_v58  ;;  %v2383_v28 = vsel %vm2364_vm14, %v2326_v32, 0.0 }
0x1075   :  { %v2342_v45 = vsub.f32 0.0, %v2340_v47  ;;  %v2341_v42 = vadd.f32 2.0, %v2337_v52  ;;  %v2385_v56 = vmul.f32 %v2383_v28, %v2374_v29 }
0x1076   :  { %v2384_v22 = vsel %vm2365_vm15, %v2329_v8, 0.0 }
0x1077   :  { %v2344_v61 = vmul.f32 1.442695, %v2342_v45  ;;  %v2343_v43 = vsub.f32 0.0, %v2341_v42  ;;  %v2386_v2 = vmul.f32 %v2384_v22, %v2379_v6  ;;  %v2400_v1 = vadd.f32 %v2393_v10, %v2385_v56  ;;  %v2552_v45 = vpop.permute.xlu0 %2551 }
0x1079   :  { %3902 = vpow2.f32 %v2344_v61  ;;  %v2346_v26 = vmul.f32 1.442695, %v2343_v43  ;;  %v2401_v51 = vadd.f32 %v2398_v36, %v2386_v2 }
0x107b   :  { %3904 = vpow2.f32 %v2346_v26  ;;  %v2582_v4 = vpop.permute.xlu0 %2581 }
0x107f   :  { %v2592_v8 = vpop.permute.xlu0 %2591 }
0x1083   :  { %v3903_v54 = vpop.eup %3902 }
0x1084   :  { %v2348_v25 = vadd.f32 1.0, %v3903_v54 }
0x1085   :  { %v3905_v53 = vpop.eup %3904 }
0x1086   :  { %3906 = vrcp.f32 %v2348_v25  ;;  %v2349_v7 = vadd.f32 1.0, %v3905_v53 }
0x1088   :  { %3908 = vrcp.f32 %v2349_v7  ;;  %v3877_v7 = vld [vmem:[%s5161_s6 + $0xc8] sm:$0xff]  }
0x1090   :  { %v3907_v49 = vpop.eup %3906 }
0x1091   :  { %v2352_v11 = vadd.f32 0.001, %v3907_v49 }
0x1092   :  { %v3909_v57 = vpop.eup %3908 }
0x1093   :  { %v2366_v62 = vsel %vm2364_vm14, %v2352_v11, 1.0  ;;  %v2353_v63 = vadd.f32 0.001, %v3909_v57 }
0x1094   :  { %v2381_v9 = vmul.f32 %v2374_v29, %v2366_v62 }
0x1095   :  { %v2367_v13 = vsel %vm2365_vm15, %v2353_v63, 1.0 }
0x1096   :  { %v2382_v41 = vmul.f32 %v2379_v6, %v2367_v13  ;;  %v2402_v60 = vmul.f32 %v2381_v9, %v4971_v23  ;;  %v3876_v23 = vld [vmem:[%s5161_s6 + $0xc0] sm:$0xff]  }
0x1097   :  { %3796 = vmatprep.mubr.msk.bf16.mxu1 %vm242_vm3, %v3876_v23 }
0x1098   :  { %v2403_v37 = vmul.f32 %v2382_v41, %v4973_v59  ;;  %v5059_v40 = vadd.f32 %v2402_v60, %v2400_v1  ;;  %v2428_v59 = vpop.permute.xlu1 %2427  ;;  %v3879_v41 = vld [vmem:[%s5161_s6 + $0xd8] sm:$0xff]   ;;  %v3880_v60 = vld [vmem:[%s5161_s6 + $0xe0] sm:$0xff]  }
0x109a   :  { %v5061_v46 = vadd.f32 %v2403_v37, %v2401_v51  ;;  %v2683_v51 = vpop.permute.xlu0 %2682 }
0x109c   :  { %v2414_v14 = vpack.c.bf16 %v5061_v46, %v5059_v40  ;;  %v2518_v33 = vpop.permute.xlu1 %2517 }
0x109e   :  { %3786 = vmatprep.subr.bf16.mxu0 %v2414_v14 }
0x109f   :  { %3787 = vmatpush3.bf16.msra.mxu0 %v2414_v14  ;;  %v2693_v14 = vpop.permute.xlu0 %2692 }
0x10a0   :  { %v2438_v16 = vpop.permute.xlu1 %2437 }
0x10a2   :  { %3789 = vmatmul.mubr.msk.bf16.vlgmr.msra.gmra.mrb[36].mxu0 %vm86_vm0, %v3875_v0 }
0x10a3   :  { %3804 = vmatprep.mubr.msk.bf16.mxu0 %vm242_vm3, %v3878_v20  ;;  %v2777_v23 = vpop.permute.xlu0 %2776 }
0x10a4   :  { %v2547_v39 = vpop.permute.xlu1 %2546 }
0x10a8   :  { %v2528_v18 = vpop.permute.xlu1 %2527 }
0x10ac   :  { %v2557_v47 = vpop.permute.xlu1 %2556 }
0x10b0   :  { %v2587_v32 = vpop.permute.xlu1 %2586 }
0x10b4   :  { %v2597_v6 = vpop.permute.xlu1 %2596 }
0x10b8   :  { %v2688_v36 = vpop.permute.xlu1 %2687 }
0x10bc   :  { %v2698_v37 = vpop.permute.xlu1 %2697 }
0x10c0   :  { %v2782_v0 = vpop.permute.xlu1 %2781 }
0x1175   :  { %v3790_v27 = vpop.f32.mrb[36].mxu0 }
0x1176   :  { %v5073_v50 = vadd.f32 %v3790_v27, %v2433_v19  ;;  %v2490_v3 = vpop.f32.mrb[37].mxu0 }
0x1177   :  { %v5075_v44 = vadd.f32 %v2490_v3, %v2423_v30  ;;  %v3791_v17 = vpop.f32.mrb[38].mxu0  ;;  %v2806_v30 = vpop.permute.xlu0 %2805 }
0x1178   :  { %v5077_v48 = vadd.f32 %v3791_v17, %v2438_v16  ;;  %v2493_v34 = vpop.f32.mrb[39].mxu0  ;;  %v2532_v31 = vmul.f32 %v2523_v21, %v5073_v50 }
0x1179   :  { %v2530_v5 = vmul.f32 %v2513_v55, %v5075_v44  ;;  %v5081_v38 = vadd.f32 %v2493_v34, %v2428_v59  ;;  %v2811_v59 = vpop.permute.xlu1 %2810 }
0x117a   :  { %v2533_v24 = vmul.f32 %v2528_v18, %v5077_v48  ;;  %v2561_v61 = vadd.f32 %v2552_v45, %v2532_v31 }
0x117b   :  { %v2559_v52 = vadd.f32 %v2542_v15, %v2530_v5  ;;  %v2531_v12 = vmul.f32 %v2518_v33, %v5081_v38  ;;  %v2787_v18 = vpop.permute.xlu0 %2786 }
0x117c   :  { %v2562_v42 = vadd.f32 %v2557_v47, %v2533_v24  ;;  %v2565_v25 = vmax.f32 %v2561_v61, 0.0 }
0x117d   :  { %v2560_v43 = vadd.f32 %v2547_v39, %v2531_v12  ;;  %v2563_v26 = vmax.f32 %v2559_v52, 0.0  ;;  %v2792_v19 = vpop.permute.xlu1 %2791 }
0x117e   :  { %v2566_v54 = vmax.f32 %v2562_v42, 0.0 }
0x117f   :  { %v2564_v35 = vmax.f32 %v2560_v43, 0.0  ;;  %v2816_v42 = vpop.permute.xlu0 %2815 }
0x1180   :  { %v2573_v58 = vpack.c.bf16 %v2566_v54, %v2565_v25 }
0x1181   :  { %v2572_v53 = vpack.c.bf16 %v2564_v35, %v2563_v26 }
0x1183   :  { %3792 = vmatprep.subr.bf16.mxu1 %v2572_v53 }
0x1184   :  { %3793 = vmatpush3.bf16.msra.mxu1 %v2572_v53 }
0x1185   :  { %3794 = vmatprep.subr.bf16.mxu1 %v2573_v58 }
0x1188   :  { %3795 = vmatpush3.bf16.msra.mxu1 %v2573_v58  ;;  %v3882_v58 = vld [vmem:[%s5161_s6 + $0xf0] sm:$0xff]  }
0x118b   :  { %3797 = vmatmul.mubr.msk.bf16.vlgmr.msra.gmra.mrb[36].mxu1 %vm242_vm3, %v3877_v7  ;;  %v2846_v7 = vpop.permute.xlu0 %2845 }
0x118c   :  { %3812 = vmatprep.mubr.msk.bf16.mxu1 %vm242_vm3, %v3880_v60 }
0x125e   :  { %v3798_v29 = vpop.f32.mrb[36].mxu1 }
0x125f   :  { %v2658_v28 = vadd.f32 %v3798_v29, %v2592_v8  ;;  %v2649_v49 = vpop.f32.mrb[37].mxu1 }
0x1260   :  { %v2650_v11 = vadd.f32 %v2649_v49, %v2582_v4  ;;  %v3799_v22 = vpop.f32.mrb[38].mxu1  ;;  %v2856_v4 = vpop.permute.xlu0 %2855 }
0x1261   :  { %v2661_v57 = vadd.f32 %v3799_v22, %v2597_v6  ;;  %v2652_v56 = vpop.f32.mrb[39].mxu1  ;;  %v2666_v63 = vmax.f32 %v2658_v28, 0.0 }
0x1262   :  { %v2653_v62 = vadd.f32 %v2652_v56, %v2587_v32  ;;  %v2664_v9 = vmax.f32 %v2650_v11, 0.0 }
0x1263   :  { %v2667_v2 = vmax.f32 %v2661_v57, 0.0 }
0x1264   :  { %v2665_v10 = vmax.f32 %v2653_v62, 0.0 }
0x1265   :  { %v2674_v13 = vpack.c.bf16 %v2667_v2, %v2666_v63 }
0x1266   :  { %v2673_v1 = vpack.c.bf16 %v2665_v10, %v2664_v9 }
0x1268   :  { %3800 = vmatprep.subr.bf16.mxu0 %v2673_v1 }
0x1269   :  { %3801 = vmatpush3.bf16.msra.mxu0 %v2673_v1  ;;  %v3884_v1 = vld [vmem:[%s5163_s8 + $0x30] sm:$0xff]  }
0x126a   :  { %3802 = vmatprep.subr.bf16.mxu0 %v2674_v13 }
0x126d   :  { %3803 = vmatpush3.bf16.msra.mxu0 %v2674_v13  ;;  %v3883_v13 = vld [vmem:[%s5161_s6 + $0xf8] sm:$0xff]  }
0x1270   :  { %3805 = vmatmul.mubr.msk.bf16.vlgmr.msra.gmra.mrb[40].mxu0 %vm242_vm3, %v3879_v41  ;;  %v2947_v41 = vpop.permute.xlu0 %2946 }
0x1271   :  { %3820 = vmatprep.mubr.msk.bf16.mxu0 %vm242_vm3, %v3882_v58 }
0x1343   :  { %v3806_v33 = vpop.f32.mrb[40].mxu0 }
0x1344   :  { %v2759_v55 = vadd.f32 %v3806_v33, %v2693_v14  ;;  %v2750_v16 = vpop.f32.mrb[41].mxu0 }
0x1345   :  { %v2751_v39 = vadd.f32 %v2750_v16, %v2683_v51  ;;  %v3807_v15 = vpop.f32.mrb[42].mxu0 }
0x1346   :  { %v5102_v27 = vadd.f32 %v2759_v55, %v5073_v50  ;;  %v2762_v21 = vadd.f32 %v3807_v15, %v2698_v37  ;;  %v2753_v3 = vpop.f32.mrb[43].mxu0  ;;  %v2821_v50 = vpop.permute.xlu1 %2820 }
0x1347   :  { %v5105_v17 = vadd.f32 %v2751_v39, %v5075_v44  ;;  %v2754_v34 = vadd.f32 %v2753_v3, %v2688_v36  ;;  %v2957_v36 = vpop.permute.xlu0 %2956  ;;  %v3885_v3 = vld [vmem:[%s5163_s8 + $0x38] sm:$0xff]   ;;  %s3945_s8 = smov [#allocation2]  }
0x1348   :  { %v5108_v31 = vadd.f32 %v2762_v21, %v5077_v48  ;;  %v2796_v5 = vmul.f32 %v2787_v18, %v5102_v27  ;;  %s3207_s19 = sshll.u32 %s3945_s8, 4  ;;  %s3208_s19 = int_to_ptr.vmem [resolvable:$true] %s3207_s19 }
0x1349   :  { %v2794_v24 = vmul.f32 %v2777_v23, %v5105_v17  ;;  %v5113_v47 = vadd.f32 %v2754_v34, %v5081_v38  ;;  %v3881_v38 = vld [vmem:[%s5161_s6 + $0xe8] sm:$0xff]   ;;  %s3920_s20 = scalar_lea.vmem %s3208_s19, 256  ;;  %p3925_p1 = scmp.lt.s32.totalorder %s3208_s19, %s3208_s19 }
0x134a   :  { %v2797_v52 = vmul.f32 %v2792_v19, %v5108_v31  ;;  %v2825_v43 = vadd.f32 %v2816_v42, %v2796_v5  ;;  %v2851_v20 = vpop.permute.xlu1 %2850  ;;  %p3921_p0 = scmp.ne.s32.totalorder %s3208_s19, %s3920_s20  ;;  %p3926_p2 = scmp.lt.s32.totalorder %s3920_s20, %s3920_s20 }
0x134b   :  { %v2795_v12 = vmul.f32 %v2782_v0, %v5113_v47  ;;  %v2823_v45 = vadd.f32 %v2806_v30, %v2794_v24  ;;  %v3058_v34 = vpop.permute.xlu0 %3057 }
0x134c   :  { %v2826_v44 = vadd.f32 %v2821_v50, %v2797_v52  ;;  %v2829_v25 = vmax.f32 %v2825_v43, 0.0  ;;  %p3927_p3 = por %p3926_p2, %p3925_p1 }
0x134d   :  { %v2824_v61 = vadd.f32 %v2811_v59, %v2795_v12  ;;  %v2827_v26 = vmax.f32 %v2823_v45, 0.0 }
0x134e   :  { %v2830_v54 = vmax.f32 %v2826_v44, 0.0  ;;  %v2861_v28 = vpop.permute.xlu1 %2860  ;;  %p3928_p4 = pnand %p3927_p3, %p3921_p0 }
0x134f   :  { %v2828_v48 = vmax.f32 %v2824_v61, 0.0 }
0x1350   :  { %v2837_v53 = vpack.c.bf16 %v2830_v54, %v2829_v25 }
0x1351   :  { %v2836_v35 = vpack.c.bf16 %v2828_v48, %v2827_v26  ;;  %v3048_v26 = vpop.permute.xlu0 %3047 }
0x1352   :  { %v2952_v60 = vpop.permute.xlu1 %2951 }
0x1353   :  { %3808 = vmatprep.subr.bf16.mxu1 %v2836_v35 }
0x1354   :  { %3809 = vmatpush3.bf16.msra.mxu1 %v2836_v35 }
0x1355   :  { %3810 = vmatprep.subr.bf16.mxu1 %v2837_v53 }
0x1356   :  { %v2962_v0 = vpop.permute.xlu1 %2961 }
0x1358   :  { %3811 = vmatpush3.bf16.msra.mxu1 %v2837_v53  ;;  %v3150_v53 = vpop.permute.xlu0 %3149 }
0x1359   :  { %vm3154_vm0 = vcmp.eq.s32.totalorder %v3150_v53, 1 }
0x135a   :  { %v3063_v24 = vpop.permute.xlu1 %3062 }
0x135b   :  { %3813 = vmatmul.mubr.msk.bf16.vlgmr.msra.gmra.mrb[40].mxu1 %vm242_vm3, %v3881_v38 }
0x135c   :  { %3828 = vmatprep.mubr.msk.bf16.mxu1 %vm242_vm3, %v3884_v1 }
0x135e   :  { %v3053_v35 = vpop.permute.xlu1 %3052 }
0x1362   :  { %v3153_v38 = vpop.permute.xlu1 %3152 }
0x1363   :  { %vm3155_vm1 = vcmp.eq.s32.totalorder %v3153_v38, 1 }
0x142e   :  { %v3814_v32 = vpop.f32.mrb[40].mxu1 }
0x142f   :  { %v2922_v8 = vadd.f32 %v3814_v32, %v2856_v4  ;;  %v2913_v29 = vpop.f32.mrb[41].mxu1 }
0x1430   :  { %v2914_v49 = vadd.f32 %v2913_v29, %v2846_v7  ;;  %v3815_v6 = vpop.f32.mrb[42].mxu1 }
0x1431   :  { %v2925_v11 = vadd.f32 %v3815_v6, %v2861_v28  ;;  %v2916_v22 = vpop.f32.mrb[43].mxu1  ;;  %v2930_v56 = vmax.f32 %v2922_v8, 0.0  ;;  %v3169_v8 = vpop.permute.xlu1 %3168 }
0x1432   :  { %v2917_v57 = vadd.f32 %v2916_v22, %v2851_v20  ;;  %v2928_v63 = vmax.f32 %v2914_v49, 0.0  ;;  %v3164_v20 = vpop.permute.xlu0 %3163 }
0x1433   :  { %v2931_v62 = vmax.f32 %v2925_v11, 0.0 }
0x1434   :  { %v2929_v2 = vmax.f32 %v2917_v57, 0.0 }
0x1435   :  { %v2938_v9 = vpack.c.bf16 %v2931_v62, %v2930_v56 }
0x1436   :  { %v2937_v10 = vpack.c.bf16 %v2929_v2, %v2928_v63  ;;  %v3183_v62 = vpop.permute.xlu0 %3182 }
0x1438   :  { %3816 = vmatprep.subr.bf16.mxu0 %v2937_v10 }
0x1439   :  { %3817 = vmatpush3.bf16.msra.mxu0 %v2937_v10 }
0x143a   :  { %3818 = vmatprep.subr.bf16.mxu0 %v2938_v9 }
0x143d   :  { %3819 = vmatpush3.bf16.msra.mxu0 %v2938_v9 }
0x1440   :  { %3821 = vmatmul.mubr.msk.bf16.vlgmr.msra.gmra.mrb[44].mxu0 %vm242_vm3, %v3883_v13  ;;  %v3188_v13 = vpop.permute.xlu1 %3187 }
0x1513   :  { %v3822_v51 = vpop.f32.mrb[44].mxu0 }
0x1514   :  { %v3023_v37 = vadd.f32 %v3822_v51, %v2957_v36  ;;  %v3014_v14 = vpop.f32.mrb[45].mxu0 }
0x1515   :  { %v3015_v23 = vadd.f32 %v3014_v14, %v2947_v41  ;;  %v3823_v59 = vpop.f32.mrb[46].mxu0 }
0x1516   :  { %v3026_v30 = vadd.f32 %v3823_v59, %v2962_v0  ;;  %v3017_v33 = vpop.f32.mrb[47].mxu0  ;;  %v3031_v16 = vadd.f32 %v3023_v37, %v5102_v27 }
0x1517   :  { %v3018_v55 = vadd.f32 %v3017_v33, %v2952_v60  ;;  %v3029_v39 = vadd.f32 %v3015_v23, %v5105_v17 }
0x1518   :  { %v3032_v19 = vadd.f32 %v3026_v30, %v5108_v31 }
0x1519   :  { %v3030_v15 = vadd.f32 %v3018_v55, %v5113_v47 }
0x151a   :  { %v3039_v18 = vpack.c.bf16 %v3032_v19, %v3031_v16 }
0x151b   :  { %v3038_v21 = vpack.c.bf16 %v3030_v15, %v3029_v39 }
0x151d   :  { %3824 = vmatprep.subr.bf16.mxu1 %v3038_v21 }
0x151e   :  { %3825 = vmatpush3.bf16.msra.mxu1 %v3038_v21 }
0x151f   :  { %3826 = vmatprep.subr.bf16.mxu1 %v3039_v18 }
0x1522   :  { %3827 = vmatpush3.bf16.msra.mxu1 %v3039_v18 }
0x1525   :  { %3829 = vmatmul.mubr.msk.bf16.vlgmr.msra.gmra.mrb[44].mxu1 %vm242_vm3, %v3885_v3 }
0x15f8   :  { %v3830_v27 = vpop.f32.mrb[44].mxu1 }
0x15f9   :  { %v3124_v5 = vadd.f32 %v3830_v27, %v3058_v34  ;;  %v3115_v31 = vpop.f32.mrb[45].mxu1 }
0x15fa   :  { %v3831_v17 = vpop.f32.mrb[46].mxu1  ;;  %v3116_v58 = vadd.f32 %v3115_v31, %v3048_v26 }
0x15fb   :  { %v3130_v52 = vadd.f32 2.0, %v3124_v5  ;;  %v3127_v47 = vadd.f32 %v3831_v17, %v3063_v24  ;;  %v3118_v50 = vpop.f32.mrb[47].mxu1 }
0x15fc   :  { %v3119_v7 = vadd.f32 %v3118_v50, %v3053_v35  ;;  %v3173_v4 = vsel %vm3154_vm0, %v3116_v58, 0.0 }
0x15fd   :  { %v3132_v12 = vsub.f32 0.0, %v3130_v52  ;;  %v3131_v45 = vadd.f32 2.0, %v3127_v47  ;;  %v3175_v6 = vmul.f32 %v3173_v4, %v3164_v20 }
0x15fe   :  { %v3174_v28 = vsel %vm3155_vm1, %v3119_v7, 0.0 }
0x15ff   :  { %v3134_v42 = vmul.f32 1.442695, %v3132_v12  ;;  %v3133_v44 = vsub.f32 0.0, %v3131_v45  ;;  %v3176_v56 = vmul.f32 %v3174_v28, %v3169_v8  ;;  %v3190_v2 = vadd.f32 %v3183_v62, %v3175_v6 }
0x1601   :  { %3910 = vpow2.f32 %v3134_v42  ;;  %v3136_v61 = vmul.f32 1.442695, %v3133_v44  ;;  %v3191_v41 = vadd.f32 %v3188_v13, %v3176_v56 }
0x1603   :  { %3912 = vpow2.f32 %v3136_v61 }
0x160b   :  { %v3911_v43 = vpop.eup %3910 }
0x160c   :  { %v3138_v48 = vadd.f32 1.0, %v3911_v43 }
0x160d   :  { %v3913_v54 = vpop.eup %3912 }
0x160e   :  { %3914 = vrcp.f32 %v3138_v48  ;;  %v3139_v25 = vadd.f32 1.0, %v3913_v54 }
0x1610   :  { %3916 = vrcp.f32 %v3139_v25 }
0x1618   :  { %v3915_v32 = vpop.eup %3914 }
0x1619   :  { %v3142_v29 = vadd.f32 0.001, %v3915_v32 }
0x161a   :  { %v3917_v49 = vpop.eup %3916 }
0x161b   :  { %v3156_v11 = vsel %vm3154_vm0, %v3142_v29, 1.0  ;;  %v3143_v22 = vadd.f32 0.001, %v3917_v49 }
0x161c   :  { %v3171_v57 = vmul.f32 %v3164_v20, %v3156_v11 }
0x161d   :  { %v3157_v63 = vsel %vm3155_vm1, %v3143_v22, 1.0 }
0x161e   :  { %v3192_v9 = vmul.f32 %v3171_v57, %v5059_v40  ;;  %v3172_v10 = vmul.f32 %v3169_v8, %v3157_v63 }
0x1620   :  { %v3194_v1 = vadd.f32 %v3192_v9, %v3190_v2  ;;  %v3193_v60 = vmul.f32 %v3172_v10, %v5061_v46 }
0x1622   :  { %v3196_v36 = vmax.f32 %v3194_v1, 0.0  ;;  %v3195_v51 = vadd.f32 %v3193_v60, %v3191_v41 }
0x1624   :  { %v3198_v37 = vmin.f32 %v3196_v36, 1.0  ;;  %v3197_v14 = vmax.f32 %v3195_v51, 0.0 }
0x1626   :  { %3200 = vst [vmem:[#allocation2] sm:$0xff] %v3198_v37  ;;  %v3199_v0 = vmin.f32 %v3197_v14, 1.0 }
0x1628   :  { %3201 = vst [vmem:[#allocation2 + $0x8] sm:$0xff] %v3199_v0 }
0x1629   :  { %3931 = shalt.err (!%p3928_p4)
}
0x162a   :  { %s3932_s21 = scalar_lea.hbm %s5167_s12, 256 }
0x162b   :  { %p3933_p5 = scmp.ne.s32.totalorder %s5167_s12, %s3932_s21  ;;  %p3936_p6 = scmp.lt.u32.totalorder %s3932_s21, %s5167_s12 }
0x162d   :  { %p3938_p7 = pnand %p3936_p6, %p3933_p5 }
0x162f   :  { %3941 = shalt.err (!%p3938_p7)
}
0x1630   :  { %s3946_s5 = smov 128   ;;  %s3947_s25 = smov 8  }
0x1631   :  { %3213 = dma.vmem_to_hbm [thread:$0]  %s3208_s19, 256, %s5167_s12, [#allocation3], %s3946_s5, %s3946_s5, %s3947_s25  }
0x1632   :  { %3942 = dma.done.wait [#allocation3], 256  }
0x1633   :  { %3943 = vsyncadd [#allocation3], 4294967040 }
0x1634   :  { %3217 = vsyncpa [#allocation3], 1 }

// kernel: tpu_custom_call.1
= control target key start
LH: loop header
LB: loop body
LE: loop exit
PB: predicated region body
PF: predicated region fallthrough
CT: control target
= control target key end

     0   :  { %v5168_v3 = vmov 0   ;;  %vm86_vm0 = vcmask 130048   ;;  %s5155_s0 = inlined_call_operand.vmem [shape: f32[16,128], index: 0, kind: input, shape index: {}]   ;;  %s5156_s1 = inlined_call_operand.vmem [shape: f32[4,16,1], index: 1, kind: input, shape index: {}]   ;;  %s5157_s2 = inlined_call_operand.vmem [shape: bf16[4,32,16], index: 2, kind: input, shape index: {}]   ;;  %s5158_s3 = inlined_call_operand.vmem [shape: f32[4,32,1], index: 3, kind: input, shape index: {}]   ;;  %s5159_s4 = inlined_call_operand.vmem [shape: f32[8,32,1], index: 4, kind: input, shape index: {}]   ;;  %s5160_s5 = inlined_call_operand.vmem [shape: f32[8,32,1], index: 5, kind: input, shape index: {}]   ;;  %s5161_s6 = inlined_call_operand.vmem [shape: bf16[16,32,32], index: 6, kind: input, shape index: {}]   ;;  %s5162_s7 = inlined_call_operand.vmem [shape: f32[16,32,1], index: 7, kind: input, shape index: {}]   ;;  %s5163_s8 = inlined_call_operand.vmem [shape: bf16[4,32,32], index: 8, kind: input, shape index: {}]   ;;  %s5164_s9 = inlined_call_operand.vmem [shape: f32[4,32,1], index: 9, kind: input, shape index: {}]   ;;  %s5165_s10 = inlined_call_operand.vmem [shape: f32[4,16,1], index: 10, kind: input, shape index: {}]   ;;  %s5166_s11 = inlined_call_operand.vmem [shape: f32[4,16,1], index: 11, kind: input, shape index: {}]   ;;  %s5167_s12 = inlined_call_operand.hbm [shape: f32[16,128], index: 12, kind: output, shape index: {}]  }
   0x1   :  { %v142_v0 = vld [vmem:[%s5159_s4] sm:$0xff]  ;;  %3837 = vset.pattern.permute.xlu1 %v5168_v3  ;;  %3836 = vset.pattern.permute.xlu0 %v5168_v3  ;;  %v44_v4 = vld [vmem:[%s5155_s0 + $0x8] sm:$0xff]  ;;  %v55_v10 = vld [vmem:[%s5158_s3 + $0x18] sm:$0xff] }
   0x2   :  { %v52_v1 = vld [vmem:[%s5158_s3] sm:$0xff]  ;;  %v143_v5 = vld [vmem:[%s5159_s4 + $0x8] sm:$0xff]  ;;  %148 = vperm.xlu1 %3837, %v142_v0   ;;  %v54_v11 = vld [vmem:[%s5158_s3 + $0x10] sm:$0xff] }
   0x3   :  { %v43_v2 = vld [vmem:[%s5155_s0] sm:$0xff]  ;;  %58 = vperm.xlu0 %3836, %v52_v1   ;;  %v53_v8 = vld [vmem:[%s5158_s3 + $0x8] sm:$0xff]  ;;  %v145_v14 = vld [vmem:[%s5159_s4 + $0x18] sm:$0xff] }
   0x4   :  { %v51_v6 = vpack.c.bf16 %v44_v4, %v43_v2  ;;  %v3838_v7 = vld [vmem:[%s5157_s2] sm:$0xff]   ;;  %v3839_v9 = vld [vmem:[%s5157_s2 + $0x8] sm:$0xff]   ;;  %v144_v15 = vld [vmem:[%s5159_s4 + $0x10] sm:$0xff] }
   0x5   :  { %3650 = vmatprep.mubr.msk.bf16.mxu0 %vm86_vm0, %v3838_v7  ;;  %v171_v12 = vld [vmem:[%s5160_s5 + $0x8] sm:$0xff]  ;;  %v170_v13 = vld [vmem:[%s5160_s5] sm:$0xff]  ;;  %v173_v16 = vld [vmem:[%s5160_s5 + $0x18] sm:$0xff] }
   0x6   :  { %3648 = vmatprep.subr.bf16.mxu0 %v51_v6  ;;  %153 = vperm.xlu1 %3837, %v143_v5   ;;  %v172_v17 = vld [vmem:[%s5160_s5 + $0x10] sm:$0xff]  ;;  %v209_v18 = vld [vmem:[%s5162_s7 + $0x8] sm:$0xff]  ;;  %v208_v19 = vld [vmem:[%s5162_s7] sm:$0xff] }
   0x7   :  { %3649 = vmatpush3.bf16.msra.mxu0 %v51_v6  ;;  %63 = vperm.xlu0 %3836, %v53_v8   ;;  %v211_v20 = vld [vmem:[%s5162_s7 + $0x18] sm:$0xff]  ;;  %v210_v21 = vld [vmem:[%s5162_s7 + $0x10] sm:$0xff]  ;;  %v3231_v22 = vld [vmem:[%s5162_s7 + $0x28] sm:$0xff] }
   0x8   :  { %v3230_v23 = vld [vmem:[%s5162_s7 + $0x20] sm:$0xff]  ;;  %v3233_v24 = vld [vmem:[%s5162_s7 + $0x38] sm:$0xff]  ;;  %v3232_v25 = vld [vmem:[%s5162_s7 + $0x30] sm:$0xff] }
   0x9   :  { %v3239_v26 = vld [vmem:[%s5159_s4 + $0x28] sm:$0xff]  ;;  %v3238_v27 = vld [vmem:[%s5159_s4 + $0x20] sm:$0xff]  ;;  %v3241_v30 = vld [vmem:[%s5159_s4 + $0x38] sm:$0xff] }
   0xa   :  { %3651 = vmatmul.mubr.msk.bf16.vlgmr.msra.gmra.mrb[0].mxu0 %vm86_vm0, %v3839_v9  ;;  %73 = vperm.xlu1 %3837, %v55_v10   ;;  %v3243_v28 = vld [vmem:[%s5160_s5 + $0x28] sm:$0xff]  ;;  %v3242_v29 = vld [vmem:[%s5160_s5 + $0x20] sm:$0xff]  ;;  %v3240_v31 = vld [vmem:[%s5159_s4 + $0x30] sm:$0xff] }
   0xb   :  { %68 = vperm.xlu0 %3836, %v54_v11   ;;  %v3245_v32 = vld [vmem:[%s5160_s5 + $0x38] sm:$0xff]  ;;  %v3244_v33 = vld [vmem:[%s5160_s5 + $0x30] sm:$0xff]  ;;  %v3251_v34 = vld [vmem:[%s5162_s7 + $0x48] sm:$0xff] }
   0xc   :  { %v3250_v35 = vld [vmem:[%s5162_s7 + $0x40] sm:$0xff]  ;;  %v3253_v36 = vld [vmem:[%s5162_s7 + $0x58] sm:$0xff]  ;;  %v3252_v37 = vld [vmem:[%s5162_s7 + $0x50] sm:$0xff] }
   0xd   :  { %v3263_v38 = vld [vmem:[%s5162_s7 + $0x68] sm:$0xff]  ;;  %v3262_v39 = vld [vmem:[%s5162_s7 + $0x60] sm:$0xff] }
   0xe   :  { %181 = vperm.xlu1 %3837, %v171_v12  }
   0xf   :  { %176 = vperm.xlu0 %3836, %v170_v13  }
  0x12   :  { %163 = vperm.xlu1 %3837, %v145_v14  }
  0x13   :  { %158 = vperm.xlu0 %3836, %v144_v15  }
  0x16   :  { %191 = vperm.xlu1 %3837, %v173_v16  }
  0x17   :  { %186 = vperm.xlu0 %3836, %v172_v17  }
  0x1a   :  { %219 = vperm.xlu1 %3837, %v209_v18  }
  0x1b   :  { %214 = vperm.xlu0 %3836, %v208_v19  }
  0x1e   :  { %229 = vperm.xlu1 %3837, %v211_v20  }
  0x1f   :  { %224 = vperm.xlu0 %3836, %v210_v21  }
  0x22   :  { %321 = vperm.xlu1 %3837, %v3231_v22  }
  0x23   :  { %316 = vperm.xlu0 %3836, %v3230_v23  }
  0x26   :  { %331 = vperm.xlu1 %3837, %v3233_v24  }
  0x27   :  { %326 = vperm.xlu0 %3836, %v3232_v25  }
  0x2a   :  { %415 = vperm.xlu1 %3837, %v3239_v26  }
  0x2b   :  { %410 = vperm.xlu0 %3836, %v3238_v27  }
  0x2e   :  { %444 = vperm.xlu1 %3837, %v3243_v28  }
  0x2f   :  { %439 = vperm.xlu0 %3836, %v3242_v29  }
  0x32   :  { %425 = vperm.xlu1 %3837, %v3241_v30  }
  0x33   :  { %420 = vperm.xlu0 %3836, %v3240_v31  }
  0x36   :  { %454 = vperm.xlu1 %3837, %v3245_v32  }
  0x37   :  { %449 = vperm.xlu0 %3836, %v3244_v33  }
  0x3a   :  { %484 = vperm.xlu1 %3837, %v3251_v34  }
  0x3b   :  { %479 = vperm.xlu0 %3836, %v3250_v35  }
  0x3e   :  { %494 = vperm.xlu1 %3837, %v3253_v36  }
  0x3f   :  { %489 = vperm.xlu0 %3836, %v3252_v37  }
  0x42   :  { %585 = vperm.xlu1 %3837, %v3263_v38  }
  0x43   :  { %580 = vperm.xlu0 %3836, %v3262_v39  }
  0x44   :  { %17 = vsyncpa [#allocation3], 0  ;;  %v3265_v40 = vld [vmem:[%s5162_s7 + $0x78] sm:$0xff]  ;;  %v3264_v41 = vld [vmem:[%s5162_s7 + $0x70] sm:$0xff]  ;;  %vm242_vm3 = vcmask 261120  }
  0x45   :  { %v676_v42 = vld [vmem:[%s5164_s9 + $0x18] sm:$0xff]  ;;  %v675_v43 = vld [vmem:[%s5164_s9 + $0x10] sm:$0xff]  ;;  %v46_v44 = vld [vmem:[%s5156_s1 + $0x8] sm:$0xff] }
  0x46   :  { %595 = vperm.xlu1 %3837, %v3265_v40   ;;  %v45_v45 = vld [vmem:[%s5156_s1] sm:$0xff]  ;;  %v674_v46 = vld [vmem:[%s5164_s9 + $0x8] sm:$0xff]  ;;  %vm777_vm1 = vcmp.gt.f32.partialorder %v46_v44, 0.5  ;;  %v3283_v58 = vld [vmem:[%s5158_s3 + $0x38] sm:$0xff] }
  0x47   :  { %590 = vperm.xlu0 %3836, %v3264_v41   ;;  %v673_v47 = vld [vmem:[%s5164_s9] sm:$0xff]  ;;  %vm776_vm2 = vcmp.gt.f32.partialorder %v45_v45, 0.5  ;;  %v779_v48 = vsel %vm777_vm1, 1, %v5168_v3  ;;  %v791_v50 = vld [vmem:[%s5165_s10 + $0x8] sm:$0xff]  ;;  %v3282_v59 = vld [vmem:[%s5158_s3 + $0x30] sm:$0xff] }
  0x48   :  { %v778_v49 = vsel %vm776_vm2, 1, %v5168_v3  ;;  %v790_v51 = vld [vmem:[%s5165_s10] sm:$0xff]  ;;  %v809_v52 = vld [vmem:[%s5166_s11 + $0x8] sm:$0xff]  ;;  %v3291_v62 = vld [vmem:[%s5159_s4 + $0x58] sm:$0xff] }
  0x49   :  { %v808_v53 = vld [vmem:[%s5166_s11] sm:$0xff]  ;;  %v3281_v54 = vld [vmem:[%s5158_s3 + $0x28] sm:$0xff]  ;;  %v3290_v63 = vld [vmem:[%s5159_s4 + $0x50] sm:$0xff] }
  0x4a   :  { %694 = vperm.xlu1 %3837, %v676_v42   ;;  %v3280_v55 = vld [vmem:[%s5158_s3 + $0x20] sm:$0xff]  ;;  %v3289_v56 = vld [vmem:[%s5159_s4 + $0x48] sm:$0xff]  ;;  %v3295_v1 = vld [vmem:[%s5160_s5 + $0x58] sm:$0xff] }
  0x4b   :  { %689 = vperm.xlu0 %3836, %v675_v43   ;;  %v3288_v57 = vld [vmem:[%s5159_s4 + $0x40] sm:$0xff]  ;;  %v3293_v60 = vld [vmem:[%s5160_s5 + $0x48] sm:$0xff]  ;;  %v3294_v2 = vld [vmem:[%s5160_s5 + $0x50] sm:$0xff] }
  0x4c   :  { %v3292_v61 = vld [vmem:[%s5160_s5 + $0x40] sm:$0xff]  ;;  %v3301_v4 = vld [vmem:[%s5162_s7 + $0x88] sm:$0xff]  ;;  %v3303_v6 = vld [vmem:[%s5162_s7 + $0x98] sm:$0xff] }
  0x4d   :  { %v3840_v0 = vld [vmem:[%s5161_s6] sm:$0xff]   ;;  %v3302_v7 = vld [vmem:[%s5162_s7 + $0x90] sm:$0xff]  ;;  %v3313_v8 = vld [vmem:[%s5162_s7 + $0xa8] sm:$0xff] }
  0x4e   :  { %684 = vperm.xlu1 %3837, %v674_v46   ;;  %3658 = vmatprep.mubr.msk.bf16.mxu1 %vm242_vm3, %v3840_v0  ;;  %v3300_v5 = vld [vmem:[%s5162_s7 + $0x80] sm:$0xff]  ;;  %v3315_v10 = vld [vmem:[%s5162_s7 + $0xb8] sm:$0xff]  ;;  %v3314_v11 = vld [vmem:[%s5162_s7 + $0xb0] sm:$0xff] }
  0x4f   :  { %679 = vperm.xlu0 %3836, %v673_v47   ;;  %v3312_v9 = vld [vmem:[%s5162_s7 + $0xa0] sm:$0xff]  ;;  %v3321_v14 = vld [vmem:[%s5159_s4 + $0x68] sm:$0xff]  ;;  %v3323_v22 = vld [vmem:[%s5159_s4 + $0x78] sm:$0xff] }
  0x50   :  { %v3320_v15 = vld [vmem:[%s5159_s4 + $0x60] sm:$0xff]  ;;  %v3325_v18 = vld [vmem:[%s5160_s5 + $0x68] sm:$0xff]  ;;  %v3322_v23 = vld [vmem:[%s5159_s4 + $0x70] sm:$0xff] }
  0x51   :  { %v3324_v19 = vld [vmem:[%s5160_s5 + $0x60] sm:$0xff]  ;;  %v3327_v26 = vld [vmem:[%s5160_s5 + $0x78] sm:$0xff]  ;;  %v3326_v27 = vld [vmem:[%s5160_s5 + $0x70] sm:$0xff] }
  0x52   :  { %784 = vperm.xlu1 %3837, %v779_v48   ;;  %v3333_v30 = vld [vmem:[%s5162_s7 + $0xc8] sm:$0xff]  ;;  %v3332_v31 = vld [vmem:[%s5162_s7 + $0xc0] sm:$0xff]  ;;  %v3335_v34 = vld [vmem:[%s5162_s7 + $0xd8] sm:$0xff] }
  0x53   :  { %781 = vperm.xlu0 %3836, %v778_v49   ;;  %v3334_v35 = vld [vmem:[%s5162_s7 + $0xd0] sm:$0xff]  ;;  %v3345_v38 = vld [vmem:[%s5162_s7 + $0xe8] sm:$0xff]  ;;  %v3344_v39 = vld [vmem:[%s5162_s7 + $0xe0] sm:$0xff] }
  0x54   :  { %v3347_v42 = vld [vmem:[%s5162_s7 + $0xf8] sm:$0xff]  ;;  %v3346_v43 = vld [vmem:[%s5162_s7 + $0xf0] sm:$0xff]  ;;  %v3375_v0 = vld [vmem:[%s5158_s3 + $0x48] sm:$0xff] }
  0x55   :  { %v3359_v46 = vld [vmem:[%s5164_s9 + $0x38] sm:$0xff]  ;;  %v3358_v47 = vld [vmem:[%s5164_s9 + $0x30] sm:$0xff] }
  0x56   :  { %799 = vperm.xlu1 %3837, %v791_v50   ;;  %v3275_v48 = vld [vmem:[%s5156_s1 + $0x18] sm:$0xff]  ;;  %v3274_v49 = vld [vmem:[%s5156_s1 + $0x10] sm:$0xff]  ;;  %v3357_v50 = vld [vmem:[%s5164_s9 + $0x28] sm:$0xff] }
  0x57   :  { %794 = vperm.xlu0 %3836, %v790_v51   ;;  %v3356_v51 = vld [vmem:[%s5164_s9 + $0x20] sm:$0xff]  ;;  %vm1565_vm4 = vcmp.gt.f32.partialorder %v3275_v48, 0.5  ;;  %vm1564_vm5 = vcmp.gt.f32.partialorder %v3274_v49, 0.5 }
  0x5a   :  { %817 = vperm.xlu1 %3837, %v809_v52  }
  0x5b   :  { %812 = vperm.xlu0 %3836, %v808_v53  }
  0x5e   :  { %847 = vperm.xlu1 %3837, %v3281_v54   ;;  %v1567_v54 = vsel %vm1565_vm4, 1, %v5168_v3 }
  0x5f   :  { %842 = vperm.xlu0 %3836, %v3280_v55   ;;  %v1566_v55 = vsel %vm1564_vm5, 1, %v5168_v3 }
  0x62   :  { %937 = vperm.xlu1 %3837, %v3289_v56  }
  0x63   :  { %932 = vperm.xlu0 %3836, %v3288_v57  }
  0x66   :  { %857 = vperm.xlu1 %3837, %v3283_v58   ;;  %v3365_v58 = vld [vmem:[%s5165_s10 + $0x18] sm:$0xff] }
  0x67   :  { %852 = vperm.xlu0 %3836, %v3282_v59   ;;  %v3364_v59 = vld [vmem:[%s5165_s10 + $0x10] sm:$0xff] }
  0x6a   :  { %966 = vperm.xlu1 %3837, %v3293_v60   ;;  %v3367_v60 = vld [vmem:[%s5166_s11 + $0x18] sm:$0xff] }
  0x6b   :  { %961 = vperm.xlu0 %3836, %v3292_v61   ;;  %v3366_v61 = vld [vmem:[%s5166_s11 + $0x10] sm:$0xff] }
  0x6e   :  { %947 = vperm.xlu1 %3837, %v3291_v62  }
  0x6f   :  { %942 = vperm.xlu0 %3836, %v3290_v63  }
  0x72   :  { %976 = vperm.xlu1 %3837, %v3295_v1   ;;  %v3374_v1 = vld [vmem:[%s5158_s3 + $0x40] sm:$0xff] }
  0x73   :  { %971 = vperm.xlu0 %3836, %v3294_v2  }
  0x76   :  { %1006 = vperm.xlu1 %3837, %v3301_v4  }
  0x77   :  { %1001 = vperm.xlu0 %3836, %v3300_v5   ;;  %v3383_v5 = vld [vmem:[%s5159_s4 + $0x88] sm:$0xff] }
  0x7a   :  { %1016 = vperm.xlu1 %3837, %v3303_v6   ;;  %v3382_v6 = vld [vmem:[%s5159_s4 + $0x80] sm:$0xff] }
  0x7b   :  { %1011 = vperm.xlu0 %3836, %v3302_v7   ;;  %v3377_v7 = vld [vmem:[%s5158_s3 + $0x58] sm:$0xff] }
  0x7e   :  { %1107 = vperm.xlu1 %3837, %v3313_v8   ;;  %v3376_v8 = vld [vmem:[%s5158_s3 + $0x50] sm:$0xff] }
  0x7f   :  { %1102 = vperm.xlu0 %3836, %v3312_v9  }
  0x81   :  { %v4233_v12 = vpop.permute.xlu1 %148 }
  0x82   :  { %v4235_v13 = vpop.permute.xlu0 %58  ;;  %1117 = vperm.xlu1 %3837, %v3315_v10  }
  0x83   :  { %1112 = vperm.xlu0 %3836, %v3314_v11   ;;  %v3387_v11 = vld [vmem:[%s5160_s5 + $0x88] sm:$0xff] }
  0x85   :  { %v4243_v16 = vpop.permute.xlu1 %153 }
  0x86   :  { %v4245_v17 = vpop.permute.xlu0 %63  ;;  %1201 = vperm.xlu1 %3837, %v3321_v14   ;;  %v3386_v14 = vld [vmem:[%s5160_s5 + $0x80] sm:$0xff] }
  0x87   :  { %1196 = vperm.xlu0 %3836, %v3320_v15  }
  0x89   :  { %v4253_v20 = vpop.permute.xlu1 %73 }
  0x8a   :  { %v4255_v21 = vpop.permute.xlu0 %68  ;;  %1230 = vperm.xlu1 %3837, %v3325_v18  }
  0x8b   :  { %1225 = vperm.xlu0 %3836, %v3324_v19   ;;  %v3385_v19 = vld [vmem:[%s5159_s4 + $0x98] sm:$0xff] }
  0x8d   :  { %v4263_v24 = vpop.permute.xlu1 %181 }
  0x8e   :  { %v4265_v25 = vpop.permute.xlu0 %176  ;;  %1211 = vperm.xlu1 %3837, %v3323_v22   ;;  %v3384_v22 = vld [vmem:[%s5159_s4 + $0x90] sm:$0xff] }
  0x8f   :  { %1206 = vperm.xlu0 %3836, %v3322_v23   ;;  %v3389_v23 = vld [vmem:[%s5160_s5 + $0x98] sm:$0xff] }
  0x91   :  { %v4273_v28 = vpop.permute.xlu1 %163 }
  0x92   :  { %v4275_v29 = vpop.permute.xlu0 %158  ;;  %1240 = vperm.xlu1 %3837, %v3327_v26   ;;  %v3388_v26 = vld [vmem:[%s5160_s5 + $0x90] sm:$0xff] }
  0x93   :  { %1235 = vperm.xlu0 %3836, %v3326_v27  }
  0x95   :  { %v4283_v32 = vpop.permute.xlu1 %191 }
  0x96   :  { %v4285_v33 = vpop.permute.xlu0 %186  ;;  %1270 = vperm.xlu1 %3837, %v3333_v30  }
  0x97   :  { %1265 = vperm.xlu0 %3836, %v3332_v31   ;;  %v3395_v31 = vld [vmem:[%s5162_s7 + $0x108] sm:$0xff] }
  0x99   :  { %v4293_v36 = vpop.permute.xlu1 %219 }
  0x9a   :  { %v4295_v37 = vpop.permute.xlu0 %214  ;;  %1280 = vperm.xlu1 %3837, %v3335_v34   ;;  %v3394_v34 = vld [vmem:[%s5162_s7 + $0x100] sm:$0xff] }
  0x9b   :  { %1275 = vperm.xlu0 %3836, %v3334_v35  }
  0x9d   :  { %v4303_v40 = vpop.permute.xlu1 %229 }
  0x9e   :  { %v4305_v41 = vpop.permute.xlu0 %224  ;;  %1371 = vperm.xlu1 %3837, %v3345_v38  }
  0x9f   :  { %1366 = vperm.xlu0 %3836, %v3344_v39   ;;  %v3397_v39 = vld [vmem:[%s5162_s7 + $0x118] sm:$0xff] }
  0xa1   :  { %v4313_v44 = vpop.permute.xlu1 %321 }
  0xa2   :  { %1381 = vperm.xlu1 %3837, %v3347_v42   ;;  %v4315_v45 = vpop.permute.xlu0 %316  ;;  %v3396_v42 = vld [vmem:[%s5162_s7 + $0x110] sm:$0xff] }
  0xa3   :  { %1376 = vperm.xlu0 %3836, %v3346_v43   ;;  %v3407_v43 = vld [vmem:[%s5162_s7 + $0x128] sm:$0xff] }
  0xa5   :  { %v4335_v52 = vpop.permute.xlu1 %331 }
  0xa6   :  { %1482 = vperm.xlu1 %3837, %v3359_v46   ;;  %v4337_v53 = vpop.permute.xlu0 %326  ;;  %v3406_v46 = vld [vmem:[%s5162_s7 + $0x120] sm:$0xff] }
  0xa7   :  { %1477 = vperm.xlu0 %3836, %v3358_v47  }
  0xa9   :  { %v4341_v56 = vpop.permute.xlu1 %415 }
  0xaa   :  { %1472 = vperm.xlu1 %3837, %v3357_v50   ;;  %v4343_v57 = vpop.permute.xlu0 %410  ;;  %v3409_v50 = vld [vmem:[%s5162_s7 + $0x138] sm:$0xff] }
  0xab   :  { %1467 = vperm.xlu0 %3836, %v3356_v51   ;;  %v3408_v51 = vld [vmem:[%s5162_s7 + $0x130] sm:$0xff] }
  0xad   :  { %v4357_v62 = vpop.permute.xlu1 %444 }
  0xae   :  { %1572 = vperm.xlu1 %3837, %v1567_v54   ;;  %v4359_v63 = vpop.permute.xlu0 %439 }
  0xaf   :  { %1569 = vperm.xlu0 %3836, %v1566_v55  }
  0xb1   :  { %v4367_v2 = vpop.permute.xlu1 %425 }
  0xb2   :  { %1588 = vperm.xlu1 %3837, %v3365_v58   ;;  %v4369_v4 = vpop.permute.xlu0 %420 }
  0xb3   :  { %1583 = vperm.xlu0 %3836, %v3364_v59  }
  0xb5   :  { %v4383_v9 = vpop.permute.xlu1 %454 }
  0xb6   :  { %1607 = vperm.xlu1 %3837, %v3367_v60   ;;  %v4385_v10 = vpop.permute.xlu0 %449 }
  0xb7   :  { %1602 = vperm.xlu0 %3836, %v3366_v61  }
  0xb9   :  { %v4393_v15 = vpop.permute.xlu1 %484 }
  0xba   :  { %1637 = vperm.xlu1 %3837, %v3375_v0   ;;  %v4395_v18 = vpop.permute.xlu0 %479 }
  0xbb   :  { %1632 = vperm.xlu0 %3836, %v3374_v1  }
  0xbd   :  { %v4409_v27 = vpop.permute.xlu1 %494 }
  0xbe   :  { %1727 = vperm.xlu1 %3837, %v3383_v5   ;;  %v4411_v30 = vpop.permute.xlu0 %489 }
  0xbf   :  { %1722 = vperm.xlu0 %3836, %v3382_v6   ;;  %v3415_v6 = vld [vmem:[%s5159_s4 + $0xa8] sm:$0xff] }
  0xc1   :  { %v4419_v35 = vpop.permute.xlu1 %585 }
  0xc2   :  { %1647 = vperm.xlu1 %3837, %v3377_v7   ;;  %v4421_v38 = vpop.permute.xlu0 %580 }
  0xc3   :  { %1642 = vperm.xlu0 %3836, %v3376_v8  }
  0xc5   :  { %v4435_v47 = vpop.permute.xlu1 %595 }
  0xc6   :  { %1756 = vperm.xlu1 %3837, %v3387_v11   ;;  %v4437_v48 = vpop.permute.xlu0 %590  ;;  %v3419_v11 = vld [vmem:[%s5160_s5 + $0xa8] sm:$0xff] }
  0xc7   :  { %1751 = vperm.xlu0 %3836, %v3386_v14   ;;  %v3418_v14 = vld [vmem:[%s5160_s5 + $0xa0] sm:$0xff] }
  0xc9   :  { %v4451_v60 = vpop.permute.xlu1 %694 }
  0xca   :  { %1737 = vperm.xlu1 %3837, %v3385_v19   ;;  %v4456_v1 = vpop.permute.xlu0 %689 }
  0xcb   :  { %1732 = vperm.xlu0 %3836, %v3384_v22  }
  0xcd   :  { %v4485_v19 = vpop.permute.xlu1 %684 }
  0xce   :  { %1766 = vperm.xlu1 %3837, %v3389_v23  }
  0xcf   :  { %1761 = vperm.xlu0 %3836, %v3388_v26   ;;  %v3417_v26 = vld [vmem:[%s5159_s4 + $0xb8] sm:$0xff] }
  0xd2   :  { %1796 = vperm.xlu1 %3837, %v3395_v31   ;;  %v3416_v31 = vld [vmem:[%s5159_s4 + $0xb0] sm:$0xff] }
  0xd3   :  { %1791 = vperm.xlu0 %3836, %v3394_v34   ;;  %v4495_v34 = vpop.permute.xlu1 %784 }
  0xd4   :  { %vm787_vm11 = vcmp.eq.s32.totalorder %v4495_v34, 1  ;;  %v3918_v34 = vld [vmem:[%s5155_s0] sm:$0xff] }
  0xd6   :  { %1806 = vperm.xlu1 %3837, %v3397_v39  }
  0xd7   :  { %1801 = vperm.xlu0 %3836, %v3396_v42   ;;  %v3421_v42 = vld [vmem:[%s5160_s5 + $0xb8] sm:$0xff] }
  0xda   :  { %1897 = vperm.xlu1 %3837, %v3407_v43   ;;  %v3420_v43 = vld [vmem:[%s5160_s5 + $0xb0] sm:$0xff] }
  0xdb   :  { %1892 = vperm.xlu0 %3836, %v3406_v46   ;;  %v3841_v46 = vld [vmem:[%s5161_s6 + $0x8] sm:$0xff]  }
  0xdd   :  { %v3652_v49 = vpop.f32.mrb[0].mxu0 }
  0xde   :  { %v4446_v54 = vadd.f32 %v3652_v49, %v4255_v21  ;;  %v127_v55 = vpop.f32.mrb[1].mxu0  ;;  %1907 = vperm.xlu1 %3837, %v3409_v50   ;;  %v3427_v49 = vld [vmem:[%s5162_s7 + $0x148] sm:$0xff]  ;;  %v4511_v50 = vpop.permute.xlu1 %799 }
  0xdf   :  { %v4449_v58 = vadd.f32 %v127_v55, %v4235_v13  ;;  %v3653_v59 = vpop.f32.mrb[2].mxu0  ;;  %1902 = vperm.xlu0 %3836, %v3408_v51   ;;  %v3426_v51 = vld [vmem:[%s5162_s7 + $0x140] sm:$0xff] }
  0xe0   :  { %v4454_v61 = vadd.f32 %v3653_v59, %v4253_v20  ;;  %v130_v0 = vpop.f32.mrb[3].mxu0  ;;  %v168_v5 = vmul.f32 %v4275_v29, %v4446_v54  ;;  %v3414_v20 = vld [vmem:[%s5159_s4 + $0xa0] sm:$0xff]  ;;  %v3429_v59 = vld [vmem:[%s5162_s7 + $0x158] sm:$0xff] }
  0xe1   :  { %v166_v21 = vmul.f32 %v4233_v12, %v4449_v58  ;;  %v4463_v13 = vadd.f32 %v130_v0, %v4245_v17  ;;  %v3428_v0 = vld [vmem:[%s5162_s7 + $0x150] sm:$0xff] }
  0xe2   :  { %v169_v7 = vmul.f32 %v4273_v28, %v4454_v61  ;;  %1991 = vperm.xlu1 %3837, %v3415_v6   ;;  %v196_v17 = vadd.f32 %v4285_v33, %v168_v5  ;;  %v4525_v5 = vpop.permute.xlu1 %817  ;;  %v3439_v6 = vld [vmem:[%s5162_s7 + $0x168] sm:$0xff] }
  0xe3   :  { %v167_v29 = vmul.f32 %v4243_v16, %v4463_v13  ;;  %v194_v8 = vadd.f32 %v4265_v25, %v166_v21  ;;  %1986 = vperm.xlu0 %3836, %v3414_v20   ;;  %v4487_v16 = vpop.permute.xlu0 %679  ;;  %v3438_v20 = vld [vmem:[%s5162_s7 + $0x160] sm:$0xff] }
  0xe4   :  { %v197_v12 = vadd.f32 %v4283_v32, %v169_v7  ;;  %v200_v33 = vmax.f32 %v196_v17, 0.0  ;;  %v3441_v7 = vld [vmem:[%s5162_s7 + $0x178] sm:$0xff] }
  0xe5   :  { %v195_v28 = vadd.f32 %v4263_v24, %v167_v29  ;;  %v198_v32 = vmax.f32 %v194_v8, 0.0  ;;  %v3440_v8 = vld [vmem:[%s5162_s7 + $0x170] sm:$0xff]  ;;  %v3453_v17 = vld [vmem:[%s5164_s9 + $0x58] sm:$0xff] }
  0xe6   :  { %v201_v25 = vmax.f32 %v197_v12, 0.0  ;;  %2020 = vperm.xlu1 %3837, %v3419_v11   ;;  %v4538_v29 = vpop.permute.xlu1 %847  ;;  %v3452_v11 = vld [vmem:[%s5164_s9 + $0x50] sm:$0xff] }
  0xe7   :  { %v199_v22 = vmax.f32 %v195_v28, 0.0  ;;  %2015 = vperm.xlu0 %3836, %v3418_v14   ;;  %v4497_v39 = vpop.permute.xlu0 %781  ;;  %v3369_v14 = vld [vmem:[%s5156_s1 + $0x28] sm:$0xff] }
  0xe8   :  { %v207_v24 = vpack.c.bf16 %v201_v25, %v200_v33  ;;  %v3368_v25 = vld [vmem:[%s5156_s1 + $0x20] sm:$0xff]  ;;  %vm2355_vm6 = vcmp.gt.f32.partialorder %v3369_v14, 0.5  ;;  %vm786_vm10 = vcmp.eq.s32.totalorder %v4497_v39, 1 }
  0xe9   :  { %v206_v23 = vpack.c.bf16 %v199_v22, %v198_v32  ;;  %v3451_v22 = vld [vmem:[%s5164_s9 + $0x48] sm:$0xff]  ;;  %v3450_v33 = vld [vmem:[%s5164_s9 + $0x40] sm:$0xff]  ;;  %vm2354_vm7 = vcmp.gt.f32.partialorder %v3368_v25, 0.5  ;;  %v3471_v25 = vld [vmem:[%s5158_s3 + $0x78] sm:$0xff] }
  0xea   :  { %2001 = vperm.xlu1 %3837, %v3417_v26   ;;  %v4554_v28 = vpop.permute.xlu1 %937 }
  0xeb   :  { %3654 = vmatprep.subr.bf16.mxu1 %v206_v23  ;;  %1996 = vperm.xlu0 %3836, %v3416_v31   ;;  %v4516_v55 = vpop.permute.xlu0 %794  ;;  %v2356_v31 = vsel %vm2354_vm7, 1, %v5168_v3 }
  0xec   :  { %3655 = vmatpush3.bf16.msra.mxu1 %v206_v23  ;;  %v2357_v23 = vsel %vm2355_vm6, 1, %v5168_v3 }
  0xed   :  { %3656 = vmatprep.subr.bf16.mxu1 %v207_v24 }
  0xee   :  { %2030 = vperm.xlu1 %3837, %v3421_v42   ;;  %v4568_v26 = vpop.permute.xlu1 %857  ;;  %v3459_v42 = vld [vmem:[%s5165_s10 + $0x28] sm:$0xff] }
  0xef   :  { %2025 = vperm.xlu0 %3836, %v3420_v43   ;;  %v4527_v21 = vpop.permute.xlu0 %812  ;;  %v3458_v43 = vld [vmem:[%s5165_s10 + $0x20] sm:$0xff] }
  0xf0   :  { %3657 = vmatpush3.bf16.msra.mxu1 %v207_v24 }
  0xf2   :  { %2060 = vperm.xlu1 %3837, %v3427_v49  }
  0xf3   :  { %3659 = vmatmul.mubr.msk.bf16.vlgmr.msra.gmra.mrb[0].mxu1 %vm242_vm3, %v3841_v46  ;;  %2055 = vperm.xlu0 %3836, %v3426_v51   ;;  %v4543_v12 = vpop.permute.xlu0 %842  ;;  %v4579_v46 = vpop.permute.xlu1 %966  ;;  %v3461_v51 = vld [vmem:[%s5166_s11 + $0x28] sm:$0xff] }
  0xf4   :  { %5170 = vst [vmem:[#allocation5_spill] sm:$0xff] %v4579_v46 }
  0xf6   :  { %2070 = vperm.xlu1 %3837, %v3429_v59   ;;  %v3460_v59 = vld [vmem:[%s5166_s11 + $0x20] sm:$0xff] }
  0xf7   :  { %2065 = vperm.xlu0 %3836, %v3428_v0   ;;  %v4559_v32 = vpop.permute.xlu0 %932  ;;  %v3469_v0 = vld [vmem:[%s5158_s3 + $0x68] sm:$0xff] }
  0xfa   :  { %2161 = vperm.xlu1 %3837, %v3439_v6   ;;  %v4592_v6 = vpop.permute.xlu1 %947 }
  0xfb   :  { %2156 = vperm.xlu0 %3836, %v3438_v20   ;;  %v4571_v24 = vpop.permute.xlu0 %852  ;;  %v3468_v20 = vld [vmem:[%s5158_s3 + $0x60] sm:$0xff] }
  0xfe   :  { %2171 = vperm.xlu1 %3837, %v3441_v7  }
  0xff   :  { %2166 = vperm.xlu0 %3836, %v3440_v8   ;;  %v4581_v49 = vpop.permute.xlu0 %961  ;;  %v3477_v8 = vld [vmem:[%s5159_s4 + $0xc8] sm:$0xff] }
 0x102   :  { %2272 = vperm.xlu1 %3837, %v3453_v17   ;;  %v3476_v17 = vld [vmem:[%s5159_s4 + $0xc0] sm:$0xff] }
 0x103   :  { %2267 = vperm.xlu0 %3836, %v3452_v11   ;;  %v4597_v7 = vpop.permute.xlu0 %942  ;;  %v4605_v11 = vpop.permute.xlu1 %976 }
 0x106   :  { %2262 = vperm.xlu1 %3837, %v3451_v22   ;;  %v3470_v22 = vld [vmem:[%s5158_s3 + $0x70] sm:$0xff] }
 0x107   :  { %2257 = vperm.xlu0 %3836, %v3450_v33   ;;  %v4607_v14 = vpop.permute.xlu0 %971  ;;  %v3481_v33 = vld [vmem:[%s5160_s5 + $0xc8] sm:$0xff] }
 0x108   :  { %5171 = vst [vmem:[#allocation6_spill] sm:$0xff] %v4607_v14 }
 0x10a   :  { %2362 = vperm.xlu1 %3837, %v2357_v23   ;;  %v4618_v23 = vpop.permute.xlu1 %1006 }
 0x10b   :  { %2359 = vperm.xlu0 %3836, %v2356_v31   ;;  %5172 = vst [vmem:[#allocation7_spill] sm:$0xff] %v4618_v23  ;;  %v3480_v31 = vld [vmem:[%s5160_s5 + $0xc0] sm:$0xff] }
 0x10e   :  { %2378 = vperm.xlu1 %3837, %v3459_v42   ;;  %v4623_v42 = vpop.permute.xlu0 %1001 }
 0x10f   :  { %2373 = vperm.xlu0 %3836, %v3458_v43   ;;  %5173 = vst [vmem:[#allocation8_spill] sm:$0xff] %v4623_v42  ;;  %v3479_v43 = vld [vmem:[%s5159_s4 + $0xd8] sm:$0xff] }
 0x112   :  { %2397 = vperm.xlu1 %3837, %v3461_v51   ;;  %v3478_v51 = vld [vmem:[%s5159_s4 + $0xd0] sm:$0xff] }
 0x113   :  { %2392 = vperm.xlu0 %3836, %v3460_v59   ;;  %v4631_v59 = vpop.permute.xlu1 %1016 }
 0x114   :  { %5174 = vst [vmem:[#allocation9_spill] sm:$0xff] %v4631_v59 }
 0x116   :  { %2427 = vperm.xlu1 %3837, %v3469_v0   ;;  %v4633_v0 = vpop.permute.xlu0 %1011 }
 0x117   :  { %2422 = vperm.xlu0 %3836, %v3468_v20   ;;  %5175 = vst [vmem:[#allocation10_spill] sm:$0xff] %v4633_v0  ;;  %v3483_v20 = vld [vmem:[%s5160_s5 + $0xd8] sm:$0xff] }
 0x11a   :  { %2517 = vperm.xlu1 %3837, %v3477_v8   ;;  %v3482_v8 = vld [vmem:[%s5160_s5 + $0xd0] sm:$0xff] }
 0x11b   :  { %2512 = vperm.xlu0 %3836, %v3476_v17   ;;  %v3489_v17 = vld [vmem:[%s5162_s7 + $0x188] sm:$0xff] }
 0x11e   :  { %2437 = vperm.xlu1 %3837, %v3471_v25   ;;  %v4644_v25 = vpop.permute.xlu1 %1107 }
 0x11f   :  { %2432 = vperm.xlu0 %3836, %v3470_v22   ;;  %5176 = vst [vmem:[#allocation11_spill] sm:$0xff] %v4644_v25  ;;  %v3488_v22 = vld [vmem:[%s5162_s7 + $0x180] sm:$0xff]  ;;  %v3509_v25 = vld [vmem:[%s5159_s4 + $0xe8] sm:$0xff] }
 0x122   :  { %2546 = vperm.xlu1 %3837, %v3481_v33   ;;  %v4649_v33 = vpop.permute.xlu0 %1102 }
 0x123   :  { %2541 = vperm.xlu0 %3836, %v3480_v31   ;;  %5177 = vst [vmem:[#allocation12_spill] sm:$0xff] %v4649_v33  ;;  %v3491_v31 = vld [vmem:[%s5162_s7 + $0x198] sm:$0xff] }
 0x126   :  { %2527 = vperm.xlu1 %3837, %v3479_v43   ;;  %v3490_v43 = vld [vmem:[%s5162_s7 + $0x190] sm:$0xff] }
 0x127   :  { %2522 = vperm.xlu0 %3836, %v3478_v51   ;;  %v4657_v51 = vpop.permute.xlu1 %1117 }
 0x128   :  { %5178 = vst [vmem:[#allocation13_spill] sm:$0xff] %v4657_v51 }
 0x12a   :  { %2556 = vperm.xlu1 %3837, %v3483_v20   ;;  %v4659_v20 = vpop.permute.xlu0 %1112 }
 0x12b   :  { %2551 = vperm.xlu0 %3836, %v3482_v8   ;;  %5179 = vst [vmem:[#allocation14_spill] sm:$0xff] %v4659_v20  ;;  %v3501_v8 = vld [vmem:[%s5162_s7 + $0x1a8] sm:$0xff]  ;;  %v4670_v3 = vpop.permute.xlu1 %1201  ;;  %v3553_v20 = vld [vmem:[%s5165_s10 + $0x38] sm:$0xff] }
 0x12c   :  { %5180 = vst [vmem:[#allocation15_spill] sm:$0xff] %v4670_v3 }
 0x12e   :  { %2586 = vperm.xlu1 %3837, %v3489_v17   ;;  %v3500_v17 = vld [vmem:[%s5162_s7 + $0x1a0] sm:$0xff] }
 0x12f   :  { %2581 = vperm.xlu0 %3836, %v3488_v22   ;;  %v3503_v22 = vld [vmem:[%s5162_s7 + $0x1b8] sm:$0xff] }
 0x132   :  { %2596 = vperm.xlu1 %3837, %v3491_v31   ;;  %v3502_v31 = vld [vmem:[%s5162_s7 + $0x1b0] sm:$0xff] }
 0x133   :  { %2591 = vperm.xlu0 %3836, %v3490_v43   ;;  %v4675_v43 = vpop.permute.xlu0 %1196 }
 0x134   :  { %5181 = vst [vmem:[#allocation16_spill] sm:$0xff] %v4675_v43  ;;  %v3513_v43 = vld [vmem:[%s5160_s5 + $0xe8] sm:$0xff] }
 0x136   :  { %2687 = vperm.xlu1 %3837, %v3501_v8   ;;  %v3508_v8 = vld [vmem:[%s5159_s4 + $0xe0] sm:$0xff] }
 0x137   :  { %2682 = vperm.xlu0 %3836, %v3500_v17   ;;  %v4683_v17 = vpop.permute.xlu1 %1230  ;;  %v4685_v3 = vpop.permute.xlu0 %1225 }
 0x138   :  { %5182 = vst [vmem:[#allocation17_spill] sm:$0xff] %v4683_v17  ;;  %5183 = vst [vmem:[#allocation18_spill] sm:$0xff] %v4685_v3  ;;  %v3515_v17 = vld [vmem:[%s5160_s5 + $0xf8] sm:$0xff] }
 0x13a   :  { %2697 = vperm.xlu1 %3837, %v3503_v22   ;;  %v3512_v22 = vld [vmem:[%s5160_s5 + $0xe0] sm:$0xff] }
 0x13b   :  { %2692 = vperm.xlu0 %3836, %v3502_v31   ;;  %v3511_v31 = vld [vmem:[%s5159_s4 + $0xf8] sm:$0xff]  ;;  %v4696_v51 = vpop.permute.xlu1 %1211 }
 0x13c   :  { %5184 = vst [vmem:[#allocation19_spill] sm:$0xff] %v4696_v51  ;;  %v3521_v51 = vld [vmem:[%s5162_s7 + $0x1c8] sm:$0xff] }
 0x13e   :  { %2781 = vperm.xlu1 %3837, %v3509_v25   ;;  %v3510_v25 = vld [vmem:[%s5159_s4 + $0xf0] sm:$0xff] }
 0x13f   :  { %2776 = vperm.xlu0 %3836, %v3508_v8   ;;  %v4701_v8 = vpop.permute.xlu0 %1206 }
 0x140   :  { %5185 = vst [vmem:[#allocation20_spill] sm:$0xff] %v4701_v8 }
 0x142   :  { %2810 = vperm.xlu1 %3837, %v3513_v43   ;;  %v3514_v43 = vld [vmem:[%s5160_s5 + $0xf0] sm:$0xff] }
 0x143   :  { %2805 = vperm.xlu0 %3836, %v3512_v22   ;;  %v4709_v22 = vpop.permute.xlu1 %1240  ;;  %v4711_v3 = vpop.permute.xlu0 %1235 }
 0x144   :  { %5186 = vst [vmem:[#allocation21_spill] sm:$0xff] %v4709_v22  ;;  %5187 = vst [vmem:[#allocation22_spill] sm:$0xff] %v4711_v3  ;;  %v3533_v3 = vld [vmem:[%s5162_s7 + $0x1e8] sm:$0xff] }
 0x146   :  { %2791 = vperm.xlu1 %3837, %v3511_v31   ;;  %v3520_v31 = vld [vmem:[%s5162_s7 + $0x1c0] sm:$0xff] }
 0x147   :  { %2786 = vperm.xlu0 %3836, %v3510_v25   ;;  %v3523_v25 = vld [vmem:[%s5162_s7 + $0x1d8] sm:$0xff]  ;;  %v4722_v8 = vpop.permute.xlu1 %1270 }
 0x148   :  { %5188 = vst [vmem:[#allocation23_spill] sm:$0xff] %v4722_v8 }
 0x14a   :  { %2820 = vperm.xlu1 %3837, %v3515_v17   ;;  %v3522_v17 = vld [vmem:[%s5162_s7 + $0x1d0] sm:$0xff] }
 0x14b   :  { %2815 = vperm.xlu0 %3836, %v3514_v43   ;;  %v4727_v43 = vpop.permute.xlu0 %1265  ;;  %v4739_v8 = vpop.permute.xlu1 %1280 }
 0x14c   :  { %5189 = vst [vmem:[#allocation24_spill] sm:$0xff] %v4727_v43  ;;  %5190 = vst [vmem:[#allocation25_spill] sm:$0xff] %v4739_v8  ;;  %v3463_v8 = vld [vmem:[%s5156_s1 + $0x38] sm:$0xff] }
 0x14d   :  { %vm3145_vm8 = vcmp.gt.f32.partialorder %v3463_v8, 0.5  ;;  %v3552_v8 = vld [vmem:[%s5165_s10 + $0x30] sm:$0xff] }
 0x14e   :  { %2850 = vperm.xlu1 %3837, %v3521_v51   ;;  %v3842_v51 = vld [vmem:[%s5161_s6 + $0x10] sm:$0xff]  }
 0x14f   :  { %2845 = vperm.xlu0 %3836, %v3520_v31   ;;  %v3532_v31 = vld [vmem:[%s5162_s7 + $0x1e0] sm:$0xff]  ;;  %3666 = vmatprep.mubr.msk.bf16.mxu0 %vm242_vm3, %v3842_v51  ;;  %v4741_v43 = vpop.permute.xlu0 %1275  ;;  %v3547_v51 = vld [vmem:[%s5164_s9 + $0x78] sm:$0xff]  ;;  %v4752_v22 = vpop.permute.xlu1 %1371 }
 0x150   :  { %5191 = vst [vmem:[#allocation26_spill] sm:$0xff] %v4741_v43  ;;  %5192 = vst [vmem:[#allocation27_spill] sm:$0xff] %v4752_v22  ;;  %v3544_v22 = vld [vmem:[%s5164_s9 + $0x60] sm:$0xff] }
 0x152   :  { %2860 = vperm.xlu1 %3837, %v3523_v25   ;;  %v3535_v25 = vld [vmem:[%s5162_s7 + $0x1f8] sm:$0xff] }
 0x153   :  { %2855 = vperm.xlu0 %3836, %v3522_v17   ;;  %v3534_v17 = vld [vmem:[%s5162_s7 + $0x1f0] sm:$0xff] }
 0x156   :  { %2951 = vperm.xlu1 %3837, %v3533_v3   ;;  %v3546_v3 = vld [vmem:[%s5164_s9 + $0x70] sm:$0xff] }
 0x157   :  { %2946 = vperm.xlu0 %3836, %v3532_v31   ;;  %v4757_v31 = vpop.permute.xlu0 %1366 }
 0x158   :  { %5193 = vst [vmem:[#allocation28_spill] sm:$0xff] %v4757_v31  ;;  %v4771_v31 = vpop.permute.xlu1 %1381 }
 0x159   :  { %5194 = vst [vmem:[#allocation29_spill] sm:$0xff] %v4771_v31 }
 0x15a   :  { %2961 = vperm.xlu1 %3837, %v3535_v25   ;;  %v3462_v25 = vld [vmem:[%s5156_s1 + $0x30] sm:$0xff] }
 0x15b   :  { %2956 = vperm.xlu0 %3836, %v3534_v17   ;;  %v3545_v17 = vld [vmem:[%s5164_s9 + $0x68] sm:$0xff]  ;;  %vm3144_vm9 = vcmp.gt.f32.partialorder %v3462_v25, 0.5  ;;  %v4773_v43 = vpop.permute.xlu0 %1376 }
 0x15c   :  { %5195 = vst [vmem:[#allocation30_spill] sm:$0xff] %v4773_v43  ;;  %v4780_v23 = vpop.permute.xlu1 %1482 }
 0x15d   :  { %5197 = vst [vmem:[#allocation31_spill] sm:$0xff] %v4780_v23 }
 0x15e   :  { %3062 = vperm.xlu1 %3837, %v3547_v51   ;;  %v5196_v51 = vmov 0  }
 0x15f   :  { %3057 = vperm.xlu0 %3836, %v3546_v3   ;;  %v3147_v33 = vsel %vm3145_vm8, 1, %v5196_v51  ;;  %v3146_v3 = vsel %vm3144_vm9, 1, %v5196_v51  ;;  %v4785_v25 = vpop.permute.xlu0 %1477 }
 0x160   :  { %5198 = vst [vmem:[#allocation32_spill] sm:$0xff] %v4785_v25 }
 0x162   :  { %3052 = vperm.xlu1 %3837, %v3545_v17   ;;  %v4793_v17 = vpop.permute.xlu1 %1472 }
 0x163   :  { %3047 = vperm.xlu0 %3836, %v3544_v22   ;;  %v3555_v22 = vld [vmem:[%s5166_s11 + $0x38] sm:$0xff]  ;;  %5199 = vst [vmem:[#allocation33_spill] sm:$0xff] %v4793_v17  ;;  %v4795_v51 = vpop.permute.xlu0 %1467 }
 0x166   :  { %3152 = vperm.xlu1 %3837, %v3147_v33   ;;  %v3554_v33 = vld [vmem:[%s5166_s11 + $0x30] sm:$0xff] }
 0x167   :  { %3149 = vperm.xlu0 %3836, %v3146_v3  }
 0x16a   :  { %3168 = vperm.xlu1 %3837, %v3553_v20  }
 0x16b   :  { %3163 = vperm.xlu0 %3836, %v3552_v8  }
 0x16e   :  { %3187 = vperm.xlu1 %3837, %v3555_v22  }
 0x16f   :  { %3182 = vperm.xlu0 %3836, %v3554_v33  }
 0x1c6   :  { %v3660_v3 = vpop.f32.mrb[0].mxu1 }
 0x1c7   :  { %v292_v23 = vadd.f32 %v3660_v3, %v4305_v41  ;;  %v283_v25 = vpop.f32.mrb[1].mxu1  ;;  %v3843_v41 = vld [vmem:[%s5161_s6 + $0x18] sm:$0xff]  }
 0x1c8   :  { %v284_v20 = vadd.f32 %v283_v25, %v4295_v37  ;;  %v3661_v8 = vpop.f32.mrb[2].mxu1 }
 0x1c9   :  { %v295_v31 = vadd.f32 %v3661_v8, %v4303_v40  ;;  %v286_v43 = vpop.f32.mrb[3].mxu1  ;;  %v300_v42 = vmax.f32 %v292_v23, 0.0 }
 0x1ca   :  { %v287_v59 = vadd.f32 %v286_v43, %v4293_v36  ;;  %v298_v46 = vmax.f32 %v284_v20, 0.0  ;;  %v3844_v36 = vld [vmem:[%s5161_s6 + $0x20] sm:$0xff]  }
 0x1cb   :  { %v301_v0 = vmax.f32 %v295_v31, 0.0  ;;  %3674 = vmatprep.mubr.msk.bf16.mxu1 %vm242_vm3, %v3844_v36 }
 0x1cc   :  { %v299_v17 = vmax.f32 %v287_v59, 0.0 }
 0x1cd   :  { %v308_v22 = vpack.c.bf16 %v301_v0, %v300_v42 }
 0x1ce   :  { %v307_v14 = vpack.c.bf16 %v299_v17, %v298_v46 }
 0x1d0   :  { %3662 = vmatprep.subr.bf16.mxu0 %v307_v14 }
 0x1d1   :  { %3663 = vmatpush3.bf16.msra.mxu0 %v307_v14 }
 0x1d2   :  { %3664 = vmatprep.subr.bf16.mxu0 %v308_v22 }
 0x1d5   :  { %3665 = vmatpush3.bf16.msra.mxu0 %v308_v22 }
 0x1d8   :  { %3667 = vmatmul.mubr.msk.bf16.vlgmr.msra.gmra.mrb[4].mxu0 %vm242_vm3, %v3843_v41 }
 0x2ab   :  { %v3668_v37 = vpop.f32.mrb[4].mxu0 }
 0x2ac   :  { %v393_v40 = vadd.f32 %v3668_v37, %v4337_v53  ;;  %v384_v46 = vpop.f32.mrb[5].mxu0 }
 0x2ad   :  { %v385_v14 = vadd.f32 %v384_v46, %v4315_v45  ;;  %v3669_v23 = vpop.f32.mrb[6].mxu0 }
 0x2ae   :  { %v401_v42 = vadd.f32 %v393_v40, %v4446_v54  ;;  %v396_v59 = vadd.f32 %v3669_v23, %v4335_v52  ;;  %v387_v0 = vpop.f32.mrb[7].mxu0 }
 0x2af   :  { %v399_v43 = vadd.f32 %v385_v14, %v4449_v58  ;;  %v388_v31 = vadd.f32 %v387_v0, %v4313_v44 }
 0x2b0   :  { %v402_v25 = vadd.f32 %v396_v59, %v4454_v61  ;;  %v430_v33 = vmul.f32 %v4369_v4, %v401_v42 }
 0x2b1   :  { %v428_v17 = vmul.f32 %v4343_v57, %v399_v43  ;;  %v400_v53 = vadd.f32 %v388_v31, %v4463_v13 }
 0x2b2   :  { %v431_v45 = vmul.f32 %v4367_v2, %v402_v25  ;;  %v459_v44 = vadd.f32 %v4385_v10, %v430_v33 }
 0x2b3   :  { %v429_v3 = vmul.f32 %v4341_v56, %v400_v53  ;;  %v457_v54 = vadd.f32 %v4359_v63, %v428_v17  ;;  %v3845_v56 = vld [vmem:[%s5161_s6 + $0x28] sm:$0xff]  }
 0x2b4   :  { %v460_v52 = vadd.f32 %v4383_v9, %v431_v45  ;;  %v463_v22 = vmax.f32 %v459_v44, 0.0 }
 0x2b5   :  { %v458_v58 = vadd.f32 %v4357_v62, %v429_v3  ;;  %v461_v20 = vmax.f32 %v457_v54, 0.0  ;;  %v3846_v62 = vld [vmem:[%s5161_s6 + $0x30] sm:$0xff]  }
 0x2b6   :  { %v464_v8 = vmax.f32 %v460_v52, 0.0  ;;  %3682 = vmatprep.mubr.msk.bf16.mxu0 %vm242_vm3, %v3846_v62 }
 0x2b7   :  { %v462_v61 = vmax.f32 %v458_v58, 0.0 }
 0x2b8   :  { %v471_v57 = vpack.c.bf16 %v464_v8, %v463_v22 }
 0x2b9   :  { %v470_v4 = vpack.c.bf16 %v462_v61, %v461_v20 }
 0x2bb   :  { %3670 = vmatprep.subr.bf16.mxu1 %v470_v4 }
 0x2bc   :  { %3671 = vmatpush3.bf16.msra.mxu1 %v470_v4 }
 0x2bd   :  { %3672 = vmatprep.subr.bf16.mxu1 %v471_v57 }
 0x2c0   :  { %3673 = vmatpush3.bf16.msra.mxu1 %v471_v57 }
 0x2c3   :  { %3675 = vmatmul.mubr.msk.bf16.vlgmr.msra.gmra.mrb[4].mxu1 %vm242_vm3, %v3845_v56 }
 0x396   :  { %v3676_v63 = vpop.f32.mrb[4].mxu1 }
 0x397   :  { %v556_v2 = vadd.f32 %v3676_v63, %v4411_v30  ;;  %v547_v9 = vpop.f32.mrb[5].mxu1  ;;  %v3847_v30 = vld [vmem:[%s5161_s6 + $0x38] sm:$0xff]  }
 0x398   :  { %v548_v10 = vadd.f32 %v547_v9, %v4395_v18  ;;  %v3677_v13 = vpop.f32.mrb[6].mxu1 }
 0x399   :  { %v559_v41 = vadd.f32 %v3677_v13, %v4409_v27  ;;  %v550_v36 = vpop.f32.mrb[7].mxu1  ;;  %v564_v40 = vmax.f32 %v556_v2, 0.0 }
 0x39a   :  { %v551_v37 = vadd.f32 %v550_v36, %v4393_v15  ;;  %v562_v14 = vmax.f32 %v548_v10, 0.0  ;;  %v3848_v15 = vld [vmem:[%s5163_s8] sm:$0xff]  }
 0x39b   :  { %v565_v46 = vmax.f32 %v559_v41, 0.0  ;;  %3690 = vmatprep.mubr.msk.bf16.mxu1 %vm242_vm3, %v3848_v15 }
 0x39c   :  { %v563_v23 = vmax.f32 %v551_v37, 0.0 }
 0x39d   :  { %v572_v59 = vpack.c.bf16 %v565_v46, %v564_v40 }
 0x39e   :  { %v571_v0 = vpack.c.bf16 %v563_v23, %v562_v14 }
 0x3a0   :  { %3678 = vmatprep.subr.bf16.mxu0 %v571_v0 }
 0x3a1   :  { %3679 = vmatpush3.bf16.msra.mxu0 %v571_v0 }
 0x3a2   :  { %3680 = vmatprep.subr.bf16.mxu0 %v572_v59 }
 0x3a5   :  { %3681 = vmatpush3.bf16.msra.mxu0 %v572_v59 }
 0x3a8   :  { %3683 = vmatmul.mubr.msk.bf16.vlgmr.msra.gmra.mrb[8].mxu0 %vm242_vm3, %v3847_v30 }
 0x47b   :  { %v3684_v18 = vpop.f32.mrb[8].mxu0 }
 0x47c   :  { %v657_v27 = vadd.f32 %v3684_v18, %v4437_v48  ;;  %v648_v31 = vpop.f32.mrb[9].mxu0  ;;  %v3849_v48 = vld [vmem:[%s5163_s8 + $0x8] sm:$0xff]  }
 0x47d   :  { %v649_v33 = vadd.f32 %v648_v31, %v4421_v38  ;;  %v3685_v17 = vpop.f32.mrb[10].mxu0 }
 0x47e   :  { %v660_v45 = vadd.f32 %v3685_v17, %v4435_v47  ;;  %v651_v3 = vpop.f32.mrb[11].mxu0  ;;  %v665_v52 = vadd.f32 %v657_v27, %v401_v42  ;;  %v3919_v27 = vld [vmem:[%s5155_s0 + $0x8] sm:$0xff] }
 0x47f   :  { %v652_v54 = vadd.f32 %v651_v3, %v4419_v35  ;;  %v663_v44 = vadd.f32 %v649_v33, %v399_v43  ;;  %v3850_v35 = vld [vmem:[%s5157_s2 + $0x10] sm:$0xff]  }
 0x480   :  { %v666_v58 = vadd.f32 %v660_v45, %v402_v25  ;;  %3696 = vmatprep.mubr.msk.bf16.mxu0 %vm86_vm0, %v3850_v35 }
 0x481   :  { %v664_v20 = vadd.f32 %v652_v54, %v400_v53 }
 0x482   :  { %v672_v61 = vpack.c.bf16 %v666_v58, %v665_v52 }
 0x483   :  { %v671_v8 = vpack.c.bf16 %v664_v20, %v663_v44 }
 0x485   :  { %3686 = vmatprep.subr.bf16.mxu1 %v671_v8 }
 0x486   :  { %3687 = vmatpush3.bf16.msra.mxu1 %v671_v8 }
 0x487   :  { %3688 = vmatprep.subr.bf16.mxu1 %v672_v61 }
 0x48a   :  { %3689 = vmatpush3.bf16.msra.mxu1 %v672_v61 }
 0x48d   :  { %3691 = vmatmul.mubr.msk.bf16.vlgmr.msra.gmra.mrb[8].mxu1 %vm242_vm3, %v3849_v48 }
 0x560   :  { %v3692_v38 = vpop.f32.mrb[8].mxu1 }
 0x561   :  { %v756_v47 = vadd.f32 %v3692_v38, %v4456_v1  ;;  %v747_v42 = vpop.f32.mrb[9].mxu1 }
 0x562   :  { %v3693_v43 = vpop.f32.mrb[10].mxu1  ;;  %v748_v1 = vadd.f32 %v747_v42, %v4487_v16  ;;  %v5201_v42 = vld [vmem:[#allocation5_spill] sm:$0xff] }
 0x563   :  { %v762_v25 = vadd.f32 2.0, %v756_v47  ;;  %v759_v53 = vadd.f32 %v3693_v43, %v4451_v60  ;;  %v750_v4 = vpop.f32.mrb[11].mxu1  ;;  %v5200_v47 = vld [vmem:[#allocation6_spill] sm:$0xff] }
 0x564   :  { %v751_v41 = vadd.f32 %v750_v4, %v4485_v19  ;;  %v804_v60 = vsel %vm786_vm10, %v748_v1, 0.0 }
 0x565   :  { %v764_v22 = vsub.f32 0.0, %v762_v25  ;;  %v763_v57 = vadd.f32 2.0, %v759_v53  ;;  %v806_v14 = vmul.f32 %v804_v60, %v4516_v55 }
 0x566   :  { %v805_v40 = vsel %vm787_vm11, %v751_v41, 0.0 }
 0x567   :  { %v766_v56 = vmul.f32 1.442695, %v764_v22  ;;  %v765_v62 = vsub.f32 0.0, %v763_v57  ;;  %v807_v0 = vmul.f32 %v805_v40, %v4511_v50  ;;  %v820_v19 = vadd.f32 %v4527_v21, %v806_v14  ;;  %v5203_v57 = vld [vmem:[#allocation8_spill] sm:$0xff]  ;;  %v3856_v14 = vld [vmem:[%s5161_s6 + $0x60] sm:$0xff]  }
 0x569   :  { %3886 = vpow2.f32 %v766_v56  ;;  %v768_v63 = vmul.f32 1.442695, %v765_v62  ;;  %v821_v18 = vadd.f32 %v4525_v5, %v807_v0  ;;  %v3852_v5 = vld [vmem:[%s5161_s6 + $0x40] sm:$0xff]  }
 0x56a   :  { %3704 = vmatprep.mubr.msk.bf16.mxu1 %vm242_vm3, %v3852_v5 }
 0x56b   :  { %3888 = vpow2.f32 %v768_v63  ;;  %v5204_v63 = vld [vmem:[#allocation9_spill] sm:$0xff] }
 0x573   :  { %v3887_v2 = vpop.eup %3886 }
 0x574   :  { %v770_v9 = vadd.f32 1.0, %v3887_v2 }
 0x575   :  { %v3889_v10 = vpop.eup %3888 }
 0x576   :  { %3890 = vrcp.f32 %v770_v9  ;;  %v771_v13 = vadd.f32 1.0, %v3889_v10  ;;  %v5205_v10 = vld [vmem:[#allocation7_spill] sm:$0xff] }
 0x578   :  { %3892 = vrcp.f32 %v771_v13 }
 0x580   :  { %v3891_v36 = vpop.eup %3890 }
 0x581   :  { %v774_v37 = vadd.f32 0.001, %v3891_v36 }
 0x582   :  { %v3893_v46 = vpop.eup %3892 }
 0x583   :  { %v788_v23 = vsel %vm786_vm10, %v774_v37, 1.0  ;;  %v775_v59 = vadd.f32 0.001, %v3893_v46  ;;  %v3855_v46 = vld [vmem:[%s5161_s6 + $0x58] sm:$0xff]  }
 0x584   :  { %v802_v30 = vmul.f32 %v4516_v55, %v788_v23 }
 0x585   :  { %v789_v16 = vsel %vm787_vm11, %v775_v59, 1.0  ;;  %v5206_v59 = vld [vmem:[#allocation14_spill] sm:$0xff] }
 0x586   :  { %v803_v39 = vmul.f32 %v4511_v50, %v789_v16  ;;  %v822_v15 = vmul.f32 %v3918_v34, %v802_v30  ;;  %v3851_v50 = vld [vmem:[%s5157_s2 + $0x18] sm:$0xff]   ;;  %v5207_v16 = vld [vmem:[#allocation12_spill] sm:$0xff] }
 0x588   :  { %v823_v31 = vmul.f32 %v3919_v27, %v803_v39  ;;  %v4875_v33 = vadd.f32 %v822_v15, %v820_v19  ;;  %v5208_v15 = vld [vmem:[#allocation13_spill] sm:$0xff] }
 0x58a   :  { %v4877_v55 = vadd.f32 %v823_v31, %v821_v18 }
 0x58c   :  { %v834_v21 = vpack.c.bf16 %v4877_v55, %v4875_v33 }
 0x58e   :  { %3694 = vmatprep.subr.bf16.mxu0 %v834_v21 }
 0x58f   :  { %3695 = vmatpush3.bf16.msra.mxu0 %v834_v21  ;;  %v5209_v21 = vld [vmem:[#allocation11_spill] sm:$0xff] }
 0x592   :  { %3697 = vmatmul.mubr.msk.bf16.vlgmr.msra.gmra.mrb[12].mxu0 %vm86_vm0, %v3851_v50 }
 0x665   :  { %v3698_v17 = vpop.f32.mrb[12].mxu0 }
 0x666   :  { %v919_v45 = vadd.f32 %v3698_v17, %v4571_v24  ;;  %v910_v3 = vpop.f32.mrb[13].mxu0  ;;  %v5210_v17 = vld [vmem:[#allocation20_spill] sm:$0xff] }
 0x667   :  { %v911_v54 = vadd.f32 %v910_v3, %v4543_v12  ;;  %v3699_v52 = vpop.f32.mrb[14].mxu0 }
 0x668   :  { %v922_v58 = vadd.f32 %v3699_v52, %v4568_v26  ;;  %v913_v44 = vpop.f32.mrb[15].mxu0  ;;  %v952_v20 = vmul.f32 %v4597_v7, %v919_v45  ;;  %v5211_v52 = vld [vmem:[#allocation16_spill] sm:$0xff] }
 0x669   :  { %v950_v61 = vmul.f32 %v4559_v32, %v911_v54  ;;  %v914_v8 = vadd.f32 %v913_v44, %v4538_v29  ;;  %v3853_v29 = vld [vmem:[%s5161_s6 + $0x48] sm:$0xff]  }
 0x66a   :  { %v953_v48 = vmul.f32 %v4592_v6, %v922_v58  ;;  %v981_v12 = vadd.f32 %v5200_v47, %v952_v20  ;;  %v5202_v6 = vld [vmem:[#allocation10_spill] sm:$0xff] }
 0x66b   :  { %v979_v35 = vadd.f32 %v4581_v49, %v950_v61  ;;  %v951_v38 = vmul.f32 %v4554_v28, %v914_v8  ;;  %v3854_v28 = vld [vmem:[%s5161_s6 + $0x50] sm:$0xff]   ;;  %v5212_v61 = vld [vmem:[#allocation19_spill] sm:$0xff] }
 0x66c   :  { %v982_v24 = vadd.f32 %v4605_v11, %v953_v48  ;;  %v985_v7 = vmax.f32 %v981_v12, 0.0  ;;  %3712 = vmatprep.mubr.msk.bf16.mxu0 %vm242_vm3, %v3854_v28  ;;  %v5215_v12 = vld [vmem:[#allocation21_spill] sm:$0xff] }
 0x66d   :  { %v980_v43 = vadd.f32 %v5201_v42, %v951_v38  ;;  %v983_v26 = vmax.f32 %v979_v35, 0.0  ;;  %v5213_v35 = vld [vmem:[#allocation15_spill] sm:$0xff]  ;;  %v5216_v42 = vld [vmem:[#allocation17_spill] sm:$0xff] }
 0x66e   :  { %v986_v25 = vmax.f32 %v982_v24, 0.0  ;;  %v5214_v24 = vld [vmem:[#allocation18_spill] sm:$0xff] }
 0x66f   :  { %v984_v53 = vmax.f32 %v980_v43, 0.0 }
 0x670   :  { %v993_v32 = vpack.c.bf16 %v986_v25, %v985_v7 }
 0x671   :  { %v992_v4 = vpack.c.bf16 %v984_v53, %v983_v26  ;;  %v5217_v26 = vld [vmem:[#allocation22_spill] sm:$0xff] }
 0x673   :  { %3700 = vmatprep.subr.bf16.mxu1 %v992_v4 }
 0x674   :  { %3701 = vmatpush3.bf16.msra.mxu1 %v992_v4 }
 0x675   :  { %3702 = vmatprep.subr.bf16.mxu1 %v993_v32 }
 0x678   :  { %3703 = vmatpush3.bf16.msra.mxu1 %v993_v32 }
 0x67b   :  { %3705 = vmatmul.mubr.msk.bf16.vlgmr.msra.gmra.mrb[12].mxu1 %vm242_vm3, %v3853_v29  ;;  %v3858_v29 = vld [vmem:[%s5161_s6 + $0x70] sm:$0xff]  }
 0x67c   :  { %3720 = vmatprep.mubr.msk.bf16.mxu1 %vm242_vm3, %v3856_v14 }
 0x74e   :  { %v3706_v49 = vpop.f32.mrb[12].mxu1 }
 0x74f   :  { %v1078_v11 = vadd.f32 %v3706_v49, %v5202_v6  ;;  %v1069_v22 = vpop.f32.mrb[13].mxu1  ;;  %v5218_v49 = vld [vmem:[#allocation26_spill] sm:$0xff] }
 0x750   :  { %v1070_v56 = vadd.f32 %v1069_v22, %v5203_v57  ;;  %v3707_v62 = vpop.f32.mrb[14].mxu1  ;;  %v5219_v22 = vld [vmem:[#allocation24_spill] sm:$0xff] }
 0x751   :  { %v1081_v2 = vadd.f32 %v3707_v62, %v5204_v63  ;;  %v1072_v9 = vpop.f32.mrb[15].mxu1  ;;  %v1086_v1 = vmax.f32 %v1078_v11, 0.0  ;;  %v5220_v62 = vld [vmem:[#allocation25_spill] sm:$0xff] }
 0x752   :  { %v1073_v13 = vadd.f32 %v1072_v9, %v5205_v10  ;;  %v1084_v60 = vmax.f32 %v1070_v56, 0.0  ;;  %v5221_v9 = vld [vmem:[#allocation23_spill] sm:$0xff] }
 0x753   :  { %v1087_v41 = vmax.f32 %v1081_v2, 0.0 }
 0x754   :  { %v1085_v36 = vmax.f32 %v1073_v13, 0.0 }
 0x755   :  { %v1094_v37 = vpack.c.bf16 %v1087_v41, %v1086_v1 }
 0x756   :  { %v1093_v40 = vpack.c.bf16 %v1085_v36, %v1084_v60 }
 0x758   :  { %3708 = vmatprep.subr.bf16.mxu0 %v1093_v40 }
 0x759   :  { %3709 = vmatpush3.bf16.msra.mxu0 %v1093_v40  ;;  %v3859_v40 = vld [vmem:[%s5161_s6 + $0x78] sm:$0xff]  }
 0x75a   :  { %3710 = vmatprep.subr.bf16.mxu0 %v1094_v37 }
 0x75d   :  { %3711 = vmatpush3.bf16.msra.mxu0 %v1094_v37 }
 0x760   :  { %3713 = vmatmul.mubr.msk.bf16.vlgmr.msra.gmra.mrb[16].mxu0 %vm242_vm3, %v3855_v46  ;;  %v3860_v46 = vld [vmem:[%s5163_s8 + $0x10] sm:$0xff]  }
 0x761   :  { %3728 = vmatprep.mubr.msk.bf16.mxu0 %vm242_vm3, %v3858_v29 }
 0x833   :  { %v3714_v23 = vpop.f32.mrb[16].mxu0 }
 0x834   :  { %v1179_v0 = vadd.f32 %v3714_v23, %v5206_v59  ;;  %v1170_v30 = vpop.f32.mrb[17].mxu0  ;;  %v5222_v23 = vld [vmem:[#allocation30_spill] sm:$0xff] }
 0x835   :  { %v1171_v19 = vadd.f32 %v1170_v30, %v5207_v16  ;;  %v3715_v39 = vpop.f32.mrb[18].mxu0  ;;  %v5223_v30 = vld [vmem:[#allocation28_spill] sm:$0xff] }
 0x836   :  { %v1187_v34 = vadd.f32 %v1179_v0, %v919_v45  ;;  %v1182_v18 = vadd.f32 %v3715_v39, %v5208_v15  ;;  %v1173_v27 = vpop.f32.mrb[19].mxu0  ;;  %v5224_v39 = vld [vmem:[#allocation29_spill] sm:$0xff] }
 0x837   :  { %v1185_v31 = vadd.f32 %v1171_v19, %v911_v54  ;;  %v1174_v50 = vadd.f32 %v1173_v27, %v5209_v21  ;;  %v5225_v27 = vld [vmem:[#allocation27_spill] sm:$0xff] }
 0x838   :  { %v1188_v5 = vadd.f32 %v1182_v18, %v922_v58  ;;  %v1216_v3 = vmul.f32 %v5210_v17, %v1187_v34 }
 0x839   :  { %v1214_v44 = vmul.f32 %v5211_v52, %v1185_v31  ;;  %v1186_v20 = vadd.f32 %v1174_v50, %v914_v8  ;;  %v3857_v8 = vld [vmem:[%s5161_s6 + $0x68] sm:$0xff]  }
 0x83a   :  { %v1217_v48 = vmul.f32 %v5212_v61, %v1188_v5  ;;  %v1245_v54 = vadd.f32 %v5217_v26, %v1216_v3 }
 0x83b   :  { %v1215_v38 = vmul.f32 %v5213_v35, %v1186_v20  ;;  %v1243_v47 = vadd.f32 %v5214_v24, %v1214_v44  ;;  %v3862_v35 = vld [vmem:[%s5157_s2 + $0x20] sm:$0xff]  }
 0x83c   :  { %v1246_v45 = vadd.f32 %v5215_v12, %v1217_v48  ;;  %v1249_v4 = vmax.f32 %v1245_v54, 0.0  ;;  %v3861_v48 = vld [vmem:[%s5163_s8 + $0x18] sm:$0xff]  }
 0x83d   :  { %v1244_v43 = vadd.f32 %v5216_v42, %v1215_v38  ;;  %v1247_v25 = vmax.f32 %v1243_v47, 0.0  ;;  %v5227_v47 = vld [vmem:[#allocation31_spill] sm:$0xff] }
 0x83e   :  { %v1250_v58 = vmax.f32 %v1246_v45, 0.0 }
 0x83f   :  { %v1248_v53 = vmax.f32 %v1244_v43, 0.0 }
 0x840   :  { %v1257_v32 = vpack.c.bf16 %v1250_v58, %v1249_v4 }
 0x841   :  { %v1256_v7 = vpack.c.bf16 %v1248_v53, %v1247_v25 }
 0x843   :  { %3716 = vmatprep.subr.bf16.mxu1 %v1256_v7 }
 0x844   :  { %3717 = vmatpush3.bf16.msra.mxu1 %v1256_v7 }
 0x845   :  { %3718 = vmatprep.subr.bf16.mxu1 %v1257_v32 }
 0x848   :  { %3719 = vmatpush3.bf16.msra.mxu1 %v1257_v32  ;;  %v1570_v32 = vpop.permute.xlu0 %1569 }
 0x849   :  { %vm1574_vm12 = vcmp.eq.s32.totalorder %v1570_v32, 1  ;;  %v3865_v32 = vld [vmem:[%s5161_s6 + $0x88] sm:$0xff]  }
 0x84b   :  { %3721 = vmatmul.mubr.msk.bf16.vlgmr.msra.gmra.mrb[16].mxu1 %vm242_vm3, %v3857_v8  ;;  %v1573_v8 = vpop.permute.xlu1 %1572 }
 0x84c   :  { %3736 = vmatprep.mubr.msk.bf16.mxu1 %vm242_vm3, %v3860_v46  ;;  %vm1575_vm13 = vcmp.eq.s32.totalorder %v1573_v8, 1  ;;  %v3866_v8 = vld [vmem:[%s5161_s6 + $0x90] sm:$0xff]  }
 0x91e   :  { %v3722_v28 = vpop.f32.mrb[16].mxu1 }
 0x91f   :  { %v1342_v6 = vadd.f32 %v3722_v28, %v5218_v49  ;;  %v1333_v11 = vpop.f32.mrb[17].mxu1  ;;  %v5228_v28 = vld [vmem:[#allocation33_spill] sm:$0xff] }
 0x920   :  { %v1334_v57 = vadd.f32 %v1333_v11, %v5219_v22  ;;  %v3723_v56 = vpop.f32.mrb[18].mxu1 }
 0x921   :  { %v1345_v63 = vadd.f32 %v3723_v56, %v5220_v62  ;;  %v1336_v2 = vpop.f32.mrb[19].mxu1  ;;  %v1350_v13 = vmax.f32 %v1342_v6, 0.0  ;;  %v1584_v6 = vpop.permute.xlu0 %1583 }
 0x922   :  { %v1337_v10 = vadd.f32 %v1336_v2, %v5221_v9  ;;  %v1348_v41 = vmax.f32 %v1334_v57, 0.0  ;;  %v1589_v57 = vpop.permute.xlu1 %1588 }
 0x923   :  { %v1351_v1 = vmax.f32 %v1345_v63, 0.0 }
 0x924   :  { %v1349_v60 = vmax.f32 %v1337_v10, 0.0 }
 0x925   :  { %v1358_v36 = vpack.c.bf16 %v1351_v1, %v1350_v13 }
 0x926   :  { %v1357_v37 = vpack.c.bf16 %v1349_v60, %v1348_v41  ;;  %v1603_v41 = vpop.permute.xlu0 %1602 }
 0x928   :  { %3724 = vmatprep.subr.bf16.mxu0 %v1357_v37 }
 0x929   :  { %3725 = vmatpush3.bf16.msra.mxu0 %v1357_v37 }
 0x92a   :  { %3726 = vmatprep.subr.bf16.mxu0 %v1358_v36 }
 0x92d   :  { %3727 = vmatpush3.bf16.msra.mxu0 %v1358_v36 }
 0x930   :  { %3729 = vmatmul.mubr.msk.bf16.vlgmr.msra.gmra.mrb[20].mxu0 %vm242_vm3, %v3859_v40  ;;  %v1608_v40 = vpop.permute.xlu1 %1607 }
 0x931   :  { %3742 = vmatprep.mubr.msk.bf16.mxu0 %vm86_vm0, %v3862_v35 }
 0xa03   :  { %v3730_v14 = vpop.f32.mrb[20].mxu0 }
 0xa04   :  { %v1443_v59 = vadd.f32 %v3730_v14, %v5222_v23  ;;  %v1434_v0 = vpop.f32.mrb[21].mxu0 }
 0xa05   :  { %v1435_v16 = vadd.f32 %v1434_v0, %v5223_v30  ;;  %v3731_v19 = vpop.f32.mrb[22].mxu0  ;;  %v3863_v30 = vld [vmem:[%s5157_s2 + $0x28] sm:$0xff]  }
 0xa06   :  { %v1446_v15 = vadd.f32 %v3731_v19, %v5224_v39  ;;  %v1437_v18 = vpop.f32.mrb[23].mxu0  ;;  %v1451_v50 = vadd.f32 %v1443_v59, %v1187_v34 }
 0xa07   :  { %v1438_v21 = vadd.f32 %v1437_v18, %v5225_v27  ;;  %v1449_v3 = vadd.f32 %v1435_v16, %v1185_v31  ;;  %v5226_v31 = vld [vmem:[#allocation32_spill] sm:$0xff]  ;;  %v1633_v16 = vpop.permute.xlu0 %1632 }
 0xa08   :  { %v1452_v17 = vadd.f32 %v1446_v15, %v1188_v5 }
 0xa09   :  { %v1450_v52 = vadd.f32 %v1438_v21, %v1186_v20 }
 0xa0a   :  { %v1459_v44 = vpack.c.bf16 %v1452_v17, %v1451_v50 }
 0xa0b   :  { %v1458_v61 = vpack.c.bf16 %v1450_v52, %v1449_v3  ;;  %v1723_v39 = vpop.permute.xlu0 %1722 }
 0xa0d   :  { %3732 = vmatprep.subr.bf16.mxu1 %v1458_v61 }
 0xa0e   :  { %3733 = vmatpush3.bf16.msra.mxu1 %v1458_v61 }
 0xa0f   :  { %3734 = vmatprep.subr.bf16.mxu1 %v1459_v44  ;;  %v1643_v18 = vpop.permute.xlu0 %1642 }
 0xa12   :  { %3735 = vmatpush3.bf16.msra.mxu1 %v1459_v44 }
 0xa13   :  { %v1752_v21 = vpop.permute.xlu0 %1751 }
 0xa15   :  { %3737 = vmatmul.mubr.msk.bf16.vlgmr.msra.gmra.mrb[20].mxu1 %vm242_vm3, %v3861_v48 }
 0xa17   :  { %v1733_v3 = vpop.permute.xlu0 %1732 }
 0xae8   :  { %v3738_v34 = vpop.f32.mrb[20].mxu1 }
 0xae9   :  { %v1544_v5 = vadd.f32 %v3738_v34, %v5226_v31  ;;  %v1535_v20 = vpop.f32.mrb[21].mxu1 }
 0xaea   :  { %v3739_v38 = vpop.f32.mrb[22].mxu1  ;;  %v1536_v29 = vadd.f32 %v1535_v20, %v4795_v51 }
 0xaeb   :  { %v1550_v24 = vadd.f32 2.0, %v1544_v5  ;;  %v1547_v12 = vadd.f32 %v3739_v38, %v5227_v47  ;;  %v1538_v45 = vpop.f32.mrb[23].mxu1 }
 0xaec   :  { %v1539_v49 = vadd.f32 %v1538_v45, %v5228_v28  ;;  %v1593_v11 = vsel %vm1574_vm12, %v1536_v29, 0.0  ;;  %v1762_v45 = vpop.permute.xlu0 %1761 }
 0xaed   :  { %v1552_v42 = vsub.f32 0.0, %v1550_v24  ;;  %v1551_v43 = vadd.f32 2.0, %v1547_v12  ;;  %v1595_v2 = vmul.f32 %v1593_v11, %v1584_v6 }
 0xaee   :  { %v1594_v62 = vsel %vm1575_vm13, %v1539_v49, 0.0 }
 0xaef   :  { %v1554_v26 = vmul.f32 1.442695, %v1552_v42  ;;  %v1553_v54 = vsub.f32 0.0, %v1551_v43  ;;  %v1596_v13 = vmul.f32 %v1594_v62, %v1589_v57  ;;  %v1610_v36 = vadd.f32 %v1603_v41, %v1595_v2 }
 0xaf0   :  { %v1792_v29 = vpop.permute.xlu0 %1791 }
 0xaf1   :  { %3894 = vpow2.f32 %v1554_v26  ;;  %v1556_v25 = vmul.f32 1.442695, %v1553_v54  ;;  %v1611_v46 = vadd.f32 %v1608_v40, %v1596_v13 }
 0xaf3   :  { %3896 = vpow2.f32 %v1556_v25 }
 0xaf4   :  { %v1802_v49 = vpop.permute.xlu0 %1801 }
 0xafb   :  { %v3895_v53 = vpop.eup %3894 }
 0xafc   :  { %v1558_v58 = vadd.f32 1.0, %v3895_v53 }
 0xafd   :  { %v3897_v7 = vpop.eup %3896 }
 0xafe   :  { %3898 = vrcp.f32 %v1558_v58  ;;  %v1559_v4 = vadd.f32 1.0, %v3897_v7 }
 0xb00   :  { %3900 = vrcp.f32 %v1559_v4 }
 0xb08   :  { %v3899_v22 = vpop.eup %3898 }
 0xb09   :  { %v1562_v56 = vadd.f32 0.001, %v3899_v22 }
 0xb0a   :  { %v3901_v63 = vpop.eup %3900 }
 0xb0b   :  { %v1576_v9 = vsel %vm1574_vm12, %v1562_v56, 1.0  ;;  %v1563_v10 = vadd.f32 0.001, %v3901_v63 }
 0xb0c   :  { %v1591_v1 = vmul.f32 %v1584_v6, %v1576_v9 }
 0xb0d   :  { %v1577_v60 = vsel %vm1575_vm13, %v1563_v10, 1.0 }
 0xb0e   :  { %v1592_v51 = vmul.f32 %v1589_v57, %v1577_v60  ;;  %v1612_v37 = vmul.f32 %v1591_v1, %v4875_v33  ;;  %v3864_v33 = vld [vmem:[%s5161_s6 + $0x80] sm:$0xff]  }
 0xb0f   :  { %3750 = vmatprep.mubr.msk.bf16.mxu1 %vm242_vm3, %v3864_v33 }
 0xb10   :  { %v1613_v14 = vmul.f32 %v1592_v51, %v4877_v55  ;;  %v4971_v23 = vadd.f32 %v1612_v37, %v1610_v36  ;;  %v1638_v55 = vpop.permute.xlu1 %1637  ;;  %v3867_v51 = vld [vmem:[%s5161_s6 + $0x98] sm:$0xff]   ;;  %v3868_v37 = vld [vmem:[%s5161_s6 + $0xa0] sm:$0xff]  }
 0xb12   :  { %v4973_v59 = vadd.f32 %v1613_v14, %v1611_v46  ;;  %v1893_v46 = vpop.permute.xlu0 %1892 }
 0xb14   :  { %v1624_v0 = vpack.c.bf16 %v4973_v59, %v4971_v23  ;;  %v1728_v19 = vpop.permute.xlu1 %1727 }
 0xb16   :  { %3740 = vmatprep.subr.bf16.mxu0 %v1624_v0 }
 0xb17   :  { %3741 = vmatpush3.bf16.msra.mxu0 %v1624_v0  ;;  %v1903_v0 = vpop.permute.xlu0 %1902 }
 0xb18   :  { %v1648_v15 = vpop.permute.xlu1 %1647 }
 0xb1a   :  { %3743 = vmatmul.mubr.msk.bf16.vlgmr.msra.gmra.mrb[24].mxu0 %vm86_vm0, %v3863_v30 }
 0xb1b   :  { %3758 = vmatprep.mubr.msk.bf16.mxu0 %vm242_vm3, %v3866_v8  ;;  %v1987_v33 = vpop.permute.xlu0 %1986 }
 0xb1c   :  { %v1757_v27 = vpop.permute.xlu1 %1756 }
 0xb20   :  { %v1738_v50 = vpop.permute.xlu1 %1737 }
 0xb24   :  { %v1767_v24 = vpop.permute.xlu1 %1766 }
 0xb28   :  { %v1797_v28 = vpop.permute.xlu1 %1796 }
 0xb2c   :  { %v1807_v57 = vpop.permute.xlu1 %1806 }
 0xb30   :  { %v1898_v40 = vpop.permute.xlu1 %1897 }
 0xb34   :  { %v1908_v14 = vpop.permute.xlu1 %1907 }
 0xb38   :  { %v1992_v30 = vpop.permute.xlu1 %1991 }
 0xbed   :  { %v3744_v17 = vpop.f32.mrb[24].mxu0 }
 0xbee   :  { %v4985_v52 = vadd.f32 %v3744_v17, %v1643_v18  ;;  %v1700_v44 = vpop.f32.mrb[25].mxu0 }
 0xbef   :  { %v4987_v61 = vadd.f32 %v1700_v44, %v1633_v16  ;;  %v3745_v48 = vpop.f32.mrb[26].mxu0  ;;  %v2016_v16 = vpop.permute.xlu0 %2015 }
 0xbf0   :  { %v4989_v35 = vadd.f32 %v3745_v48, %v1648_v15  ;;  %v1703_v34 = vpop.f32.mrb[27].mxu0  ;;  %v1742_v31 = vmul.f32 %v1733_v3, %v4985_v52 }
 0xbf1   :  { %v1740_v5 = vmul.f32 %v1723_v39, %v4987_v61  ;;  %v4993_v20 = vadd.f32 %v1703_v34, %v1638_v55  ;;  %v2021_v55 = vpop.permute.xlu1 %2020 }
 0xbf2   :  { %v1743_v38 = vmul.f32 %v1738_v50, %v4989_v35  ;;  %v1771_v43 = vadd.f32 %v1762_v45, %v1742_v31 }
 0xbf3   :  { %v1769_v47 = vadd.f32 %v1752_v21, %v1740_v5  ;;  %v1741_v12 = vmul.f32 %v1728_v19, %v4993_v20  ;;  %v1997_v50 = vpop.permute.xlu0 %1996 }
 0xbf4   :  { %v1772_v42 = vadd.f32 %v1767_v24, %v1743_v38  ;;  %v1775_v58 = vmax.f32 %v1771_v43, 0.0 }
 0xbf5   :  { %v1770_v26 = vadd.f32 %v1757_v27, %v1741_v12  ;;  %v1773_v54 = vmax.f32 %v1769_v47, 0.0  ;;  %v2002_v18 = vpop.permute.xlu1 %2001 }
 0xbf6   :  { %v1776_v25 = vmax.f32 %v1772_v42, 0.0 }
 0xbf7   :  { %v1774_v53 = vmax.f32 %v1770_v26, 0.0  ;;  %v2026_v42 = vpop.permute.xlu0 %2025 }
 0xbf8   :  { %v1783_v4 = vpack.c.bf16 %v1776_v25, %v1775_v58 }
 0xbf9   :  { %v1782_v7 = vpack.c.bf16 %v1774_v53, %v1773_v54 }
 0xbfb   :  { %3746 = vmatprep.subr.bf16.mxu1 %v1782_v7 }
 0xbfc   :  { %3747 = vmatpush3.bf16.msra.mxu1 %v1782_v7 }
 0xbfd   :  { %3748 = vmatprep.subr.bf16.mxu1 %v1783_v4 }
 0xc00   :  { %3749 = vmatpush3.bf16.msra.mxu1 %v1783_v4  ;;  %v3870_v4 = vld [vmem:[%s5161_s6 + $0xb0] sm:$0xff]  }
 0xc03   :  { %3751 = vmatmul.mubr.msk.bf16.vlgmr.msra.gmra.mrb[24].mxu1 %vm242_vm3, %v3865_v32  ;;  %v2056_v32 = vpop.permute.xlu0 %2055 }
 0xc04   :  { %3766 = vmatprep.mubr.msk.bf16.mxu1 %vm242_vm3, %v3868_v37 }
 0xcd6   :  { %v3752_v6 = vpop.f32.mrb[24].mxu1 }
 0xcd7   :  { %v1868_v11 = vadd.f32 %v3752_v6, %v1802_v49  ;;  %v1859_v22 = vpop.f32.mrb[25].mxu1 }
 0xcd8   :  { %v1860_v56 = vadd.f32 %v1859_v22, %v1792_v29  ;;  %v3753_v62 = vpop.f32.mrb[26].mxu1  ;;  %v2066_v29 = vpop.permute.xlu0 %2065 }
 0xcd9   :  { %v1871_v63 = vadd.f32 %v3753_v62, %v1807_v57  ;;  %v1862_v2 = vpop.f32.mrb[27].mxu1  ;;  %v1876_v10 = vmax.f32 %v1868_v11, 0.0 }
 0xcda   :  { %v1863_v9 = vadd.f32 %v1862_v2, %v1797_v28  ;;  %v1874_v1 = vmax.f32 %v1860_v56, 0.0 }
 0xcdb   :  { %v1877_v13 = vmax.f32 %v1871_v63, 0.0 }
 0xcdc   :  { %v1875_v41 = vmax.f32 %v1863_v9, 0.0 }
 0xcdd   :  { %v1884_v60 = vpack.c.bf16 %v1877_v13, %v1876_v10 }
 0xcde   :  { %v1883_v36 = vpack.c.bf16 %v1875_v41, %v1874_v1 }
 0xce0   :  { %3754 = vmatprep.subr.bf16.mxu0 %v1883_v36 }
 0xce1   :  { %3755 = vmatpush3.bf16.msra.mxu0 %v1883_v36  ;;  %v3872_v36 = vld [vmem:[%s5163_s8 + $0x20] sm:$0xff]  }
 0xce2   :  { %3756 = vmatprep.subr.bf16.mxu0 %v1884_v60 }
 0xce5   :  { %3757 = vmatpush3.bf16.msra.mxu0 %v1884_v60  ;;  %v3871_v60 = vld [vmem:[%s5161_s6 + $0xb8] sm:$0xff]  }
 0xce8   :  { %3759 = vmatmul.mubr.msk.bf16.vlgmr.msra.gmra.mrb[28].mxu0 %vm242_vm3, %v3867_v51  ;;  %v2157_v51 = vpop.permute.xlu0 %2156 }
 0xce9   :  { %3774 = vmatprep.mubr.msk.bf16.mxu0 %vm242_vm3, %v3870_v4 }
 0xdbb   :  { %v3760_v19 = vpop.f32.mrb[28].mxu0 }
 0xdbc   :  { %v1969_v39 = vadd.f32 %v3760_v19, %v1903_v0  ;;  %v1960_v15 = vpop.f32.mrb[29].mxu0 }
 0xdbd   :  { %v1961_v27 = vadd.f32 %v1960_v15, %v1893_v46  ;;  %v3761_v21 = vpop.f32.mrb[30].mxu0 }
 0xdbe   :  { %v5014_v17 = vadd.f32 %v1969_v39, %v4985_v52  ;;  %v1972_v3 = vadd.f32 %v3761_v21, %v1908_v14  ;;  %v1963_v44 = vpop.f32.mrb[31].mxu0  ;;  %v2031_v52 = vpop.permute.xlu1 %2030 }
 0xdbf   :  { %v5017_v48 = vadd.f32 %v1961_v27, %v4987_v61  ;;  %v1964_v34 = vadd.f32 %v1963_v44, %v1898_v40  ;;  %v2167_v40 = vpop.permute.xlu0 %2166  ;;  %v3873_v44 = vld [vmem:[%s5163_s8 + $0x28] sm:$0xff]  }
 0xdc0   :  { %v5020_v31 = vadd.f32 %v1972_v3, %v4989_v35  ;;  %v2006_v5 = vmul.f32 %v1997_v50, %v5014_v17 }
 0xdc1   :  { %v2004_v38 = vmul.f32 %v1987_v33, %v5017_v48  ;;  %v5025_v24 = vadd.f32 %v1964_v34, %v4993_v20  ;;  %v3869_v20 = vld [vmem:[%s5161_s6 + $0xa8] sm:$0xff]  }
 0xdc2   :  { %v2007_v47 = vmul.f32 %v2002_v18, %v5020_v31  ;;  %v2035_v26 = vadd.f32 %v2026_v42, %v2006_v5  ;;  %v2061_v8 = vpop.permute.xlu1 %2060 }
 0xdc3   :  { %v2005_v12 = vmul.f32 %v1992_v30, %v5025_v24  ;;  %v2033_v45 = vadd.f32 %v2016_v16, %v2004_v38 }
 0xdc4   :  { %v2036_v61 = vadd.f32 %v2031_v52, %v2007_v47  ;;  %v2039_v58 = vmax.f32 %v2035_v26, 0.0 }
 0xdc5   :  { %v2034_v43 = vadd.f32 %v2021_v55, %v2005_v12  ;;  %v2037_v54 = vmax.f32 %v2033_v45, 0.0 }
 0xdc6   :  { %v2040_v25 = vmax.f32 %v2036_v61, 0.0  ;;  %v2071_v11 = vpop.permute.xlu1 %2070 }
 0xdc7   :  { %v2038_v35 = vmax.f32 %v2034_v43, 0.0 }
 0xdc8   :  { %v2047_v7 = vpack.c.bf16 %v2040_v25, %v2039_v58 }
 0xdc9   :  { %v2046_v53 = vpack.c.bf16 %v2038_v35, %v2037_v54 }
 0xdca   :  { %v2162_v37 = vpop.permute.xlu1 %2161 }
 0xdcb   :  { %3762 = vmatprep.subr.bf16.mxu1 %v2046_v53 }
 0xdcc   :  { %3763 = vmatpush3.bf16.msra.mxu1 %v2046_v53 }
 0xdcd   :  { %3764 = vmatprep.subr.bf16.mxu1 %v2047_v7 }
 0xdce   :  { %v2172_v30 = vpop.permute.xlu1 %2171 }
 0xdd0   :  { %3765 = vmatpush3.bf16.msra.mxu1 %v2047_v7 }
 0xdd2   :  { %v2273_v38 = vpop.permute.xlu1 %2272 }
 0xdd3   :  { %3767 = vmatmul.mubr.msk.bf16.vlgmr.msra.gmra.mrb[28].mxu1 %vm242_vm3, %v3869_v20 }
 0xdd4   :  { %3782 = vmatprep.mubr.msk.bf16.mxu1 %vm242_vm3, %v3872_v36 }
 0xdd6   :  { %v2263_v58 = vpop.permute.xlu1 %2262 }
 0xdda   :  { %v2363_v4 = vpop.permute.xlu1 %2362 }
 0xddb   :  { %vm2365_vm15 = vcmp.eq.s32.totalorder %v2363_v4, 1 }
 0xea6   :  { %v3768_v28 = vpop.f32.mrb[28].mxu1 }
 0xea7   :  { %v2132_v49 = vadd.f32 %v3768_v28, %v2066_v29  ;;  %v2123_v6 = vpop.f32.mrb[29].mxu1 }
 0xea8   :  { %v2124_v22 = vadd.f32 %v2123_v6, %v2056_v32  ;;  %v3769_v57 = vpop.f32.mrb[30].mxu1  ;;  %v2379_v6 = vpop.permute.xlu1 %2378 }
 0xea9   :  { %v2135_v56 = vadd.f32 %v3769_v57, %v2071_v11  ;;  %v2126_v62 = vpop.f32.mrb[31].mxu1  ;;  %v2140_v2 = vmax.f32 %v2132_v49, 0.0 }
 0xeaa   :  { %v2127_v63 = vadd.f32 %v2126_v62, %v2061_v8  ;;  %v2138_v10 = vmax.f32 %v2124_v22, 0.0 }
 0xeab   :  { %v2141_v9 = vmax.f32 %v2135_v56, 0.0 }
 0xeac   :  { %v2139_v13 = vmax.f32 %v2127_v63, 0.0  ;;  %v2398_v36 = vpop.permute.xlu1 %2397 }
 0xead   :  { %v2148_v1 = vpack.c.bf16 %v2141_v9, %v2140_v2 }
 0xeae   :  { %v2147_v41 = vpack.c.bf16 %v2139_v13, %v2138_v10 }
 0xeb0   :  { %3770 = vmatprep.subr.bf16.mxu0 %v2147_v41 }
 0xeb1   :  { %3771 = vmatpush3.bf16.msra.mxu0 %v2147_v41 }
 0xeb2   :  { %3772 = vmatprep.subr.bf16.mxu0 %v2148_v1 }
 0xeb5   :  { %3773 = vmatpush3.bf16.msra.mxu0 %v2148_v1 }
 0xeb8   :  { %3775 = vmatmul.mubr.msk.bf16.vlgmr.msra.gmra.mrb[32].mxu0 %vm242_vm3, %v3871_v60 }
 0xf8b   :  { %v3776_v46 = vpop.f32.mrb[32].mxu0 }
 0xf8c   :  { %v2233_v14 = vadd.f32 %v3776_v46, %v2167_v40  ;;  %v2224_v0 = vpop.f32.mrb[33].mxu0 }
 0xf8d   :  { %v2225_v33 = vadd.f32 %v2224_v0, %v2157_v51  ;;  %v3777_v55 = vpop.f32.mrb[34].mxu0  ;;  %v3875_v0 = vld [vmem:[%s5157_s2 + $0x38] sm:$0xff]  }
 0xf8e   :  { %v2236_v16 = vadd.f32 %v3777_v55, %v2172_v30  ;;  %v2227_v19 = vpop.f32.mrb[35].mxu0  ;;  %v2241_v15 = vadd.f32 %v2233_v14, %v5014_v17  ;;  %v3874_v17 = vld [vmem:[%s5157_s2 + $0x30] sm:$0xff]  }
 0xf8f   :  { %v2228_v39 = vadd.f32 %v2227_v19, %v2162_v37  ;;  %v2239_v27 = vadd.f32 %v2225_v33, %v5017_v48  ;;  %3788 = vmatprep.mubr.msk.bf16.mxu0 %vm86_vm0, %v3874_v17  ;;  %v2268_v48 = vpop.permute.xlu0 %2267 }
 0xf90   :  { %v2242_v18 = vadd.f32 %v2236_v16, %v5020_v31 }
 0xf91   :  { %v2240_v21 = vadd.f32 %v2228_v39, %v5025_v24 }
 0xf92   :  { %v2249_v50 = vpack.c.bf16 %v2242_v18, %v2241_v15 }
 0xf93   :  { %v2248_v3 = vpack.c.bf16 %v2240_v21, %v2239_v27  ;;  %v2258_v35 = vpop.permute.xlu0 %2257 }
 0xf95   :  { %3778 = vmatprep.subr.bf16.mxu1 %v2248_v3 }
 0xf96   :  { %3779 = vmatpush3.bf16.msra.mxu1 %v2248_v3 }
 0xf97   :  { %3780 = vmatprep.subr.bf16.mxu1 %v2249_v50  ;;  %v2360_v20 = vpop.permute.xlu0 %2359 }
 0xf98   :  { %vm2364_vm14 = vcmp.eq.s32.totalorder %v2360_v20, 1  ;;  %v3878_v20 = vld [vmem:[%s5161_s6 + $0xd0] sm:$0xff]  }
 0xf9a   :  { %3781 = vmatpush3.bf16.msra.mxu1 %v2249_v50 }
 0xf9b   :  { %v2374_v29 = vpop.permute.xlu0 %2373 }
 0xf9d   :  { %3783 = vmatmul.mubr.msk.bf16.vlgmr.msra.gmra.mrb[32].mxu1 %vm242_vm3, %v3873_v44 }
 0xf9f   :  { %v2393_v10 = vpop.permute.xlu0 %2392 }
 0xfa3   :  { %v2423_v30 = vpop.permute.xlu0 %2422 }
 0xfa7   :  { %v2513_v55 = vpop.permute.xlu0 %2512 }
 0xfab   :  { %v2433_v19 = vpop.permute.xlu0 %2432 }
 0xfaf   :  { %v2542_v15 = vpop.permute.xlu0 %2541 }
 0xfb3   :  { %v2523_v21 = vpop.permute.xlu0 %2522 }
0x1070   :  { %v3784_v34 = vpop.f32.mrb[32].mxu1 }
0x1071   :  { %v2334_v31 = vadd.f32 %v3784_v34, %v2268_v48  ;;  %v2325_v5 = vpop.f32.mrb[33].mxu1 }
0x1072   :  { %v3785_v24 = vpop.f32.mrb[34].mxu1  ;;  %v2326_v32 = vadd.f32 %v2325_v5, %v2258_v35 }
0x1073   :  { %v2340_v47 = vadd.f32 2.0, %v2334_v31  ;;  %v2337_v52 = vadd.f32 %v3785_v24, %v2273_v38  ;;  %v2328_v12 = vpop.f32.mrb[35].mxu1 }
0x1074   :  { %v2329_v8 = vadd.f32 %v2328_v12, %v2263_v58  ;;  %v2383_v28 = vsel %vm2364_vm14, %v2326_v32, 0.0 }
0x1075   :  { %v2342_v45 = vsub.f32 0.0, %v2340_v47  ;;  %v2341_v42 = vadd.f32 2.0, %v2337_v52  ;;  %v2385_v56 = vmul.f32 %v2383_v28, %v2374_v29 }
0x1076   :  { %v2384_v22 = vsel %vm2365_vm15, %v2329_v8, 0.0 }
0x1077   :  { %v2344_v61 = vmul.f32 1.442695, %v2342_v45  ;;  %v2343_v43 = vsub.f32 0.0, %v2341_v42  ;;  %v2386_v2 = vmul.f32 %v2384_v22, %v2379_v6  ;;  %v2400_v1 = vadd.f32 %v2393_v10, %v2385_v56  ;;  %v2552_v45 = vpop.permute.xlu0 %2551 }
0x1079   :  { %3902 = vpow2.f32 %v2344_v61  ;;  %v2346_v26 = vmul.f32 1.442695, %v2343_v43  ;;  %v2401_v51 = vadd.f32 %v2398_v36, %v2386_v2 }
0x107b   :  { %3904 = vpow2.f32 %v2346_v26  ;;  %v2582_v4 = vpop.permute.xlu0 %2581 }
0x107f   :  { %v2592_v8 = vpop.permute.xlu0 %2591 }
0x1083   :  { %v3903_v54 = vpop.eup %3902 }
0x1084   :  { %v2348_v25 = vadd.f32 1.0, %v3903_v54 }
0x1085   :  { %v3905_v53 = vpop.eup %3904 }
0x1086   :  { %3906 = vrcp.f32 %v2348_v25  ;;  %v2349_v7 = vadd.f32 1.0, %v3905_v53 }
0x1088   :  { %3908 = vrcp.f32 %v2349_v7  ;;  %v3877_v7 = vld [vmem:[%s5161_s6 + $0xc8] sm:$0xff]  }
0x1090   :  { %v3907_v49 = vpop.eup %3906 }
0x1091   :  { %v2352_v11 = vadd.f32 0.001, %v3907_v49 }
0x1092   :  { %v3909_v57 = vpop.eup %3908 }
0x1093   :  { %v2366_v62 = vsel %vm2364_vm14, %v2352_v11, 1.0  ;;  %v2353_v63 = vadd.f32 0.001, %v3909_v57 }
0x1094   :  { %v2381_v9 = vmul.f32 %v2374_v29, %v2366_v62 }
0x1095   :  { %v2367_v13 = vsel %vm2365_vm15, %v2353_v63, 1.0 }
0x1096   :  { %v2382_v41 = vmul.f32 %v2379_v6, %v2367_v13  ;;  %v2402_v60 = vmul.f32 %v2381_v9, %v4971_v23  ;;  %v3876_v23 = vld [vmem:[%s5161_s6 + $0xc0] sm:$0xff]  }
0x1097   :  { %3796 = vmatprep.mubr.msk.bf16.mxu1 %vm242_vm3, %v3876_v23 }
0x1098   :  { %v2403_v37 = vmul.f32 %v2382_v41, %v4973_v59  ;;  %v5059_v40 = vadd.f32 %v2402_v60, %v2400_v1  ;;  %v2428_v59 = vpop.permute.xlu1 %2427  ;;  %v3879_v41 = vld [vmem:[%s5161_s6 + $0xd8] sm:$0xff]   ;;  %v3880_v60 = vld [vmem:[%s5161_s6 + $0xe0] sm:$0xff]  }
0x109a   :  { %v5061_v46 = vadd.f32 %v2403_v37, %v2401_v51  ;;  %v2683_v51 = vpop.permute.xlu0 %2682 }
0x109c   :  { %v2414_v14 = vpack.c.bf16 %v5061_v46, %v5059_v40  ;;  %v2518_v33 = vpop.permute.xlu1 %2517 }
0x109e   :  { %3786 = vmatprep.subr.bf16.mxu0 %v2414_v14 }
0x109f   :  { %3787 = vmatpush3.bf16.msra.mxu0 %v2414_v14  ;;  %v2693_v14 = vpop.permute.xlu0 %2692 }
0x10a0   :  { %v2438_v16 = vpop.permute.xlu1 %2437 }
0x10a2   :  { %3789 = vmatmul.mubr.msk.bf16.vlgmr.msra.gmra.mrb[36].mxu0 %vm86_vm0, %v3875_v0 }
0x10a3   :  { %3804 = vmatprep.mubr.msk.bf16.mxu0 %vm242_vm3, %v3878_v20  ;;  %v2777_v23 = vpop.permute.xlu0 %2776 }
0x10a4   :  { %v2547_v39 = vpop.permute.xlu1 %2546 }
0x10a8   :  { %v2528_v18 = vpop.permute.xlu1 %2527 }
0x10ac   :  { %v2557_v47 = vpop.permute.xlu1 %2556 }
0x10b0   :  { %v2587_v32 = vpop.permute.xlu1 %2586 }
0x10b4   :  { %v2597_v6 = vpop.permute.xlu1 %2596 }
0x10b8   :  { %v2688_v36 = vpop.permute.xlu1 %2687 }
0x10bc   :  { %v2698_v37 = vpop.permute.xlu1 %2697 }
0x10c0   :  { %v2782_v0 = vpop.permute.xlu1 %2781 }
0x1175   :  { %v3790_v27 = vpop.f32.mrb[36].mxu0 }
0x1176   :  { %v5073_v50 = vadd.f32 %v3790_v27, %v2433_v19  ;;  %v2490_v3 = vpop.f32.mrb[37].mxu0 }
0x1177   :  { %v5075_v44 = vadd.f32 %v2490_v3, %v2423_v30  ;;  %v3791_v17 = vpop.f32.mrb[38].mxu0  ;;  %v2806_v30 = vpop.permute.xlu0 %2805 }
0x1178   :  { %v5077_v48 = vadd.f32 %v3791_v17, %v2438_v16  ;;  %v2493_v34 = vpop.f32.mrb[39].mxu0  ;;  %v2532_v31 = vmul.f32 %v2523_v21, %v5073_v50 }
0x1179   :  { %v2530_v5 = vmul.f32 %v2513_v55, %v5075_v44  ;;  %v5081_v38 = vadd.f32 %v2493_v34, %v2428_v59  ;;  %v2811_v59 = vpop.permute.xlu1 %2810 }
0x117a   :  { %v2533_v24 = vmul.f32 %v2528_v18, %v5077_v48  ;;  %v2561_v61 = vadd.f32 %v2552_v45, %v2532_v31 }
0x117b   :  { %v2559_v52 = vadd.f32 %v2542_v15, %v2530_v5  ;;  %v2531_v12 = vmul.f32 %v2518_v33, %v5081_v38  ;;  %v2787_v18 = vpop.permute.xlu0 %2786 }
0x117c   :  { %v2562_v42 = vadd.f32 %v2557_v47, %v2533_v24  ;;  %v2565_v25 = vmax.f32 %v2561_v61, 0.0 }
0x117d   :  { %v2560_v43 = vadd.f32 %v2547_v39, %v2531_v12  ;;  %v2563_v26 = vmax.f32 %v2559_v52, 0.0  ;;  %v2792_v19 = vpop.permute.xlu1 %2791 }
0x117e   :  { %v2566_v54 = vmax.f32 %v2562_v42, 0.0 }
0x117f   :  { %v2564_v35 = vmax.f32 %v2560_v43, 0.0  ;;  %v2816_v42 = vpop.permute.xlu0 %2815 }
0x1180   :  { %v2573_v58 = vpack.c.bf16 %v2566_v54, %v2565_v25 }
0x1181   :  { %v2572_v53 = vpack.c.bf16 %v2564_v35, %v2563_v26 }
0x1183   :  { %3792 = vmatprep.subr.bf16.mxu1 %v2572_v53 }
0x1184   :  { %3793 = vmatpush3.bf16.msra.mxu1 %v2572_v53 }
0x1185   :  { %3794 = vmatprep.subr.bf16.mxu1 %v2573_v58 }
0x1188   :  { %3795 = vmatpush3.bf16.msra.mxu1 %v2573_v58  ;;  %v3882_v58 = vld [vmem:[%s5161_s6 + $0xf0] sm:$0xff]  }
0x118b   :  { %3797 = vmatmul.mubr.msk.bf16.vlgmr.msra.gmra.mrb[36].mxu1 %vm242_vm3, %v3877_v7  ;;  %v2846_v7 = vpop.permute.xlu0 %2845 }
0x118c   :  { %3812 = vmatprep.mubr.msk.bf16.mxu1 %vm242_vm3, %v3880_v60 }
0x125e   :  { %v3798_v29 = vpop.f32.mrb[36].mxu1 }
0x125f   :  { %v2658_v28 = vadd.f32 %v3798_v29, %v2592_v8  ;;  %v2649_v49 = vpop.f32.mrb[37].mxu1 }
0x1260   :  { %v2650_v11 = vadd.f32 %v2649_v49, %v2582_v4  ;;  %v3799_v22 = vpop.f32.mrb[38].mxu1  ;;  %v2856_v4 = vpop.permute.xlu0 %2855 }
0x1261   :  { %v2661_v57 = vadd.f32 %v3799_v22, %v2597_v6  ;;  %v2652_v56 = vpop.f32.mrb[39].mxu1  ;;  %v2666_v63 = vmax.f32 %v2658_v28, 0.0 }
0x1262   :  { %v2653_v62 = vadd.f32 %v2652_v56, %v2587_v32  ;;  %v2664_v9 = vmax.f32 %v2650_v11, 0.0 }
0x1263   :  { %v2667_v2 = vmax.f32 %v2661_v57, 0.0 }
0x1264   :  { %v2665_v10 = vmax.f32 %v2653_v62, 0.0 }
0x1265   :  { %v2674_v13 = vpack.c.bf16 %v2667_v2, %v2666_v63 }
0x1266   :  { %v2673_v1 = vpack.c.bf16 %v2665_v10, %v2664_v9 }
0x1268   :  { %3800 = vmatprep.subr.bf16.mxu0 %v2673_v1 }
0x1269   :  { %3801 = vmatpush3.bf16.msra.mxu0 %v2673_v1  ;;  %v3884_v1 = vld [vmem:[%s5163_s8 + $0x30] sm:$0xff]  }
0x126a   :  { %3802 = vmatprep.subr.bf16.mxu0 %v2674_v13 }
0x126d   :  { %3803 = vmatpush3.bf16.msra.mxu0 %v2674_v13  ;;  %v3883_v13 = vld [vmem:[%s5161_s6 + $0xf8] sm:$0xff]  }
0x1270   :  { %3805 = vmatmul.mubr.msk.bf16.vlgmr.msra.gmra.mrb[40].mxu0 %vm242_vm3, %v3879_v41  ;;  %v2947_v41 = vpop.permute.xlu0 %2946 }
0x1271   :  { %3820 = vmatprep.mubr.msk.bf16.mxu0 %vm242_vm3, %v3882_v58 }
0x1343   :  { %v3806_v33 = vpop.f32.mrb[40].mxu0 }
0x1344   :  { %v2759_v55 = vadd.f32 %v3806_v33, %v2693_v14  ;;  %v2750_v16 = vpop.f32.mrb[41].mxu0 }
0x1345   :  { %v2751_v39 = vadd.f32 %v2750_v16, %v2683_v51  ;;  %v3807_v15 = vpop.f32.mrb[42].mxu0 }
0x1346   :  { %v5102_v27 = vadd.f32 %v2759_v55, %v5073_v50  ;;  %v2762_v21 = vadd.f32 %v3807_v15, %v2698_v37  ;;  %v2753_v3 = vpop.f32.mrb[43].mxu0  ;;  %v2821_v50 = vpop.permute.xlu1 %2820 }
0x1347   :  { %v5105_v17 = vadd.f32 %v2751_v39, %v5075_v44  ;;  %v2754_v34 = vadd.f32 %v2753_v3, %v2688_v36  ;;  %v2957_v36 = vpop.permute.xlu0 %2956  ;;  %v3885_v3 = vld [vmem:[%s5163_s8 + $0x38] sm:$0xff]   ;;  %s3945_s8 = smov [#allocation2]  }
0x1348   :  { %v5108_v31 = vadd.f32 %v2762_v21, %v5077_v48  ;;  %v2796_v5 = vmul.f32 %v2787_v18, %v5102_v27  ;;  %s3207_s19 = sshll.u32 %s3945_s8, 4  ;;  %s3208_s19 = int_to_ptr.vmem [resolvable:$true] %s3207_s19 }
0x1349   :  { %v2794_v24 = vmul.f32 %v2777_v23, %v5105_v17  ;;  %v5113_v47 = vadd.f32 %v2754_v34, %v5081_v38  ;;  %v3881_v38 = vld [vmem:[%s5161_s6 + $0xe8] sm:$0xff]   ;;  %s3920_s20 = scalar_lea.vmem %s3208_s19, 256  ;;  %p3925_p1 = scmp.lt.s32.totalorder %s3208_s19, %s3208_s19 }
0x134a   :  { %v2797_v52 = vmul.f32 %v2792_v19, %v5108_v31  ;;  %v2825_v43 = vadd.f32 %v2816_v42, %v2796_v5  ;;  %v2851_v20 = vpop.permute.xlu1 %2850  ;;  %p3921_p0 = scmp.ne.s32.totalorder %s3208_s19, %s3920_s20  ;;  %p3926_p2 = scmp.lt.s32.totalorder %s3920_s20, %s3920_s20 }
0x134b   :  { %v2795_v12 = vmul.f32 %v2782_v0, %v5113_v47  ;;  %v2823_v45 = vadd.f32 %v2806_v30, %v2794_v24  ;;  %v3058_v34 = vpop.permute.xlu0 %3057 }
0x134c   :  { %v2826_v44 = vadd.f32 %v2821_v50, %v2797_v52  ;;  %v2829_v25 = vmax.f32 %v2825_v43, 0.0  ;;  %p3927_p3 = por %p3926_p2, %p3925_p1 }
0x134d   :  { %v2824_v61 = vadd.f32 %v2811_v59, %v2795_v12  ;;  %v2827_v26 = vmax.f32 %v2823_v45, 0.0 }
0x134e   :  { %v2830_v54 = vmax.f32 %v2826_v44, 0.0  ;;  %v2861_v28 = vpop.permute.xlu1 %2860  ;;  %p3928_p4 = pnand %p3927_p3, %p3921_p0 }
0x134f   :  { %v2828_v48 = vmax.f32 %v2824_v61, 0.0 }
0x1350   :  { %v2837_v53 = vpack.c.bf16 %v2830_v54, %v2829_v25 }
0x1351   :  { %v2836_v35 = vpack.c.bf16 %v2828_v48, %v2827_v26  ;;  %v3048_v26 = vpop.permute.xlu0 %3047 }
0x1352   :  { %v2952_v60 = vpop.permute.xlu1 %2951 }
0x1353   :  { %3808 = vmatprep.subr.bf16.mxu1 %v2836_v35 }
0x1354   :  { %3809 = vmatpush3.bf16.msra.mxu1 %v2836_v35 }
0x1355   :  { %3810 = vmatprep.subr.bf16.mxu1 %v2837_v53 }
0x1356   :  { %v2962_v0 = vpop.permute.xlu1 %2961 }
0x1358   :  { %3811 = vmatpush3.bf16.msra.mxu1 %v2837_v53  ;;  %v3150_v53 = vpop.permute.xlu0 %3149 }
0x1359   :  { %vm3154_vm0 = vcmp.eq.s32.totalorder %v3150_v53, 1 }
0x135a   :  { %v3063_v24 = vpop.permute.xlu1 %3062 }
0x135b   :  { %3813 = vmatmul.mubr.msk.bf16.vlgmr.msra.gmra.mrb[40].mxu1 %vm242_vm3, %v3881_v38 }
0x135c   :  { %3828 = vmatprep.mubr.msk.bf16.mxu1 %vm242_vm3, %v3884_v1 }
0x135e   :  { %v3053_v35 = vpop.permute.xlu1 %3052 }
0x1362   :  { %v3153_v38 = vpop.permute.xlu1 %3152 }
0x1363   :  { %vm3155_vm1 = vcmp.eq.s32.totalorder %v3153_v38, 1 }
0x142e   :  { %v3814_v32 = vpop.f32.mrb[40].mxu1 }
0x142f   :  { %v2922_v8 = vadd.f32 %v3814_v32, %v2856_v4  ;;  %v2913_v29 = vpop.f32.mrb[41].mxu1 }
0x1430   :  { %v2914_v49 = vadd.f32 %v2913_v29, %v2846_v7  ;;  %v3815_v6 = vpop.f32.mrb[42].mxu1 }
0x1431   :  { %v2925_v11 = vadd.f32 %v3815_v6, %v2861_v28  ;;  %v2916_v22 = vpop.f32.mrb[43].mxu1  ;;  %v2930_v56 = vmax.f32 %v2922_v8, 0.0  ;;  %v3169_v8 = vpop.permute.xlu1 %3168 }
0x1432   :  { %v2917_v57 = vadd.f32 %v2916_v22, %v2851_v20  ;;  %v2928_v63 = vmax.f32 %v2914_v49, 0.0  ;;  %v3164_v20 = vpop.permute.xlu0 %3163 }
0x1433   :  { %v2931_v62 = vmax.f32 %v2925_v11, 0.0 }
0x1434   :  { %v2929_v2 = vmax.f32 %v2917_v57, 0.0 }
0x1435   :  { %v2938_v9 = vpack.c.bf16 %v2931_v62, %v2930_v56 }
0x1436   :  { %v2937_v10 = vpack.c.bf16 %v2929_v2, %v2928_v63  ;;  %v3183_v62 = vpop.permute.xlu0 %3182 }
0x1438   :  { %3816 = vmatprep.subr.bf16.mxu0 %v2937_v10 }
0x1439   :  { %3817 = vmatpush3.bf16.msra.mxu0 %v2937_v10 }
0x143a   :  { %3818 = vmatprep.subr.bf16.mxu0 %v2938_v9 }
0x143d   :  { %3819 = vmatpush3.bf16.msra.mxu0 %v2938_v9 }
0x1440   :  { %3821 = vmatmul.mubr.msk.bf16.vlgmr.msra.gmra.mrb[44].mxu0 %vm242_vm3, %v3883_v13  ;;  %v3188_v13 = vpop.permute.xlu1 %3187 }
0x1513   :  { %v3822_v51 = vpop.f32.mrb[44].mxu0 }
0x1514   :  { %v3023_v37 = vadd.f32 %v3822_v51, %v2957_v36  ;;  %v3014_v14 = vpop.f32.mrb[45].mxu0 }
0x1515   :  { %v3015_v23 = vadd.f32 %v3014_v14, %v2947_v41  ;;  %v3823_v59 = vpop.f32.mrb[46].mxu0 }
0x1516   :  { %v3026_v30 = vadd.f32 %v3823_v59, %v2962_v0  ;;  %v3017_v33 = vpop.f32.mrb[47].mxu0  ;;  %v3031_v16 = vadd.f32 %v3023_v37, %v5102_v27 }
0x1517   :  { %v3018_v55 = vadd.f32 %v3017_v33, %v2952_v60  ;;  %v3029_v39 = vadd.f32 %v3015_v23, %v5105_v17 }
0x1518   :  { %v3032_v19 = vadd.f32 %v3026_v30, %v5108_v31 }
0x1519   :  { %v3030_v15 = vadd.f32 %v3018_v55, %v5113_v47 }
0x151a   :  { %v3039_v18 = vpack.c.bf16 %v3032_v19, %v3031_v16 }
0x151b   :  { %v3038_v21 = vpack.c.bf16 %v3030_v15, %v3029_v39 }
0x151d   :  { %3824 = vmatprep.subr.bf16.mxu1 %v3038_v21 }
0x151e   :  { %3825 = vmatpush3.bf16.msra.mxu1 %v3038_v21 }
0x151f   :  { %3826 = vmatprep.subr.bf16.mxu1 %v3039_v18 }
0x1522   :  { %3827 = vmatpush3.bf16.msra.mxu1 %v3039_v18 }
0x1525   :  { %3829 = vmatmul.mubr.msk.bf16.vlgmr.msra.gmra.mrb[44].mxu1 %vm242_vm3, %v3885_v3 }
0x15f8   :  { %v3830_v27 = vpop.f32.mrb[44].mxu1 }
0x15f9   :  { %v3124_v5 = vadd.f32 %v3830_v27, %v3058_v34  ;;  %v3115_v31 = vpop.f32.mrb[45].mxu1 }
0x15fa   :  { %v3831_v17 = vpop.f32.mrb[46].mxu1  ;;  %v3116_v58 = vadd.f32 %v3115_v31, %v3048_v26 }
0x15fb   :  { %v3130_v52 = vadd.f32 2.0, %v3124_v5  ;;  %v3127_v47 = vadd.f32 %v3831_v17, %v3063_v24  ;;  %v3118_v50 = vpop.f32.mrb[47].mxu1 }
0x15fc   :  { %v3119_v7 = vadd.f32 %v3118_v50, %v3053_v35  ;;  %v3173_v4 = vsel %vm3154_vm0, %v3116_v58, 0.0 }
0x15fd   :  { %v3132_v12 = vsub.f32 0.0, %v3130_v52  ;;  %v3131_v45 = vadd.f32 2.0, %v3127_v47  ;;  %v3175_v6 = vmul.f32 %v3173_v4, %v3164_v20 }
0x15fe   :  { %v3174_v28 = vsel %vm3155_vm1, %v3119_v7, 0.0 }
0x15ff   :  { %v3134_v42 = vmul.f32 1.442695, %v3132_v12  ;;  %v3133_v44 = vsub.f32 0.0, %v3131_v45  ;;  %v3176_v56 = vmul.f32 %v3174_v28, %v3169_v8  ;;  %v3190_v2 = vadd.f32 %v3183_v62, %v3175_v6 }
0x1601   :  { %3910 = vpow2.f32 %v3134_v42  ;;  %v3136_v61 = vmul.f32 1.442695, %v3133_v44  ;;  %v3191_v41 = vadd.f32 %v3188_v13, %v3176_v56 }
0x1603   :  { %3912 = vpow2.f32 %v3136_v61 }
0x160b   :  { %v3911_v43 = vpop.eup %3910 }
0x160c   :  { %v3138_v48 = vadd.f32 1.0, %v3911_v43 }
0x160d   :  { %v3913_v54 = vpop.eup %3912 }
0x160e   :  { %3914 = vrcp.f32 %v3138_v48  ;;  %v3139_v25 = vadd.f32 1.0, %v3913_v54 }
0x1610   :  { %3916 = vrcp.f32 %v3139_v25 }
0x1618   :  { %v3915_v32 = vpop.eup %3914 }
0x1619   :  { %v3142_v29 = vadd.f32 0.001, %v3915_v32 }
0x161a   :  { %v3917_v49 = vpop.eup %3916 }
0x161b   :  { %v3156_v11 = vsel %vm3154_vm0, %v3142_v29, 1.0  ;;  %v3143_v22 = vadd.f32 0.001, %v3917_v49 }
0x161c   :  { %v3171_v57 = vmul.f32 %v3164_v20, %v3156_v11 }
0x161d   :  { %v3157_v63 = vsel %vm3155_vm1, %v3143_v22, 1.0 }
0x161e   :  { %v3192_v9 = vmul.f32 %v3171_v57, %v5059_v40  ;;  %v3172_v10 = vmul.f32 %v3169_v8, %v3157_v63 }
0x1620   :  { %v3194_v1 = vadd.f32 %v3192_v9, %v3190_v2  ;;  %v3193_v60 = vmul.f32 %v3172_v10, %v5061_v46 }
0x1622   :  { %v3196_v36 = vmax.f32 %v3194_v1, 0.0  ;;  %v3195_v51 = vadd.f32 %v3193_v60, %v3191_v41 }
0x1624   :  { %v3198_v37 = vmin.f32 %v3196_v36, 1.0  ;;  %v3197_v14 = vmax.f32 %v3195_v51, 0.0 }
0x1626   :  { %3200 = vst [vmem:[#allocation2] sm:$0xff] %v3198_v37  ;;  %v3199_v0 = vmin.f32 %v3197_v14, 1.0 }
0x1628   :  { %3201 = vst [vmem:[#allocation2 + $0x8] sm:$0xff] %v3199_v0 }
0x1629   :  { %3931 = shalt.err (!%p3928_p4)
}
0x162a   :  { %s3932_s21 = scalar_lea.hbm %s5167_s12, 256 }
0x162b   :  { %p3933_p5 = scmp.ne.s32.totalorder %s5167_s12, %s3932_s21  ;;  %p3936_p6 = scmp.lt.u32.totalorder %s3932_s21, %s5167_s12 }
0x162d   :  { %p3938_p7 = pnand %p3936_p6, %p3933_p5 }
0x162f   :  { %3941 = shalt.err (!%p3938_p7)
}
0x1630   :  { %s3946_s5 = smov 128   ;;  %s3947_s25 = smov 8  }
0x1631   :  { %3213 = dma.vmem_to_hbm [thread:$0]  %s3208_s19, 256, %s5167_s12, [#allocation3], %s3946_s5, %s3946_s5, %s3947_s25  }
0x1632   :  { %3942 = dma.done.wait [#allocation3], 256  }
0x1633   :  { %3943 = vsyncadd [#allocation3], 4294967040 }
0x1634   :  { %3217 = vsyncpa [#allocation3], 1 }

</bundles_post_ra>
